<compile_context>
chip_gen: v7x
topology: tpu7x:2x2x1
jax: 0.10.0
libtpu: 0.0.40
codegen_flags: <defaults>
</compile_context>

<pallas_src>
from functools import partial

import jax
import jax.numpy as jnp
from jax.experimental import pallas as pl
from jax.experimental.pallas import tpu as pltpu

EPS = 1e-5


# ----------------------------- Pallas kernels ------------------------------

def _conv3d_bn_kernel(x0_ref, x1_ref, x2_ref, w_ref, scale_ref, bias_ref,
                      *out_refs, H, W, apply_relu, compute_pool):
    """One (b, d) output depth slice of a 3x3x3 conv + folded BN (+ReLU) (+ fused HW pool).

    x{kd}_ref : (HW + 2*(W+1), Cin) bf16  -- depth slice d+kd of the padded input,
                flattened spatial axis zero-padded by W+1 rows at each end.
    w_ref     : (27, Cin, Cout) bf16,  tap index t = kd*9 + kh*3 + kw.
    scale/bias: (1, Cout) f32 folded BatchNorm affine.
    out_refs  : y_ref (HW, Cout) [, pool_ref (1, Cout) f32].
    """
    y_ref = out_refs[0]
    HW = H * W
    P = W + 1
    Cout = y_ref.shape[-1]

    # w-coordinate of every flattened spatial row (for the lateral-boundary masks).
    col = jax.lax.broadcasted_iota(jnp.int32, (HW, 1), 0) % W
    mask_left = col >= 1            # valid when reading neighbour at w-1
    mask_right = col <= W - 2       # valid when reading neighbour at w+1

    x_refs = (x0_ref, x1_ref, x2_ref)
    acc = jnp.zeros((HW, Cout), jnp.float32)
    for kd in range(3):
        xk = x_refs[kd]
        for kh in range(3):
            for kw in range(3):
                dh, dw = kh - 1, kw - 1
                s = dh * W + dw
                a = xk[pl.ds(P + s, HW), :]          # static-offset shifted load
                if dw == -1:
                    a = jnp.where(mask_left, a, jnp.zeros_like(a))
                elif dw == 1:
                    a = jnp.where(mask_right, a, jnp.zeros_like(a))
                acc += jnp.dot(a, w_ref[kd * 9 + kh * 3 + kw],
                               preferred_element_type=jnp.float32)

    acc = acc * scale_ref[...] + bias_ref[...]
    if apply_relu:
        acc = jnp.maximum(acc, 0.0)
    y_ref[...] = acc.astype(y_ref.dtype)
    if compute_pool:
        # Fused DepthAttention pooling: mean over H*W of the (post-BN) output.
        out_refs[1][...] = jnp.mean(acc, axis=0, keepdims=True)


def conv3d_bn(xp, wmat, scale, bias, *, H, W, apply_relu, compute_pool, out_dtype):
    """xp: (B, D+2, HW+2*(W+1), Cin) bf16 (zero-padded).  Returns (B, D, HW, Cout)
    [and (B, D, 1, Cout) fused pool if compute_pool]."""
    B, Dp2, HWp, Cin = xp.shape
    D = Dp2 - 2
    HW = H * W
    Cout = wmat.shape[-1]

    kernel = partial(_conv3d_bn_kernel, H=H, W=W,
                     apply_relu=apply_relu, compute_pool=compute_pool)

    def x_spec(kd):
        return pl.BlockSpec((None, None, HWp, Cin),
                            lambda b, d: (b, d + kd, 0, 0))

    in_specs = [
        x_spec(0), x_spec(1), x_spec(2),                       # three depth taps
        pl.BlockSpec(wmat.shape, lambda b, d: (0, 0, 0)),      # weights resident in VMEM
        pl.BlockSpec((1, Cout), lambda b, d: (0, 0)),          # folded BN scale
        pl.BlockSpec((1, Cout), lambda b, d: (0, 0)),          # folded BN bias
    ]

    y_shape = jax.ShapeDtypeStruct((B, D, HW, Cout), out_dtype)
    y_spec = pl.BlockSpec((None, None, HW, Cout), lambda b, d: (b, d, 0, 0))

    if compute_pool:
        out_shape = (y_shape, jax.ShapeDtypeStruct((B, D, 1, Cout), jnp.float32))
        out_specs = (y_spec,
                     pl.BlockSpec((None, None, 1, Cout), lambda b, d: (b, d, 0, 0)))
    else:
        out_shape = y_shape
        out_specs = y_spec

    return pl.pallas_call(
        kernel,
        out_shape=out_shape,
        grid=(B, D),
        in_specs=in_specs,
        out_specs=out_specs,
        compiler_params=pltpu.CompilerParams(
            dimension_semantics=("parallel", "parallel")),
    )(xp, xp, xp, wmat, scale, bias)


def _gate_add_relu_kernel(y_ref, g_ref, r_ref, o_ref):
    o_ref[...] = jnp.maximum(y_ref[...] * g_ref[...] + r_ref[...], 0.0)


def gate_add_relu(y2, gate, residual):
    """out = relu(y2 * gate + residual); lane-dense (.., HW, Cpad) blocks, gridded over (B, D).
    The conv2 output buffer is reused in place via input_output_aliases."""
    B, D, HW, Cp = y2.shape
    blk = lambda b, d: (b, d, 0, 0)
    return pl.pallas_call(
        _gate_add_relu_kernel,
        out_shape=jax.ShapeDtypeStruct((B, D, HW, Cp), jnp.float32),
        grid=(B, D),
        in_specs=[pl.BlockSpec((None, None, HW, Cp), blk),
                  pl.BlockSpec((None, None, 1, Cp), blk),
                  pl.BlockSpec((None, None, HW, Cp), blk)],
        out_specs=pl.BlockSpec((None, None, HW, Cp), blk),
        input_output_aliases={0: 0},
        compiler_params=pltpu.CompilerParams(
            dimension_semantics=("parallel", "parallel")),
    )(y2, gate, residual)


# ------------------------------- JAX glue ----------------------------------

def bn_fold(gamma, beta, mean, var):
    scale = gamma / jnp.sqrt(var + EPS)
    bias = beta - mean * scale
    return scale, bias


def prep_conv_weight(w, cin_pad, cout_pad):
    """(Cout, Cin, 3, 3, 3) -> (27, cin_pad, cout_pad) bf16, tap t = kd*9 + kh*3 + kw."""
    Co, Ci = w.shape[0], w.shape[1]
    wt = jnp.transpose(w, (2, 3, 4, 1, 0))                     # (kd, kh, kw, Ci, Co)
    wt = jnp.pad(wt, ((0, 0), (0, 0), (0, 0),
                      (0, cin_pad - Ci), (0, cout_pad - Co)))
    return wt.reshape(27, cin_pad, cout_pad).astype(jnp.bfloat16)


def da_basic_block(x, p):
    B, C, D, H, W = x.shape
    HW = H * W
    P = W + 1
    Cpad = ((C + 127) // 128) * 128           # lane-dense output channels (>= 128)

    # NCDHW -> channels-last flattened spatial (one transpose at the block boundary).
    x_cl = jnp.transpose(x, (0, 2, 3, 4, 1)).reshape(B, D, HW, C)

    # Folded eval-mode BatchNorm affines, zero-padded to Cpad (padded channels -> 0).
    s1, b1 = bn_fold(p['bn1_gamma'], p['bn1_beta'], p['bn1_mean'], p['bn1_var'])
    s2, b2 = bn_fold(p['bn2_gamma'], p['bn2_beta'], p['bn2_mean'], p['bn2_var'])
    pad_c = lambda v: jnp.pad(v, (0, Cpad - C)).reshape(1, Cpad)
    s1p, b1p, s2p, b2p = pad_c(s1), pad_c(b1), pad_c(s2), pad_c(b2)

    w1 = prep_conv_weight(p['conv1_w'], cin_pad=C, cout_pad=Cpad)      # (27, C,    Cpad)
    w2 = prep_conv_weight(p['conv2_w'], cin_pad=Cpad, cout_pad=Cpad)   # (27, Cpad, Cpad)

    # conv1 -> bn1 -> relu  (bf16, channels-last, lane-dense Cpad output)
    xp1 = jnp.pad(x_cl, ((0, 0), (1, 1), (P, P), (0, 0))).astype(jnp.bfloat16)
    y1 = conv3d_bn(xp1, w1, s1p, b1p, H=H, W=W,
                   apply_relu=True, compute_pool=False, out_dtype=jnp.bfloat16)

    # conv2 -> bn2  (+ fused DepthAttention H*W average pool)
    xp2 = jnp.pad(y1, ((0, 0), (1, 1), (P, P), (0, 0)))
    y2, pooled = conv3d_bn(xp2, w2, s2p, b2p, H=H, W=W,
                           apply_relu=False, compute_pool=True, out_dtype=jnp.float32)

    # DepthAttention MLP: a few KFLOPs -> plain XLA (per perf review).
    yv = pooled[:, :, 0, :C].transpose(0, 2, 1).reshape(B, C * D)      # idx = c*D + d
    h = jax.nn.relu(yv @ p['fc1_w'] + p['fc1_b'])
    g = jax.nn.sigmoid(h @ p['fc2_w'] + p['fc2_b'])                    # (B, C*D)
    gate = g.reshape(B, C, D).transpose(0, 2, 1)                       # (B, D, C)
    gate = jnp.pad(gate, ((0, 0), (0, 0), (0, Cpad - C))).reshape(B, D, 1, Cpad)

    # Residual (stride=1, inplanes == planes, downsample is None) -> channel-padded x.
    residual = jnp.pad(x_cl, ((0, 0), (0, 0), (0, 0), (0, Cpad - C)))

    out_cl = gate_add_relu(y2, gate, residual)                          # (B, D, HW, Cpad)
    out = out_cl[..., :C].reshape(B, D, H, W, C).transpose(0, 4, 1, 2, 3)
    return out


def init_params(key, inplanes, planes, depth):
    ks = jax.random.split(key, 14)
    CD = planes * depth
    Hd = CD // planes   # reduction = channel -> hidden == depth
    p = {}
    p['conv1_w'] = 0.1 * jax.random.normal(ks[0], (planes, inplanes, 3, 3, 3), jnp.float32)
    p['conv2_w'] = 0.1 * jax.random.normal(ks[1], (planes, planes, 3, 3, 3), jnp.float32)
    for i, name in enumerate(['bn1', 'bn2']):
        p[f'{name}_gamma'] = 1.0 + 0.1 * jax.random.normal(ks[2 + 4 * i], (planes,), jnp.float32)
        p[f'{name}_beta'] = 0.1 * jax.random.normal(ks[3 + 4 * i], (planes,), jnp.float32)
        p[f'{name}_mean'] = 0.1 * jax.random.normal(ks[4 + 4 * i], (planes,), jnp.float32)
        p[f'{name}_var'] = 1.0 + 0.1 * jnp.abs(jax.random.normal(ks[5 + 4 * i], (planes,), jnp.float32))
    p['fc1_w'] = 0.2 * jax.random.normal(ks[10], (CD, Hd), jnp.float32)   # stored as (in, out)
    p['fc1_b'] = 0.1 * jax.random.normal(ks[11], (1, Hd), jnp.float32)
    p['fc2_w'] = 0.2 * jax.random.normal(ks[12], (Hd, CD), jnp.float32)
    p['fc2_b'] = 0.1 * jax.random.normal(ks[13], (1, CD), jnp.float32)
    return p


# Pure-JAX reference. mxu_dtype=bfloat16 mimics the kernel's MXU input precision
# (bf16 operands, fp32 accumulation); mxu_dtype=float32 is the exact module math.
def ref_forward(x, p, mxu_dtype=jnp.float32):
    def conv(xx, w):
        return jax.lax.conv_general_dilated(
            xx.astype(mxu_dtype), w.astype(mxu_dtype), (1, 1, 1),
            [(1, 1), (1, 1), (1, 1)],
            dimension_numbers=('NCDHW', 'OIDHW', 'NCDHW'),
            preferred_element_type=jnp.float32)

    def bn(xx, g, b, m, v):
        sh = (1, -1, 1, 1, 1)
        return (xx - m.reshape(sh)) / jnp.sqrt(v.reshape(sh) + EPS) * g.reshape(sh) + b.reshape(sh)

    out = jax.nn.relu(bn(conv(x, p['conv1_w']),
                         p['bn1_gamma'], p['bn1_beta'], p['bn1_mean'], p['bn1_var']))
    out = bn(conv(out, p['conv2_w']),
             p['bn2_gamma'], p['bn2_beta'], p['bn2_mean'], p['bn2_var'])
    B, C, D, H, W = out.shape
    y = out.mean(axis=(3, 4)).reshape(B, C * D)
    h = jax.nn.relu(y @ p['fc1_w'] + p['fc1_b'])
    g = jax.nn.sigmoid(h @ p['fc2_w'] + p['fc2_b']).reshape(B, C, D, 1, 1)
    return jax.nn.relu(out * g + x)


if __name__ == "__main__":
    B, C, D, H, W = 2, 4, 8, 8, 8   # inplanes == planes == 4, depth == D == 8
    key = jax.random.PRNGKey(0)
    kx, kp = jax.random.split(key)
    x = jax.random.normal(kx, (B, C, D, H, W), jnp.float32)
    params = init_params(kp, C, C, D)

    out = jax.jit(da_basic_block)(x, params)
    out = jax.block_until_ready(out)

    ref_matched = ref_forward(x, params, mxu_dtype=jnp.bfloat16)   # same MXU precision
    ref_f32 = ref_forward(x, params, mxu_dtype=jnp.float32)        # exact module math
    err_m = float(jnp.max(jnp.abs(out - ref_matched)))
    err_f = float(jnp.max(jnp.abs(out - ref_f32)))

    assert out.shape == x.shape, f"shape mismatch {out.shape} vs {x.shape}"
    assert err_m < 3e-2, f"matched-precision max abs err too large: {err_m}"
    assert err_f < 1e-1, f"fp32-reference max abs err too large: {err_f}"
    print("KERNEL_OK")
</pallas_src>

<mosaic_0001>
module attributes {stable_mosaic.version = 11 : i64} {
  func.func @_conv3d_bn_kernel(%arg0: i32, %arg1: i32, %arg2: memref<1x1x82x4xbf16, #tpu.memory_space<vmem>>, %arg3: memref<1x1x82x4xbf16, #tpu.memory_space<vmem>>, %arg4: memref<1x1x82x4xbf16, #tpu.memory_space<vmem>>, %arg5: memref<27x4x128xbf16, #tpu.memory_space<vmem>>, %arg6: memref<1x128xf32, #tpu.memory_space<vmem>>, %arg7: memref<1x128xf32, #tpu.memory_space<vmem>>, %arg8: memref<1x1x64x128xbf16, #tpu.memory_space<vmem>>) attributes {dimension_semantics = [#tpu.dimension_semantics<parallel>, #tpu.dimension_semantics<parallel>], iteration_bounds = array<i64: 2, 8>, scalar_prefetch = 0 : i64, scratch_operands = 0 : i64, tpu.core_type = #tpu.core_type<tc>, window_params = [{transform_indices = @transform_0, window_bounds = array<i64: 1, 1, 82, 4>}, {transform_indices = @transform_1, window_bounds = array<i64: 1, 1, 82, 4>}, {transform_indices = @transform_2, window_bounds = array<i64: 1, 1, 82, 4>}, {pipeline_mode = #tpu.pipeline_mode<synchronous>, transform_indices = @transform_3, window_bounds = array<i64: 27, 4, 128>}, {pipeline_mode = #tpu.pipeline_mode<synchronous>, transform_indices = @transform_4, window_bounds = array<i64: 1, 128>}, {pipeline_mode = #tpu.pipeline_mode<synchronous>, transform_indices = @transform_5, window_bounds = array<i64: 1, 128>}, {transform_indices = @transform_6, window_bounds = array<i64: 1, 1, 64, 128>}]} {
    %0 = tpu.iota {dimensions = array<i32: 0>} : vector<64x1xi32>
    %c8_i32 = arith.constant 8 : i32
    %c0_i32 = arith.constant 0 : i32
    %1 = arith.cmpi eq, %c8_i32, %c0_i32 : i32
    %c1_i32 = arith.constant 1 : i32
    %2 = arith.select %1, %c1_i32, %c8_i32 : i32
    %3 = vector.broadcast %2 : i32 to vector<64x1xi32>
    %4 = arith.remsi %0, %3 : vector<64x1xi32>
    %c0_i32_0 = arith.constant 0 : i32
    %5 = vector.broadcast %c0_i32_0 : i32 to vector<64x1xi32>
    %6 = arith.cmpi ne, %4, %5 : vector<64x1xi32>
    %c0_i32_1 = arith.constant 0 : i32
    %7 = vector.broadcast %c0_i32_1 : i32 to vector<64x1xi32>
    %8 = arith.cmpi slt, %4, %7 : vector<64x1xi32>
    %c0_i32_2 = arith.constant 0 : i32
    %9 = arith.cmpi slt, %2, %c0_i32_2 : i32
    %10 = vector.broadcast %9 : i1 to vector<64x1xi1>
    %11 = vector.broadcast %10 : vector<64x1xi1> to vector<64x1xi1>
    %12 = arith.xori %8, %11 : vector<64x1xi1>
    %13 = arith.andi %12, %6 : vector<64x1xi1>
    %14 = vector.broadcast %2 : i32 to vector<64x1xi32>
    %15 = arith.addi %4, %14 : vector<64x1xi32>
    %16 = arith.select %13, %15, %4 : vector<64x1xi1>, vector<64x1xi32>
    %c1_i32_3 = arith.constant 1 : i32
    %17 = vector.broadcast %c1_i32_3 : i32 to vector<64x1xi32>
    %18 = arith.cmpi sge, %16, %17 : vector<64x1xi32>
    %c6_i32 = arith.constant 6 : i32
    %19 = vector.broadcast %c6_i32 : i32 to vector<64x1xi32>
    %20 = arith.cmpi sle, %16, %19 : vector<64x1xi32>
    %cst = arith.constant 0.000000e+00 : f32
    %21 = vector.broadcast %cst : f32 to vector<64x128xf32>
    %c0 = arith.constant 0 : index
    %c0_4 = arith.constant 0 : index
    %c0_5 = arith.constant 0 : index
    %c0_6 = arith.constant 0 : index
    %22 = vector.load %arg2[%c0, %c0_4, %c0_5, %c0_6] : memref<1x1x82x4xbf16, #tpu.memory_space<vmem>>, vector<1x1x64x4xbf16>
    %23 = vector.shape_cast %22 : vector<1x1x64x4xbf16> to vector<64x4xbf16>
    %cst_7 = arith.constant 0.000000e+00 : bf16
    %24 = vector.broadcast %cst_7 : bf16 to vector<64x4xbf16>
    %25 = vector.shape_cast %18 : vector<64x1xi1> to vector<64x1xi1>
    %26 = vector.broadcast %25 : vector<64x1xi1> to vector<64x4xi1>
    %27 = arith.select %26, %23, %24 : vector<64x4xi1>, vector<64x4xbf16>
    %c0_8 = arith.constant 0 : index
    %c0_9 = arith.constant 0 : index
    %c0_10 = arith.constant 0 : index
    %28 = vector.load %arg5[%c0_8, %c0_9, %c0_10] : memref<27x4x128xbf16, #tpu.memory_space<vmem>>, vector<1x4x128xbf16>
    %29 = vector.shape_cast %28 : vector<1x4x128xbf16> to vector<4x128xbf16>
    %cst_11 = arith.constant dense<0.000000e+00> : vector<64x128xf32>
    %30 = tpu.matmul %27, %29, %cst_11 {dimension_numbers = #tpu.dot_dimension_numbers<[1], [0], [0], [1], [0, 0, 1, 1], [], []>} : vector<64x4xbf16>, vector<4x128xbf16>, vector<64x128xf32> -> vector<64x128xf32>
    %31 = arith.addf %21, %30 : vector<64x128xf32>
    %c0_12 = arith.constant 0 : index
    %c0_13 = arith.constant 0 : index
    %c1 = arith.constant 1 : index
    %c0_14 = arith.constant 0 : index
    %32 = vector.load %arg2[%c0_12, %c0_13, %c1, %c0_14] : memref<1x1x82x4xbf16, #tpu.memory_space<vmem>>, vector<1x1x64x4xbf16>
    %33 = vector.shape_cast %32 : vector<1x1x64x4xbf16> to vector<64x4xbf16>
    %c1_15 = arith.constant 1 : index
    %c0_16 = arith.constant 0 : index
    %c0_17 = arith.constant 0 : index
    %34 = vector.load %arg5[%c1_15, %c0_16, %c0_17] : memref<27x4x128xbf16, #tpu.memory_space<vmem>>, vector<1x4x128xbf16>
    %35 = vector.shape_cast %34 : vector<1x4x128xbf16> to vector<4x128xbf16>
    %cst_18 = arith.constant dense<0.000000e+00> : vector<64x128xf32>
    %36 = tpu.matmul %33, %35, %cst_18 {dimension_numbers = #tpu.dot_dimension_numbers<[1], [0], [0], [1], [0, 0, 1, 1], [], []>} : vector<64x4xbf16>, vector<4x128xbf16>, vector<64x128xf32> -> vector<64x128xf32>
    %37 = arith.addf %31, %36 : vector<64x128xf32>
    %c0_19 = arith.constant 0 : index
    %c0_20 = arith.constant 0 : index
    %c2 = arith.constant 2 : index
    %c0_21 = arith.constant 0 : index
    %38 = vector.load %arg2[%c0_19, %c0_20, %c2, %c0_21] : memref<1x1x82x4xbf16, #tpu.memory_space<vmem>>, vector<1x1x64x4xbf16>
    %39 = vector.shape_cast %38 : vector<1x1x64x4xbf16> to vector<64x4xbf16>
    %cst_22 = arith.constant 0.000000e+00 : bf16
    %40 = vector.broadcast %cst_22 : bf16 to vector<64x4xbf16>
    %41 = vector.shape_cast %20 : vector<64x1xi1> to vector<64x1xi1>
    %42 = vector.broadcast %41 : vector<64x1xi1> to vector<64x4xi1>
    %43 = arith.select %42, %39, %40 : vector<64x4xi1>, vector<64x4xbf16>
    %c2_23 = arith.constant 2 : index
    %c0_24 = arith.constant 0 : index
    %c0_25 = arith.constant 0 : index
    %44 = vector.load %arg5[%c2_23, %c0_24, %c0_25] : memref<27x4x128xbf16, #tpu.memory_space<vmem>>, vector<1x4x128xbf16>
    %45 = vector.shape_cast %44 : vector<1x4x128xbf16> to vector<4x128xbf16>
    %cst_26 = arith.constant dense<0.000000e+00> : vector<64x128xf32>
    %46 = tpu.matmul %43, %45, %cst_26 {dimension_numbers = #tpu.dot_dimension_numbers<[1], [0], [0], [1], [0, 0, 1, 1], [], []>} : vector<64x4xbf16>, vector<4x128xbf16>, vector<64x128xf32> -> vector<64x128xf32>
    %47 = arith.addf %37, %46 : vector<64x128xf32>
    %c0_27 = arith.constant 0 : index
    %c0_28 = arith.constant 0 : index
    %c8 = arith.constant 8 : index
    %c0_29 = arith.constant 0 : index
    %48 = vector.load %arg2[%c0_27, %c0_28, %c8, %c0_29] : memref<1x1x82x4xbf16, #tpu.memory_space<vmem>>, vector<1x1x64x4xbf16>
    %49 = vector.shape_cast %48 : vector<1x1x64x4xbf16> to vector<64x4xbf16>
    %cst_30 = arith.constant 0.000000e+00 : bf16
    %50 = vector.broadcast %cst_30 : bf16 to vector<64x4xbf16>
    %51 = vector.shape_cast %18 : vector<64x1xi1> to vector<64x1xi1>
    %52 = vector.broadcast %51 : vector<64x1xi1> to vector<64x4xi1>
    %53 = arith.select %52, %49, %50 : vector<64x4xi1>, vector<64x4xbf16>
    %c3 = arith.constant 3 : index
    %c0_31 = arith.constant 0 : index
    %c0_32 = arith.constant 0 : index
    %54 = vector.load %arg5[%c3, %c0_31, %c0_32] : memref<27x4x128xbf16, #tpu.memory_space<vmem>>, vector<1x4x128xbf16>
    %55 = vector.shape_cast %54 : vector<1x4x128xbf16> to vector<4x128xbf16>
    %cst_33 = arith.constant dense<0.000000e+00> : vector<64x128xf32>
    %56 = tpu.matmul %53, %55, %cst_33 {dimension_numbers = #tpu.dot_dimension_numbers<[1], [0], [0], [1], [0, 0, 1, 1], [], []>} : vector<64x4xbf16>, vector<4x128xbf16>, vector<64x128xf32> -> vector<64x128xf32>
    %57 = arith.addf %47, %56 : vector<64x128xf32>
    %c0_34 = arith.constant 0 : index
    %c0_35 = arith.constant 0 : index
    %c9 = arith.constant 9 : index
    %c0_36 = arith.constant 0 : index
    %58 = vector.load %arg2[%c0_34, %c0_35, %c9, %c0_36] : memref<1x1x82x4xbf16, #tpu.memory_space<vmem>>, vector<1x1x64x4xbf16>
    %59 = vector.shape_cast %58 : vector<1x1x64x4xbf16> to vector<64x4xbf16>
    %c4 = arith.constant 4 : index
    %c0_37 = arith.constant 0 : index
    %c0_38 = arith.constant 0 : index
    %60 = vector.load %arg5[%c4, %c0_37, %c0_38] : memref<27x4x128xbf16, #tpu.memory_space<vmem>>, vector<1x4x128xbf16>
    %61 = vector.shape_cast %60 : vector<1x4x128xbf16> to vector<4x128xbf16>
    %cst_39 = arith.constant dense<0.000000e+00> : vector<64x128xf32>
    %62 = tpu.matmul %59, %61, %cst_39 {dimension_numbers = #tpu.dot_dimension_numbers<[1], [0], [0], [1], [0, 0, 1, 1], [], []>} : vector<64x4xbf16>, vector<4x128xbf16>, vector<64x128xf32> -> vector<64x128xf32>
    %63 = arith.addf %57, %62 : vector<64x128xf32>
    %c0_40 = arith.constant 0 : index
    %c0_41 = arith.constant 0 : index
    %c10 = arith.constant 10 : index
    %c0_42 = arith.constant 0 : index
    %64 = vector.load %arg2[%c0_40, %c0_41, %c10, %c0_42] : memref<1x1x82x4xbf16, #tpu.memory_space<vmem>>, vector<1x1x64x4xbf16>
    %65 = vector.shape_cast %64 : vector<1x1x64x4xbf16> to vector<64x4xbf16>
    %cst_43 = arith.constant 0.000000e+00 : bf16
    %66 = vector.broadcast %cst_43 : bf16 to vector<64x4xbf16>
    %67 = vector.shape_cast %20 : vector<64x1xi1> to vector<64x1xi1>
    %68 = vector.broadcast %67 : vector<64x1xi1> to vector<64x4xi1>
    %69 = arith.select %68, %65, %66 : vector<64x4xi1>, vector<64x4xbf16>
    %c5 = arith.constant 5 : index
    %c0_44 = arith.constant 0 : index
    %c0_45 = arith.constant 0 : index
    %70 = vector.load %arg5[%c5, %c0_44, %c0_45] : memref<27x4x128xbf16, #tpu.memory_space<vmem>>, vector<1x4x128xbf16>
    %71 = vector.shape_cast %70 : vector<1x4x128xbf16> to vector<4x128xbf16>
    %cst_46 = arith.constant dense<0.000000e+00> : vector<64x128xf32>
    %72 = tpu.matmul %69, %71, %cst_46 {dimension_numbers = #tpu.dot_dimension_numbers<[1], [0], [0], [1], [0, 0, 1, 1], [], []>} : vector<64x4xbf16>, vector<4x128xbf16>, vector<64x128xf32> -> vector<64x128xf32>
    %73 = arith.addf %63, %72 : vector<64x128xf32>
    %c0_47 = arith.constant 0 : index
    %c0_48 = arith.constant 0 : index
    %c16 = arith.constant 16 : index
    %c0_49 = arith.constant 0 : index
    %74 = vector.load %arg2[%c0_47, %c0_48, %c16, %c0_49] : memref<1x1x82x4xbf16, #tpu.memory_space<vmem>>, vector<1x1x64x4xbf16>
    %75 = vector.shape_cast %74 : vector<1x1x64x4xbf16> to vector<64x4xbf16>
    %cst_50 = arith.constant 0.000000e+00 : bf16
    %76 = vector.broadcast %cst_50 : bf16 to vector<64x4xbf16>
    %77 = vector.shape_cast %18 : vector<64x1xi1> to vector<64x1xi1>
    %78 = vector.broadcast %77 : vector<64x1xi1> to vector<64x4xi1>
    %79 = arith.select %78, %75, %76 : vector<64x4xi1>, vector<64x4xbf16>
    %c6 = arith.constant 6 : index
    %c0_51 = arith.constant 0 : index
    %c0_52 = arith.constant 0 : index
    %80 = vector.load %arg5[%c6, %c0_51, %c0_52] : memref<27x4x128xbf16, #tpu.memory_space<vmem>>, vector<1x4x128xbf16>
    %81 = vector.shape_cast %80 : vector<1x4x128xbf16> to vector<4x128xbf16>
    %cst_53 = arith.constant dense<0.000000e+00> : vector<64x128xf32>
    %82 = tpu.matmul %79, %81, %cst_53 {dimension_numbers = #tpu.dot_dimension_numbers<[1], [0], [0], [1], [0, 0, 1, 1], [], []>} : vector<64x4xbf16>, vector<4x128xbf16>, vector<64x128xf32> -> vector<64x128xf32>
    %83 = arith.addf %73, %82 : vector<64x128xf32>
    %c0_54 = arith.constant 0 : index
    %c0_55 = arith.constant 0 : index
    %c17 = arith.constant 17 : index
    %c0_56 = arith.constant 0 : index
    %84 = vector.load %arg2[%c0_54, %c0_55, %c17, %c0_56] : memref<1x1x82x4xbf16, #tpu.memory_space<vmem>>, vector<1x1x64x4xbf16>
    %85 = vector.shape_cast %84 : vector<1x1x64x4xbf16> to vector<64x4xbf16>
    %c7 = arith.constant 7 : index
    %c0_57 = arith.constant 0 : index
    %c0_58 = arith.constant 0 : index
    %86 = vector.load %arg5[%c7, %c0_57, %c0_58] : memref<27x4x128xbf16, #tpu.memory_space<vmem>>, vector<1x4x128xbf16>
    %87 = vector.shape_cast %86 : vector<1x4x128xbf16> to vector<4x128xbf16>
    %cst_59 = arith.constant dense<0.000000e+00> : vector<64x128xf32>
    %88 = tpu.matmul %85, %87, %cst_59 {dimension_numbers = #tpu.dot_dimension_numbers<[1], [0], [0], [1], [0, 0, 1, 1], [], []>} : vector<64x4xbf16>, vector<4x128xbf16>, vector<64x128xf32> -> vector<64x128xf32>
    %89 = arith.addf %83, %88 : vector<64x128xf32>
    %c0_60 = arith.constant 0 : index
    %c0_61 = arith.constant 0 : index
    %c18 = arith.constant 18 : index
    %c0_62 = arith.constant 0 : index
    %90 = vector.load %arg2[%c0_60, %c0_61, %c18, %c0_62] : memref<1x1x82x4xbf16, #tpu.memory_space<vmem>>, vector<1x1x64x4xbf16>
    %91 = vector.shape_cast %90 : vector<1x1x64x4xbf16> to vector<64x4xbf16>
    %cst_63 = arith.constant 0.000000e+00 : bf16
    %92 = vector.broadcast %cst_63 : bf16 to vector<64x4xbf16>
    %93 = vector.shape_cast %20 : vector<64x1xi1> to vector<64x1xi1>
    %94 = vector.broadcast %93 : vector<64x1xi1> to vector<64x4xi1>
    %95 = arith.select %94, %91, %92 : vector<64x4xi1>, vector<64x4xbf16>
    %c8_64 = arith.constant 8 : index
    %c0_65 = arith.constant 0 : index
    %c0_66 = arith.constant 0 : index
    %96 = vector.load %arg5[%c8_64, %c0_65, %c0_66] : memref<27x4x128xbf16, #tpu.memory_space<vmem>>, vector<1x4x128xbf16>
    %97 = vector.shape_cast %96 : vector<1x4x128xbf16> to vector<4x128xbf16>
    %cst_67 = arith.constant dense<0.000000e+00> : vector<64x128xf32>
    %98 = tpu.matmul %95, %97, %cst_67 {dimension_numbers = #tpu.dot_dimension_numbers<[1], [0], [0], [1], [0, 0, 1, 1], [], []>} : vector<64x4xbf16>, vector<4x128xbf16>, vector<64x128xf32> -> vector<64x128xf32>
    %99 = arith.addf %89, %98 : vector<64x128xf32>
    %c0_68 = arith.constant 0 : index
    %c0_69 = arith.constant 0 : index
    %c0_70 = arith.constant 0 : index
    %c0_71 = arith.constant 0 : index
    %100 = vector.load %arg3[%c0_68, %c0_69, %c0_70, %c0_71] : memref<1x1x82x4xbf16, #tpu.memory_space<vmem>>, vector<1x1x64x4xbf16>
    %101 = vector.shape_cast %100 : vector<1x1x64x4xbf16> to vector<64x4xbf16>
    %cst_72 = arith.constant 0.000000e+00 : bf16
    %102 = vector.broadcast %cst_72 : bf16 to vector<64x4xbf16>
    %103 = vector.shape_cast %18 : vector<64x1xi1> to vector<64x1xi1>
    %104 = vector.broadcast %103 : vector<64x1xi1> to vector<64x4xi1>
    %105 = arith.select %104, %101, %102 : vector<64x4xi1>, vector<64x4xbf16>
    %c9_73 = arith.constant 9 : index
    %c0_74 = arith.constant 0 : index
    %c0_75 = arith.constant 0 : index
    %106 = vector.load %arg5[%c9_73, %c0_74, %c0_75] : memref<27x4x128xbf16, #tpu.memory_space<vmem>>, vector<1x4x128xbf16>
    %107 = vector.shape_cast %106 : vector<1x4x128xbf16> to vector<4x128xbf16>
    %cst_76 = arith.constant dense<0.000000e+00> : vector<64x128xf32>
    %108 = tpu.matmul %105, %107, %cst_76 {dimension_numbers = #tpu.dot_dimension_numbers<[1], [0], [0], [1], [0, 0, 1, 1], [], []>} : vector<64x4xbf16>, vector<4x128xbf16>, vector<64x128xf32> -> vector<64x128xf32>
    %109 = arith.addf %99, %108 : vector<64x128xf32>
    %c0_77 = arith.constant 0 : index
    %c0_78 = arith.constant 0 : index
    %c1_79 = arith.constant 1 : index
    %c0_80 = arith.constant 0 : index
    %110 = vector.load %arg3[%c0_77, %c0_78, %c1_79, %c0_80] : memref<1x1x82x4xbf16, #tpu.memory_space<vmem>>, vector<1x1x64x4xbf16>
    %111 = vector.shape_cast %110 : vector<1x1x64x4xbf16> to vector<64x4xbf16>
    %c10_81 = arith.constant 10 : index
    %c0_82 = arith.constant 0 : index
    %c0_83 = arith.constant 0 : index
    %112 = vector.load %arg5[%c10_81, %c0_82, %c0_83] : memref<27x4x128xbf16, #tpu.memory_space<vmem>>, vector<1x4x128xbf16>
    %113 = vector.shape_cast %112 : vector<1x4x128xbf16> to vector<4x128xbf16>
    %cst_84 = arith.constant dense<0.000000e+00> : vector<64x128xf32>
    %114 = tpu.matmul %111, %113, %cst_84 {dimension_numbers = #tpu.dot_dimension_numbers<[1], [0], [0], [1], [0, 0, 1, 1], [], []>} : vector<64x4xbf16>, vector<4x128xbf16>, vector<64x128xf32> -> vector<64x128xf32>
    %115 = arith.addf %109, %114 : vector<64x128xf32>
    %c0_85 = arith.constant 0 : index
    %c0_86 = arith.constant 0 : index
    %c2_87 = arith.constant 2 : index
    %c0_88 = arith.constant 0 : index
    %116 = vector.load %arg3[%c0_85, %c0_86, %c2_87, %c0_88] : memref<1x1x82x4xbf16, #tpu.memory_space<vmem>>, vector<1x1x64x4xbf16>
    %117 = vector.shape_cast %116 : vector<1x1x64x4xbf16> to vector<64x4xbf16>
    %cst_89 = arith.constant 0.000000e+00 : bf16
    %118 = vector.broadcast %cst_89 : bf16 to vector<64x4xbf16>
    %119 = vector.shape_cast %20 : vector<64x1xi1> to vector<64x1xi1>
    %120 = vector.broadcast %119 : vector<64x1xi1> to vector<64x4xi1>
    %121 = arith.select %120, %117, %118 : vector<64x4xi1>, vector<64x4xbf16>
    %c11 = arith.constant 11 : index
    %c0_90 = arith.constant 0 : index
    %c0_91 = arith.constant 0 : index
    %122 = vector.load %arg5[%c11, %c0_90, %c0_91] : memref<27x4x128xbf16, #tpu.memory_space<vmem>>, vector<1x4x128xbf16>
    %123 = vector.shape_cast %122 : vector<1x4x128xbf16> to vector<4x128xbf16>
    %cst_92 = arith.constant dense<0.000000e+00> : vector<64x128xf32>
    %124 = tpu.matmul %121, %123, %cst_92 {dimension_numbers = #tpu.dot_dimension_numbers<[1], [0], [0], [1], [0, 0, 1, 1], [], []>} : vector<64x4xbf16>, vector<4x128xbf16>, vector<64x128xf32> -> vector<64x128xf32>
    %125 = arith.addf %115, %124 : vector<64x128xf32>
    %c0_93 = arith.constant 0 : index
    %c0_94 = arith.constant 0 : index
    %c8_95 = arith.constant 8 : index
    %c0_96 = arith.constant 0 : index
    %126 = vector.load %arg3[%c0_93, %c0_94, %c8_95, %c0_96] : memref<1x1x82x4xbf16, #tpu.memory_space<vmem>>, vector<1x1x64x4xbf16>
    %127 = vector.shape_cast %126 : vector<1x1x64x4xbf16> to vector<64x4xbf16>
    %cst_97 = arith.constant 0.000000e+00 : bf16
    %128 = vector.broadcast %cst_97 : bf16 to vector<64x4xbf16>
    %129 = vector.shape_cast %18 : vector<64x1xi1> to vector<64x1xi1>
    %130 = vector.broadcast %129 : vector<64x1xi1> to vector<64x4xi1>
    %131 = arith.select %130, %127, %128 : vector<64x4xi1>, vector<64x4xbf16>
    %c12 = arith.constant 12 : index
    %c0_98 = arith.constant 0 : index
    %c0_99 = arith.constant 0 : index
    %132 = vector.load %arg5[%c12, %c0_98, %c0_99] : memref<27x4x128xbf16, #tpu.memory_space<vmem>>, vector<1x4x128xbf16>
    %133 = vector.shape_cast %132 : vector<1x4x128xbf16> to vector<4x128xbf16>
    %cst_100 = arith.constant dense<0.000000e+00> : vector<64x128xf32>
    %134 = tpu.matmul %131, %133, %cst_100 {dimension_numbers = #tpu.dot_dimension_numbers<[1], [0], [0], [1], [0, 0, 1, 1], [], []>} : vector<64x4xbf16>, vector<4x128xbf16>, vector<64x128xf32> -> vector<64x128xf32>
    %135 = arith.addf %125, %134 : vector<64x128xf32>
    %c0_101 = arith.constant 0 : index
    %c0_102 = arith.constant 0 : index
    %c9_103 = arith.constant 9 : index
    %c0_104 = arith.constant 0 : index
    %136 = vector.load %arg3[%c0_101, %c0_102, %c9_103, %c0_104] : memref<1x1x82x4xbf16, #tpu.memory_space<vmem>>, vector<1x1x64x4xbf16>
    %137 = vector.shape_cast %136 : vector<1x1x64x4xbf16> to vector<64x4xbf16>
    %c13 = arith.constant 13 : index
    %c0_105 = arith.constant 0 : index
    %c0_106 = arith.constant 0 : index
    %138 = vector.load %arg5[%c13, %c0_105, %c0_106] : memref<27x4x128xbf16, #tpu.memory_space<vmem>>, vector<1x4x128xbf16>
    %139 = vector.shape_cast %138 : vector<1x4x128xbf16> to vector<4x128xbf16>
    %cst_107 = arith.constant dense<0.000000e+00> : vector<64x128xf32>
    %140 = tpu.matmul %137, %139, %cst_107 {dimension_numbers = #tpu.dot_dimension_numbers<[1], [0], [0], [1], [0, 0, 1, 1], [], []>} : vector<64x4xbf16>, vector<4x128xbf16>, vector<64x128xf32> -> vector<64x128xf32>
    %141 = arith.addf %135, %140 : vector<64x128xf32>
    %c0_108 = arith.constant 0 : index
    %c0_109 = arith.constant 0 : index
    %c10_110 = arith.constant 10 : index
    %c0_111 = arith.constant 0 : index
    %142 = vector.load %arg3[%c0_108, %c0_109, %c10_110, %c0_111] : memref<1x1x82x4xbf16, #tpu.memory_space<vmem>>, vector<1x1x64x4xbf16>
    %143 = vector.shape_cast %142 : vector<1x1x64x4xbf16> to vector<64x4xbf16>
    %cst_112 = arith.constant 0.000000e+00 : bf16
    %144 = vector.broadcast %cst_112 : bf16 to vector<64x4xbf16>
    %145 = vector.shape_cast %20 : vector<64x1xi1> to vector<64x1xi1>
    %146 = vector.broadcast %145 : vector<64x1xi1> to vector<64x4xi1>
    %147 = arith.select %146, %143, %144 : vector<64x4xi1>, vector<64x4xbf16>
    %c14 = arith.constant 14 : index
    %c0_113 = arith.constant 0 : index
    %c0_114 = arith.constant 0 : index
    %148 = vector.load %arg5[%c14, %c0_113, %c0_114] : memref<27x4x128xbf16, #tpu.memory_space<vmem>>, vector<1x4x128xbf16>
    %149 = vector.shape_cast %148 : vector<1x4x128xbf16> to vector<4x128xbf16>
    %cst_115 = arith.constant dense<0.000000e+00> : vector<64x128xf32>
    %150 = tpu.matmul %147, %149, %cst_115 {dimension_numbers = #tpu.dot_dimension_numbers<[1], [0], [0], [1], [0, 0, 1, 1], [], []>} : vector<64x4xbf16>, vector<4x128xbf16>, vector<64x128xf32> -> vector<64x128xf32>
    %151 = arith.addf %141, %150 : vector<64x128xf32>
    %c0_116 = arith.constant 0 : index
    %c0_117 = arith.constant 0 : index
    %c16_118 = arith.constant 16 : index
    %c0_119 = arith.constant 0 : index
    %152 = vector.load %arg3[%c0_116, %c0_117, %c16_118, %c0_119] : memref<1x1x82x4xbf16, #tpu.memory_space<vmem>>, vector<1x1x64x4xbf16>
    %153 = vector.shape_cast %152 : vector<1x1x64x4xbf16> to vector<64x4xbf16>
    %cst_120 = arith.constant 0.000000e+00 : bf16
    %154 = vector.broadcast %cst_120 : bf16 to vector<64x4xbf16>
    %155 = vector.shape_cast %18 : vector<64x1xi1> to vector<64x1xi1>
    %156 = vector.broadcast %155 : vector<64x1xi1> to vector<64x4xi1>
    %157 = arith.select %156, %153, %154 : vector<64x4xi1>, vector<64x4xbf16>
    %c15 = arith.constant 15 : index
    %c0_121 = arith.constant 0 : index
    %c0_122 = arith.constant 0 : index
    %158 = vector.load %arg5[%c15, %c0_121, %c0_122] : memref<27x4x128xbf16, #tpu.memory_space<vmem>>, vector<1x4x128xbf16>
    %159 = vector.shape_cast %158 : vector<1x4x128xbf16> to vector<4x128xbf16>
    %cst_123 = arith.constant dense<0.000000e+00> : vector<64x128xf32>
    %160 = tpu.matmul %157, %159, %cst_123 {dimension_numbers = #tpu.dot_dimension_numbers<[1], [0], [0], [1], [0, 0, 1, 1], [], []>} : vector<64x4xbf16>, vector<4x128xbf16>, vector<64x128xf32> -> vector<64x128xf32>
    %161 = arith.addf %151, %160 : vector<64x128xf32>
    %c0_124 = arith.constant 0 : index
    %c0_125 = arith.constant 0 : index
    %c17_126 = arith.constant 17 : index
    %c0_127 = arith.constant 0 : index
    %162 = vector.load %arg3[%c0_124, %c0_125, %c17_126, %c0_127] : memref<1x1x82x4xbf16, #tpu.memory_space<vmem>>, vector<1x1x64x4xbf16>
    %163 = vector.shape_cast %162 : vector<1x1x64x4xbf16> to vector<64x4xbf16>
    %c16_128 = arith.constant 16 : index
    %c0_129 = arith.constant 0 : index
    %c0_130 = arith.constant 0 : index
    %164 = vector.load %arg5[%c16_128, %c0_129, %c0_130] : memref<27x4x128xbf16, #tpu.memory_space<vmem>>, vector<1x4x128xbf16>
    %165 = vector.shape_cast %164 : vector<1x4x128xbf16> to vector<4x128xbf16>
    %cst_131 = arith.constant dense<0.000000e+00> : vector<64x128xf32>
    %166 = tpu.matmul %163, %165, %cst_131 {dimension_numbers = #tpu.dot_dimension_numbers<[1], [0], [0], [1], [0, 0, 1, 1], [], []>} : vector<64x4xbf16>, vector<4x128xbf16>, vector<64x128xf32> -> vector<64x128xf32>
    %167 = arith.addf %161, %166 : vector<64x128xf32>
    %c0_132 = arith.constant 0 : index
    %c0_133 = arith.constant 0 : index
    %c18_134 = arith.constant 18 : index
    %c0_135 = arith.constant 0 : index
    %168 = vector.load %arg3[%c0_132, %c0_133, %c18_134, %c0_135] : memref<1x1x82x4xbf16, #tpu.memory_space<vmem>>, vector<1x1x64x4xbf16>
    %169 = vector.shape_cast %168 : vector<1x1x64x4xbf16> to vector<64x4xbf16>
    %cst_136 = arith.constant 0.000000e+00 : bf16
    %170 = vector.broadcast %cst_136 : bf16 to vector<64x4xbf16>
    %171 = vector.shape_cast %20 : vector<64x1xi1> to vector<64x1xi1>
    %172 = vector.broadcast %171 : vector<64x1xi1> to vector<64x4xi1>
    %173 = arith.select %172, %169, %170 : vector<64x4xi1>, vector<64x4xbf16>
    %c17_137 = arith.constant 17 : index
    %c0_138 = arith.constant 0 : index
    %c0_139 = arith.constant 0 : index
    %174 = vector.load %arg5[%c17_137, %c0_138, %c0_139] : memref<27x4x128xbf16, #tpu.memory_space<vmem>>, vector<1x4x128xbf16>
    %175 = vector.shape_cast %174 : vector<1x4x128xbf16> to vector<4x128xbf16>
    %cst_140 = arith.constant dense<0.000000e+00> : vector<64x128xf32>
    %176 = tpu.matmul %173, %175, %cst_140 {dimension_numbers = #tpu.dot_dimension_numbers<[1], [0], [0], [1], [0, 0, 1, 1], [], []>} : vector<64x4xbf16>, vector<4x128xbf16>, vector<64x128xf32> -> vector<64x128xf32>
    %177 = arith.addf %167, %176 : vector<64x128xf32>
    %c0_141 = arith.constant 0 : index
    %c0_142 = arith.constant 0 : index
    %c0_143 = arith.constant 0 : index
    %c0_144 = arith.constant 0 : index
    %178 = vector.load %arg4[%c0_141, %c0_142, %c0_143, %c0_144] : memref<1x1x82x4xbf16, #tpu.memory_space<vmem>>, vector<1x1x64x4xbf16>
    %179 = vector.shape_cast %178 : vector<1x1x64x4xbf16> to vector<64x4xbf16>
    %cst_145 = arith.constant 0.000000e+00 : bf16
    %180 = vector.broadcast %cst_145 : bf16 to vector<64x4xbf16>
    %181 = vector.shape_cast %18 : vector<64x1xi1> to vector<64x1xi1>
    %182 = vector.broadcast %181 : vector<64x1xi1> to vector<64x4xi1>
    %183 = arith.select %182, %179, %180 : vector<64x4xi1>, vector<64x4xbf16>
    %c18_146 = arith.constant 18 : index
    %c0_147 = arith.constant 0 : index
    %c0_148 = arith.constant 0 : index
    %184 = vector.load %arg5[%c18_146, %c0_147, %c0_148] : memref<27x4x128xbf16, #tpu.memory_space<vmem>>, vector<1x4x128xbf16>
    %185 = vector.shape_cast %184 : vector<1x4x128xbf16> to vector<4x128xbf16>
    %cst_149 = arith.constant dense<0.000000e+00> : vector<64x128xf32>
    %186 = tpu.matmul %183, %185, %cst_149 {dimension_numbers = #tpu.dot_dimension_numbers<[1], [0], [0], [1], [0, 0, 1, 1], [], []>} : vector<64x4xbf16>, vector<4x128xbf16>, vector<64x128xf32> -> vector<64x128xf32>
    %187 = arith.addf %177, %186 : vector<64x128xf32>
    %c0_150 = arith.constant 0 : index
    %c0_151 = arith.constant 0 : index
    %c1_152 = arith.constant 1 : index
    %c0_153 = arith.constant 0 : index
    %188 = vector.load %arg4[%c0_150, %c0_151, %c1_152, %c0_153] : memref<1x1x82x4xbf16, #tpu.memory_space<vmem>>, vector<1x1x64x4xbf16>
    %189 = vector.shape_cast %188 : vector<1x1x64x4xbf16> to vector<64x4xbf16>
    %c19 = arith.constant 19 : index
    %c0_154 = arith.constant 0 : index
    %c0_155 = arith.constant 0 : index
    %190 = vector.load %arg5[%c19, %c0_154, %c0_155] : memref<27x4x128xbf16, #tpu.memory_space<vmem>>, vector<1x4x128xbf16>
    %191 = vector.shape_cast %190 : vector<1x4x128xbf16> to vector<4x128xbf16>
    %cst_156 = arith.constant dense<0.000000e+00> : vector<64x128xf32>
    %192 = tpu.matmul %189, %191, %cst_156 {dimension_numbers = #tpu.dot_dimension_numbers<[1], [0], [0], [1], [0, 0, 1, 1], [], []>} : vector<64x4xbf16>, vector<4x128xbf16>, vector<64x128xf32> -> vector<64x128xf32>
    %193 = arith.addf %187, %192 : vector<64x128xf32>
    %c0_157 = arith.constant 0 : index
    %c0_158 = arith.constant 0 : index
    %c2_159 = arith.constant 2 : index
    %c0_160 = arith.constant 0 : index
    %194 = vector.load %arg4[%c0_157, %c0_158, %c2_159, %c0_160] : memref<1x1x82x4xbf16, #tpu.memory_space<vmem>>, vector<1x1x64x4xbf16>
    %195 = vector.shape_cast %194 : vector<1x1x64x4xbf16> to vector<64x4xbf16>
    %cst_161 = arith.constant 0.000000e+00 : bf16
    %196 = vector.broadcast %cst_161 : bf16 to vector<64x4xbf16>
    %197 = vector.shape_cast %20 : vector<64x1xi1> to vector<64x1xi1>
    %198 = vector.broadcast %197 : vector<64x1xi1> to vector<64x4xi1>
    %199 = arith.select %198, %195, %196 : vector<64x4xi1>, vector<64x4xbf16>
    %c20 = arith.constant 20 : index
    %c0_162 = arith.constant 0 : index
    %c0_163 = arith.constant 0 : index
    %200 = vector.load %arg5[%c20, %c0_162, %c0_163] : memref<27x4x128xbf16, #tpu.memory_space<vmem>>, vector<1x4x128xbf16>
    %201 = vector.shape_cast %200 : vector<1x4x128xbf16> to vector<4x128xbf16>
    %cst_164 = arith.constant dense<0.000000e+00> : vector<64x128xf32>
    %202 = tpu.matmul %199, %201, %cst_164 {dimension_numbers = #tpu.dot_dimension_numbers<[1], [0], [0], [1], [0, 0, 1, 1], [], []>} : vector<64x4xbf16>, vector<4x128xbf16>, vector<64x128xf32> -> vector<64x128xf32>
    %203 = arith.addf %193, %202 : vector<64x128xf32>
    %c0_165 = arith.constant 0 : index
    %c0_166 = arith.constant 0 : index
    %c8_167 = arith.constant 8 : index
    %c0_168 = arith.constant 0 : index
    %204 = vector.load %arg4[%c0_165, %c0_166, %c8_167, %c0_168] : memref<1x1x82x4xbf16, #tpu.memory_space<vmem>>, vector<1x1x64x4xbf16>
    %205 = vector.shape_cast %204 : vector<1x1x64x4xbf16> to vector<64x4xbf16>
    %cst_169 = arith.constant 0.000000e+00 : bf16
    %206 = vector.broadcast %cst_169 : bf16 to vector<64x4xbf16>
    %207 = vector.shape_cast %18 : vector<64x1xi1> to vector<64x1xi1>
    %208 = vector.broadcast %207 : vector<64x1xi1> to vector<64x4xi1>
    %209 = arith.select %208, %205, %206 : vector<64x4xi1>, vector<64x4xbf16>
    %c21 = arith.constant 21 : index
    %c0_170 = arith.constant 0 : index
    %c0_171 = arith.constant 0 : index
    %210 = vector.load %arg5[%c21, %c0_170, %c0_171] : memref<27x4x128xbf16, #tpu.memory_space<vmem>>, vector<1x4x128xbf16>
    %211 = vector.shape_cast %210 : vector<1x4x128xbf16> to vector<4x128xbf16>
    %cst_172 = arith.constant dense<0.000000e+00> : vector<64x128xf32>
    %212 = tpu.matmul %209, %211, %cst_172 {dimension_numbers = #tpu.dot_dimension_numbers<[1], [0], [0], [1], [0, 0, 1, 1], [], []>} : vector<64x4xbf16>, vector<4x128xbf16>, vector<64x128xf32> -> vector<64x128xf32>
    %213 = arith.addf %203, %212 : vector<64x128xf32>
    %c0_173 = arith.constant 0 : index
    %c0_174 = arith.constant 0 : index
    %c9_175 = arith.constant 9 : index
    %c0_176 = arith.constant 0 : index
    %214 = vector.load %arg4[%c0_173, %c0_174, %c9_175, %c0_176] : memref<1x1x82x4xbf16, #tpu.memory_space<vmem>>, vector<1x1x64x4xbf16>
    %215 = vector.shape_cast %214 : vector<1x1x64x4xbf16> to vector<64x4xbf16>
    %c22 = arith.constant 22 : index
    %c0_177 = arith.constant 0 : index
    %c0_178 = arith.constant 0 : index
    %216 = vector.load %arg5[%c22, %c0_177, %c0_178] : memref<27x4x128xbf16, #tpu.memory_space<vmem>>, vector<1x4x128xbf16>
    %217 = vector.shape_cast %216 : vector<1x4x128xbf16> to vector<4x128xbf16>
    %cst_179 = arith.constant dense<0.000000e+00> : vector<64x128xf32>
    %218 = tpu.matmul %215, %217, %cst_179 {dimension_numbers = #tpu.dot_dimension_numbers<[1], [0], [0], [1], [0, 0, 1, 1], [], []>} : vector<64x4xbf16>, vector<4x128xbf16>, vector<64x128xf32> -> vector<64x128xf32>
    %219 = arith.addf %213, %218 : vector<64x128xf32>
    %c0_180 = arith.constant 0 : index
    %c0_181 = arith.constant 0 : index
    %c10_182 = arith.constant 10 : index
    %c0_183 = arith.constant 0 : index
    %220 = vector.load %arg4[%c0_180, %c0_181, %c10_182, %c0_183] : memref<1x1x82x4xbf16, #tpu.memory_space<vmem>>, vector<1x1x64x4xbf16>
    %221 = vector.shape_cast %220 : vector<1x1x64x4xbf16> to vector<64x4xbf16>
    %cst_184 = arith.constant 0.000000e+00 : bf16
    %222 = vector.broadcast %cst_184 : bf16 to vector<64x4xbf16>
    %223 = vector.shape_cast %20 : vector<64x1xi1> to vector<64x1xi1>
    %224 = vector.broadcast %223 : vector<64x1xi1> to vector<64x4xi1>
    %225 = arith.select %224, %221, %222 : vector<64x4xi1>, vector<64x4xbf16>
    %c23 = arith.constant 23 : index
    %c0_185 = arith.constant 0 : index
    %c0_186 = arith.constant 0 : index
    %226 = vector.load %arg5[%c23, %c0_185, %c0_186] : memref<27x4x128xbf16, #tpu.memory_space<vmem>>, vector<1x4x128xbf16>
    %227 = vector.shape_cast %226 : vector<1x4x128xbf16> to vector<4x128xbf16>
    %cst_187 = arith.constant dense<0.000000e+00> : vector<64x128xf32>
    %228 = tpu.matmul %225, %227, %cst_187 {dimension_numbers = #tpu.dot_dimension_numbers<[1], [0], [0], [1], [0, 0, 1, 1], [], []>} : vector<64x4xbf16>, vector<4x128xbf16>, vector<64x128xf32> -> vector<64x128xf32>
    %229 = arith.addf %219, %228 : vector<64x128xf32>
    %c0_188 = arith.constant 0 : index
    %c0_189 = arith.constant 0 : index
    %c16_190 = arith.constant 16 : index
    %c0_191 = arith.constant 0 : index
    %230 = vector.load %arg4[%c0_188, %c0_189, %c16_190, %c0_191] : memref<1x1x82x4xbf16, #tpu.memory_space<vmem>>, vector<1x1x64x4xbf16>
    %231 = vector.shape_cast %230 : vector<1x1x64x4xbf16> to vector<64x4xbf16>
    %cst_192 = arith.constant 0.000000e+00 : bf16
    %232 = vector.broadcast %cst_192 : bf16 to vector<64x4xbf16>
    %233 = vector.shape_cast %18 : vector<64x1xi1> to vector<64x1xi1>
    %234 = vector.broadcast %233 : vector<64x1xi1> to vector<64x4xi1>
    %235 = arith.select %234, %231, %232 : vector<64x4xi1>, vector<64x4xbf16>
    %c24 = arith.constant 24 : index
    %c0_193 = arith.constant 0 : index
    %c0_194 = arith.constant 0 : index
    %236 = vector.load %arg5[%c24, %c0_193, %c0_194] : memref<27x4x128xbf16, #tpu.memory_space<vmem>>, vector<1x4x128xbf16>
    %237 = vector.shape_cast %236 : vector<1x4x128xbf16> to vector<4x128xbf16>
    %cst_195 = arith.constant dense<0.000000e+00> : vector<64x128xf32>
    %238 = tpu.matmul %235, %237, %cst_195 {dimension_numbers = #tpu.dot_dimension_numbers<[1], [0], [0], [1], [0, 0, 1, 1], [], []>} : vector<64x4xbf16>, vector<4x128xbf16>, vector<64x128xf32> -> vector<64x128xf32>
    %239 = arith.addf %229, %238 : vector<64x128xf32>
    %c0_196 = arith.constant 0 : index
    %c0_197 = arith.constant 0 : index
    %c17_198 = arith.constant 17 : index
    %c0_199 = arith.constant 0 : index
    %240 = vector.load %arg4[%c0_196, %c0_197, %c17_198, %c0_199] : memref<1x1x82x4xbf16, #tpu.memory_space<vmem>>, vector<1x1x64x4xbf16>
    %241 = vector.shape_cast %240 : vector<1x1x64x4xbf16> to vector<64x4xbf16>
    %c25 = arith.constant 25 : index
    %c0_200 = arith.constant 0 : index
    %c0_201 = arith.constant 0 : index
    %242 = vector.load %arg5[%c25, %c0_200, %c0_201] : memref<27x4x128xbf16, #tpu.memory_space<vmem>>, vector<1x4x128xbf16>
    %243 = vector.shape_cast %242 : vector<1x4x128xbf16> to vector<4x128xbf16>
    %cst_202 = arith.constant dense<0.000000e+00> : vector<64x128xf32>
    %244 = tpu.matmul %241, %243, %cst_202 {dimension_numbers = #tpu.dot_dimension_numbers<[1], [0], [0], [1], [0, 0, 1, 1], [], []>} : vector<64x4xbf16>, vector<4x128xbf16>, vector<64x128xf32> -> vector<64x128xf32>
    %245 = arith.addf %239, %244 : vector<64x128xf32>
    %c0_203 = arith.constant 0 : index
    %c0_204 = arith.constant 0 : index
    %c18_205 = arith.constant 18 : index
    %c0_206 = arith.constant 0 : index
    %246 = vector.load %arg4[%c0_203, %c0_204, %c18_205, %c0_206] : memref<1x1x82x4xbf16, #tpu.memory_space<vmem>>, vector<1x1x64x4xbf16>
    %247 = vector.shape_cast %246 : vector<1x1x64x4xbf16> to vector<64x4xbf16>
    %cst_207 = arith.constant 0.000000e+00 : bf16
    %248 = vector.broadcast %cst_207 : bf16 to vector<64x4xbf16>
    %249 = vector.shape_cast %20 : vector<64x1xi1> to vector<64x1xi1>
    %250 = vector.broadcast %249 : vector<64x1xi1> to vector<64x4xi1>
    %251 = arith.select %250, %247, %248 : vector<64x4xi1>, vector<64x4xbf16>
    %c26 = arith.constant 26 : index
    %c0_208 = arith.constant 0 : index
    %c0_209 = arith.constant 0 : index
    %252 = vector.load %arg5[%c26, %c0_208, %c0_209] : memref<27x4x128xbf16, #tpu.memory_space<vmem>>, vector<1x4x128xbf16>
    %253 = vector.shape_cast %252 : vector<1x4x128xbf16> to vector<4x128xbf16>
    %cst_210 = arith.constant dense<0.000000e+00> : vector<64x128xf32>
    %254 = tpu.matmul %251, %253, %cst_210 {dimension_numbers = #tpu.dot_dimension_numbers<[1], [0], [0], [1], [0, 0, 1, 1], [], []>} : vector<64x4xbf16>, vector<4x128xbf16>, vector<64x128xf32> -> vector<64x128xf32>
    %255 = arith.addf %245, %254 : vector<64x128xf32>
    %c0_211 = arith.constant 0 : index
    %c0_212 = arith.constant 0 : index
    %256 = vector.load %arg6[%c0_211, %c0_212] : memref<1x128xf32, #tpu.memory_space<vmem>>, vector<1x128xf32>
    %257 = vector.broadcast %256 : vector<1x128xf32> to vector<64x128xf32>
    %258 = arith.mulf %255, %257 : vector<64x128xf32>
    %c0_213 = arith.constant 0 : index
    %c0_214 = arith.constant 0 : index
    %259 = vector.load %arg7[%c0_213, %c0_214] : memref<1x128xf32, #tpu.memory_space<vmem>>, vector<1x128xf32>
    %260 = vector.broadcast %259 : vector<1x128xf32> to vector<64x128xf32>
    %261 = arith.addf %258, %260 : vector<64x128xf32>
    %cst_215 = arith.constant 0.000000e+00 : f32
    %262 = vector.broadcast %cst_215 : f32 to vector<64x128xf32>
    %263 = arith.maximumf %261, %262 : vector<64x128xf32>
    %264 = arith.truncf %263 : vector<64x128xf32> to vector<64x128xbf16>
    %c0_216 = arith.constant 0 : index
    %c0_217 = arith.constant 0 : index
    %c0_218 = arith.constant 0 : index
    %c0_219 = arith.constant 0 : index
    %265 = vector.load %arg8[%c0_216, %c0_217, %c0_218, %c0_219] : memref<1x1x64x128xbf16, #tpu.memory_space<vmem>>, vector<1x1x64x128xbf16>
    %266 = vector.shape_cast %265 : vector<1x1x64x128xbf16> to vector<64x128xbf16>
    %267 = vector.shape_cast %264 : vector<64x128xbf16> to vector<1x1x64x128xbf16>
    tpu.vector_store %arg8[%c0_216, %c0_217, %c0_218, %c0_219], %267 {strides = array<i32>} : memref<1x1x64x128xbf16, #tpu.memory_space<vmem>>, vector<1x1x64x128xbf16>,
    return
  }
  func.func @transform_0(%arg0: i32, %arg1: i32) -> (i32, i32, i32, i32) {
    %c0_i32 = arith.constant 0 : i32
    %0 = arith.addi %arg1, %c0_i32 : i32
    %c0_i32_0 = arith.constant 0 : i32
    %c0_i32_1 = arith.constant 0 : i32
    %c0_i32_2 = arith.constant 0 : i32
    return %arg0, %0, %c0_i32_0, %c0_i32_1 : i32, i32, i32, i32
  }
  func.func @transform_1(%arg0: i32, %arg1: i32) -> (i32, i32, i32, i32) {
    %c1_i32 = arith.constant 1 : i32
    %0 = arith.addi %arg1, %c1_i32 : i32
    %c0_i32 = arith.constant 0 : i32
    %c0_i32_0 = arith.constant 0 : i32
    %c0_i32_1 = arith.constant 0 : i32
    return %arg0, %0, %c0_i32, %c0_i32_0 : i32, i32, i32, i32
  }
  func.func @transform_2(%arg0: i32, %arg1: i32) -> (i32, i32, i32, i32) {
    %c2_i32 = arith.constant 2 : i32
    %0 = arith.addi %arg1, %c2_i32 : i32
    %c0_i32 = arith.constant 0 : i32
    %c0_i32_0 = arith.constant 0 : i32
    %c0_i32_1 = arith.constant 0 : i32
    return %arg0, %0, %c0_i32, %c0_i32_0 : i32, i32, i32, i32
  }
  func.func @transform_3(%arg0: i32, %arg1: i32) -> (i32, i32, i32) {
    %c0_i32 = arith.constant 0 : i32
    %c0_i32_0 = arith.constant 0 : i32
    %c0_i32_1 = arith.constant 0 : i32
    %c0_i32_2 = arith.constant 0 : i32
    return %c0_i32, %c0_i32_0, %c0_i32_1 : i32, i32, i32
  }
  func.func @transform_4(%arg0: i32, %arg1: i32) -> (i32, i32) {
    %c0_i32 = arith.constant 0 : i32
    %c0_i32_0 = arith.constant 0 : i32
    %c0_i32_1 = arith.constant 0 : i32
    return %c0_i32, %c0_i32_0 : i32, i32
  }
  func.func @transform_5(%arg0: i32, %arg1: i32) -> (i32, i32) {
    %c0_i32 = arith.constant 0 : i32
    %c0_i32_0 = arith.constant 0 : i32
    %c0_i32_1 = arith.constant 0 : i32
    return %c0_i32, %c0_i32_0 : i32, i32
  }
  func.func @transform_6(%arg0: i32, %arg1: i32) -> (i32, i32, i32, i32) {
    %c0_i32 = arith.constant 0 : i32
    %c0_i32_0 = arith.constant 0 : i32
    %c0_i32_1 = arith.constant 0 : i32
    return %arg0, %arg1, %c0_i32, %c0_i32_0 : i32, i32, i32, i32
  }
}

module attributes {stable_mosaic.version = 11 : i64} {
  func.func @_conv3d_bn_kernel(%arg0: i32, %arg1: i32, %arg2: memref<1x1x82x128xbf16, #tpu.memory_space<vmem>>, %arg3: memref<1x1x82x128xbf16, #tpu.memory_space<vmem>>, %arg4: memref<1x1x82x128xbf16, #tpu.memory_space<vmem>>, %arg5: memref<27x128x128xbf16, #tpu.memory_space<vmem>>, %arg6: memref<1x128xf32, #tpu.memory_space<vmem>>, %arg7: memref<1x128xf32, #tpu.memory_space<vmem>>, %arg8: memref<1x1x64x128xf32, #tpu.memory_space<vmem>>, %arg9: memref<1x1x1x128xf32, #tpu.memory_space<vmem>>) attributes {dimension_semantics = [#tpu.dimension_semantics<parallel>, #tpu.dimension_semantics<parallel>], iteration_bounds = array<i64: 2, 8>, scalar_prefetch = 0 : i64, scratch_operands = 0 : i64, tpu.core_type = #tpu.core_type<tc>, window_params = [{transform_indices = @transform_0, window_bounds = array<i64: 1, 1, 82, 128>}, {transform_indices = @transform_1, window_bounds = array<i64: 1, 1, 82, 128>}, {transform_indices = @transform_2, window_bounds = array<i64: 1, 1, 82, 128>}, {pipeline_mode = #tpu.pipeline_mode<synchronous>, transform_indices = @transform_3, window_bounds = array<i64: 27, 128, 128>}, {pipeline_mode = #tpu.pipeline_mode<synchronous>, transform_indices = @transform_4, window_bounds = array<i64: 1, 128>}, {pipeline_mode = #tpu.pipeline_mode<synchronous>, transform_indices = @transform_5, window_bounds = array<i64: 1, 128>}, {transform_indices = @transform_6, window_bounds = array<i64: 1, 1, 64, 128>}, {transform_indices = @transform_7, window_bounds = array<i64: 1, 1, 1, 128>}]} {
    %0 = tpu.iota {dimensions = array<i32: 0>} : vector<64x1xi32>
    %c8_i32 = arith.constant 8 : i32
    %c0_i32 = arith.constant 0 : i32
    %1 = arith.cmpi eq, %c8_i32, %c0_i32 : i32
    %c1_i32 = arith.constant 1 : i32
    %2 = arith.select %1, %c1_i32, %c8_i32 : i32
    %3 = vector.broadcast %2 : i32 to vector<64x1xi32>
    %4 = arith.remsi %0, %3 : vector<64x1xi32>
    %c0_i32_0 = arith.constant 0 : i32
    %5 = vector.broadcast %c0_i32_0 : i32 to vector<64x1xi32>
    %6 = arith.cmpi ne, %4, %5 : vector<64x1xi32>
    %c0_i32_1 = arith.constant 0 : i32
    %7 = vector.broadcast %c0_i32_1 : i32 to vector<64x1xi32>
    %8 = arith.cmpi slt, %4, %7 : vector<64x1xi32>
    %c0_i32_2 = arith.constant 0 : i32
    %9 = arith.cmpi slt, %2, %c0_i32_2 : i32
    %10 = vector.broadcast %9 : i1 to vector<64x1xi1>
    %11 = vector.broadcast %10 : vector<64x1xi1> to vector<64x1xi1>
    %12 = arith.xori %8, %11 : vector<64x1xi1>
    %13 = arith.andi %12, %6 : vector<64x1xi1>
    %14 = vector.broadcast %2 : i32 to vector<64x1xi32>
    %15 = arith.addi %4, %14 : vector<64x1xi32>
    %16 = arith.select %13, %15, %4 : vector<64x1xi1>, vector<64x1xi32>
    %c1_i32_3 = arith.constant 1 : i32
    %17 = vector.broadcast %c1_i32_3 : i32 to vector<64x1xi32>
    %18 = arith.cmpi sge, %16, %17 : vector<64x1xi32>
    %c6_i32 = arith.constant 6 : i32
    %19 = vector.broadcast %c6_i32 : i32 to vector<64x1xi32>
    %20 = arith.cmpi sle, %16, %19 : vector<64x1xi32>
    %cst = arith.constant 0.000000e+00 : f32
    %21 = vector.broadcast %cst : f32 to vector<64x128xf32>
    %c0 = arith.constant 0 : index
    %c0_4 = arith.constant 0 : index
    %c0_5 = arith.constant 0 : index
    %c0_6 = arith.constant 0 : index
    %22 = vector.load %arg2[%c0, %c0_4, %c0_5, %c0_6] : memref<1x1x82x128xbf16, #tpu.memory_space<vmem>>, vector<1x1x64x128xbf16>
    %23 = vector.shape_cast %22 : vector<1x1x64x128xbf16> to vector<64x128xbf16>
    %cst_7 = arith.constant 0.000000e+00 : bf16
    %24 = vector.broadcast %cst_7 : bf16 to vector<64x128xbf16>
    %25 = vector.shape_cast %18 : vector<64x1xi1> to vector<64x1xi1>
    %26 = vector.broadcast %25 : vector<64x1xi1> to vector<64x128xi1>
    %27 = arith.select %26, %23, %24 : vector<64x128xi1>, vector<64x128xbf16>
    %c0_8 = arith.constant 0 : index
    %c0_9 = arith.constant 0 : index
    %c0_10 = arith.constant 0 : index
    %28 = vector.load %arg5[%c0_8, %c0_9, %c0_10] : memref<27x128x128xbf16, #tpu.memory_space<vmem>>, vector<1x128x128xbf16>
    %29 = vector.shape_cast %28 : vector<1x128x128xbf16> to vector<128x128xbf16>
    %cst_11 = arith.constant dense<0.000000e+00> : vector<64x128xf32>
    %30 = tpu.matmul %27, %29, %cst_11 {dimension_numbers = #tpu.dot_dimension_numbers<[1], [0], [0], [1], [0, 0, 1, 1], [], []>} : vector<64x128xbf16>, vector<128x128xbf16>, vector<64x128xf32> -> vector<64x128xf32>
    %31 = arith.addf %21, %30 : vector<64x128xf32>
    %c0_12 = arith.constant 0 : index
    %c0_13 = arith.constant 0 : index
    %c1 = arith.constant 1 : index
    %c0_14 = arith.constant 0 : index
    %32 = vector.load %arg2[%c0_12, %c0_13, %c1, %c0_14] : memref<1x1x82x128xbf16, #tpu.memory_space<vmem>>, vector<1x1x64x128xbf16>
    %33 = vector.shape_cast %32 : vector<1x1x64x128xbf16> to vector<64x128xbf16>
    %c1_15 = arith.constant 1 : index
    %c0_16 = arith.constant 0 : index
    %c0_17 = arith.constant 0 : index
    %34 = vector.load %arg5[%c1_15, %c0_16, %c0_17] : memref<27x128x128xbf16, #tpu.memory_space<vmem>>, vector<1x128x128xbf16>
    %35 = vector.shape_cast %34 : vector<1x128x128xbf16> to vector<128x128xbf16>
    %cst_18 = arith.constant dense<0.000000e+00> : vector<64x128xf32>
    %36 = tpu.matmul %33, %35, %cst_18 {dimension_numbers = #tpu.dot_dimension_numbers<[1], [0], [0], [1], [0, 0, 1, 1], [], []>} : vector<64x128xbf16>, vector<128x128xbf16>, vector<64x128xf32> -> vector<64x128xf32>
    %37 = arith.addf %31, %36 : vector<64x128xf32>
    %c0_19 = arith.constant 0 : index
    %c0_20 = arith.constant 0 : index
    %c2 = arith.constant 2 : index
    %c0_21 = arith.constant 0 : index
    %38 = vector.load %arg2[%c0_19, %c0_20, %c2, %c0_21] : memref<1x1x82x128xbf16, #tpu.memory_space<vmem>>, vector<1x1x64x128xbf16>
    %39 = vector.shape_cast %38 : vector<1x1x64x128xbf16> to vector<64x128xbf16>
    %cst_22 = arith.constant 0.000000e+00 : bf16
    %40 = vector.broadcast %cst_22 : bf16 to vector<64x128xbf16>
    %41 = vector.shape_cast %20 : vector<64x1xi1> to vector<64x1xi1>
    %42 = vector.broadcast %41 : vector<64x1xi1> to vector<64x128xi1>
    %43 = arith.select %42, %39, %40 : vector<64x128xi1>, vector<64x128xbf16>
    %c2_23 = arith.constant 2 : index
    %c0_24 = arith.constant 0 : index
    %c0_25 = arith.constant 0 : index
    %44 = vector.load %arg5[%c2_23, %c0_24, %c0_25] : memref<27x128x128xbf16, #tpu.memory_space<vmem>>, vector<1x128x128xbf16>
    %45 = vector.shape_cast %44 : vector<1x128x128xbf16> to vector<128x128xbf16>
    %cst_26 = arith.constant dense<0.000000e+00> : vector<64x128xf32>
    %46 = tpu.matmul %43, %45, %cst_26 {dimension_numbers = #tpu.dot_dimension_numbers<[1], [0], [0], [1], [0, 0, 1, 1], [], []>} : vector<64x128xbf16>, vector<128x128xbf16>, vector<64x128xf32> -> vector<64x128xf32>
    %47 = arith.addf %37, %46 : vector<64x128xf32>
    %c0_27 = arith.constant 0 : index
    %c0_28 = arith.constant 0 : index
    %c8 = arith.constant 8 : index
    %c0_29 = arith.constant 0 : index
    %48 = vector.load %arg2[%c0_27, %c0_28, %c8, %c0_29] : memref<1x1x82x128xbf16, #tpu.memory_space<vmem>>, vector<1x1x64x128xbf16>
    %49 = vector.shape_cast %48 : vector<1x1x64x128xbf16> to vector<64x128xbf16>
    %cst_30 = arith.constant 0.000000e+00 : bf16
    %50 = vector.broadcast %cst_30 : bf16 to vector<64x128xbf16>
    %51 = vector.shape_cast %18 : vector<64x1xi1> to vector<64x1xi1>
    %52 = vector.broadcast %51 : vector<64x1xi1> to vector<64x128xi1>
    %53 = arith.select %52, %49, %50 : vector<64x128xi1>, vector<64x128xbf16>
    %c3 = arith.constant 3 : index
    %c0_31 = arith.constant 0 : index
    %c0_32 = arith.constant 0 : index
    %54 = vector.load %arg5[%c3, %c0_31, %c0_32] : memref<27x128x128xbf16, #tpu.memory_space<vmem>>, vector<1x128x128xbf16>
    %55 = vector.shape_cast %54 : vector<1x128x128xbf16> to vector<128x128xbf16>
    %cst_33 = arith.constant dense<0.000000e+00> : vector<64x128xf32>
    %56 = tpu.matmul %53, %55, %cst_33 {dimension_numbers = #tpu.dot_dimension_numbers<[1], [0], [0], [1], [0, 0, 1, 1], [], []>} : vector<64x128xbf16>, vector<128x128xbf16>, vector<64x128xf32> -> vector<64x128xf32>
    %57 = arith.addf %47, %56 : vector<64x128xf32>
    %c0_34 = arith.constant 0 : index
    %c0_35 = arith.constant 0 : index
    %c9 = arith.constant 9 : index
    %c0_36 = arith.constant 0 : index
    %58 = vector.load %arg2[%c0_34, %c0_35, %c9, %c0_36] : memref<1x1x82x128xbf16, #tpu.memory_space<vmem>>, vector<1x1x64x128xbf16>
    %59 = vector.shape_cast %58 : vector<1x1x64x128xbf16> to vector<64x128xbf16>
    %c4 = arith.constant 4 : index
    %c0_37 = arith.constant 0 : index
    %c0_38 = arith.constant 0 : index
    %60 = vector.load %arg5[%c4, %c0_37, %c0_38] : memref<27x128x128xbf16, #tpu.memory_space<vmem>>, vector<1x128x128xbf16>
    %61 = vector.shape_cast %60 : vector<1x128x128xbf16> to vector<128x128xbf16>
    %cst_39 = arith.constant dense<0.000000e+00> : vector<64x128xf32>
    %62 = tpu.matmul %59, %61, %cst_39 {dimension_numbers = #tpu.dot_dimension_numbers<[1], [0], [0], [1], [0, 0, 1, 1], [], []>} : vector<64x128xbf16>, vector<128x128xbf16>, vector<64x128xf32> -> vector<64x128xf32>
    %63 = arith.addf %57, %62 : vector<64x128xf32>
    %c0_40 = arith.constant 0 : index
    %c0_41 = arith.constant 0 : index
    %c10 = arith.constant 10 : index
    %c0_42 = arith.constant 0 : index
    %64 = vector.load %arg2[%c0_40, %c0_41, %c10, %c0_42] : memref<1x1x82x128xbf16, #tpu.memory_space<vmem>>, vector<1x1x64x128xbf16>
    %65 = vector.shape_cast %64 : vector<1x1x64x128xbf16> to vector<64x128xbf16>
    %cst_43 = arith.constant 0.000000e+00 : bf16
    %66 = vector.broadcast %cst_43 : bf16 to vector<64x128xbf16>
    %67 = vector.shape_cast %20 : vector<64x1xi1> to vector<64x1xi1>
    %68 = vector.broadcast %67 : vector<64x1xi1> to vector<64x128xi1>
    %69 = arith.select %68, %65, %66 : vector<64x128xi1>, vector<64x128xbf16>
    %c5 = arith.constant 5 : index
    %c0_44 = arith.constant 0 : index
    %c0_45 = arith.constant 0 : index
    %70 = vector.load %arg5[%c5, %c0_44, %c0_45] : memref<27x128x128xbf16, #tpu.memory_space<vmem>>, vector<1x128x128xbf16>
    %71 = vector.shape_cast %70 : vector<1x128x128xbf16> to vector<128x128xbf16>
    %cst_46 = arith.constant dense<0.000000e+00> : vector<64x128xf32>
    %72 = tpu.matmul %69, %71, %cst_46 {dimension_numbers = #tpu.dot_dimension_numbers<[1], [0], [0], [1], [0, 0, 1, 1], [], []>} : vector<64x128xbf16>, vector<128x128xbf16>, vector<64x128xf32> -> vector<64x128xf32>
    %73 = arith.addf %63, %72 : vector<64x128xf32>
    %c0_47 = arith.constant 0 : index
    %c0_48 = arith.constant 0 : index
    %c16 = arith.constant 16 : index
    %c0_49 = arith.constant 0 : index
    %74 = vector.load %arg2[%c0_47, %c0_48, %c16, %c0_49] : memref<1x1x82x128xbf16, #tpu.memory_space<vmem>>, vector<1x1x64x128xbf16>
    %75 = vector.shape_cast %74 : vector<1x1x64x128xbf16> to vector<64x128xbf16>
    %cst_50 = arith.constant 0.000000e+00 : bf16
    %76 = vector.broadcast %cst_50 : bf16 to vector<64x128xbf16>
    %77 = vector.shape_cast %18 : vector<64x1xi1> to vector<64x1xi1>
    %78 = vector.broadcast %77 : vector<64x1xi1> to vector<64x128xi1>
    %79 = arith.select %78, %75, %76 : vector<64x128xi1>, vector<64x128xbf16>
    %c6 = arith.constant 6 : index
    %c0_51 = arith.constant 0 : index
    %c0_52 = arith.constant 0 : index
    %80 = vector.load %arg5[%c6, %c0_51, %c0_52] : memref<27x128x128xbf16, #tpu.memory_space<vmem>>, vector<1x128x128xbf16>
    %81 = vector.shape_cast %80 : vector<1x128x128xbf16> to vector<128x128xbf16>
    %cst_53 = arith.constant dense<0.000000e+00> : vector<64x128xf32>
    %82 = tpu.matmul %79, %81, %cst_53 {dimension_numbers = #tpu.dot_dimension_numbers<[1], [0], [0], [1], [0, 0, 1, 1], [], []>} : vector<64x128xbf16>, vector<128x128xbf16>, vector<64x128xf32> -> vector<64x128xf32>
    %83 = arith.addf %73, %82 : vector<64x128xf32>
    %c0_54 = arith.constant 0 : index
    %c0_55 = arith.constant 0 : index
    %c17 = arith.constant 17 : index
    %c0_56 = arith.constant 0 : index
    %84 = vector.load %arg2[%c0_54, %c0_55, %c17, %c0_56] : memref<1x1x82x128xbf16, #tpu.memory_space<vmem>>, vector<1x1x64x128xbf16>
    %85 = vector.shape_cast %84 : vector<1x1x64x128xbf16> to vector<64x128xbf16>
    %c7 = arith.constant 7 : index
    %c0_57 = arith.constant 0 : index
    %c0_58 = arith.constant 0 : index
    %86 = vector.load %arg5[%c7, %c0_57, %c0_58] : memref<27x128x128xbf16, #tpu.memory_space<vmem>>, vector<1x128x128xbf16>
    %87 = vector.shape_cast %86 : vector<1x128x128xbf16> to vector<128x128xbf16>
    %cst_59 = arith.constant dense<0.000000e+00> : vector<64x128xf32>
    %88 = tpu.matmul %85, %87, %cst_59 {dimension_numbers = #tpu.dot_dimension_numbers<[1], [0], [0], [1], [0, 0, 1, 1], [], []>} : vector<64x128xbf16>, vector<128x128xbf16>, vector<64x128xf32> -> vector<64x128xf32>
    %89 = arith.addf %83, %88 : vector<64x128xf32>
    %c0_60 = arith.constant 0 : index
    %c0_61 = arith.constant 0 : index
    %c18 = arith.constant 18 : index
    %c0_62 = arith.constant 0 : index
    %90 = vector.load %arg2[%c0_60, %c0_61, %c18, %c0_62] : memref<1x1x82x128xbf16, #tpu.memory_space<vmem>>, vector<1x1x64x128xbf16>
    %91 = vector.shape_cast %90 : vector<1x1x64x128xbf16> to vector<64x128xbf16>
    %cst_63 = arith.constant 0.000000e+00 : bf16
    %92 = vector.broadcast %cst_63 : bf16 to vector<64x128xbf16>
    %93 = vector.shape_cast %20 : vector<64x1xi1> to vector<64x1xi1>
    %94 = vector.broadcast %93 : vector<64x1xi1> to vector<64x128xi1>
    %95 = arith.select %94, %91, %92 : vector<64x128xi1>, vector<64x128xbf16>
    %c8_64 = arith.constant 8 : index
    %c0_65 = arith.constant 0 : index
    %c0_66 = arith.constant 0 : index
    %96 = vector.load %arg5[%c8_64, %c0_65, %c0_66] : memref<27x128x128xbf16, #tpu.memory_space<vmem>>, vector<1x128x128xbf16>
    %97 = vector.shape_cast %96 : vector<1x128x128xbf16> to vector<128x128xbf16>
    %cst_67 = arith.constant dense<0.000000e+00> : vector<64x128xf32>
    %98 = tpu.matmul %95, %97, %cst_67 {dimension_numbers = #tpu.dot_dimension_numbers<[1], [0], [0], [1], [0, 0, 1, 1], [], []>} : vector<64x128xbf16>, vector<128x128xbf16>, vector<64x128xf32> -> vector<64x128xf32>
    %99 = arith.addf %89, %98 : vector<64x128xf32>
    %c0_68 = arith.constant 0 : index
    %c0_69 = arith.constant 0 : index
    %c0_70 = arith.constant 0 : index
    %c0_71 = arith.constant 0 : index
    %100 = vector.load %arg3[%c0_68, %c0_69, %c0_70, %c0_71] : memref<1x1x82x128xbf16, #tpu.memory_space<vmem>>, vector<1x1x64x128xbf16>
    %101 = vector.shape_cast %100 : vector<1x1x64x128xbf16> to vector<64x128xbf16>
    %cst_72 = arith.constant 0.000000e+00 : bf16
    %102 = vector.broadcast %cst_72 : bf16 to vector<64x128xbf16>
    %103 = vector.shape_cast %18 : vector<64x1xi1> to vector<64x1xi1>
    %104 = vector.broadcast %103 : vector<64x1xi1> to vector<64x128xi1>
    %105 = arith.select %104, %101, %102 : vector<64x128xi1>, vector<64x128xbf16>
    %c9_73 = arith.constant 9 : index
    %c0_74 = arith.constant 0 : index
    %c0_75 = arith.constant 0 : index
    %106 = vector.load %arg5[%c9_73, %c0_74, %c0_75] : memref<27x128x128xbf16, #tpu.memory_space<vmem>>, vector<1x128x128xbf16>
    %107 = vector.shape_cast %106 : vector<1x128x128xbf16> to vector<128x128xbf16>
    %cst_76 = arith.constant dense<0.000000e+00> : vector<64x128xf32>
    %108 = tpu.matmul %105, %107, %cst_76 {dimension_numbers = #tpu.dot_dimension_numbers<[1], [0], [0], [1], [0, 0, 1, 1], [], []>} : vector<64x128xbf16>, vector<128x128xbf16>, vector<64x128xf32> -> vector<64x128xf32>
    %109 = arith.addf %99, %108 : vector<64x128xf32>
    %c0_77 = arith.constant 0 : index
    %c0_78 = arith.constant 0 : index
    %c1_79 = arith.constant 1 : index
    %c0_80 = arith.constant 0 : index
    %110 = vector.load %arg3[%c0_77, %c0_78, %c1_79, %c0_80] : memref<1x1x82x128xbf16, #tpu.memory_space<vmem>>, vector<1x1x64x128xbf16>
    %111 = vector.shape_cast %110 : vector<1x1x64x128xbf16> to vector<64x128xbf16>
    %c10_81 = arith.constant 10 : index
    %c0_82 = arith.constant 0 : index
    %c0_83 = arith.constant 0 : index
    %112 = vector.load %arg5[%c10_81, %c0_82, %c0_83] : memref<27x128x128xbf16, #tpu.memory_space<vmem>>, vector<1x128x128xbf16>
    %113 = vector.shape_cast %112 : vector<1x128x128xbf16> to vector<128x128xbf16>
    %cst_84 = arith.constant dense<0.000000e+00> : vector<64x128xf32>
    %114 = tpu.matmul %111, %113, %cst_84 {dimension_numbers = #tpu.dot_dimension_numbers<[1], [0], [0], [1], [0, 0, 1, 1], [], []>} : vector<64x128xbf16>, vector<128x128xbf16>, vector<64x128xf32> -> vector<64x128xf32>
    %115 = arith.addf %109, %114 : vector<64x128xf32>
    %c0_85 = arith.constant 0 : index
    %c0_86 = arith.constant 0 : index
    %c2_87 = arith.constant 2 : index
    %c0_88 = arith.constant 0 : index
    %116 = vector.load %arg3[%c0_85, %c0_86, %c2_87, %c0_88] : memref<1x1x82x128xbf16, #tpu.memory_space<vmem>>, vector<1x1x64x128xbf16>
    %117 = vector.shape_cast %116 : vector<1x1x64x128xbf16> to vector<64x128xbf16>
    %cst_89 = arith.constant 0.000000e+00 : bf16
    %118 = vector.broadcast %cst_89 : bf16 to vector<64x128xbf16>
    %119 = vector.shape_cast %20 : vector<64x1xi1> to vector<64x1xi1>
    %120 = vector.broadcast %119 : vector<64x1xi1> to vector<64x128xi1>
    %121 = arith.select %120, %117, %118 : vector<64x128xi1>, vector<64x128xbf16>
    %c11 = arith.constant 11 : index
    %c0_90 = arith.constant 0 : index
    %c0_91 = arith.constant 0 : index
    %122 = vector.load %arg5[%c11, %c0_90, %c0_91] : memref<27x128x128xbf16, #tpu.memory_space<vmem>>, vector<1x128x128xbf16>
    %123 = vector.shape_cast %122 : vector<1x128x128xbf16> to vector<128x128xbf16>
    %cst_92 = arith.constant dense<0.000000e+00> : vector<64x128xf32>
    %124 = tpu.matmul %121, %123, %cst_92 {dimension_numbers = #tpu.dot_dimension_numbers<[1], [0], [0], [1], [0, 0, 1, 1], [], []>} : vector<64x128xbf16>, vector<128x128xbf16>, vector<64x128xf32> -> vector<64x128xf32>
    %125 = arith.addf %115, %124 : vector<64x128xf32>
    %c0_93 = arith.constant 0 : index
    %c0_94 = arith.constant 0 : index
    %c8_95 = arith.constant 8 : index
    %c0_96 = arith.constant 0 : index
    %126 = vector.load %arg3[%c0_93, %c0_94, %c8_95, %c0_96] : memref<1x1x82x128xbf16, #tpu.memory_space<vmem>>, vector<1x1x64x128xbf16>
    %127 = vector.shape_cast %126 : vector<1x1x64x128xbf16> to vector<64x128xbf16>
    %cst_97 = arith.constant 0.000000e+00 : bf16
    %128 = vector.broadcast %cst_97 : bf16 to vector<64x128xbf16>
    %129 = vector.shape_cast %18 : vector<64x1xi1> to vector<64x1xi1>
    %130 = vector.broadcast %129 : vector<64x1xi1> to vector<64x128xi1>
    %131 = arith.select %130, %127, %128 : vector<64x128xi1>, vector<64x128xbf16>
    %c12 = arith.constant 12 : index
    %c0_98 = arith.constant 0 : index
    %c0_99 = arith.constant 0 : index
    %132 = vector.load %arg5[%c12, %c0_98, %c0_99] : memref<27x128x128xbf16, #tpu.memory_space<vmem>>, vector<1x128x128xbf16>
    %133 = vector.shape_cast %132 : vector<1x128x128xbf16> to vector<128x128xbf16>
    %cst_100 = arith.constant dense<0.000000e+00> : vector<64x128xf32>
    %134 = tpu.matmul %131, %133, %cst_100 {dimension_numbers = #tpu.dot_dimension_numbers<[1], [0], [0], [1], [0, 0, 1, 1], [], []>} : vector<64x128xbf16>, vector<128x128xbf16>, vector<64x128xf32> -> vector<64x128xf32>
    %135 = arith.addf %125, %134 : vector<64x128xf32>
    %c0_101 = arith.constant 0 : index
    %c0_102 = arith.constant 0 : index
    %c9_103 = arith.constant 9 : index
    %c0_104 = arith.constant 0 : index
    %136 = vector.load %arg3[%c0_101, %c0_102, %c9_103, %c0_104] : memref<1x1x82x128xbf16, #tpu.memory_space<vmem>>, vector<1x1x64x128xbf16>
    %137 = vector.shape_cast %136 : vector<1x1x64x128xbf16> to vector<64x128xbf16>
    %c13 = arith.constant 13 : index
    %c0_105 = arith.constant 0 : index
    %c0_106 = arith.constant 0 : index
    %138 = vector.load %arg5[%c13, %c0_105, %c0_106] : memref<27x128x128xbf16, #tpu.memory_space<vmem>>, vector<1x128x128xbf16>
    %139 = vector.shape_cast %138 : vector<1x128x128xbf16> to vector<128x128xbf16>
    %cst_107 = arith.constant dense<0.000000e+00> : vector<64x128xf32>
    %140 = tpu.matmul %137, %139, %cst_107 {dimension_numbers = #tpu.dot_dimension_numbers<[1], [0], [0], [1], [0, 0, 1, 1], [], []>} : vector<64x128xbf16>, vector<128x128xbf16>, vector<64x128xf32> -> vector<64x128xf32>
    %141 = arith.addf %135, %140 : vector<64x128xf32>
    %c0_108 = arith.constant 0 : index
    %c0_109 = arith.constant 0 : index
    %c10_110 = arith.constant 10 : index
    %c0_111 = arith.constant 0 : index
    %142 = vector.load %arg3[%c0_108, %c0_109, %c10_110, %c0_111] : memref<1x1x82x128xbf16, #tpu.memory_space<vmem>>, vector<1x1x64x128xbf16>
    %143 = vector.shape_cast %142 : vector<1x1x64x128xbf16> to vector<64x128xbf16>
    %cst_112 = arith.constant 0.000000e+00 : bf16
    %144 = vector.broadcast %cst_112 : bf16 to vector<64x128xbf16>
    %145 = vector.shape_cast %20 : vector<64x1xi1> to vector<64x1xi1>
    %146 = vector.broadcast %145 : vector<64x1xi1> to vector<64x128xi1>
    %147 = arith.select %146, %143, %144 : vector<64x128xi1>, vector<64x128xbf16>
    %c14 = arith.constant 14 : index
    %c0_113 = arith.constant 0 : index
    %c0_114 = arith.constant 0 : index
    %148 = vector.load %arg5[%c14, %c0_113, %c0_114] : memref<27x128x128xbf16, #tpu.memory_space<vmem>>, vector<1x128x128xbf16>
    %149 = vector.shape_cast %148 : vector<1x128x128xbf16> to vector<128x128xbf16>
    %cst_115 = arith.constant dense<0.000000e+00> : vector<64x128xf32>
    %150 = tpu.matmul %147, %149, %cst_115 {dimension_numbers = #tpu.dot_dimension_numbers<[1], [0], [0], [1], [0, 0, 1, 1], [], []>} : vector<64x128xbf16>, vector<128x128xbf16>, vector<64x128xf32> -> vector<64x128xf32>
    %151 = arith.addf %141, %150 : vector<64x128xf32>
    %c0_116 = arith.constant 0 : index
    %c0_117 = arith.constant 0 : index
    %c16_118 = arith.constant 16 : index
    %c0_119 = arith.constant 0 : index
    %152 = vector.load %arg3[%c0_116, %c0_117, %c16_118, %c0_119] : memref<1x1x82x128xbf16, #tpu.memory_space<vmem>>, vector<1x1x64x128xbf16>
    %153 = vector.shape_cast %152 : vector<1x1x64x128xbf16> to vector<64x128xbf16>
    %cst_120 = arith.constant 0.000000e+00 : bf16
    %154 = vector.broadcast %cst_120 : bf16 to vector<64x128xbf16>
    %155 = vector.shape_cast %18 : vector<64x1xi1> to vector<64x1xi1>
    %156 = vector.broadcast %155 : vector<64x1xi1> to vector<64x128xi1>
    %157 = arith.select %156, %153, %154 : vector<64x128xi1>, vector<64x128xbf16>
    %c15 = arith.constant 15 : index
    %c0_121 = arith.constant 0 : index
    %c0_122 = arith.constant 0 : index
    %158 = vector.load %arg5[%c15, %c0_121, %c0_122] : memref<27x128x128xbf16, #tpu.memory_space<vmem>>, vector<1x128x128xbf16>
    %159 = vector.shape_cast %158 : vector<1x128x128xbf16> to vector<128x128xbf16>
    %cst_123 = arith.constant dense<0.000000e+00> : vector<64x128xf32>
    %160 = tpu.matmul %157, %159, %cst_123 {dimension_numbers = #tpu.dot_dimension_numbers<[1], [0], [0], [1], [0, 0, 1, 1], [], []>} : vector<64x128xbf16>, vector<128x128xbf16>, vector<64x128xf32> -> vector<64x128xf32>
    %161 = arith.addf %151, %160 : vector<64x128xf32>
    %c0_124 = arith.constant 0 : index
    %c0_125 = arith.constant 0 : index
    %c17_126 = arith.constant 17 : index
    %c0_127 = arith.constant 0 : index
    %162 = vector.load %arg3[%c0_124, %c0_125, %c17_126, %c0_127] : memref<1x1x82x128xbf16, #tpu.memory_space<vmem>>, vector<1x1x64x128xbf16>
    %163 = vector.shape_cast %162 : vector<1x1x64x128xbf16> to vector<64x128xbf16>
    %c16_128 = arith.constant 16 : index
    %c0_129 = arith.constant 0 : index
    %c0_130 = arith.constant 0 : index
    %164 = vector.load %arg5[%c16_128, %c0_129, %c0_130] : memref<27x128x128xbf16, #tpu.memory_space<vmem>>, vector<1x128x128xbf16>
    %165 = vector.shape_cast %164 : vector<1x128x128xbf16> to vector<128x128xbf16>
    %cst_131 = arith.constant dense<0.000000e+00> : vector<64x128xf32>
    %166 = tpu.matmul %163, %165, %cst_131 {dimension_numbers = #tpu.dot_dimension_numbers<[1], [0], [0], [1], [0, 0, 1, 1], [], []>} : vector<64x128xbf16>, vector<128x128xbf16>, vector<64x128xf32> -> vector<64x128xf32>
    %167 = arith.addf %161, %166 : vector<64x128xf32>
    %c0_132 = arith.constant 0 : index
    %c0_133 = arith.constant 0 : index
    %c18_134 = arith.constant 18 : index
    %c0_135 = arith.constant 0 : index
    %168 = vector.load %arg3[%c0_132, %c0_133, %c18_134, %c0_135] : memref<1x1x82x128xbf16, #tpu.memory_space<vmem>>, vector<1x1x64x128xbf16>
    %169 = vector.shape_cast %168 : vector<1x1x64x128xbf16> to vector<64x128xbf16>
    %cst_136 = arith.constant 0.000000e+00 : bf16
    %170 = vector.broadcast %cst_136 : bf16 to vector<64x128xbf16>
    %171 = vector.shape_cast %20 : vector<64x1xi1> to vector<64x1xi1>
    %172 = vector.broadcast %171 : vector<64x1xi1> to vector<64x128xi1>
    %173 = arith.select %172, %169, %170 : vector<64x128xi1>, vector<64x128xbf16>
    %c17_137 = arith.constant 17 : index
    %c0_138 = arith.constant 0 : index
    %c0_139 = arith.constant 0 : index
    %174 = vector.load %arg5[%c17_137, %c0_138, %c0_139] : memref<27x128x128xbf16, #tpu.memory_space<vmem>>, vector<1x128x128xbf16>
    %175 = vector.shape_cast %174 : vector<1x128x128xbf16> to vector<128x128xbf16>
    %cst_140 = arith.constant dense<0.000000e+00> : vector<64x128xf32>
    %176 = tpu.matmul %173, %175, %cst_140 {dimension_numbers = #tpu.dot_dimension_numbers<[1], [0], [0], [1], [0, 0, 1, 1], [], []>} : vector<64x128xbf16>, vector<128x128xbf16>, vector<64x128xf32> -> vector<64x128xf32>
    %177 = arith.addf %167, %176 : vector<64x128xf32>
    %c0_141 = arith.constant 0 : index
    %c0_142 = arith.constant 0 : index
    %c0_143 = arith.constant 0 : index
    %c0_144 = arith.constant 0 : index
    %178 = vector.load %arg4[%c0_141, %c0_142, %c0_143, %c0_144] : memref<1x1x82x128xbf16, #tpu.memory_space<vmem>>, vector<1x1x64x128xbf16>
    %179 = vector.shape_cast %178 : vector<1x1x64x128xbf16> to vector<64x128xbf16>
    %cst_145 = arith.constant 0.000000e+00 : bf16
    %180 = vector.broadcast %cst_145 : bf16 to vector<64x128xbf16>
    %181 = vector.shape_cast %18 : vector<64x1xi1> to vector<64x1xi1>
    %182 = vector.broadcast %181 : vector<64x1xi1> to vector<64x128xi1>
    %183 = arith.select %182, %179, %180 : vector<64x128xi1>, vector<64x128xbf16>
    %c18_146 = arith.constant 18 : index
    %c0_147 = arith.constant 0 : index
    %c0_148 = arith.constant 0 : index
    %184 = vector.load %arg5[%c18_146, %c0_147, %c0_148] : memref<27x128x128xbf16, #tpu.memory_space<vmem>>, vector<1x128x128xbf16>
    %185 = vector.shape_cast %184 : vector<1x128x128xbf16> to vector<128x128xbf16>
    %cst_149 = arith.constant dense<0.000000e+00> : vector<64x128xf32>
    %186 = tpu.matmul %183, %185, %cst_149 {dimension_numbers = #tpu.dot_dimension_numbers<[1], [0], [0], [1], [0, 0, 1, 1], [], []>} : vector<64x128xbf16>, vector<128x128xbf16>, vector<64x128xf32> -> vector<64x128xf32>
    %187 = arith.addf %177, %186 : vector<64x128xf32>
    %c0_150 = arith.constant 0 : index
    %c0_151 = arith.constant 0 : index
    %c1_152 = arith.constant 1 : index
    %c0_153 = arith.constant 0 : index
    %188 = vector.load %arg4[%c0_150, %c0_151, %c1_152, %c0_153] : memref<1x1x82x128xbf16, #tpu.memory_space<vmem>>, vector<1x1x64x128xbf16>
    %189 = vector.shape_cast %188 : vector<1x1x64x128xbf16> to vector<64x128xbf16>
    %c19 = arith.constant 19 : index
    %c0_154 = arith.constant 0 : index
    %c0_155 = arith.constant 0 : index
    %190 = vector.load %arg5[%c19, %c0_154, %c0_155] : memref<27x128x128xbf16, #tpu.memory_space<vmem>>, vector<1x128x128xbf16>
    %191 = vector.shape_cast %190 : vector<1x128x128xbf16> to vector<128x128xbf16>
    %cst_156 = arith.constant dense<0.000000e+00> : vector<64x128xf32>
    %192 = tpu.matmul %189, %191, %cst_156 {dimension_numbers = #tpu.dot_dimension_numbers<[1], [0], [0], [1], [0, 0, 1, 1], [], []>} : vector<64x128xbf16>, vector<128x128xbf16>, vector<64x128xf32> -> vector<64x128xf32>
    %193 = arith.addf %187, %192 : vector<64x128xf32>
    %c0_157 = arith.constant 0 : index
    %c0_158 = arith.constant 0 : index
    %c2_159 = arith.constant 2 : index
    %c0_160 = arith.constant 0 : index
    %194 = vector.load %arg4[%c0_157, %c0_158, %c2_159, %c0_160] : memref<1x1x82x128xbf16, #tpu.memory_space<vmem>>, vector<1x1x64x128xbf16>
    %195 = vector.shape_cast %194 : vector<1x1x64x128xbf16> to vector<64x128xbf16>
    %cst_161 = arith.constant 0.000000e+00 : bf16
    %196 = vector.broadcast %cst_161 : bf16 to vector<64x128xbf16>
    %197 = vector.shape_cast %20 : vector<64x1xi1> to vector<64x1xi1>
    %198 = vector.broadcast %197 : vector<64x1xi1> to vector<64x128xi1>
    %199 = arith.select %198, %195, %196 : vector<64x128xi1>, vector<64x128xbf16>
    %c20 = arith.constant 20 : index
    %c0_162 = arith.constant 0 : index
    %c0_163 = arith.constant 0 : index
    %200 = vector.load %arg5[%c20, %c0_162, %c0_163] : memref<27x128x128xbf16, #tpu.memory_space<vmem>>, vector<1x128x128xbf16>
    %201 = vector.shape_cast %200 : vector<1x128x128xbf16> to vector<128x128xbf16>
    %cst_164 = arith.constant dense<0.000000e+00> : vector<64x128xf32>
    %202 = tpu.matmul %199, %201, %cst_164 {dimension_numbers = #tpu.dot_dimension_numbers<[1], [0], [0], [1], [0, 0, 1, 1], [], []>} : vector<64x128xbf16>, vector<128x128xbf16>, vector<64x128xf32> -> vector<64x128xf32>
    %203 = arith.addf %193, %202 : vector<64x128xf32>
    %c0_165 = arith.constant 0 : index
    %c0_166 = arith.constant 0 : index
    %c8_167 = arith.constant 8 : index
    %c0_168 = arith.constant 0 : index
    %204 = vector.load %arg4[%c0_165, %c0_166, %c8_167, %c0_168] : memref<1x1x82x128xbf16, #tpu.memory_space<vmem>>, vector<1x1x64x128xbf16>
    %205 = vector.shape_cast %204 : vector<1x1x64x128xbf16> to vector<64x128xbf16>
    %cst_169 = arith.constant 0.000000e+00 : bf16
    %206 = vector.broadcast %cst_169 : bf16 to vector<64x128xbf16>
    %207 = vector.shape_cast %18 : vector<64x1xi1> to vector<64x1xi1>
    %208 = vector.broadcast %207 : vector<64x1xi1> to vector<64x128xi1>
    %209 = arith.select %208, %205, %206 : vector<64x128xi1>, vector<64x128xbf16>
    %c21 = arith.constant 21 : index
    %c0_170 = arith.constant 0 : index
    %c0_171 = arith.constant 0 : index
    %210 = vector.load %arg5[%c21, %c0_170, %c0_171] : memref<27x128x128xbf16, #tpu.memory_space<vmem>>, vector<1x128x128xbf16>
    %211 = vector.shape_cast %210 : vector<1x128x128xbf16> to vector<128x128xbf16>
    %cst_172 = arith.constant dense<0.000000e+00> : vector<64x128xf32>
    %212 = tpu.matmul %209, %211, %cst_172 {dimension_numbers = #tpu.dot_dimension_numbers<[1], [0], [0], [1], [0, 0, 1, 1], [], []>} : vector<64x128xbf16>, vector<128x128xbf16>, vector<64x128xf32> -> vector<64x128xf32>
    %213 = arith.addf %203, %212 : vector<64x128xf32>
    %c0_173 = arith.constant 0 : index
    %c0_174 = arith.constant 0 : index
    %c9_175 = arith.constant 9 : index
    %c0_176 = arith.constant 0 : index
    %214 = vector.load %arg4[%c0_173, %c0_174, %c9_175, %c0_176] : memref<1x1x82x128xbf16, #tpu.memory_space<vmem>>, vector<1x1x64x128xbf16>
    %215 = vector.shape_cast %214 : vector<1x1x64x128xbf16> to vector<64x128xbf16>
    %c22 = arith.constant 22 : index
    %c0_177 = arith.constant 0 : index
    %c0_178 = arith.constant 0 : index
    %216 = vector.load %arg5[%c22, %c0_177, %c0_178] : memref<27x128x128xbf16, #tpu.memory_space<vmem>>, vector<1x128x128xbf16>
    %217 = vector.shape_cast %216 : vector<1x128x128xbf16> to vector<128x128xbf16>
    %cst_179 = arith.constant dense<0.000000e+00> : vector<64x128xf32>
    %218 = tpu.matmul %215, %217, %cst_179 {dimension_numbers = #tpu.dot_dimension_numbers<[1], [0], [0], [1], [0, 0, 1, 1], [], []>} : vector<64x128xbf16>, vector<128x128xbf16>, vector<64x128xf32> -> vector<64x128xf32>
    %219 = arith.addf %213, %218 : vector<64x128xf32>
    %c0_180 = arith.constant 0 : index
    %c0_181 = arith.constant 0 : index
    %c10_182 = arith.constant 10 : index
    %c0_183 = arith.constant 0 : index
    %220 = vector.load %arg4[%c0_180, %c0_181, %c10_182, %c0_183] : memref<1x1x82x128xbf16, #tpu.memory_space<vmem>>, vector<1x1x64x128xbf16>
    %221 = vector.shape_cast %220 : vector<1x1x64x128xbf16> to vector<64x128xbf16>
    %cst_184 = arith.constant 0.000000e+00 : bf16
    %222 = vector.broadcast %cst_184 : bf16 to vector<64x128xbf16>
    %223 = vector.shape_cast %20 : vector<64x1xi1> to vector<64x1xi1>
    %224 = vector.broadcast %223 : vector<64x1xi1> to vector<64x128xi1>
    %225 = arith.select %224, %221, %222 : vector<64x128xi1>, vector<64x128xbf16>
    %c23 = arith.constant 23 : index
    %c0_185 = arith.constant 0 : index
    %c0_186 = arith.constant 0 : index
    %226 = vector.load %arg5[%c23, %c0_185, %c0_186] : memref<27x128x128xbf16, #tpu.memory_space<vmem>>, vector<1x128x128xbf16>
    %227 = vector.shape_cast %226 : vector<1x128x128xbf16> to vector<128x128xbf16>
    %cst_187 = arith.constant dense<0.000000e+00> : vector<64x128xf32>
    %228 = tpu.matmul %225, %227, %cst_187 {dimension_numbers = #tpu.dot_dimension_numbers<[1], [0], [0], [1], [0, 0, 1, 1], [], []>} : vector<64x128xbf16>, vector<128x128xbf16>, vector<64x128xf32> -> vector<64x128xf32>
    %229 = arith.addf %219, %228 : vector<64x128xf32>
    %c0_188 = arith.constant 0 : index
    %c0_189 = arith.constant 0 : index
    %c16_190 = arith.constant 16 : index
    %c0_191 = arith.constant 0 : index
    %230 = vector.load %arg4[%c0_188, %c0_189, %c16_190, %c0_191] : memref<1x1x82x128xbf16, #tpu.memory_space<vmem>>, vector<1x1x64x128xbf16>
    %231 = vector.shape_cast %230 : vector<1x1x64x128xbf16> to vector<64x128xbf16>
    %cst_192 = arith.constant 0.000000e+00 : bf16
    %232 = vector.broadcast %cst_192 : bf16 to vector<64x128xbf16>
    %233 = vector.shape_cast %18 : vector<64x1xi1> to vector<64x1xi1>
    %234 = vector.broadcast %233 : vector<64x1xi1> to vector<64x128xi1>
    %235 = arith.select %234, %231, %232 : vector<64x128xi1>, vector<64x128xbf16>
    %c24 = arith.constant 24 : index
    %c0_193 = arith.constant 0 : index
    %c0_194 = arith.constant 0 : index
    %236 = vector.load %arg5[%c24, %c0_193, %c0_194] : memref<27x128x128xbf16, #tpu.memory_space<vmem>>, vector<1x128x128xbf16>
    %237 = vector.shape_cast %236 : vector<1x128x128xbf16> to vector<128x128xbf16>
    %cst_195 = arith.constant dense<0.000000e+00> : vector<64x128xf32>
    %238 = tpu.matmul %235, %237, %cst_195 {dimension_numbers = #tpu.dot_dimension_numbers<[1], [0], [0], [1], [0, 0, 1, 1], [], []>} : vector<64x128xbf16>, vector<128x128xbf16>, vector<64x128xf32> -> vector<64x128xf32>
    %239 = arith.addf %229, %238 : vector<64x128xf32>
    %c0_196 = arith.constant 0 : index
    %c0_197 = arith.constant 0 : index
    %c17_198 = arith.constant 17 : index
    %c0_199 = arith.constant 0 : index
    %240 = vector.load %arg4[%c0_196, %c0_197, %c17_198, %c0_199] : memref<1x1x82x128xbf16, #tpu.memory_space<vmem>>, vector<1x1x64x128xbf16>
    %241 = vector.shape_cast %240 : vector<1x1x64x128xbf16> to vector<64x128xbf16>
    %c25 = arith.constant 25 : index
    %c0_200 = arith.constant 0 : index
    %c0_201 = arith.constant 0 : index
    %242 = vector.load %arg5[%c25, %c0_200, %c0_201] : memref<27x128x128xbf16, #tpu.memory_space<vmem>>, vector<1x128x128xbf16>
    %243 = vector.shape_cast %242 : vector<1x128x128xbf16> to vector<128x128xbf16>
    %cst_202 = arith.constant dense<0.000000e+00> : vector<64x128xf32>
    %244 = tpu.matmul %241, %243, %cst_202 {dimension_numbers = #tpu.dot_dimension_numbers<[1], [0], [0], [1], [0, 0, 1, 1], [], []>} : vector<64x128xbf16>, vector<128x128xbf16>, vector<64x128xf32> -> vector<64x128xf32>
    %245 = arith.addf %239, %244 : vector<64x128xf32>
    %c0_203 = arith.constant 0 : index
    %c0_204 = arith.constant 0 : index
    %c18_205 = arith.constant 18 : index
    %c0_206 = arith.constant 0 : index
    %246 = vector.load %arg4[%c0_203, %c0_204, %c18_205, %c0_206] : memref<1x1x82x128xbf16, #tpu.memory_space<vmem>>, vector<1x1x64x128xbf16>
    %247 = vector.shape_cast %246 : vector<1x1x64x128xbf16> to vector<64x128xbf16>
    %cst_207 = arith.constant 0.000000e+00 : bf16
    %248 = vector.broadcast %cst_207 : bf16 to vector<64x128xbf16>
    %249 = vector.shape_cast %20 : vector<64x1xi1> to vector<64x1xi1>
    %250 = vector.broadcast %249 : vector<64x1xi1> to vector<64x128xi1>
    %251 = arith.select %250, %247, %248 : vector<64x128xi1>, vector<64x128xbf16>
    %c26 = arith.constant 26 : index
    %c0_208 = arith.constant 0 : index
    %c0_209 = arith.constant 0 : index
    %252 = vector.load %arg5[%c26, %c0_208, %c0_209] : memref<27x128x128xbf16, #tpu.memory_space<vmem>>, vector<1x128x128xbf16>
    %253 = vector.shape_cast %252 : vector<1x128x128xbf16> to vector<128x128xbf16>
    %cst_210 = arith.constant dense<0.000000e+00> : vector<64x128xf32>
    %254 = tpu.matmul %251, %253, %cst_210 {dimension_numbers = #tpu.dot_dimension_numbers<[1], [0], [0], [1], [0, 0, 1, 1], [], []>} : vector<64x128xbf16>, vector<128x128xbf16>, vector<64x128xf32> -> vector<64x128xf32>
    %255 = arith.addf %245, %254 : vector<64x128xf32>
    %c0_211 = arith.constant 0 : index
    %c0_212 = arith.constant 0 : index
    %256 = vector.load %arg6[%c0_211, %c0_212] : memref<1x128xf32, #tpu.memory_space<vmem>>, vector<1x128xf32>
    %257 = vector.broadcast %256 : vector<1x128xf32> to vector<64x128xf32>
    %258 = arith.mulf %255, %257 : vector<64x128xf32>
    %c0_213 = arith.constant 0 : index
    %c0_214 = arith.constant 0 : index
    %259 = vector.load %arg7[%c0_213, %c0_214] : memref<1x128xf32, #tpu.memory_space<vmem>>, vector<1x128xf32>
    %260 = vector.broadcast %259 : vector<1x128xf32> to vector<64x128xf32>
    %261 = arith.addf %258, %260 : vector<64x128xf32>
    %c0_215 = arith.constant 0 : index
    %c0_216 = arith.constant 0 : index
    %c0_217 = arith.constant 0 : index
    %c0_218 = arith.constant 0 : index
    %262 = vector.load %arg8[%c0_215, %c0_216, %c0_217, %c0_218] : memref<1x1x64x128xf32, #tpu.memory_space<vmem>>, vector<1x1x64x128xf32>
    %263 = vector.shape_cast %262 : vector<1x1x64x128xf32> to vector<64x128xf32>
    %264 = vector.shape_cast %261 : vector<64x128xf32> to vector<1x1x64x128xf32>
    tpu.vector_store %arg8[%c0_215, %c0_216, %c0_217, %c0_218], %264 {strides = array<i32>} : memref<1x1x64x128xf32, #tpu.memory_space<vmem>>, vector<1x1x64x128xf32>,
    %cst_219 = arith.constant dense<0.000000e+00> : vector<128xf32>
    %265 = vector.multi_reduction <add>, %261, %cst_219 [0] : vector<64x128xf32> to vector<128xf32>
    %266 = vector.shape_cast %265 : vector<128xf32> to vector<1x128xf32>
    %cst_220 = arith.constant 6.400000e+01 : f32
    %267 = vector.broadcast %cst_220 : f32 to vector<1x128xf32>
    %268 = arith.divf %266, %267 : vector<1x128xf32>
    %c0_221 = arith.constant 0 : index
    %c0_222 = arith.constant 0 : index
    %c0_223 = arith.constant 0 : index
    %c0_224 = arith.constant 0 : index
    %269 = vector.load %arg9[%c0_221, %c0_222, %c0_223, %c0_224] : memref<1x1x1x128xf32, #tpu.memory_space<vmem>>, vector<1x1x1x128xf32>
    %270 = vector.shape_cast %269 : vector<1x1x1x128xf32> to vector<1x128xf32>
    %271 = vector.shape_cast %268 : vector<1x128xf32> to vector<1x1x1x128xf32>
    tpu.vector_store %arg9[%c0_221, %c0_222, %c0_223, %c0_224], %271 {strides = array<i32>} : memref<1x1x1x128xf32, #tpu.memory_space<vmem>>, vector<1x1x1x128xf32>,
    return
  }
  func.func @transform_0(%arg0: i32, %arg1: i32) -> (i32, i32, i32, i32) {
    %c0_i32 = arith.constant 0 : i32
    %0 = arith.addi %arg1, %c0_i32 : i32
    %c0_i32_0 = arith.constant 0 : i32
    %c0_i32_1 = arith.constant 0 : i32
    %c0_i32_2 = arith.constant 0 : i32
    return %arg0, %0, %c0_i32_0, %c0_i32_1 : i32, i32, i32, i32
  }
  func.func @transform_1(%arg0: i32, %arg1: i32) -> (i32, i32, i32, i32) {
    %c1_i32 = arith.constant 1 : i32
    %0 = arith.addi %arg1, %c1_i32 : i32
    %c0_i32 = arith.constant 0 : i32
    %c0_i32_0 = arith.constant 0 : i32
    %c0_i32_1 = arith.constant 0 : i32
    return %arg0, %0, %c0_i32, %c0_i32_0 : i32, i32, i32, i32
  }
  func.func @transform_2(%arg0: i32, %arg1: i32) -> (i32, i32, i32, i32) {
    %c2_i32 = arith.constant 2 : i32
    %0 = arith.addi %arg1, %c2_i32 : i32
    %c0_i32 = arith.constant 0 : i32
    %c0_i32_0 = arith.constant 0 : i32
    %c0_i32_1 = arith.constant 0 : i32
    return %arg0, %0, %c0_i32, %c0_i32_0 : i32, i32, i32, i32
  }
  func.func @transform_3(%arg0: i32, %arg1: i32) -> (i32, i32, i32) {
    %c0_i32 = arith.constant 0 : i32
    %c0_i32_0 = arith.constant 0 : i32
    %c0_i32_1 = arith.constant 0 : i32
    %c0_i32_2 = arith.constant 0 : i32
    return %c0_i32, %c0_i32_0, %c0_i32_1 : i32, i32, i32
  }
  func.func @transform_4(%arg0: i32, %arg1: i32) -> (i32, i32) {
    %c0_i32 = arith.constant 0 : i32
    %c0_i32_0 = arith.constant 0 : i32
    %c0_i32_1 = arith.constant 0 : i32
    return %c0_i32, %c0_i32_0 : i32, i32
  }
  func.func @transform_5(%arg0: i32, %arg1: i32) -> (i32, i32) {
    %c0_i32 = arith.constant 0 : i32
    %c0_i32_0 = arith.constant 0 : i32
    %c0_i32_1 = arith.constant 0 : i32
    return %c0_i32, %c0_i32_0 : i32, i32
  }
  func.func @transform_6(%arg0: i32, %arg1: i32) -> (i32, i32, i32, i32) {
    %c0_i32 = arith.constant 0 : i32
    %c0_i32_0 = arith.constant 0 : i32
    %c0_i32_1 = arith.constant 0 : i32
    return %arg0, %arg1, %c0_i32, %c0_i32_0 : i32, i32, i32, i32
  }
  func.func @transform_7(%arg0: i32, %arg1: i32) -> (i32, i32, i32, i32) {
    %c0_i32 = arith.constant 0 : i32
    %c0_i32_0 = arith.constant 0 : i32
    %c0_i32_1 = arith.constant 0 : i32
    return %arg0, %arg1, %c0_i32, %c0_i32_0 : i32, i32, i32, i32
  }
}

module attributes {stable_mosaic.version = 11 : i64} {
  func.func @_gate_add_relu_kernel(%arg0: i32, %arg1: i32, %arg2: memref<1x1x64x128xf32, #tpu.memory_space<vmem>>, %arg3: memref<1x1x1x128xf32, #tpu.memory_space<vmem>>, %arg4: memref<1x1x64x128xf32, #tpu.memory_space<vmem>>, %arg5: memref<1x1x64x128xf32, #tpu.memory_space<vmem>>) attributes {dimension_semantics = [#tpu.dimension_semantics<parallel>, #tpu.dimension_semantics<parallel>], iteration_bounds = array<i64: 2, 8>, scalar_prefetch = 0 : i64, scratch_operands = 0 : i64, tpu.core_type = #tpu.core_type<tc>, window_params = [{transform_indices = @transform_0, window_bounds = array<i64: 1, 1, 64, 128>}, {transform_indices = @transform_1, window_bounds = array<i64: 1, 1, 1, 128>}, {transform_indices = @transform_2, window_bounds = array<i64: 1, 1, 64, 128>}, {transform_indices = @transform_3, window_bounds = array<i64: 1, 1, 64, 128>}]} {
    %c0 = arith.constant 0 : index
    %c0_0 = arith.constant 0 : index
    %c0_1 = arith.constant 0 : index
    %c0_2 = arith.constant 0 : index
    %0 = vector.load %arg2[%c0, %c0_0, %c0_1, %c0_2] : memref<1x1x64x128xf32, #tpu.memory_space<vmem>>, vector<1x1x64x128xf32>
    %1 = vector.shape_cast %0 : vector<1x1x64x128xf32> to vector<64x128xf32>
    %c0_3 = arith.constant 0 : index
    %c0_4 = arith.constant 0 : index
    %c0_5 = arith.constant 0 : index
    %c0_6 = arith.constant 0 : index
    %2 = vector.load %arg3[%c0_3, %c0_4, %c0_5, %c0_6] : memref<1x1x1x128xf32, #tpu.memory_space<vmem>>, vector<1x1x1x128xf32>
    %3 = vector.shape_cast %2 : vector<1x1x1x128xf32> to vector<1x128xf32>
    %4 = vector.broadcast %3 : vector<1x128xf32> to vector<64x128xf32>
    %5 = arith.mulf %1, %4 : vector<64x128xf32>
    %c0_7 = arith.constant 0 : index
    %c0_8 = arith.constant 0 : index
    %c0_9 = arith.constant 0 : index
    %c0_10 = arith.constant 0 : index
    %6 = vector.load %arg4[%c0_7, %c0_8, %c0_9, %c0_10] : memref<1x1x64x128xf32, #tpu.memory_space<vmem>>, vector<1x1x64x128xf32>
    %7 = vector.shape_cast %6 : vector<1x1x64x128xf32> to vector<64x128xf32>
    %8 = arith.addf %5, %7 : vector<64x128xf32>
    %cst = arith.constant 0.000000e+00 : f32
    %9 = vector.broadcast %cst : f32 to vector<64x128xf32>
    %10 = arith.maximumf %8, %9 : vector<64x128xf32>
    %c0_11 = arith.constant 0 : index
    %c0_12 = arith.constant 0 : index
    %c0_13 = arith.constant 0 : index
    %c0_14 = arith.constant 0 : index
    %11 = vector.load %arg5[%c0_11, %c0_12, %c0_13, %c0_14] : memref<1x1x64x128xf32, #tpu.memory_space<vmem>>, vector<1x1x64x128xf32>
    %12 = vector.shape_cast %11 : vector<1x1x64x128xf32> to vector<64x128xf32>
    %13 = vector.shape_cast %10 : vector<64x128xf32> to vector<1x1x64x128xf32>
    tpu.vector_store %arg5[%c0_11, %c0_12, %c0_13, %c0_14], %13 {strides = array<i32>} : memref<1x1x64x128xf32, #tpu.memory_space<vmem>>, vector<1x1x64x128xf32>,
    return
  }
  func.func @transform_0(%arg0: i32, %arg1: i32) -> (i32, i32, i32, i32) {
    %c0_i32 = arith.constant 0 : i32
    %c0_i32_0 = arith.constant 0 : i32
    %c0_i32_1 = arith.constant 0 : i32
    return %arg0, %arg1, %c0_i32, %c0_i32_0 : i32, i32, i32, i32
  }
  func.func @transform_1(%arg0: i32, %arg1: i32) -> (i32, i32, i32, i32) {
    %c0_i32 = arith.constant 0 : i32
    %c0_i32_0 = arith.constant 0 : i32
    %c0_i32_1 = arith.constant 0 : i32
    return %arg0, %arg1, %c0_i32, %c0_i32_0 : i32, i32, i32, i32
  }
  func.func @transform_2(%arg0: i32, %arg1: i32) -> (i32, i32, i32, i32) {
    %c0_i32 = arith.constant 0 : i32
    %c0_i32_0 = arith.constant 0 : i32
    %c0_i32_1 = arith.constant 0 : i32
    return %arg0, %arg1, %c0_i32, %c0_i32_0 : i32, i32, i32, i32
  }
  func.func @transform_3(%arg0: i32, %arg1: i32) -> (i32, i32, i32, i32) {
    %c0_i32 = arith.constant 0 : i32
    %c0_i32_0 = arith.constant 0 : i32
    %c0_i32_1 = arith.constant 0 : i32
    return %arg0, %arg1, %c0_i32, %c0_i32_0 : i32, i32, i32, i32
  }
}

</mosaic_0001>

<bundles_post_ra>
// kernel: da_basic_block.5
= control target key start
LH: loop header
LB: loop body
LE: loop exit
PB: predicated region body
PF: predicated region fallthrough
CT: control target
= control target key end

     0   :  { %s573_s12 = smov 0   ;;  %s575_s13 = smov 0   ;;  %s630_s0 = inlined_call_operand.vmem [shape: f32[2,8,64,128], index: 0, kind: input, shape index: {}, may-alias: {0,3}]   ;;  %s631_s1 = inlined_call_operand.vmem [shape: f32[2,8,1,128], index: 1, kind: input, shape index: {}]   ;;  %s632_s2 = inlined_call_operand.vmem [shape: f32[2,8,64,128], index: 2, kind: input, shape index: {}]   ;;  %s633_s3 = inlined_call_operand.vmem [shape: f32[2,8,64,128], index: 3, kind: output, shape index: {}, may-alias: {0,3}]  }
   0x1   :  { %s577_s14 = smov 0   ;;  %s579_s15 = smov 0  }
   0x2   :  { %s581_s16 = smov 0  }
   0x3 LB: > { %s22_s17 = sadd.s32 1, %s543_s14  ;;  %s25_s18 = sadd.s32 1, %s547_s15  ;;  %s551_s16 = sphi %s581_s16, %s13_s16   ;;  %s547_s15 = sphi %s579_s15, %s637_s15   ;;  %s543_s14 = sphi %s577_s14, %s636_s14   ;;  %s539_s13 = sphi %s575_s13, %s635_s13   ;;  %s535_s12 = sphi %s573_s12, %s634_s12  }
   0x4   : > { %p23_p0 = scmp.ge.s32.totalorder %s22_s17, 8  ;;  %p459_p1 = scmp.ge.s32.totalorder %s551_s16, 1 }
   0x5   : > { %p187_p2 = scmp.lt.s32.totalorder %s551_s16, 17 }
   0x6   : > { %s639_s17 = smov (%p23_p0, %s22_s17), 0  ;;  %s641_s18 = smov (!%p23_p0, %s25_s18), %s547_s15 }
   0x7   : > { %p188_p3 = pnand %p459_p1, %p187_p2  ;;  %p27_p4 = scmp.ge.s32.totalorder %s641_s18, 2 }
   0x8   : > { %p235_p5 = scmp.lt.s32.totalorder (!%p188_p3), %s539_s13, 1  ;;  %p237_p6 = scmp.lt.s32.totalorder (!%p188_p3), %s535_s12, 7 }
   0x9   : > { %s643_s18 = smov (%p27_p4, %s641_s18), 0  ;;  %191 = sbr.rel (%p188_p3) target bundleno = 34 (0x22), region = 32 }
  0x10   : > { %s645_s13 = smov (!%p235_p5, %s539_s13), 1  ;;  %s647_s12 = smov (!%p237_p6, %s535_s12), 7 }
  0x11   : > { %s461_s19 = sshll.u32 %s645_s13, 6  ;;  %s463_s20 = sshll.u32 %s645_s13, 3 }
  0x12   : > { %s460_s21 = sshll.u32 %s647_s12, 3  ;;  %s249_s22 = sadd.s32 %s463_s20, %s647_s12 }
  0x13   : > { %s241_s23 = sadd.s32 %s461_s19, %s460_s21  ;;  %s250_s26 = scalar_lea.vmem %s631_s1, %s249_s22 }
  0x14   : > { %s462_s27 = sshll.u32 %s241_s23, 3  ;;  %v470_v0 = vld [vmem:[%s250_s26] ss:$0 sm:$0xff] }
  0x15   : > { %s243_s30 = scalar_lea.vmem %s630_s0, %s462_s27  ;;  %s259_s6 = scalar_lea.vmem %s632_s2, %s462_s27 }
  0x16   : > { %v269_v1 = vld [vmem:[%s243_s30] sm:$0xff]  ;;  %v270_v2 = vld [vmem:[%s243_s30 + $0x8] sm:$0xff]  ;;  %v271_v3 = vld [vmem:[%s243_s30 + $0x10] sm:$0xff]  ;;  %s268_s9 = scalar_lea.vmem %s633_s3, %s462_s27 }
  0x17   : > { %v272_v4 = vld [vmem:[%s243_s30 + $0x18] sm:$0xff]  ;;  %v273_v5 = vld [vmem:[%s243_s30 + $0x20] sm:$0xff]  ;;  %v274_v6 = vld [vmem:[%s243_s30 + $0x28] sm:$0xff]  ;;  %v284_v7 = vmul.f32 %v470_v0, %v269_v1  ;;  %v285_v8 = vmul.f32 %v470_v0, %v270_v2  ;;  %v286_v9 = vmul.f32 %v470_v0, %v271_v3 }
  0x18   : > { %v275_v10 = vld [vmem:[%s243_s30 + $0x30] sm:$0xff]  ;;  %v276_v11 = vld [vmem:[%s243_s30 + $0x38] sm:$0xff]  ;;  %v287_v12 = vmul.f32 %v470_v0, %v272_v4  ;;  %v288_v13 = vmul.f32 %v470_v0, %v273_v5  ;;  %v289_v14 = vmul.f32 %v470_v0, %v274_v6  ;;  %v292_v15 = vld [vmem:[%s259_s6] sm:$0xff] }
  0x19   : > { %v290_v16 = vmul.f32 %v470_v0, %v275_v10  ;;  %v291_v17 = vmul.f32 %v470_v0, %v276_v11  ;;  %v293_v18 = vld [vmem:[%s259_s6 + $0x8] sm:$0xff]  ;;  %v294_v19 = vld [vmem:[%s259_s6 + $0x10] sm:$0xff]  ;;  %v295_v20 = vld [vmem:[%s259_s6 + $0x18] sm:$0xff]  ;;  %v300_v21 = vadd.f32 %v292_v15, %v284_v7 }
  0x1a   : > { %v296_v22 = vld [vmem:[%s259_s6 + $0x20] sm:$0xff]  ;;  %v297_v23 = vld [vmem:[%s259_s6 + $0x28] sm:$0xff]  ;;  %v298_v24 = vld [vmem:[%s259_s6 + $0x30] sm:$0xff]  ;;  %v301_v25 = vadd.f32 %v293_v18, %v285_v8  ;;  %v302_v26 = vadd.f32 %v294_v19, %v286_v9  ;;  %v303_v27 = vadd.f32 %v295_v20, %v287_v12 }
  0x1b   : > { %v299_v28 = vld [vmem:[%s259_s6 + $0x38] sm:$0xff]  ;;  %v304_v29 = vadd.f32 %v296_v22, %v288_v13  ;;  %v305_v30 = vadd.f32 %v297_v23, %v289_v14  ;;  %v306_v31 = vadd.f32 %v298_v24, %v290_v16  ;;  %v308_v32 = vmax.f32 %v300_v21, 0.0 }
  0x1c   : > { %v307_v33 = vadd.f32 %v299_v28, %v291_v17  ;;  %v309_v34 = vmax.f32 %v301_v25, 0.0  ;;  %v310_v35 = vmax.f32 %v302_v26, 0.0  ;;  %v311_v36 = vmax.f32 %v303_v27, 0.0 }
  0x1d   : > { %v312_v37 = vmax.f32 %v304_v29, 0.0  ;;  %v313_v38 = vmax.f32 %v305_v30, 0.0  ;;  %v314_v39 = vmax.f32 %v306_v31, 0.0  ;;  %316 = vst [vmem:[%s268_s9] sm:$0xff] %v308_v32 }
  0x1e   : > { %v315_v40 = vmax.f32 %v307_v33, 0.0  ;;  %317 = vst [vmem:[%s268_s9 + $0x8] sm:$0xff] %v309_v34  ;;  %318 = vst [vmem:[%s268_s9 + $0x10] sm:$0xff] %v310_v35 }
  0x1f   : > { %319 = vst [vmem:[%s268_s9 + $0x18] sm:$0xff] %v311_v36  ;;  %320 = vst [vmem:[%s268_s9 + $0x20] sm:$0xff] %v312_v37 }
  0x20   : > { %321 = vst [vmem:[%s268_s9 + $0x28] sm:$0xff] %v313_v38  ;;  %322 = vst [vmem:[%s268_s9 + $0x30] sm:$0xff] %v314_v39 }
  0x21   : > { %323 = vst [vmem:[%s268_s9 + $0x38] sm:$0xff] %v315_v40 }
  0x22 PF: > { %s13_s16 = sadd.s32 1, %s551_s16   ;;  %s634_s12 = smov %s543_s14 }
  0x23   : > { %p10_p7 = scmp.ge.s32.totalorder %s13_s16, 18   ;;  %s635_s13 = smov %s547_s15 }
  0x24   : > { %s636_s14 = smov %s639_s17  ;;  %s637_s15 = smov %s643_s18 }
  0x25   :  { %12 = sbr.rel (!%p10_p7) target bundleno = 3 (0x3), region = 68 }

// kernel: da_basic_block.3
= control target key start
LH: loop header
LB: loop body
LE: loop exit
PB: predicated region body
PF: predicated region fallthrough
CT: control target
= control target key end

     0   :  { %s5608_s21 = smov 0   ;;  %s5610_s22 = smov 0   ;;  %s7131_s0 = inlined_call_operand.vmem [shape: bf16[2,10,82,4], index: 0, kind: input, shape index: {}, may-alias: {0,1,2}]   ;;  %s7132_s1 = inlined_call_operand.vmem [shape: bf16[2,10,82,4], index: 1, kind: input, shape index: {}, may-alias: {0,1,2}]   ;;  %s7133_s2 = inlined_call_operand.vmem [shape: bf16[2,10,82,4], index: 2, kind: input, shape index: {}, may-alias: {0,1,2}]   ;;  %s7134_s3 = inlined_call_operand.vmem [shape: bf16[27,4,128], index: 3, kind: input, shape index: {}]   ;;  %s7135_s4 = inlined_call_operand.vmem [shape: f32[1,128], index: 4, kind: input, shape index: {}]   ;;  %s7136_s5 = inlined_call_operand.vmem [shape: f32[1,128], index: 5, kind: input, shape index: {}]   ;;  %s7137_s6 = inlined_call_operand.vmem [shape: bf16[2,8,64,128], index: 6, kind: output, shape index: {}]  }
   0x1   :  { %s5612_s23 = smov 0   ;;  %s5614_s24 = smov 0  }
   0x2   :  { %s5616_s25 = smov 0  }
   0x3 LB: > { %s25_s26 = sadd.s32 1, %s5562_s23  ;;  %s28_s27 = sadd.s32 1, %s5566_s24  ;;  %s5570_s25 = sphi %s5616_s25, %s16_s25   ;;  %s5566_s24 = sphi %s5614_s24, %s7450_s24   ;;  %s5562_s23 = sphi %s5612_s23, %s7449_s23   ;;  %s5558_s22 = sphi %s5610_s22, %s7448_s22   ;;  %s5554_s21 = sphi %s5608_s21, %s7447_s21  }
   0x4   : > { %p26_p0 = scmp.ge.s32.totalorder %s25_s26, 8  ;;  %p4485_p1 = scmp.ge.s32.totalorder %s5570_s25, 1 }
   0x5   : > { %p272_p2 = scmp.lt.s32.totalorder %s5570_s25, 17 }
   0x6   : > { %s7452_s26 = smov (%p26_p0, %s25_s26), 0  ;;  %s7454_s27 = smov (!%p26_p0, %s28_s27), %s5566_s24 }
   0x7   : > { %p273_p3 = pnand %p4485_p1, %p272_p2  ;;  %p30_p4 = scmp.ge.s32.totalorder %s7454_s27, 2 }
   0x9   : > { %s7456_s27 = smov (%p30_p4, %s7454_s27), 0  ;;  %276 = sbr.rel (%p273_p3) target bundleno = 487 (0x1e7), region = 44 }
  0x10   : > { %v4492_v0 = vld [vmem:[%s7134_s3 + $0x2] sm:$0x3]  ;;  %vm7145_vm0 = vcmask 1041408   ;;  %v4616_v1 = vld [vmem:[%s7134_s3 + $0x1a] sm:$0x3]  ;;  %p330_p5 = scmp.lt.s32.totalorder %s5558_s22, 1  ;;  %v373_v2 = vlaneseq }
  0x11   : > { %5410 = vmatprep.subr.msk.bf16.mxu1 %vm7145_vm0, %v4492_v0  ;;  %5423 = vmatprep.subr.msk.bf16.mxu0 %vm7145_vm0, %v4616_v1  ;;  %v613_v3 = vsel %vm7145_vm0, %v4492_v0, 0  ;;  %v5650_v4 = vsel %vm7145_vm0, %v4616_v1, 0  ;;  %p332_p6 = scmp.lt.s32.totalorder %s5554_s21, 9  ;;  %s339_s8 = sadd.s32 1, %s5554_s21  ;;  %v534_v6 = vld [vmem:[%s7134_s3] sm:$0x3] }
  0x12   : > { %7165 = vst [vmem:[#allocation2_spill] sm:$0xff] %v5650_v4  ;;  %4931 = vmatpush3.bf16.msra.mxu1 %v613_v3  ;;  %5061 = vmatpush3.bf16.msra.mxu0 %v5650_v4  ;;  %s7458_s22 = smov (!%p330_p5, %s5558_s22), 1  ;;  %v5657_v5 = vshrl.u32 %v373_v2, 7  ;;  %v4626_v7 = vld [vmem:[%s7134_s3 + $0x1c] sm:$0x3]  ;;  %p342_p7 = scmp.lt.s32.totalorder %s339_s8, 9 }
  0x13   : > { %s333_s11 = scalar_select %p332_p6, %s5554_s21, 9  ;;  %5411 = vmatprep.subr.msk.bf16.mxu1 %vm7145_vm0, %v534_v6  ;;  %5425 = vmatprep.subr.msk.bf16.mxu0 %vm7145_vm0, %v4626_v7  ;;  %vm7138_vm2 = vsmask.f32 7424  ;;  %v5684_v16 = vsel %vm7145_vm0, %v534_v6, 0  ;;  %v5687_v17 = vsel %vm7145_vm0, %v4626_v7, 0  ;;  %vm7149_vm5 = vcmask 31744  }
  0x14   : > { %s5668_s14 = smul.u32 110, %s7458_s22  ;;  %v376_v8 = vadd.s32 16, %v5657_v5  ;;  %v377_v9 = vadd.s32 24, %v5657_v5  ;;  %v5674_v10 = vadd.s32 8, %v5657_v5  ;;  %v386_v11 = vand.u32 7, %v5657_v5  ;;  %s7460_s8 = smov (!%p342_p7, %s339_s8), 9 }
  0x15   : > { %s5438_s15 = smul.u32 11, %s333_s11  ;;  %v5690_v18 = vadd.s32 32, %v5657_v5  ;;  %v5715_v22 = vadd.s32 40, %v5657_v5  ;;  %v5572_v33 = vmov 0   ;;  %vm813_vm10 = vcmask 1040384   ;;  %s350_s7 = sadd.s32 2, %s5554_s21 }
  0x16   : > { %v393_v12 = vand.u32 7, %v5674_v10  ;;  %v400_v13 = vand.u32 7, %v376_v8  ;;  %v407_v14 = vand.u32 7, %v377_v9  ;;  %vm5679_vm1 = vcmp.le.s32.totalorder %v386_v11, 6  ;;  %s5440_s18 = smul.u32 11, %s7460_s8  ;;  %p6258_p8 = scmp.lt.s32.totalorder %s350_s7, 9 }
  0x17   : > { %s336_s16 = sadd.s32 %s5668_s14, %s5438_s15  ;;  %vm797_vm7 = vmpackc.low %vm5679_vm1, %vm5679_vm1  ;;  %v414_v35 = vand.u32 7, %v5690_v18  ;;  %v421_v40 = vand.u32 7, %v5715_v22  ;;  %vm814_vm11 = vcmask 1044484   ;;  %vm5794_vm13 = vcmp.ge.s32.totalorder %v386_v11, 1  ;;  %v5836_v19 = vld [vmem:[%s7134_s3 + $0x4] sm:$0x3] }
  0x18   : > { %s4486_s17 = sshll.u32 %s336_s16, 2  ;;  %vm5697_vm3 = vcmp.ge.s32.totalorder %v400_v13, 1  ;;  %vm5701_vm4 = vcmp.ge.s32.totalorder %v407_v14, 1  ;;  %vm5707_vm6 = vcmp.le.s32.totalorder %v393_v12, 6  ;;  %s346_s29 = sadd.s32 %s5440_s18, %s5668_s14  ;;  %vm5735_vm8 = vcmp.le.s32.totalorder %v400_v13, 6 }
  0x19   : > { %s5695_s28 = scalar_lea.vmem %s7131_s0, %s4486_s17  ;;  %s4487_s30 = sshll.u32 %s346_s29, 2  ;;  %vm5749_vm9 = vcmp.le.s32.totalorder %v407_v14, 6  ;;  %v5759_v34 = vsel %vm797_vm7, 65537, %v5572_v33  ;;  %vm5782_vm12 = vmpackc.low %vm5697_vm3, %vm5697_vm3 }
  0x1a   : > { %v5719_v23 = vld [vmem:[%s5695_s28] sm:$0xf]  ;;  %v5722_v24 = vld [vmem:[%s5695_s28 + $0x4] sm:$0xf]  ;;  %v5725_v25 = vld [vmem:[%s5695_s28 + $0x8] sm:$0xf]  ;;  %s5742_s9 = scalar_lea.vmem %s7132_s1, %s4487_s30 }
  0x1b   : > { %v5728_v26 = vld [vmem:[%s5695_s28 + $0xc] sm:$0xf]  ;;  %v4493_v27 = vcombine.low %v5719_v23, %v5722_v24  ;;  %v5733_v28 = vld [vmem:[%s5695_s28 + $0x10] sm:$0xf]  ;;  %v5747_v31 = vld [vmem:[%s5695_s28 + $0x14] sm:$0xf] }
  0x1c   : > { %v4494_v30 = vcombine.low %v5725_v25, %v5728_v26  ;;  %v4495_v38 = vcombine.low %v5733_v28, %v5747_v31  ;;  %v2333_v39 = vld [vmem:[%s5742_s9 + $0x4] sm:$0xf]  ;;  %v5767_v43 = vld [vmem:[%s5742_s9 + $0x8] sm:$0xf]  ;;  %v5770_v44 = vld [vmem:[%s5742_s9 + $0xc] sm:$0xf] }
  0x1d   : > { %v563_v36 = vshrl.u32 %v4493_v27, 16  ;;  %v565_v37 = vshll.u32 %v4493_v27, 16  ;;  %v5773_v47 = vld [vmem:[%s5742_s9 + $0x10] sm:$0xf]  ;;  %v4617_v48 = vcombine.low %v2333_v39, %v5767_v43  ;;  %v5777_v49 = vld [vmem:[%s5695_s28 + $0x18] sm:$0xf]  ;;  %vm5801_vm14 = vmpackc.low %vm5701_vm4, %vm5701_vm4 }
  0x1e   : > { %v570_v41 = vshll.u32 %v4494_v30, 16  ;;  %v574_v42 = vshrl.u32 %v4494_v30, 16  ;;  %v578_v46 = vshll.u32 %v4495_v38, 16  ;;  %v4618_v52 = vcombine.low %v5770_v44, %v5773_v47  ;;  %v5789_v53 = vld [vmem:[%s5742_s9 + $0x14] sm:$0xf]  ;;  %vm798_vm15 = vmpackc.low %vm5707_vm6, %vm5707_vm6  ;;  %s7462_s7 = smov (!%p6258_p8, %s350_s7), 9 }
  0x1f   : > { %v567_v45 = vrot.slane %v565_v37, 1  ;;  %v5792_v54 = vld [vmem:[%s5742_s9 + $0x18] sm:$0xf]  ;;  %v582_v55 = vshrl.u32 %v4495_v38, 16  ;;  %v2368_v60 = vshrl.u32 %v4617_v48, 16  ;;  %v2370_v61 = vshll.u32 %v4617_v48, 16  ;;  %vm799_vm1 = vmpackc.low %vm5735_vm8, %vm5735_vm8 }
  0x20   : > { %v572_v51 = vrot.slane %v570_v41, 1  ;;  %v580_v59 = vrot.slane %v578_v46, 1  ;;  %v5806_v62 = vld [vmem:[%s5695_s28 + $0x1c] sm:$0xf]  ;;  %v2375_v0 = vshll.u32 %v4618_v52, 16  ;;  %v2379_v1 = vshrl.u32 %v4618_v52, 16  ;;  %vm800_vm3 = vmpackc.low %vm5749_vm9, %vm5749_vm9 }
  0x21   : > { %v568_v58 = vor.u32 %v567_v45, %v563_v36  ;;  %v5810_v2 = vcombine.low %v5789_v53, %v5792_v54  ;;  %v5813_v3 = vld [vmem:[%s5695_s28 + $0x20] sm:$0x1]  ;;  %v528_v6 = vsel %vm5782_vm12, %v5725_v25, 0  ;;  %v2372_v8 = vrot.slane %v2370_v61, 1  ;;  %v5863_v46 = vld [vmem:[%s7134_s3 + $0x1e] sm:$0x3]  ;;  %vm5877_vm4 = vmor %vm813_vm10, %vm814_vm11 }
  0x22   : > { %v576_v63 = vor.u32 %v574_v42, %v572_v51  ;;  %v4496_v9 = vcombine.low %v5777_v49, %v5806_v62  ;;  %v529_v11 = vsel %vm5801_vm14, %v5728_v26, 0  ;;  %v2377_v14 = vrot.slane %v2375_v0, 1  ;;  %v2491_v52 = vld [vmem:[%s5742_s9 + $0x4] sm:$0xe]  ;;  %vm5897_vm9 = vmpackc.low %vm5794_vm13, %vm5794_vm13  ;;  %s5441_s15 = smul.u32 11, %s7462_s7  ;;  %p363_p9 = scmp.lt.s32.totalorder %s5554_s21, 7 }
  0x23   : > { %7184 = vst [vmem:[#allocation3_spill] sm:$0xff] %v5810_v2  ;;  %v573_v7 = vsel %vm7138_vm2, %v568_v58, %v572_v51  ;;  %v2383_v15 = vshll.u32 %v5810_v2, 16  ;;  %v2373_v20 = vor.u32 %v2372_v8, %v2368_v60  ;;  %v584_v27 = vor.u32 %v582_v55, %v580_v59  ;;  %s4490_s7 = sshll.u32 %s7458_s22, 6 }
  0x24   : > { %4932 = vmatprep.mubr.msk.bf16.mxu1 %vm7149_vm5, %v573_v7  ;;  %v581_v13 = vsel %vm7138_vm2, %v576_v63, %v580_v59  ;;  %v586_v30 = vshll.u32 %v4496_v9, 16  ;;  %v4497_v36 = vcombine.low %v5813_v3, %v5813_v3  ;;  %v2381_v37 = vor.u32 %v2379_v1, %v2377_v14  ;;  %s357_s16 = sadd.s32 %s5441_s15, %s5668_s14  ;;  %s7464_s21 = smov (!%p363_p9, %s5554_s21), 7 }
  0x25   : > { %4933 = vmatmul.mubr.msk.bf16.vlgmr.msra.gmra.mrb[0].mxu1 %vm7149_vm5, %v581_v13  ;;  %v5845_v38 = vrot.slane %v2383_v15, 1  ;;  %v590_v39 = vshrl.u32 %v4496_v9, 16  ;;  %v806_v41 = vsel %vm798_vm15, 65537, %v5572_v33  ;;  %v2378_v42 = vsel %vm7138_vm2, %v2373_v20, %v2377_v14  ;;  %s4488_s17 = sshll.u32 %s357_s16, 2  ;;  %s4489_s30 = sshll.u32 %s7464_s21, 3 }
  0x26   : > { %4941 = vmatpush3.bf16.msra.mxu1 %v5684_v16  ;;  %v588_v45 = vrot.slane %v586_v30, 1  ;;  %v594_v32 = vshll.u32 %v4497_v36, 16  ;;  %v807_v16 = vsel %vm799_vm1, 65537, %v5572_v33  ;;  %5062 = vmatprep.mubr.msk.bf16.mxu0 %vm7149_vm5, %v2378_v42  ;;  %v808_v48 = vsel %vm800_vm3, 65537, %v5572_v33  ;;  %s6362_s29 = scalar_lea.vmem %s7133_s2, %s4488_s17  ;;  %s367_s11 = sadd.s32 %s4490_s7, %s4489_s30 }
  0x27   : > { %7185 = vst [vmem:[#allocation4_spill] sm:$0xff] %v5845_v38  ;;  %5412 = vmatprep.subr.msk.bf16.mxu1 %vm7145_vm0, %v5836_v19  ;;  %v2386_v21 = vsel %vm7138_vm2, %v2381_v37, %v5845_v38  ;;  %v816_v51 = vrot.slane %v5759_v34, 7  ;;  %v818_v29 = vrot.slane %v806_v41, 7  ;;  %v821_v61 = vrot.slane %v807_v16, 7  ;;  %s4491_s12 = sshll.u32 %s367_s11, 2 }
  0x28   : > { %5063 = vmatmul.mubr.msk.bf16.vlgmr.msra.gmra.mrb[0].mxu0 %vm7149_vm5, %v2386_v21  ;;  %v589_v55 = vsel %vm7138_vm2, %v584_v27, %v588_v45  ;;  %v592_v58 = vor.u32 %v590_v39, %v588_v45  ;;  %v596_v59 = vrot.slane %v594_v32, 1  ;;  %vm7147_vm6 = vcmask 1046528   ;;  %s369_s13 = scalar_lea.vmem %s7137_s6, %s4491_s12 }
  0x29   : > { %5071 = vmatpush3.bf16.msra.mxu0 %v5687_v17  ;;  %4936 = vmatprep.mubr.msk.bf16.mxu1 %vm7149_vm5, %v589_v55  ;;  %v817_v34 = vrot.slane %v816_v51, 4  ;;  %v820_v63 = vrot.slane %v818_v29, 4  ;;  %v824_v0 = vrot.slane %v808_v48, 7  ;;  %vm5883_vm7 = vcmp.ne.s16.totalorder %v816_v51, 0 }
  0x2a   : > { %v7188_v1 = vmov 0  ;;  %v597_v7 = vsel %vm7138_vm2, %v592_v58, %v596_v59  ;;  %v823_v8 = vrot.slane %v821_v61, 4  ;;  %v2492_v9 = vsel %vm5883_vm7, %v2491_v52, 0  ;;  %5426 = vmatprep.subr.msk.bf16.mxu0 %vm7145_vm0, %v5863_v46 }
  0x2b   : > { %v7189_v1 = vsel %vm5883_vm7, 4294967295, %v7188_v1  ;;  %vm490_vm8 = vcmp.le.s32.totalorder %v414_v35, 6  ;;  %v5903_v13 = vsel %vm5877_vm4, %v817_v34, %v818_v29  ;;  %v5907_v14 = vsel %vm5877_vm4, %v820_v63, %v821_v61 }
  0x2c   : > { %v826_v15 = vrot.slane %v824_v0, 4  ;;  %vm491_vm10 = vcmp.le.s32.totalorder %v421_v40, 6  ;;  %vm801_vm11 = vmpackc.low %vm490_vm8, %vm490_vm8  ;;  %v5914_v56 = vsel %vm5877_vm4, %v823_v8, %v824_v0  ;;  %vm7143_vm13 = vcmp.ne.s16.totalorder %v5903_v13, 0 }
  0x2d   : > { %4937 = vmatmul.mubr.msk.bf16.gmra.mrb[4].mxu1 %vm7149_vm5, %v597_v7  ;;  %7192 = vst [vmem:[#allocation5_spill] sm:$0xff] %v5914_v56  ;;  %vm7142_vm15 = vcmp.ne.s16.totalorder %v5907_v14, 0  ;;  %vm802_vm1 = vmpackc.low %vm491_vm10, %vm491_vm10  ;;  %v809_v20 = vsel %vm801_vm11, 65537, %v5572_v33  ;;  %vm7141_vm3 = vcmp.ne.s16.totalorder %v5914_v56, 0  ;;  %v2493_v27 = vsel %vm7143_vm13, %v5767_v43, 0 }
  0x2e   : > { %v2494_v30 = vsel %vm7142_vm15, %v5770_v44, 0  ;;  %v810_v36 = vsel %vm802_vm1, 65537, %v5572_v33  ;;  %v2495_v37 = vsel %vm7141_vm3, %v5773_v47, 0  ;;  %v4627_v39 = vcombine.low %v2492_v9, %v2493_v27 }
  0x2f   : > { %v827_v41 = vrot.slane %v809_v20, 7  ;;  %v830_v42 = vrot.slane %v810_v36, 7  ;;  %v4503_v45 = vcombine.low %v528_v6, %v529_v11  ;;  %v4628_v32 = vcombine.low %v2494_v30, %v2495_v37  ;;  %v5994_v20 = vld [vmem:[%s5742_s9 + $0x1c] sm:$0xf]  ;;  %v6012_v30 = vld [vmem:[%s5742_s9 + $0x20] sm:$0xf] }
  0x30   : > { %vm479_vm8 = vcmp.ge.s32.totalorder %v393_v12, 1  ;;  %v526_v16 = vsel %vm5897_vm9, %v5719_v23, 0  ;;  %v2526_v21 = vrot.slane %v4627_v39, 1  ;;  %v380_v6 = vadd.s32 48, %v5657_v5 }
  0x31   : > { %v5945_v48 = vsel %vm5877_vm4, %v826_v15, %v827_v41  ;;  %v829_v51 = vrot.slane %v827_v41, 4  ;;  %vm5947_vm10 = vmpackc.low %vm479_vm8, %vm479_vm8  ;;  %v2527_v11 = vrot.slane %v4628_v32, 1  ;;  %v381_v12 = vadd.s32 56, %v5657_v5 }
  0x32   : > { %vm7139_vm11 = vcmp.ne.s16.totalorder %v5945_v48, 0  ;;  %v527_v10 = vsel %vm5947_vm10, %v5722_v24, 0  ;;  %v428_v58 = vand.u32 7, %v380_v6  ;;  %v905_v61 = vsel %vm7145_vm0, %v5836_v19, 0  ;;  %v5982_v19 = vld [vmem:[%s7134_s3 + $0x6] sm:$0x3] }
  0x33   : > { %v5959_v23 = vsel %vm5877_vm4, %v829_v51, %v830_v42  ;;  %v2496_v52 = vsel %vm7139_vm11, %v5789_v53, 0  ;;  %v4502_v55 = vcombine.low %v526_v16, %v527_v10  ;;  %v2528_v59 = vsel %vm7147_vm6, %v2526_v21, %v2527_v11  ;;  %v780_v16 = vld [vmem:[%s5695_s28] sm:$0xe]  ;;  %v2341_v51 = vld [vmem:[%s5742_s9 + $0x24] sm:$0x1] }
  0x34   : > { %vm7140_vm1 = vcmp.ne.s16.totalorder %v5959_v23, 0  ;;  %v435_v34 = vand.u32 7, %v381_v12  ;;  %5072 = vmatprep.mubr.msk.bf16.mxu0 %vm7149_vm5, %v2528_v59  ;;  %vm492_vm8 = vcmp.le.s32.totalorder %v428_v58, 6  ;;  %vm5975_vm2 = vcmp.ge.s32.totalorder %v414_v35, 1 }
  0x35   : > { %v2497_v5 = vsel %vm7140_vm1, %v5792_v54, 0  ;;  %4942 = vmatprep.mubr.msk.bf16.mxu1 %vm7149_vm5, %v4502_v55  ;;  %vm803_vm1 = vmpackc.low %vm492_vm8, %vm492_vm8  ;;  %v832_v7 = vrot.slane %v830_v42, 4  ;;  %vm483_vm3 = vcmp.ge.s32.totalorder %v421_v40, 1  ;;  %vm5988_vm13 = vcmp.ge.s32.totalorder %v428_v58, 1 }
  0x36   : > { %v4629_v0 = vcombine.low %v2496_v52, %v2497_v5  ;;  %4943 = vmatmul.mubr.msk.bf16.vlgmr.msra.gmra.mrb[0].mxu1 %vm7149_vm5, %v4503_v45  ;;  %vm493_vm11 = vcmp.le.s32.totalorder %v435_v34, 6  ;;  %v811_v18 = vsel %vm803_vm1, 65537, %v5572_v33  ;;  %vm5999_vm8 = vmpackc.low %vm5975_vm2, %vm5975_vm2  ;;  %v2624_v39 = vsel %vm5897_vm9, %v5767_v43, 0  ;;  %v6042_v43 = vld [vmem:[%s7134_s3 + $0x20] sm:$0x3] }
  0x37   : > { %4951 = vmatpush3.bf16.msra.mxu1 %v905_v61  ;;  %vm804_vm15 = vmpackc.low %vm493_vm11, %vm493_vm11  ;;  %v833_v15 = vrot.slane %v811_v18, 7  ;;  %vm6003_vm11 = vcmp.ge.s32.totalorder %v435_v34, 1  ;;  %v530_v37 = vsel %vm5999_vm8, %v5733_v28, 0  ;;  %v7205_v32 = vmov 0 }
  0x38   : > { %v2529_v8 = vrot.slane %v4629_v0, 1  ;;  %v812_v9 = vsel %vm804_vm15, 65537, %v5572_v33  ;;  %5413 = vmatprep.subr.msk.bf16.mxu1 %vm7145_vm0, %v5982_v19  ;;  %v2667_v33 = vsel %vm7145_vm0, %v5863_v46, 0  ;;  %vm6014_vm15 = vmpackc.low %vm483_vm3, %vm483_vm3  ;;  %v2625_v58 = vsel %vm5947_vm10, %v5770_v44, 0 }
  0x39   : > { %v836_v27 = vrot.slane %v812_v9, 7  ;;  %v6027_v46 = vsel %vm5877_vm4, %v832_v7, %v833_v15  ;;  %v835_v42 = vrot.slane %v833_v15, 4  ;;  %v531_v45 = vsel %vm6014_vm15, %v5747_v31, 0  ;;  %vm6035_vm2 = vmpackc.low %vm5988_vm13, %vm5988_vm13 }
  0x3a   : > { %v2530_v41 = vsel %vm7147_vm6, %v2527_v11, %v2529_v8  ;;  %v7206_v32 = vsel %vm6035_vm2, 4294967295, %v7205_v32  ;;  %vm7144_vm3 = vcmp.ne.s16.totalorder %v6027_v46, 0  ;;  %v4504_v6 = vcombine.low %v530_v37, %v531_v45  ;;  %vm6053_vm13 = vmpackc.low %vm6003_vm11, %vm6003_vm11 }
  0x3b   : > { %7207 = vst [vmem:[#allocation6_spill] sm:$0xff] %v7206_v32  ;;  %5073 = vmatmul.mubr.msk.bf16.vlgmr.msra.gmra.mrb[0].mxu0 %vm7149_vm5, %v2530_v41  ;;  %v6047_v21 = vrot.slane %v836_v27, 4  ;;  %v7208_v11 = vmov 0  ;;  %v532_v10 = vsel %vm6035_vm2, %v5777_v49, 0  ;;  %v6062_v12 = vsel %vm5877_vm4, %v835_v42, %v836_v27 }
  0x3c   : > { %v7209_v11 = vsel %vm6053_vm13, 4294967295, %v7208_v11  ;;  %5081 = vmatpush3.bf16.msra.mxu0 %v2667_v33  ;;  %v2498_v52 = vsel %vm7144_vm3, %v5994_v20, 0  ;;  %v533_v55 = vsel %vm6053_vm13, %v5806_v62, 0  ;;  %vm7148_vm1 = vcmp.ne.s16.totalorder %v6062_v12, 0  ;;  %4946 = vmatprep.mubr.msk.bf16.mxu1 %vm7149_vm5, %v4504_v6  ;;  %v2742_v6 = vld [vmem:[%s5742_s9 + $0x8] sm:$0xf] }
  0x3d   : > { %7210 = vst [vmem:[#allocation7_spill] sm:$0xff] %v7209_v11  ;;  %vm7146_vm11 = vcmp.ne.s16.totalorder %v6047_v21, 0  ;;  %v4505_v60 = vcombine.low %v532_v10, %v533_v55  ;;  %5427 = vmatprep.subr.msk.bf16.mxu0 %vm7145_vm0, %v6042_v43  ;;  %v848_v59 = vsel %vm5883_vm7, %v780_v16, 0  ;;  %v2499_v61 = vsel %vm7148_vm1, %v6012_v30, 0  ;;  %v6105_v10 = vld [vmem:[%s5742_s9 + $0xc] sm:$0xf] }
  0x3e   : > { %v2500_v44 = vsel %vm7146_vm11, %v2341_v51, 0  ;;  %vm7211_vm4 = vcmp.ne.s16.totalorder %v5903_v13, 0  ;;  %vm7212_vm3 = vcmp.ne.s16.totalorder %v5907_v14, 0  ;;  %v4630_v63 = vcombine.low %v2498_v52, %v2499_v61 }
  0x3f   : > { %v849_v34 = vsel %vm7211_vm4, %v5722_v24, 0  ;;  %v850_v5 = vsel %vm7212_vm3, %v5725_v25, 0  ;;  %v4631_v0 = vcombine.low %v2500_v44, %v2500_v44  ;;  %4947 = vmatmul.mubr.msk.bf16.gmra.mrb[4].mxu1 %vm7149_vm5, %v4505_v60  ;;  %vm7213_vm0 = vcmp.ne.s16.totalorder %v5914_v56, 0 }
  0x40   : > { %v851_v7 = vsel %vm7213_vm0, %v5728_v26, 0  ;;  %v4511_v18 = vcombine.low %v848_v59, %v849_v34  ;;  %vm7214_vm11 = vcmp.ne.s16.totalorder %v5945_v48, 0  ;;  %vm7215_vm4 = vcmp.ne.s16.totalorder %v5959_v23, 0 }
  0x41   : > { %v4512_v35 = vcombine.low %v850_v5, %v851_v7  ;;  %v852_v9 = vsel %vm7214_vm11, %v5733_v28, 0  ;;  %v853_v15 = vsel %vm7215_vm4, %v5747_v31, 0  ;;  %v2531_v40 = vrot.slane %v4630_v63, 1 }
  0x42   : > { %v2533_v33 = vrot.slane %v4631_v0, 1  ;;  %v883_v27 = vrot.slane %v4511_v18, 1  ;;  %v4513_v37 = vcombine.low %v852_v9, %v853_v15  ;;  %v4637_v41 = vcombine.low %v2624_v39, %v2625_v58  ;;  %v6116_v58 = vld [vmem:[%s5742_s9 + $0x10] sm:$0xf]  ;;  %v6140_v0 = vld [vmem:[%s7134_s3 + $0x8] sm:$0x3] }
  0x43   : > { %v884_v42 = vrot.slane %v4512_v35, 1  ;;  %v2532_v45 = vsel %vm7147_vm6, %v2529_v8, %v2531_v40  ;;  %vm7216_vm0 = vcmp.ne.s16.totalorder %v6027_v46, 0  ;;  %v855_v39 = vsel %vm7148_vm1, %v5806_v62, 0  ;;  %v6119_v8 = vld [vmem:[%s5742_s9 + $0x14] sm:$0xf] }
  0x44   : > { %v2534_v16 = vsel %vm7147_vm6, %v2531_v40, %v2533_v33  ;;  %v886_v51 = vrot.slane %v4513_v37, 1  ;;  %5076 = vmatprep.mubr.msk.bf16.mxu0 %vm7149_vm5, %v2532_v45  ;;  %v854_v55 = vsel %vm7216_vm0, %v5777_v49, 0  ;;  %vm7217_vm3 = vcmask 1041408   ;;  %v6155_v40 = vld [vmem:[%s5742_s9 + $0x18] sm:$0xf] }
  0x45   : > { %v885_v52 = vsel %vm7147_vm6, %v883_v27, %v884_v42  ;;  %5077 = vmatmul.mubr.msk.bf16.gmra.mrb[4].mxu0 %vm7149_vm5, %v2534_v16  ;;  %v1024_v59 = vsel %vm7217_vm3, %v5982_v19, 0  ;;  %v4514_v61 = vcombine.low %v854_v55, %v855_v39  ;;  %vm7218_vm11 = vcmp.ne.s16.totalorder %v6047_v21, 0  ;;  %vm7219_vm4 = vmmov %vm7217_vm3  ;;  %v2623_v37 = vld [vmem:[%s5742_s9 + $0x24] sm:$0xf] }
  0x46   : > { %4952 = vmatprep.mubr.msk.bf16.mxu1 %vm7149_vm5, %v885_v52  ;;  %v887_v60 = vsel %vm7147_vm6, %v884_v42, %v886_v51  ;;  %v856_v44 = vsel %vm7218_vm11, %v5813_v3, 0  ;;  %v2626_v34 = vsel %vm5782_vm12, %v5773_v47, 0  ;;  %v2627_v5 = vsel %vm5801_vm14, %v5789_v53, 0  ;;  %5082 = vmatprep.mubr.msk.bf16.mxu0 %vm7149_vm5, %v4637_v41  ;;  %v6171_v41 = vld [vmem:[%s5742_s9 + $0x20] sm:$0xf]  ;;  %vm7220_vm0 = vmmov %vm7217_vm3 }
  0x47   : > { %v4515_v63 = vcombine.low %v856_v44, %v856_v44  ;;  %v4646_v19 = vcombine.low %v2742_v6, %v6105_v10  ;;  %4953 = vmatmul.mubr.msk.bf16.vlgmr.msra.gmra.mrb[0].mxu1 %vm7149_vm5, %v887_v60  ;;  %v2628_v47 = vsel %vm5999_vm8, %v5792_v54, 0  ;;  %v2629_v53 = vsel %vm6014_vm15, %v5994_v20, 0  ;;  %v6158_v54 = vld [vmem:[%s5742_s9 + $0x1c] sm:$0xf]  ;;  %v6183_v6 = vld [vmem:[%s7134_s3 + $0x22] sm:$0x3]  ;;  %vm7221_vm3 = vmmov %vm7220_vm0 }
  0x48   : > { %v888_v3 = vrot.slane %v4514_v61, 1  ;;  %v6151_v7 = vcombine.low %v6116_v58, %v6119_v8  ;;  %4961 = vmatpush3.bf16.msra.mxu1 %v1024_v59  ;;  %v4638_v9 = vcombine.low %v2626_v34, %v2627_v5  ;;  %v981_v20 = vsel %vm5897_vm9, %v5722_v24, 0  ;;  %v1099_v34 = vld [vmem:[%s5695_s28 + $0x4] sm:$0xf] }
  0x49   : > { %v890_v18 = vrot.slane %v4515_v63, 1  ;;  %v2779_v35 = vshll.u32 %v4646_v19, 16  ;;  %v982_v33 = vsel %vm5947_vm10, %v5725_v25, 0  ;;  %5414 = vmatprep.subr.msk.bf16.mxu1 %vm7219_vm4, %v6140_v0  ;;  %v4639_v27 = vcombine.low %v2628_v47, %v2629_v53  ;;  %v6213_v63 = vld [vmem:[%s5695_s28 + $0x8] sm:$0xf]  ;;  %vm7223_vm4 = vmmov %vm7220_vm0 }
  0x4a   : > { %v889_v15 = vsel %vm7147_vm6, %v886_v51, %v888_v3  ;;  %v2825_v42 = vsel %vm7220_vm0, %v6042_v43, 0  ;;  %v2777_v45 = vshrl.u32 %v4646_v19, 16  ;;  %v2784_v24 = vshll.u32 %v6151_v7, 16  ;;  %v6177_v51 = vld [vmem:[%s5742_s9 + $0x24] sm:$0xf]  ;;  %vm7229_vm1 = vmmov %vm7223_vm4 }
  0x4b   : > { %4956 = vmatprep.mubr.msk.bf16.mxu1 %vm7149_vm5, %v889_v15  ;;  %v2781_v16 = vrot.slane %v2779_v35, 1  ;;  %v891_v25 = vsel %vm7147_vm6, %v888_v3, %v890_v18  ;;  %v4648_v52 = vcombine.low %v6155_v40, %v6158_v54  ;;  %v4521_v55 = vcombine.low %v981_v20, %v982_v33  ;;  %v6216_v19 = vld [vmem:[%s5695_s28 + $0xc] sm:$0xf]  ;;  %v6226_v35 = vld [vmem:[%s5695_s28 + $0x10] sm:$0xf] }
  0x4c   : > { %v2630_v43 = vsel %vm6035_vm2, %v6012_v30, 0  ;;  %v2631_v39 = vsel %vm6053_vm13, %v2623_v37, 0  ;;  %v6196_v60 = vcombine.low %v6171_v41, %v6177_v51  ;;  %v983_v59 = vsel %vm5782_vm12, %v5728_v26, 0  ;;  %v6205_v30 = vld [vmem:[%s5742_s9 + $0x28] sm:$0x1] }
  0x4d   : > { %5083 = vmatmul.mubr.msk.bf16.vlgmr.msra.gmra.mrb[0].mxu0 %vm7149_vm5, %v4638_v9  ;;  %v2782_v61 = vor.u32 %v2781_v16, %v2777_v45  ;;  %v2786_v44 = vrot.slane %v2784_v24, 1  ;;  %v2792_v5 = vshll.u32 %v4648_v52, 16  ;;  %v984_v26 = vsel %vm5801_vm14, %v5733_v28, 0  ;;  %v980_v33 = vld [vmem:[%s5695_s28 + $0x20] sm:$0xf] }
  0x4e   : > { %5091 = vmatpush3.bf16.msra.mxu0 %v2825_v42  ;;  %5086 = vmatprep.mubr.msk.bf16.mxu0 %vm7149_vm5, %v4639_v27  ;;  %v4640_v47 = vcombine.low %v2630_v43, %v2631_v39  ;;  %v2788_v53 = vshrl.u32 %v6151_v7, 16  ;;  %v985_v3 = vsel %vm5999_vm8, %v5747_v31, 0  ;;  %v986_v18 = vsel %vm6014_vm15, %v5777_v49, 0  ;;  %v2900_v27 = vld [vmem:[%s5742_s9 + $0x8] sm:$0xe] }
  0x4f   : > { %4957 = vmatmul.mubr.msk.bf16.gmra.mrb[4].mxu1 %vm7149_vm5, %v891_v25  ;;  %5428 = vmatprep.subr.msk.bf16.mxu0 %vm7221_vm3, %v6183_v6  ;;  %v2796_v28 = vshrl.u32 %v4648_v52, 16  ;;  %v2800_v9 = vshll.u32 %v6196_v60, 16  ;;  %v4650_v15 = vcombine.low %v6205_v30, %v6205_v30  ;;  %vm7222_vm11 = vsmask.f32 7424  ;;  %v6237_v49 = vld [vmem:[%s5695_s28 + $0x14] sm:$0xf] }
  0x50   : > { %4962 = vmatprep.mubr.msk.bf16.mxu1 %vm7149_vm5, %v4521_v55  ;;  %v2787_v20 = vsel %vm7222_vm11, %v2782_v61, %v2786_v44  ;;  %v4522_v7 = vcombine.low %v983_v59, %v984_v26  ;;  %v4530_v31 = vcombine.low %v1099_v34, %v6213_v63  ;;  %v2794_v37 = vrot.slane %v2792_v5, 1  ;;  %v6242_v16 = vld [vmem:[%s5695_s28 + $0x18] sm:$0xf]  ;;  %v6250_v43 = vld [vmem:[%s7134_s3 + $0xa] sm:$0x3] }
  0x51   : > { %v4523_v42 = vcombine.low %v985_v3, %v986_v18  ;;  %v4531_v45 = vcombine.low %v6216_v19, %v6226_v35  ;;  %v2790_v24 = vor.u32 %v2788_v53, %v2786_v44  ;;  %v1182_v25 = vsel %vm7223_vm4, %v6140_v0, 0  ;;  %v6254_v5 = vld [vmem:[%s5695_s28 + $0x1c] sm:$0xf]  ;;  %v6271_v53 = vld [vmem:[%s5695_s28 + $0x20] sm:$0xf] }
  0x52   : > { %v1134_v52 = vshrl.u32 %v4530_v31, 16  ;;  %v1136_v55 = vshll.u32 %v4530_v31, 16  ;;  %v2798_v39 = vor.u32 %v2796_v28, %v2794_v37  ;;  %v2802_v59 = vrot.slane %v2800_v9, 1 }
  0x53   : > { %v2808_v61 = vshll.u32 %v4650_v15, 16  ;;  %v1141_v34 = vshll.u32 %v4531_v45, 16  ;;  %v987_v0 = vsel %vm6035_vm2, %v5806_v62, 0  ;;  %v988_v44 = vsel %vm6053_vm13, %v980_v33, 0 }
  0x54   : > { %v1138_v26 = vrot.slane %v1136_v55, 1  ;;  %v2901_v3 = vsel %vm5883_vm7, %v2900_v27, 0  ;;  %vm7225_vm0 = vcmp.ne.s16.totalorder %v5903_v13, 0  ;;  %vm7226_vm3 = vcmp.ne.s16.totalorder %v5907_v14, 0 }
  0x55   : > { %5087 = vmatmul.mubr.msk.bf16.gmra.mrb[4].mxu0 %vm7149_vm5, %v4640_v47  ;;  %v4532_v47 = vcombine.low %v6237_v49, %v6242_v16  ;;  %v2902_v62 = vsel %vm7225_vm0, %v6105_v10, 0  ;;  %v2903_v18 = vsel %vm7226_vm3, %v6116_v58, 0  ;;  %vm7227_vm11 = vcmp.ne.s16.totalorder %v5914_v56, 0 }
  0x56   : > { %5092 = vmatprep.mubr.msk.bf16.mxu0 %vm7149_vm5, %v2787_v20  ;;  %v2904_v28 = vsel %vm7227_vm11, %v6119_v8, 0  ;;  %v2804_v9 = vshrl.u32 %v6196_v60, 16  ;;  %v1139_v15 = vor.u32 %v1138_v26, %v1134_v52  ;;  %v1143_v20 = vrot.slane %v1141_v34, 1  ;;  %vm7234_vm11 = vmmov %vm7223_vm4 }
  0x57   : > { %4963 = vmatmul.mubr.msk.bf16.vlgmr.msra.gmra.mrb[0].mxu1 %vm7149_vm5, %v4522_v7  ;;  %vm7228_vm6 = vsmask.f32 7424  ;;  %v2957_v10 = vsel %vm7229_vm1, %v6183_v6, 0  ;;  %v4524_v33 = vcombine.low %v987_v0, %v988_v44  ;;  %v4533_v58 = vcombine.low %v6254_v5, %v6271_v53  ;;  %v6303_v6 = vld [vmem:[%s7134_s3 + $0x24] sm:$0x3] }
  0x58   : > { %4971 = vmatpush3.bf16.msra.mxu1 %v1182_v25  ;;  %4966 = vmatprep.mubr.msk.bf16.mxu1 %vm7149_vm5, %v4523_v42  ;;  %v2795_v7 = vsel %vm7228_vm6, %v2790_v24, %v2794_v37  ;;  %vm7230_vm0 = vmmov %vm7228_vm6  ;;  %v4656_v60 = vcombine.low %v2901_v3, %v2902_v62  ;;  %v4657_v27 = vcombine.low %v2903_v18, %v2904_v28  ;;  %v1149_v31 = vshll.u32 %v4532_v47, 16  ;;  %v1257_v44 = vld [vmem:[%s5695_s28 + $0x4] sm:$0xe] }
  0x59   : > { %5415 = vmatprep.subr.msk.bf16.mxu1 %vm7223_vm4, %v6250_v43  ;;  %v2803_v8 = vsel %vm7230_vm0, %v2798_v39, %v2802_v59  ;;  %v2810_v42 = vrot.slane %v2808_v61, 1  ;;  %v1145_v37 = vshrl.u32 %v4531_v45, 16  ;;  %v2806_v24 = vor.u32 %v2804_v9, %v2802_v59  ;;  %vm7231_vm6 = vmmov %vm7230_vm0  ;;  %v6308_v39 = vld [vmem:[%s5695_s28 + $0x24] sm:$0x1] }
  0x5a   : > { %v1144_v25 = vsel %vm7231_vm6, %v1139_v15, %v1143_v20  ;;  %v1153_v52 = vshrl.u32 %v4532_v47, 16  ;;  %v1157_v55 = vshll.u32 %v4533_v58, 16  ;;  %vm7232_vm1 = vcmp.ne.s16.totalorder %v5945_v48, 0 }
  0x5b   : > { %v2905_v61 = vsel %vm7232_vm1, %v6155_v40, 0  ;;  %vm7233_vm3 = vcmp.ne.s16.totalorder %v5959_v23, 0  ;;  %v2935_v59 = vrot.slane %v4656_v60, 1  ;;  %v2936_v34 = vrot.slane %v4657_v27, 1 }
  0x5c   : > { %v2906_v45 = vsel %vm7233_vm3, %v6158_v54, 0  ;;  %v1151_v0 = vrot.slane %v1149_v31, 1  ;;  %v1147_v26 = vor.u32 %v1145_v37, %v1143_v20  ;;  %vm7235_vm4 = vcmp.ne.s16.totalorder %v6027_v46, 0 }
  0x5d   : > { %5093 = vmatmul.mubr.msk.bf16.vlgmr.msra.gmra.mrb[0].mxu0 %vm7149_vm5, %v2795_v7  ;;  %v2907_v40 = vsel %vm7235_vm4, %v6171_v41, 0  ;;  %vm7236_vm0 = vcmp.ne.s16.totalorder %v6062_v12, 0  ;;  %v4534_v47 = vcombine.low %v6308_v39, %v6308_v39  ;;  %v2811_v3 = vsel %vm7231_vm6, %v2806_v24, %v2810_v42  ;;  %v4549_v24 = vld [vmem:[%s7134_s3 + $0xc] sm:$0x3] }
  0x5e   : > { %5101 = vmatpush3.bf16.msra.mxu0 %v2957_v10  ;;  %5096 = vmatprep.mubr.msk.bf16.mxu0 %vm7149_vm5, %v2803_v8  ;;  %v2908_v54 = vsel %vm7236_vm0, %v6177_v51, 0  ;;  %v4658_v62 = vcombine.low %v2905_v61, %v2906_v45  ;;  %v1155_v18 = vor.u32 %v1153_v52, %v1151_v0  ;;  %v1159_v28 = vrot.slane %v1157_v55, 1  ;;  %vm7241_vm0 = vmmov %vm7231_vm6 }
  0x5f   : > { %4967 = vmatmul.mubr.msk.bf16.gmra.mrb[4].mxu1 %vm7149_vm5, %v4524_v33  ;;  %5429 = vmatprep.subr.msk.bf16.mxu0 %vm7234_vm11, %v6303_v6  ;;  %v1258_v9 = vsel %vm5883_vm7, %v1257_v44, 0  ;;  %vm7237_vm1 = vcmp.ne.s16.totalorder %v5903_v13, 0  ;;  %vm7238_vm3 = vcmp.ne.s16.totalorder %v5907_v14, 0  ;;  %vm7239_vm11 = vcmp.ne.s16.totalorder %v5914_v56, 0 }
  0x60   : > { %4972 = vmatprep.mubr.msk.bf16.mxu1 %vm7149_vm5, %v1144_v25  ;;  %v1259_v15 = vsel %vm7237_vm1, %v6213_v63, 0  ;;  %v1260_v41 = vsel %vm7238_vm3, %v6216_v19, 0  ;;  %v1261_v51 = vsel %vm7239_vm11, %v6226_v35, 0  ;;  %vm7240_vm4 = vcmask 1046528   ;;  %vm7243_vm1 = vmmov %vm7241_vm0 }
  0x61   : > { %v2937_v20 = vsel %vm7240_vm4, %v2935_v59, %v2936_v34  ;;  %v4659_v7 = vcombine.low %v2907_v40, %v2908_v54  ;;  %v1152_v10 = vsel %vm7241_vm0, %v1147_v26, %v1151_v0  ;;  %v1161_v33 = vshrl.u32 %v4533_v58, 16 }
  0x62   : > { %v1165_v8 = vshll.u32 %v4534_v47, 16  ;;  %vm7242_vm6 = vcmask 1041408   ;;  %v1160_v27 = vsel %vm7243_vm1, %v1155_v18, %v1159_v28  ;;  %v4540_v31 = vcombine.low %v1258_v9, %v1259_v15 }
  0x63   : > { %v1314_v60 = vsel %vm7242_vm6, %v6250_v43, 0  ;;  %v4541_v42 = vcombine.low %v1260_v41, %v1261_v51  ;;  %v2938_v37 = vrot.slane %v4658_v62, 1  ;;  %v2940_v58 = vrot.slane %v4659_v7, 1  ;;  %vm7247_vm0 = vmmov %vm7242_vm6  ;;  %v6387_v62 = vld [vmem:[%s7134_s3 + $0x26] sm:$0x3] }
  0x64   : > { %vm7244_vm3 = vcmp.ne.s16.totalorder %v6047_v21, 0  ;;  %v1163_v43 = vor.u32 %v1161_v33, %v1159_v28  ;;  %v1167_v52 = vrot.slane %v1165_v8, 1  ;;  %v1292_v55 = vrot.slane %v4540_v31, 1  ;;  %v3158_v51 = vld [vmem:[%s6362_s29] sm:$0xf] }
  0x65   : > { %5097 = vmatmul.mubr.msk.bf16.gmra.mrb[4].mxu0 %vm7149_vm5, %v2811_v3  ;;  %v2909_v25 = vsel %vm7244_vm3, %v6205_v30, 0  ;;  %v1293_v61 = vrot.slane %v4541_v42, 1  ;;  %vm7245_vm11 = vcmp.ne.s16.totalorder %v5945_v48, 0  ;;  %vm7246_vm4 = vcmp.ne.s16.totalorder %v5959_v23, 0  ;;  %v3032_v3 = vld [vmem:[%s6362_s29] sm:$0xf] }
  0x66   : > { %5102 = vmatprep.mubr.msk.bf16.mxu0 %vm7149_vm5, %v2937_v20  ;;  %v1262_v45 = vsel %vm7245_vm11, %v6237_v49, 0  ;;  %v1263_v30 = vsel %vm7246_vm4, %v6242_v16, 0  ;;  %vm7248_vm6 = vcmask 1046528   ;;  %v4660_v0 = vcombine.low %v2909_v25, %v2909_v25  ;;  %v6401_v20 = vld [vmem:[%s6362_s29 + $0x4] sm:$0xf] }
  0x67   : > { %4973 = vmatmul.mubr.msk.bf16.vlgmr.msra.gmra.mrb[0].mxu1 %vm7149_vm5, %v1152_v10  ;;  %v2939_v59 = vsel %vm7248_vm6, %v2936_v34, %v2938_v37  ;;  %vm7249_vm1 = vcmp.ne.s16.totalorder %v6027_v46, 0  ;;  %vm7250_vm3 = vcmp.ne.s16.totalorder %v6062_v12, 0  ;;  %vm7252_vm11 = vmmov %vm7248_vm6  ;;  %vm7253_vm7 = vsmask.f32 7424  ;;  %v3033_v34 = vld [vmem:[%s6362_s29 + $0x4] sm:$0xf] }
  0x68   : > { %4981 = vmatpush3.bf16.msra.mxu1 %v1314_v60  ;;  %4976 = vmatprep.mubr.msk.bf16.mxu1 %vm7149_vm5, %v1160_v27  ;;  %v1264_v44 = vsel %vm7249_vm1, %v6254_v5, 0  ;;  %v1265_v26 = vsel %vm7250_vm3, %v6271_v53, 0  ;;  %vm7251_vm5 = vmmov %vm7247_vm0  ;;  %v2941_v54 = vsel %vm7252_vm11, %v2938_v37, %v2940_v58  ;;  %v1168_v47 = vsel %vm7253_vm7, %v1163_v43, %v1167_v52  ;;  %v6409_v27 = vld [vmem:[%s6362_s29 + $0x8] sm:$0xf]  ;;  %v6412_v31 = vld [vmem:[%s6362_s29 + $0xc] sm:$0xf] }
  0x69   : > { %5416 = vmatprep.subr.msk.bf16.mxu1 %vm7247_vm0, %v4549_v24  ;;  %v3083_v40 = vsel %vm7251_vm5, %v6303_v6, 0  ;;  %v4542_v18 = vcombine.low %v1262_v45, %v1263_v30  ;;  %vm7254_vm4 = vcmask 31744   ;;  %vm7255_vm0 = vmmov %vm7248_vm6  ;;  %v4543_v9 = vcombine.low %v1264_v44, %v1265_v26  ;;  %v3034_v37 = vld [vmem:[%s6362_s29 + $0x8] sm:$0xf]  ;;  %v3035_v25 = vld [vmem:[%s6362_s29 + $0xc] sm:$0xf] }
  0x6a   : > { %v1294_v28 = vsel %vm7255_vm0, %v1292_v55, %v1293_v61  ;;  %vm7256_vm5 = vmmov %vm7254_vm4  ;;  %v2942_v6 = vrot.slane %v4660_v0, 1  ;;  %v3040_v15 = vsel %vm5897_vm9, %v3032_v3, 0  ;;  %v3041_v41 = vsel %vm5947_vm10, %v3033_v34, 0  ;;  %v3036_v52 = vld [vmem:[%s6362_s29 + $0x10] sm:$0xf] }
  0x6b   : > { %vm7257_vm7 = vmmov %vm7254_vm4  ;;  %vm7258_vm6 = vcmask 1041408   ;;  %v1295_v7 = vrot.slane %v4542_v18, 1  ;;  %v1297_v10 = vrot.slane %v4543_v9, 1  ;;  %vm7260_vm3 = vcmp.ne.s16.totalorder %v6047_v21, 0  ;;  %v3037_v55 = vld [vmem:[%s6362_s29 + $0x14] sm:$0xf] }
  0x6c   : > { %vm7259_vm1 = vmmov %vm7254_vm4  ;;  %v1266_v33 = vsel %vm7260_vm3, %v6308_v39, 0  ;;  %v4666_v60 = vcombine.low %v3040_v15, %v3041_v41  ;;  %v4675_v42 = vcombine.low %v3158_v51, %v6401_v20  ;;  %v6424_v30 = vld [vmem:[%s6362_s29 + $0x10] sm:$0xf]  ;;  %v6431_v0 = vld [vmem:[%s6362_s29 + $0x14] sm:$0xf]  ;;  %v1390_v51 = vsel %vm5897_vm9, %v6213_v63, 0 }
  0x6d   : > { %5103 = vmatmul.mubr.msk.bf16.vlgmr.msra.gmra.mrb[0].mxu0 %vm7254_vm4, %v2939_v59  ;;  %vm7261_vm11 = vmmov %vm7255_vm0  ;;  %v4544_v45 = vcombine.low %v1266_v33, %v1266_v33  ;;  %v6428_v59 = vcombine.low %v6409_v27, %v6412_v31  ;;  %v3038_v44 = vld [vmem:[%s6362_s29 + $0x18] sm:$0xf]  ;;  %v3039_v3 = vld [vmem:[%s6362_s29 + $0x1c] sm:$0xf]  ;;  %v1393_v63 = vsel %vm5801_vm14, %v6237_v49, 0 }
  0x6e   : > { %5111 = vmatpush3.bf16.msra.mxu0 %v3083_v40  ;;  %5106 = vmatprep.mubr.msk.bf16.mxu0 %vm7256_vm5, %v2941_v54  ;;  %v2943_v8 = vsel %vm7261_vm11, %v2940_v58, %v2942_v6  ;;  %vm7262_vm4 = vmmov %vm7255_vm0  ;;  %v3195_v26 = vshll.u32 %v4675_v42, 16  ;;  %v4558_v40 = vld [vmem:[%s7134_s3 + $0xe] sm:$0x3]  ;;  %v3044_v54 = vsel %vm5999_vm8, %v3036_v52, 0  ;;  %v6449_v34 = vld [vmem:[%s6362_s29 + $0x18] sm:$0xf] }
  0x6f   : > { %4977 = vmatmul.mubr.msk.bf16.gmra.mrb[4].mxu1 %vm7257_vm7, %v1168_v47  ;;  %5430 = vmatprep.subr.msk.bf16.mxu0 %vm7258_vm6, %v6387_v62  ;;  %v1296_v43 = vsel %vm7262_vm4, %v1293_v61, %v1295_v7  ;;  %vm7263_vm0 = vmmov %vm7259_vm1  ;;  %v3042_v61 = vsel %vm5782_vm12, %v3034_v37, 0  ;;  %v3045_v47 = vsel %vm6014_vm15, %v3037_v55, 0  ;;  %v1299_v18 = vrot.slane %v4544_v45, 1  ;;  %v6455_v9 = vld [vmem:[%s6362_s29 + $0x1c] sm:$0xf] }
  0x70   : > { %4982 = vmatprep.mubr.msk.bf16.mxu1 %vm7259_vm1, %v1294_v28  ;;  %vm7264_vm5 = vmmov %vm7258_vm6  ;;  %v4677_v28 = vcombine.low %v6424_v30, %v6431_v0  ;;  %7269 = vst [vmem:[#allocation8_spill] sm:$0xff] %v6455_v9  ;;  %v6458_v6 = vld [vmem:[%s6362_s29 + $0x20] sm:$0x1]  ;;  %v3200_v41 = vshll.u32 %v6428_v59, 16  ;;  %v1508_v33 = vld [vmem:[%s5695_s28 + $0x8] sm:$0xf]  ;;  %v6490_v49 = vcombine.low %v6449_v34, %v6455_v9 }
  0x71   : > { %v1433_v39 = vsel %vm7264_vm5, %v4549_v24, 0  ;;  %vm7265_vm7 = vmmov %vm7262_vm4  ;;  %v3043_v24 = vsel %vm5801_vm14, %v3035_v25, 0  ;;  %v3193_v37 = vshrl.u32 %v4675_v42, 16  ;;  %v3197_v25 = vrot.slane %v3195_v26, 1  ;;  %v4684_v55 = vld [vmem:[%s7134_s3 + $0x28] sm:$0x3] }
  0x72   : > { %v1298_v58 = vsel %vm7265_vm7, %v1295_v7, %v1297_v10  ;;  %vm7266_vm6 = vmmov %vm7263_vm0  ;;  %v4667_v15 = vcombine.low %v3042_v61, %v3043_v24  ;;  %v1391_v7 = vsel %vm5947_vm10, %v6216_v19, 0  ;;  %v3046_v52 = vsel %vm6035_vm2, %v3038_v44, 0  ;;  %v6500_v24 = vld [vmem:[%s5695_s28 + $0x14] sm:$0xf] }
  0x73   : > { %vm7267_vm1 = vmmov %vm7263_vm0  ;;  %v3208_v45 = vshll.u32 %v4677_v28, 16  ;;  %v4679_v61 = vcombine.low %v6458_v6, %v6458_v6  ;;  %v3198_v26 = vor.u32 %v3197_v25, %v3193_v37  ;;  %v6530_v37 = vld [vmem:[%s5695_s28 + $0x18] sm:$0xf] }
  0x74   : > { %vm7268_vm3 = vmmov %vm7263_vm0 }
  0x75   : > { %5107 = vmatmul.mubr.msk.bf16.gmra.mrb[4].mxu0 %vm7263_vm0, %v2943_v8  ;;  %vm7270_vm11 = vmmov %vm7264_vm5  ;;  %v1392_v8 = vsel %vm5782_vm12, %v6226_v35, 0  ;;  %v3047_v35 = vsel %vm6053_vm13, %v3039_v3, 0 }
  0x76   : > { %5112 = vmatprep.mubr.msk.bf16.mxu0 %vm7266_vm6, %v4666_v60  ;;  %v4668_v60 = vcombine.low %v3044_v54, %v3045_v47  ;;  %vm7271_vm4 = vmmov %vm7264_vm5  ;;  %v3212_v54 = vshrl.u32 %v4677_v28, 16  ;;  %v4551_v47 = vcombine.low %v1392_v8, %v1393_v63  ;;  %v4669_v3 = vcombine.low %v3046_v52, %v3047_v35  ;;  %v6535_v35 = vld [vmem:[%s5695_s28 + $0x1c] sm:$0xf] }
  0x77   : > { %4983 = vmatmul.mubr.msk.bf16.vlgmr.msra.gmra.mrb[0].mxu1 %vm7267_vm1, %v1296_v43  ;;  %v6473_v43 = vld [vmem:[%s5695_s28 + $0xc] sm:$0xf]  ;;  %v3241_v19 = vsel %vm7271_vm4, %v6387_v62, 0  ;;  %vm7272_vm0 = vmmov %vm7265_vm7  ;;  %v3202_v62 = vrot.slane %v3200_v41, 1  ;;  %v3210_v41 = vrot.slane %v3208_v45, 1  ;;  %v6526_v8 = vshll.u32 %v4679_v61, 16 }
  0x78   : > { %4991 = vmatpush3.bf16.msra.mxu1 %v1433_v39  ;;  %4986 = vmatprep.mubr.msk.bf16.mxu1 %vm7268_vm3, %v1298_v58  ;;  %v1300_v42 = vsel %vm7272_vm0, %v1297_v10, %v1299_v18  ;;  %v4550_v39 = vcombine.low %v1390_v51, %v1391_v7  ;;  %vm7273_vm5 = vmmov %vm7267_vm1  ;;  %v3204_v58 = vshrl.u32 %v6428_v59, 16  ;;  %v6497_v10 = vld [vmem:[%s5695_s28 + $0x10] sm:$0xf]  ;;  %v6503_v44 = vcombine.low %v1508_v33, %v6473_v43  ;;  %v3316_v7 = vld [vmem:[%s6362_s29] sm:$0xe] }
  0x79   : > { %5417 = vmatprep.subr.msk.bf16.mxu1 %vm7270_vm11, %v4558_v40  ;;  %vm7274_vm7 = vmmov %vm7267_vm1  ;;  %v1394_v59 = vsel %vm5999_vm8, %v6242_v16, 0  ;;  %v1395_v18 = vsel %vm6014_vm15, %v6254_v5, 0  ;;  %v3216_v51 = vshll.u32 %v6490_v49, 16  ;;  %v6523_v33 = vcombine.low %v6497_v10, %v6500_v24 }
  0x7a   : > { %vm7275_vm6 = vmmov %vm7267_vm1  ;;  %v3206_v16 = vor.u32 %v3204_v58, %v3202_v62  ;;  %vm7280_vm0 = vsmask.f32 7424  ;;  %v3214_v63 = vor.u32 %v3212_v54, %v3210_v41  ;;  %v4552_v52 = vcombine.low %v1394_v59, %v1395_v18  ;;  %v6564_v54 = vld [vmem:[%s6362_s29 + $0x14] sm:$0xf] }
  0x7b   : > { %vm7276_vm1 = vmmov %vm7271_vm4  ;;  %v3203_v25 = vsel %vm7280_vm0, %v3198_v26, %v3202_v62  ;;  %v3218_v62 = vrot.slane %v3216_v51, 1  ;;  %v1550_v61 = vshll.u32 %v6523_v33, 16  ;;  %v4568_v26 = vld [vmem:[%s7134_s3 + $0x10] sm:$0x3]  ;;  %v3226_v18 = vrot.slane %v6526_v8, 1 }
  0x7c   : > { %vm7277_vm3 = vmmov %vm7276_vm1 }
  0x7d   : > { %5113 = vmatmul.mubr.msk.bf16.vlgmr.msra.gmra.mrb[0].mxu0 %vm7273_vm5, %v4667_v15  ;;  %v1389_v15 = vld [vmem:[%s5695_s28 + $0x24] sm:$0xf]  ;;  %v6516_v28 = vsel %vm7277_vm3, %v4684_v55, 0  ;;  %vm7278_vm11 = vmmov %vm7273_vm5  ;;  %vm7282_vm5 = vnez %v7189_v1 }
  0x7e   : > { %5121 = vmatpush3.bf16.msra.mxu0 %v3241_v19  ;;  %5116 = vmatprep.mubr.msk.bf16.mxu0 %vm7274_vm7, %v4668_v60  ;;  %vm7279_vm4 = vmmov %vm7276_vm1  ;;  %v1545_v60 = vshll.u32 %v6503_v44, 16  ;;  %v3220_v19 = vshrl.u32 %v6490_v49, 16  ;;  %v3317_v45 = vsel %vm7282_vm5, %v3316_v7, 0  ;;  %vm7283_vm7 = vcmp.ne.s16.totalorder %v5903_v13, 0  ;;  %v6551_v49 = vld [vmem:[%s6362_s29 + $0x10] sm:$0xf] }
  0x7f   : > { %4987 = vmatmul.mubr.msk.bf16.gmra.mrb[4].mxu1 %vm7275_vm6, %v1300_v42  ;;  %5431 = vmatprep.subr.msk.bf16.mxu0 %vm7276_vm1, %v4684_v55  ;;  %v1591_v5 = vsel %vm7279_vm4, %v4558_v40, 0  ;;  %v6538_v42 = vld [vmem:[%s6362_s29 + $0xc] sm:$0xf]  ;;  %v1396_v40 = vsel %vm6035_vm2, %v6271_v53, 0  ;;  %v1397_v55 = vsel %vm6053_vm13, %v1389_v15, 0  ;;  %vm7284_vm6 = vcmp.ne.s16.totalorder %v5907_v14, 0  ;;  %vm7286_vm3 = vmmov %vm7278_vm11 }
  0x80   : > { %4992 = vmatprep.mubr.msk.bf16.mxu1 %vm7278_vm11, %v4550_v39  ;;  %7281 = vst [vmem:[#allocation9_spill] sm:$0xff] %v6538_v42  ;;  %v3318_v39 = vsel %vm7283_vm7, %v6401_v20, 0  ;;  %v3319_v58 = vsel %vm7284_vm6, %v6409_v27, 0  ;;  %vm7285_vm1 = vcmp.ne.s16.totalorder %v5914_v56, 0  ;;  %vm7287_vm11 = vmmov %vm7280_vm0  ;;  %v1543_v15 = vshrl.u32 %v6503_v44, 16 }
  0x81   : > { %v3320_v53 = vsel %vm7285_vm1, %v6412_v31, 0  ;;  %v3211_v59 = vsel %vm7287_vm11, %v3206_v16, %v3210_v41  ;;  %v1547_v51 = vrot.slane %v1545_v60, 1  ;;  %v6571_v7 = vld [vmem:[%s6362_s29 + $0x18] sm:$0xf]  ;;  %vm7289_vm4 = vmmov %vm7286_vm3  ;;  %v4553_v38 = vcombine.low %v1396_v40, %v1397_v55  ;;  %v6582_v41 = vld [vmem:[%s5695_s28 + $0x20] sm:$0xf] }
  0x82   : > { %7288 = vst [vmem:[#allocation10_spill] sm:$0xff] %v6571_v7  ;;  %v4685_v4 = vcombine.low %v3317_v45, %v3318_v39  ;;  %vm7290_vm0 = vcmp.ne.s16.totalorder %v5945_v48, 0  ;;  %v6585_v16 = vld [vmem:[%s5695_s28 + $0x24] sm:$0xf]  ;;  %vm7291_vm7 = vmmov %vm7286_vm3  ;;  %v4686_v44 = vcombine.low %v3319_v58, %v3320_v53  ;;  %v4705_v8 = vcombine.low %v6538_v42, %v6551_v49 }
  0x83   : > { %v6577_v2 = vsel %vm7290_vm0, %v6424_v30, 0  ;;  %v3860_v60 = vsel %vm5782_vm12, %v6551_v49, 0  ;;  %vm7292_vm6 = vmmov %vm7287_vm11  ;;  %v1552_v55 = vrot.slane %v1550_v61, 1  ;;  %v1548_v39 = vor.u32 %v1547_v51, %v1543_v15 }
  0x84   : > { %v3219_v40 = vsel %vm7292_vm6, %v3214_v63, %v3218_v62  ;;  %vm7293_vm1 = vmmov %vm7286_vm3  ;;  %v6607_v58 = vcombine.low %v6582_v41, %v6585_v16  ;;  %v3609_v53 = vshll.u32 %v4705_v8, 16  ;;  %v3222_v11 = vor.u32 %v3220_v19, %v3218_v62  ;;  %v6621_v19 = vld [vmem:[%s7134_s3 + $0x2a] sm:$0x3] }
  0x85   : > { %5117 = vmatmul.mubr.msk.bf16.gmra.mrb[4].mxu0 %vm7286_vm3, %v4669_v3  ;;  %v4561_v3 = vcombine.low %v6530_v37, %v6535_v35  ;;  %vm7296_vm3 = vcmask 1041408   ;;  %vm7297_vm11 = vcmp.ne.s16.totalorder %v5959_v23, 0  ;;  %v1554_v15 = vshrl.u32 %v6523_v33, 16 }
  0x86   : > { %5122 = vmatprep.mubr.msk.bf16.mxu0 %vm7289_vm4, %v3203_v25  ;;  %v3861_v25 = vsel %vm5801_vm14, %v6564_v54, 0  ;;  %v3322_v63 = vsel %vm7297_vm11, %v6431_v0, 0  ;;  %v6616_v51 = vrot.slane %v3609_v53, 1  ;;  %vm7298_vm4 = vcmp.ne.s16.totalorder %v6027_v46, 0  ;;  %vm7302_vm11 = vmmov %vm7293_vm1 }
  0x87   : > { %4993 = vmatmul.mubr.msk.bf16.vlgmr.msra.gmra.mrb[0].mxu1 %vm7291_vm7, %v4551_v47  ;;  %v6598_v45 = vcombine.low %v3860_v60, %v3861_v25  ;;  %v6602_v47 = vcombine.low %v6564_v54, %v6571_v7  ;;  %v3351_v60 = vrot.slane %v4685_v4, 1  ;;  %v6613_v25 = vrot.slane %v4686_v44, 1  ;;  %vm7300_vm7 = vmmov %vm7293_vm1 }
  0x88   : > { %5001 = vmatpush3.bf16.msra.mxu1 %v1591_v5  ;;  %4996 = vmatprep.mubr.msk.bf16.mxu1 %vm7293_vm1, %v4552_v52  ;;  %v3613_v5 = vshrl.u32 %v4705_v8, 16  ;;  %v1558_v52 = vshll.u32 %v4561_v3, 16  ;;  %v3323_v62 = vsel %vm7298_vm4, %v6449_v34, 0  ;;  %vm7299_vm0 = vcmp.ne.s16.totalorder %v6062_v12, 0 }
  0x89   : > { %7294 = vst [vmem:[#allocation11_spill] sm:$0xff] %v6598_v45  ;;  %7295 = vst [vmem:[#allocation12_spill] sm:$0xff] %v6602_v47  ;;  %5418 = vmatprep.subr.msk.bf16.mxu1 %vm7296_vm3, %v4568_v26  ;;  %v3617_v61 = vshll.u32 %v6602_v47, 16  ;;  %v3324_v4 = vsel %vm7299_vm0, %v6455_v9, 0  ;;  %v1562_v44 = vshrl.u32 %v4561_v3, 16  ;;  %v1553_v33 = vsel %vm7292_vm6, %v1548_v39, %v1552_v55 }
  0x8a   : > { %v1566_v53 = vshll.u32 %v6607_v58, 16  ;;  %v6635_v45 = vld [vmem:[%s5695_s28 + $0x28] sm:$0x1]  ;;  %v3615_v47 = vor.u32 %v3613_v5, %v6616_v51  ;;  %vm7301_vm3 = vmmov %vm7292_vm6  ;;  %v4687_v3 = vcombine.low %v6577_v2, %v3322_v63  ;;  %v1666_v9 = vld [vmem:[%s5695_s28 + $0x8] sm:$0xe]  ;;  %vm7303_vm4 = vcmask 1046528  }
  0x8b   : > { %v6629_v8 = vrot.slane %v3617_v61, 1  ;;  %v3227_v32 = vsel %vm7301_vm3, %v3222_v11, %v3226_v18  ;;  %v1560_v61 = vrot.slane %v1558_v52, 1  ;;  %v3353_v39 = vsel %vm7303_vm4, %v3351_v60, %v6613_v25  ;;  %vm7306_vm6 = vmmov %vm7301_vm3  ;;  %v6659_v63 = vld [vmem:[%s6362_s29 + $0x8] sm:$0xf] }
  0x8c   : > { %vm7304_vm0 = vcmask 1041408   ;;  %v4688_v5 = vcombine.low %v3323_v62, %v3324_v4  ;;  %v1556_v18 = vor.u32 %v1554_v15, %v1552_v55  ;;  %v1568_v52 = vrot.slane %v1566_v53, 1 }
  0x8d   : > { %5123 = vmatmul.mubr.msk.bf16.vlgmr.msra.gmra.mrb[0].mxu0 %vm7300_vm7, %v3211_v59  ;;  %v3725_v59 = vld [vmem:[%s6362_s29 + $0x4] sm:$0xe]  ;;  %vm7305_vm7 = vmmov %vm7304_vm0  ;;  %v6652_v11 = vsel %vm7306_vm6, %v3615_v47, %v6629_v8  ;;  %v1564_v2 = vor.u32 %v1562_v44, %v1560_v61  ;;  %vm7307_vm3 = vcmp.ne.s16.totalorder %v5903_v13, 0  ;;  %vm7309_vm4 = vcmp.ne.s16.totalorder %v5907_v14, 0 }
  0x8e   : > { %5131 = vmatpush3.bf16.msra.mxu0 %v6516_v28  ;;  %5126 = vmatprep.mubr.msk.bf16.mxu0 %vm7293_vm1, %v3219_v40  ;;  %v1723_v28 = vsel %vm7305_vm7, %v4568_v26, 0  ;;  %v1570_v40 = vshrl.u32 %v6607_v58, 16  ;;  %v1667_v26 = vsel %vm7282_vm5, %v1666_v9, 0  ;;  %v3726_v60 = vsel %vm7282_vm5, %v3725_v59, 0  ;;  %vm7311_vm7 = vmmov %vm7309_vm4 }
  0x8f   : > { %4997 = vmatmul.mubr.msk.bf16.gmra.mrb[4].mxu1 %vm7302_vm11, %v4553_v38  ;;  %5432 = vmatprep.subr.msk.bf16.mxu0 %vm7304_vm0, %v6621_v19  ;;  %v4563_v38 = vcombine.low %v6635_v45, %v6635_v45  ;;  %v3727_v55 = vsel %vm7307_vm3, %v6659_v63, 0  ;;  %vm7308_vm11 = vmmov %vm7307_vm3  ;;  %v1669_v58 = vsel %vm7309_vm4, %v6497_v10, 0  ;;  %vm7310_vm0 = vcmp.ne.s16.totalorder %v5914_v56, 0 }
  0x90   : > { %5002 = vmatprep.mubr.msk.bf16.mxu1 %vm7293_vm1, %v1553_v33  ;;  %v1668_v47 = vsel %vm7308_vm11, %v6473_v43, 0  ;;  %v1670_v15 = vsel %vm7310_vm0, %v6500_v24, 0  ;;  %v3728_v9 = vsel %vm7311_vm7, %v6538_v42, 0  ;;  %vm7312_vm6 = vmmov %vm7310_vm0  ;;  %v4714_v4 = vcombine.low %v3726_v60, %v3727_v55 }
  0x91   : > { %v3729_v62 = vsel %vm7312_vm6, %v6551_v49, 0  ;;  %vm7313_vm1 = vcmp.ne.s16.totalorder %v5945_v48, 0  ;;  %vm7314_vm3 = vcmp.ne.s16.totalorder %v5959_v23, 0  ;;  %vm7315_vm11 = vsmask.f32 7424 }
  0x92   : > { %v3730_v43 = vsel %vm7313_vm1, %v6564_v54, 0  ;;  %v3731_v10 = vsel %vm7314_vm3, %v6571_v7, 0  ;;  %v1561_v44 = vsel %vm7315_vm11, %v1556_v18, %v1560_v61  ;;  %v1574_v24 = vshll.u32 %v4563_v38, 16  ;;  %vm7317_vm0 = vmmov %vm7315_vm11  ;;  %v4578_v54 = vld [vmem:[%s7134_s3 + $0x12] sm:$0x3] }
  0x93   : > { %v4715_v33 = vcombine.low %v3728_v9, %v3729_v62  ;;  %v4716_v53 = vcombine.low %v3730_v43, %v3731_v10  ;;  %vm7316_vm4 = vcmask 31744   ;;  %v1569_v59 = vsel %vm7317_vm0, %v1564_v2, %v1568_v52  ;;  %v3567_v62 = vld [vmem:[%s6362_s29 + $0x4] sm:$0xf] }
  0x94   : > { %v4569_v42 = vcombine.low %v1667_v26, %v1668_v47  ;;  %v4570_v49 = vcombine.low %v1669_v58, %v1670_v15  ;;  %v3760_v60 = vrot.slane %v4714_v4, 1  ;;  %vm7318_vm7 = vmmov %vm7316_vm4  ;;  %v3354_v55 = vrot.slane %v4687_v3, 1 }
  0x95   : > { %5127 = vmatmul.mubr.msk.bf16.gmra.mrb[4].mxu0 %vm7316_vm4, %v3227_v32  ;;  %v3761_v7 = vrot.slane %v4715_v33, 1  ;;  %v6696_v56 = vrot.slane %v4716_v53, 1  ;;  %vm7319_vm6 = vmmov %vm7316_vm4  ;;  %v3356_v61 = vrot.slane %v4688_v5, 1  ;;  %vm7320_vm1 = vcmp.ne.s16.totalorder %v6047_v21, 0 }
  0x96   : > { %5132 = vmatprep.mubr.msk.bf16.mxu0 %vm7318_vm7, %v3353_v39  ;;  %v3325_v32 = vsel %vm7320_vm1, %v6458_v6, 0  ;;  %vm7321_vm3 = vmmov %vm7316_vm4  ;;  %v1572_v18 = vor.u32 %v1570_v40, %v1568_v52  ;;  %v1576_v39 = vrot.slane %v1574_v24, 1  ;;  %vm7322_vm11 = vcmask 1046528  }
  0x97   : > { %5003 = vmatmul.mubr.msk.bf16.vlgmr.msra.gmra.mrb[0].mxu1 %vm7319_vm6, %v1561_v44  ;;  %v6704_v3 = vsel %vm7322_vm11, %v3760_v60, %v3761_v7  ;;  %vm7323_vm4 = vmmov %vm7322_vm11  ;;  %v1701_v38 = vrot.slane %v4569_v42, 1  ;;  %v1702_v26 = vrot.slane %v4570_v49, 1  ;;  %vm7324_vm0 = vcmp.ne.s16.totalorder %v5945_v48, 0  ;;  %v1799_v60 = vld [vmem:[%s5742_s9 + $0x4] sm:$0xf] }
  0x98   : > { %5011 = vmatpush3.bf16.msra.mxu1 %v1723_v28  ;;  %5006 = vmatprep.mubr.msk.bf16.mxu1 %vm7321_vm3, %v1569_v59  ;;  %v6708_v2 = vsel %vm7323_vm4, %v3761_v7, %v6696_v56  ;;  %v1671_v5 = vsel %vm7324_vm0, %v6530_v37, 0  ;;  %vm7325_vm7 = vcmp.ne.s16.totalorder %v5959_v23, 0  ;;  %vm7326_vm6 = vcmask 1041408   ;;  %vm7327_vm1 = vmmov %vm7323_vm4  ;;  %v1798_v59 = vld [vmem:[%s5742_s9] sm:$0xf] }
  0x99   : > { %v1672_v6 = vsel %vm7325_vm7, %v6535_v35, 0  ;;  %5419 = vmatprep.subr.msk.bf16.mxu1 %vm7326_vm6, %v4578_v54  ;;  %v3355_v28 = vsel %vm7327_vm1, %v6613_v25, %v3354_v55  ;;  %v4689_v40 = vcombine.low %v3325_v32, %v3325_v32  ;;  %vm7328_vm3 = vcmp.ne.s16.totalorder %v6027_v46, 0  ;;  %vm7330_vm4 = vmmov %vm7326_vm6  ;;  %v4703_v25 = vld [vmem:[%s7134_s3 + $0x2c] sm:$0x3] }
  0x9a   : > { %v1673_v7 = vsel %vm7328_vm3, %v6582_v41, 0  ;;  %vm7329_vm11 = vcmp.ne.s16.totalorder %v6062_v12, 0  ;;  %v3492_v37 = vsel %vm7330_vm4, %v6621_v19, 0  ;;  %vm7331_vm0 = vmmov %vm7327_vm1  ;;  %vm7332_vm7 = vsmask.f32 7424 }
  0x9b   : > { %v1674_v42 = vsel %vm7329_vm11, %v6585_v16, 0  ;;  %v3357_v52 = vsel %vm7331_vm0, %v3354_v55, %v3356_v61  ;;  %v1577_v35 = vsel %vm7332_vm7, %v1572_v18, %v1576_v39  ;;  %v4571_v47 = vcombine.low %v1671_v5, %v1672_v6  ;;  %vm7334_vm1 = vmmov %vm7331_vm0  ;;  %v4587_v55 = vld [vmem:[%s7134_s3 + $0x14] sm:$0x3] }
  0x9c   : > { %vm7333_vm6 = vcmask 31744   ;;  %v1703_v41 = vsel %vm7334_vm1, %v1701_v38, %v1702_v26  ;;  %v4572_v58 = vcombine.low %v1673_v7, %v1674_v42  ;;  %v3358_v16 = vrot.slane %v4689_v40, 1  ;;  %v1924_v38 = vld [vmem:[%s5742_s9] sm:$0xf]  ;;  %v6788_v40 = vld [vmem:[%s7134_s3 + $0x2e] sm:$0x3] }
  0x9d   : > { %5133 = vmatmul.mubr.msk.bf16.vlgmr.msra.gmra.mrb[0].mxu0 %vm7333_vm6, %v3355_v28  ;;  %vm7335_vm3 = vmmov %vm7333_vm6  ;;  %v3449_v19 = vsel %vm5897_vm9, %v6401_v20, 0  ;;  %v3450_v15 = vsel %vm5947_vm10, %v6409_v27, 0  ;;  %v1704_v9 = vrot.slane %v4571_v47, 1  ;;  %vm7338_vm7 = vcmp.ne.s16.totalorder %v6047_v21, 0 }
  0x9e   : > { %5141 = vmatpush3.bf16.msra.mxu0 %v3492_v37  ;;  %5136 = vmatprep.mubr.msk.bf16.mxu0 %vm7335_vm3, %v3357_v52  ;;  %vm7336_vm11 = vmmov %vm7335_vm3  ;;  %v1706_v4 = vrot.slane %v4572_v58, 1  ;;  %v1675_v43 = vsel %vm7338_vm7, %v6635_v45, 0  ;;  %v4695_v20 = vcombine.low %v3449_v19, %v3450_v15  ;;  %v4704_v44 = vcombine.low %v3567_v62, %v6659_v63  ;;  %v1800_v37 = vld [vmem:[%s5742_s9 + $0x8] sm:$0xf]  ;;  %v6793_v52 = vld [vmem:[%s6362_s29 + $0x1c] sm:$0xf] }
  0x9f   : > { %5007 = vmatmul.mubr.msk.bf16.gmra.mrb[4].mxu1 %vm7336_vm11, %v1577_v35  ;;  %5433 = vmatprep.subr.msk.bf16.mxu0 %vm7330_vm4, %v4703_v25  ;;  %vm7337_vm0 = vmmov %vm7335_vm3  ;;  %v1705_v24 = vsel %vm7334_vm1, %v1702_v26, %v1704_v9  ;;  %v4573_v27 = vcombine.low %v1675_v43, %v1675_v43  ;;  %v3451_v49 = vsel %vm5782_vm12, %v6412_v31, 0  ;;  %v3452_v45 = vsel %vm5801_vm14, %v6424_v30, 0  ;;  %v6782_v26 = vld [vmem:[%s5742_s9 + $0x4] sm:$0xf]  ;;  %v6796_v35 = vld [vmem:[%s6362_s29 + $0x20] sm:$0xf] }
  0xa0   : > { %5012 = vmatprep.mubr.msk.bf16.mxu1 %vm7337_vm0, %v1703_v41  ;;  %vm7339_vm6 = vmmov %vm7334_vm1  ;;  %v3453_v31 = vsel %vm5999_vm8, %v6431_v0, 0  ;;  %v3454_v30 = vsel %vm6014_vm15, %v6449_v34, 0  ;;  %v4696_v32 = vcombine.low %v3451_v49, %v3452_v45  ;;  %v1806_v18 = vsel %vm5897_vm9, %v1798_v59, 0  ;;  %v3448_v34 = vld [vmem:[%s6362_s29 + $0x20] sm:$0xf] }
  0xa1   : > { %v3359_v10 = vsel %vm7339_vm6, %v3356_v61, %v3358_v16  ;;  %vm7340_vm3 = vmmov %vm7337_vm0  ;;  %v1708_v61 = vrot.slane %v4573_v27, 1  ;;  %v1807_v39 = vsel %vm5947_vm10, %v1799_v60, 0  ;;  %v4697_v0 = vcombine.low %v3453_v31, %v3454_v30  ;;  %v1801_v19 = vld [vmem:[%s5742_s9 + $0xc] sm:$0xf]  ;;  %v1802_v15 = vld [vmem:[%s5742_s9 + $0x10] sm:$0xf] }
  0xa2   : > { %vm7341_vm11 = vmmov %vm7330_vm4  ;;  %v3602_v6 = vshrl.u32 %v4704_v44, 16  ;;  %v4579_v42 = vcombine.low %v1806_v18, %v1807_v39  ;;  %v3456_v16 = vsel %vm6053_vm13, %v3448_v34, 0  ;;  %v1803_v62 = vld [vmem:[%s5742_s9 + $0x14] sm:$0xf]  ;;  %v6813_v43 = vld [vmem:[%s5742_s9 + $0xc] sm:$0xf] }
  0xa3   : > { %v1849_v33 = vsel %vm7341_vm11, %v4578_v54, 0  ;;  %vm7342_vm4 = vmmov %vm7334_vm1  ;;  %v3604_v54 = vshll.u32 %v4704_v44, 16  ;;  %v1809_v27 = vsel %vm5801_vm14, %v1801_v19, 0  ;;  %v1811_v59 = vsel %vm6014_vm15, %v1803_v62, 0  ;;  %v7356_v30 = vld [vmem:[#allocation12_spill] sm:$0xff] }
  0xa4   : > { %v1707_v53 = vsel %vm7342_vm4, %v1704_v9, %v1706_v4  ;;  %vm7343_vm7 = vmmov %vm7337_vm0  ;;  %v4588_v9 = vcombine.low %v1924_v38, %v6782_v26  ;;  %v1804_v39 = vld [vmem:[%s5742_s9 + $0x18] sm:$0xf]  ;;  %v6844_v34 = vld [vmem:[%s5742_s9 + $0x14] sm:$0xf] }
  0xa5   : > { %5137 = vmatmul.mubr.msk.bf16.gmra.mrb[4].mxu0 %vm7340_vm3, %v3359_v10  ;;  %vm7344_vm6 = vmmov %vm7337_vm0  ;;  %v3606_v28 = vrot.slane %v3604_v54, 1  ;;  %v3621_v54 = vshrl.u32 %v7356_v30, 16  ;;  %v1812_v19 = vsel %vm6035_vm2, %v1804_v39, 0 }
  0xa6   : > { %5142 = vmatprep.mubr.msk.bf16.mxu0 %vm7337_vm0, %v4695_v20  ;;  %vm7345_vm1 = vmmov %vm7341_vm11  ;;  %v4707_v20 = vcombine.low %v6793_v52, %v6796_v35  ;;  %v1961_v45 = vshll.u32 %v4588_v9, 16 }
  0xa7   : > { %5013 = vmatmul.mubr.msk.bf16.vlgmr.msra.gmra.mrb[0].mxu1 %vm7343_vm7, %v1705_v24  ;;  %vm7346_vm3 = vmmov %vm7345_vm1  ;;  %v3607_v10 = vor.u32 %v3606_v28, %v3602_v6  ;;  %v1808_v24 = vsel %vm5782_vm12, %v1800_v37, 0  ;;  %v6857_v37 = vld [vmem:[%s5742_s9 + $0x1c] sm:$0xf] }
  0xa8   : > { %5021 = vmatpush3.bf16.msra.mxu1 %v1849_v33  ;;  %5016 = vmatprep.mubr.msk.bf16.mxu1 %vm7344_vm6, %v1707_v53  ;;  %v3650_v5 = vsel %vm7346_vm3, %v4703_v25, 0  ;;  %vm7347_vm11 = vmmov %vm7342_vm4  ;;  %v7349_v25 = vld [vmem:[#allocation8_spill] sm:$0xff]  ;;  %v6826_v33 = vld [vmem:[%s6362_s29 + $0x24] sm:$0x1]  ;;  %v1810_v53 = vsel %vm5999_vm8, %v1802_v15, 0  ;;  %v4580_v31 = vcombine.low %v1808_v24, %v1809_v27  ;;  %v1963_v6 = vrot.slane %v1961_v45, 1 }
  0xa9   : > { %5420 = vmatprep.subr.msk.bf16.mxu1 %vm7345_vm1, %v4587_v55  ;;  %v1709_v7 = vsel %vm7347_vm11, %v1706_v4, %v1708_v61  ;;  %vm7348_vm4 = vmmov %vm7337_vm0  ;;  %v3455_v41 = vsel %vm6035_vm2, %v7349_v25, 0  ;;  %v6810_v4 = vld [vmem:[%s5742_s9 + $0x8] sm:$0xf]  ;;  %vm7355_vm3 = vsmask.f32 7424  ;;  %v3625_v61 = vshll.u32 %v4707_v20, 16 }
  0xaa   : > { %vm7352_vm7 = vmmov %vm7337_vm0  ;;  %v4698_v44 = vcombine.low %v3455_v41, %v3456_v16  ;;  %v4589_v49 = vcombine.low %v6810_v4, %v6813_v43  ;;  %v3612_v60 = vsel %vm7355_vm3, %v3607_v10, %v6616_v51  ;;  %v4581_v18 = vcombine.low %v1810_v53, %v1811_v59  ;;  %v1805_v51 = vld [vmem:[%s5742_s9 + $0x1c] sm:$0xf] }
  0xab   : > { %vm7353_vm6 = vmmov %vm7345_vm1  ;;  %v3623_v25 = vor.u32 %v3621_v54, %v6629_v8  ;;  %v3627_v41 = vrot.slane %v3625_v61, 1  ;;  %v1813_v15 = vsel %vm6053_vm13, %v1805_v51, 0 }
  0xac   : > { %vm7354_vm1 = vmmov %vm7337_vm0  ;;  %v1966_v28 = vshll.u32 %v4589_v49, 16  ;;  %v4582_v27 = vcombine.low %v1812_v19, %v1813_v15  ;;  %v1970_v45 = vshrl.u32 %v4589_v49, 16 }
  0xad   : > { %5143 = vmatmul.mubr.msk.bf16.vlgmr.msra.gmra.mrb[0].mxu0 %vm7348_vm4, %v4696_v32  ;;  %v4708_v32 = vcombine.low %v6826_v33, %v6826_v33  ;;  %vm7357_vm11 = vmmov %vm7337_vm0 }
  0xae   : > { %5151 = vmatpush3.bf16.msra.mxu0 %v3650_v5  ;;  %5146 = vmatprep.mubr.msk.bf16.mxu0 %vm7337_vm0, %v4697_v0  ;;  %v6841_v0 = vld [vmem:[%s5742_s9 + $0x10] sm:$0xf]  ;;  %vm7358_vm4 = vmmov %vm7353_vm6  ;;  %v1959_v5 = vshrl.u32 %v4588_v9, 16  ;;  %v3629_v9 = vshrl.u32 %v4707_v20, 16  ;;  %v1968_v10 = vrot.slane %v1966_v28, 1 }
  0xaf   : > { %5017 = vmatmul.mubr.msk.bf16.gmra.mrb[4].mxu1 %vm7352_vm7, %v1709_v7  ;;  %5434 = vmatprep.subr.msk.bf16.mxu0 %vm7353_vm6, %v6788_v40  ;;  %v2007_v38 = vsel %vm7358_vm4, %v4587_v55, 0  ;;  %v4597_v7 = vld [vmem:[%s7134_s3 + $0x16] sm:$0x3]  ;;  %vm7359_vm7 = vmmov %vm7337_vm0  ;;  %v4590_v55 = vcombine.low %v6841_v0, %v6844_v34  ;;  %v3633_v16 = vshll.u32 %v4708_v32, 16  ;;  %v4723_v20 = vld [vmem:[%s7134_s3 + $0x30] sm:$0x3] }
  0xb0   : > { %5022 = vmatprep.mubr.msk.bf16.mxu1 %vm7354_vm1, %v4579_v42  ;;  %v6854_v42 = vld [vmem:[%s5742_s9 + $0x18] sm:$0xf]  ;;  %vm7360_vm6 = vmmov %vm7337_vm0  ;;  %v1964_v62 = vor.u32 %v1963_v6, %v1959_v5  ;;  %v2082_v32 = vld [vmem:[%s5742_s9] sm:$0xe]  ;;  %v1972_v49 = vor.u32 %v1970_v45, %v1968_v10 }
  0xb1   : > { %vm7361_vm1 = vmmov %vm7358_vm4  ;;  %v4591_v8 = vcombine.low %v6854_v42, %v6857_v37  ;;  %v1974_v53 = vshll.u32 %v4590_v55, 16  ;;  %v3635_v59 = vrot.slane %v3633_v16, 1  ;;  %v1978_v30 = vshrl.u32 %v4590_v55, 16 }
  0xb2   : > { %vm7362_vm3 = vmmov %vm7361_vm1  ;;  %v2083_v6 = vsel %vm7282_vm5, %v2082_v32, 0  ;;  %v2220_v50 = vsel %vm6014_vm15, %v6854_v42, 0 }
  0xb3   : > { %vm7364_vm4 = vmmov %vm7337_vm0  ;;  %v1982_v54 = vshll.u32 %v4591_v8, 16  ;;  %v1976_v61 = vrot.slane %v1974_v53, 1  ;;  %v1986_v15 = vshrl.u32 %v4591_v8, 16 }
  0xb5   : > { %5147 = vmatmul.mubr.msk.bf16.gmra.mrb[4].mxu0 %vm7357_vm11, %v4698_v44  ;;  %v3782_v44 = vsel %vm7362_vm3, %v6788_v40, 0  ;;  %vm7363_vm11 = vsmask.f32 7424  ;;  %v6881_v40 = vld [vmem:[%s5742_s9 + $0x20] sm:$0x1]  ;;  %vm7368_vm3 = vmmov %vm7364_vm4  ;;  %v1980_v51 = vor.u32 %v1978_v30, %v1976_v61  ;;  %v1984_v5 = vrot.slane %v1982_v54, 1 }
  0xb6   : > { %5152 = vmatprep.mubr.msk.bf16.mxu0 %vm7337_vm0, %v3612_v60  ;;  %v3628_v24 = vsel %vm7363_vm11, %v3623_v25, %v3627_v41  ;;  %v3631_v60 = vor.u32 %v3629_v9, %v3627_v41  ;;  %vm7365_vm0 = vmmov %vm7363_vm11  ;;  %vm7369_vm11 = vcmp.ne.s16.totalorder %v6027_v46, 0  ;;  %v4592_v39 = vcombine.low %v6881_v40, %v6881_v40  ;;  %v7373_v41 = vld [vmem:[#allocation5_spill] sm:$0xff] }
  0xb7   : > { %5023 = vmatmul.mubr.msk.bf16.vlgmr.msra.gmra.mrb[0].mxu1 %vm7359_vm7, %v4580_v31  ;;  %v1969_v31 = vsel %vm7365_vm0, %v1964_v62, %v1968_v10  ;;  %vm7366_vm7 = vmmov %vm7364_vm4  ;;  %v1985_v10 = vsel %vm7365_vm0, %v1980_v51, %v1984_v5  ;;  %v7394_v51 = vld [vmem:[#allocation9_spill] sm:$0xff] }
  0xb8   : > { %5031 = vmatpush3.bf16.msra.mxu1 %v2007_v38  ;;  %5026 = vmatprep.mubr.msk.bf16.mxu1 %vm7360_vm6, %v4581_v18  ;;  %vm7367_vm6 = vmmov %vm7364_vm4  ;;  %v3636_v38 = vsel %vm7365_vm0, %v3631_v60, %v3635_v59  ;;  %v1990_v9 = vshll.u32 %v4592_v39, 16 }
  0xb9   : > { %5421 = vmatprep.subr.msk.bf16.mxu1 %vm7361_vm1, %v4597_v7 }
  0xba   : > { %v1992_v59 = vrot.slane %v1990_v9, 1 }
  0xbd   : > { %5153 = vmatmul.mubr.msk.bf16.vlgmr.msra.gmra.mrb[0].mxu0 %vm7364_vm4, %v6652_v11  ;;  %v3732_v11 = vsel %vm7369_vm11, %v6793_v52, 0  ;;  %vm7370_vm4 = vcmp.ne.s16.totalorder %v6062_v12, 0  ;;  %vm7376_vm11 = vcmask 31744  }
  0xbe   : > { %5161 = vmatpush3.bf16.msra.mxu0 %v3782_v44  ;;  %5156 = vmatprep.mubr.msk.bf16.mxu0 %vm7366_vm7, %v3628_v24  ;;  %v3733_v18 = vsel %vm7370_vm4, %v6796_v35, 0  ;;  %vm7371_vm7 = vcmp.ne.s16.totalorder %v5903_v13, 0  ;;  %vm7377_vm4 = vcmask 1041408  }
  0xbf   : > { %5027 = vmatmul.mubr.msk.bf16.gmra.mrb[4].mxu1 %vm7367_vm6, %v4582_v27  ;;  %5435 = vmatprep.subr.msk.bf16.mxu0 %vm7361_vm1, %v4723_v20  ;;  %v2084_v28 = vsel %vm7371_vm7, %v6782_v26, 0  ;;  %vm7372_vm6 = vcmp.ne.s16.totalorder %v5907_v14, 0  ;;  %vm7374_vm1 = vcmp.ne.s16.totalorder %v7373_v41, 0  ;;  %v4717_v16 = vcombine.low %v3732_v11, %v3733_v18  ;;  %vm7378_vm7 = vmmov %vm7376_vm11  ;;  %v4607_v27 = vld [vmem:[%s7134_s3 + $0x18] sm:$0x3] }
  0xc0   : > { %5032 = vmatprep.mubr.msk.bf16.mxu1 %vm7368_vm3, %v1969_v31  ;;  %v2085_v25 = vsel %vm7372_vm6, %v6810_v4, 0  ;;  %v2086_v55 = vsel %vm7374_vm1, %v6813_v43, 0  ;;  %vm7375_vm3 = vmmov %vm7365_vm0  ;;  %v2139_v62 = vsel %vm7377_vm4, %v4597_v7, 0  ;;  %v4598_v44 = vcombine.low %v2083_v6, %v2084_v28  ;;  %v4732_v11 = vld [vmem:[%s7134_s3 + $0x32] sm:$0x3] }
  0xc1   : > { %v1977_v19 = vsel %vm7375_vm3, %v1972_v49, %v1976_v61  ;;  %v4599_v24 = vcombine.low %v2085_v25, %v2086_v55  ;;  %vm7379_vm6 = vmmov %vm7378_vm7  ;;  %v3765_v53 = vrot.slane %v4717_v16, 1  ;;  %vm7380_vm1 = vcmp.ne.s16.totalorder %v6047_v21, 0  ;;  %v3976_v6 = vld [vmem:[%s6362_s29 + $0x8] sm:$0xf]  ;;  %v6957_v28 = vld [vmem:[%s6362_s29 + $0xc] sm:$0xf] }
  0xc2   : > { %v3734_v8 = vsel %vm7380_vm1, %v6826_v33, 0  ;;  %vm7381_vm3 = vmmov %vm7379_vm6  ;;  %v1988_v7 = vor.u32 %v1986_v15, %v1984_v5  ;;  %v2117_v45 = vrot.slane %v4598_v44, 1  ;;  %vm7383_vm4 = vcmp.ne.s16.totalorder %v5959_v23, 0 }
  0xc3   : > { %v2118_v60 = vrot.slane %v4599_v24, 1  ;;  %v2088_v31 = vsel %vm7383_vm4, %v6844_v34, 0  ;;  %vm7384_vm0 = vcmask 1041408   ;;  %v4718_v30 = vcombine.low %v3734_v8, %v3734_v8 }
  0xc4   : > { %vm7387_vm1 = vmmov %vm7384_vm0  ;;  %vm7390_vm4 = vcmask 31744   ;;  %v3859_v5 = vsel %vm5947_vm10, %v7394_v51, 0  ;;  %v3863_v8 = vsel %vm6014_vm15, %v6793_v52, 0  ;;  %v5528_v52 = vld [vmem:[%s7134_s3 + $0x1a] sm:$0x3] }
  0xc5   : > { %5157 = vmatmul.mubr.msk.bf16.gmra.mrb[4].mxu0 %vm7376_vm11, %v3636_v38  ;;  %vm7382_vm11 = vcmp.ne.s16.totalorder %v5945_v48, 0  ;;  %v3901_v61 = vsel %vm7387_vm1, %v4723_v20, 0  ;;  %v3767_v20 = vrot.slane %v4718_v30, 1  ;;  %v6997_v30 = vld [vmem:[%s6362_s29 + $0x18] sm:$0xf] }
  0xc6   : > { %5162 = vmatprep.mubr.msk.bf16.mxu0 %vm7378_vm7, %v6704_v3  ;;  %v2087_v3 = vsel %vm7382_vm11, %v6841_v0, 0  ;;  %vm7385_vm7 = vcmp.ne.s16.totalorder %v6027_v46, 0  ;;  %vm7389_vm11 = vsmask.f32 7424 }
  0xc7   : > { %5033 = vmatmul.mubr.msk.bf16.vlgmr.msra.gmra.mrb[0].mxu1 %vm7379_vm6, %v1977_v19  ;;  %v2089_v33 = vsel %vm7385_vm7, %v6854_v42, 0  ;;  %vm7386_vm6 = vcmp.ne.s16.totalorder %v6062_v12, 0  ;;  %v1993_v49 = vsel %vm7389_vm11, %v1988_v7, %v1992_v59  ;;  %v4600_v18 = vcombine.low %v2087_v3, %v2088_v31  ;;  %vm7392_vm7 = vmmov %vm7390_vm4  ;;  %v3857_v31 = vld [vmem:[%s6362_s29 + $0x24] sm:$0xf] }
  0xc8   : > { %5041 = vmatpush3.bf16.msra.mxu1 %v2139_v62  ;;  %5036 = vmatprep.mubr.msk.bf16.mxu1 %vm7381_vm3, %v1985_v10  ;;  %v2090_v54 = vsel %vm7386_vm6, %v6857_v37, 0  ;;  %vm7388_vm3 = vcmask 1046528   ;;  %vm7393_vm6 = vmmov %vm7390_vm4  ;;  %vm7396_vm11 = vcmp.ne.s16.totalorder %v6047_v21, 0  ;;  %v4733_v19 = vcombine.low %v3976_v6, %v6957_v28  ;;  %v6966_v62 = vld [vmem:[%s6362_s29 + $0x10] sm:$0xf] }
  0xc9   : > { %5422 = vmatprep.subr.msk.bf16.mxu1 %vm7384_vm0, %v4607_v27  ;;  %v3766_v32 = vsel %vm7388_vm3, %v6696_v56, %v3765_v53  ;;  %vm7391_vm0 = vmmov %vm7388_vm3  ;;  %v4601_v38 = vcombine.low %v2089_v33, %v2090_v54  ;;  %v3858_v56 = vsel %vm5897_vm9, %v6659_v63, 0  ;;  %v2091_v55 = vsel %vm7396_vm11, %v6881_v40, 0  ;;  %v6969_v10 = vld [vmem:[%s6362_s29 + $0x14] sm:$0xf]  ;;  %v7402_v40 = vld [vmem:[#allocation10_spill] sm:$0xff] }
  0xca   : > { %v2119_v39 = vsel %vm7391_vm0, %v2117_v45, %v2118_v60  ;;  %vm7395_vm3 = vmmov %vm7390_vm4  ;;  %v4724_v63 = vcombine.low %v3858_v56, %v3859_v5  ;;  %v4602_v9 = vcombine.low %v2091_v55, %v2091_v55  ;;  %v4013_v7 = vshll.u32 %v4733_v19, 16  ;;  %v7000_v33 = vld [vmem:[%s6362_s29 + $0x1c] sm:$0xf] }
  0xcb   : > { %v2122_v25 = vrot.slane %v4601_v38, 1  ;;  %vm7401_vm11 = vmmov %vm7395_vm3  ;;  %v2215_v45 = vsel %vm5897_vm9, %v6782_v26, 0  ;;  %v4011_v26 = vshrl.u32 %v4733_v19, 16  ;;  %v3865_v38 = vsel %vm6053_vm13, %v3857_v31, 0 }
  0xcc   : > { %v2124_v59 = vrot.slane %v4602_v9, 1  ;;  %v4015_v54 = vrot.slane %v4013_v7, 1  ;;  %v2217_v5 = vsel %vm5782_vm12, %v6813_v43, 0  ;;  %v2219_v55 = vsel %vm5999_vm8, %v6844_v34, 0  ;;  %v5530_v43 = vld [vmem:[%s5742_s9 + $0x20] sm:$0xf] }
  0xcd   : > { %5163 = vmatmul.mubr.msk.bf16.vlgmr.msra.gmra.mrb[0].mxu0 %vm7390_vm4, %v6708_v2  ;;  %v2120_v2 = vrot.slane %v4600_v18, 1  ;;  %vm7397_vm4 = vmmov %vm7391_vm0  ;;  %v7011_v18 = vld [vmem:[%s6362_s29 + $0x24] sm:$0xf]  ;;  %vm7413_vm12 = vsmask.f32 7424 }
  0xce   : > { %5171 = vmatpush3.bf16.msra.mxu0 %v3901_v61  ;;  %5166 = vmatprep.mubr.msk.bf16.mxu0 %vm7392_vm7, %v3766_v32  ;;  %v3768_v16 = vsel %vm7397_vm4, %v3765_v53, %v3767_v20  ;;  %vm7398_vm7 = vmmov %vm7395_vm3  ;;  %v3862_v53 = vsel %vm5999_vm8, %v7402_v40, 0  ;;  %v4735_v20 = vcombine.low %v6997_v30, %v7000_v33  ;;  %v4016_v56 = vor.u32 %v4015_v54, %v4011_v26  ;;  %v2214_v40 = vld [vmem:[%s5742_s9 + $0x20] sm:$0xf]  ;;  %v4134_v34 = vld [vmem:[%s6362_s29 + $0x8] sm:$0xe] }
  0xcf   : > { %5037 = vmatmul.mubr.msk.bf16.gmra.mrb[4].mxu1 %vm7393_vm6, %v1993_v49  ;;  %5436 = vmatprep.subr.msk.bf16.mxu0 %vm7387_vm1, %v4732_v11  ;;  %v2121_v15 = vsel %vm7391_vm0, %v2118_v60, %v2120_v2  ;;  %vm7399_vm6 = vmmov %vm7387_vm1  ;;  %v2216_v60 = vsel %vm5947_vm10, %v6810_v4, 0  ;;  %v4726_v3 = vcombine.low %v3862_v53, %v3863_v8  ;;  %v4742_v4 = vld [vmem:[%s7134_s3 + $0x34] sm:$0x3]  ;;  %v7008_v49 = vld [vmem:[%s6362_s29 + $0x20] sm:$0xf] }
  0xd0   : > { %5042 = vmatprep.mubr.msk.bf16.mxu1 %vm7395_vm3, %v2119_v39  ;;  %v2258_v44 = vsel %vm7399_vm6, %v4607_v27, 0  ;;  %vm7400_vm1 = vmmov %vm7391_vm0  ;;  %v4734_v27 = vcombine.low %v6966_v62, %v6969_v10  ;;  %v4608_v32 = vcombine.low %v2215_v45, %v2216_v60  ;;  %v7407_v39 = vld [vmem:[#allocation11_spill] sm:$0xff]  ;;  %v2221_v45 = vsel %vm6035_vm2, %v6857_v37, 0  ;;  %v7423_v37 = vld [vmem:[#allocation4_spill] sm:$0xff] }
  0xd1   : > { %v2123_v24 = vsel %vm7400_vm1, %v2120_v2, %v2122_v25  ;;  %vm7403_vm4 = vmmov %vm7395_vm3  ;;  %v2218_v2 = vsel %vm5801_vm14, %v6841_v0, 0  ;;  %v7415_v53 = vld [vmem:[#allocation3_spill] sm:$0xff]  ;;  %v2222_v60 = vsel %vm6053_vm13, %v2214_v40, 0 }
  0xd2   : > { %vm7404_vm0 = vmmov %vm7399_vm6  ;;  %v4018_v61 = vshll.u32 %v4734_v27, 16  ;;  %v4022_v19 = vshrl.u32 %v4734_v27, 16  ;;  %v4609_v57 = vcombine.low %v2217_v5, %v2218_v2  ;;  %v2387_v8 = vshrl.u32 %v7415_v53, 16 }
  0xd3   : > { %vm7406_vm9 = vmmov %vm7400_vm1 }
  0xd4   : > { %v2125_v29 = vsel %vm7406_vm9, %v2122_v25, %v2124_v59  ;;  %vm7408_vm10 = vmmov %vm7395_vm3  ;;  %v4020_v51 = vrot.slane %v4018_v61, 1  ;;  %v4026_v25 = vshll.u32 %v4735_v20, 16 }
  0xd5   : > { %5167 = vmatmul.mubr.msk.bf16.gmra.mrb[4].mxu0 %vm7398_vm7, %v3768_v16  ;;  %vm7405_vm7 = vmmov %vm7404_vm0  ;;  %v5529_v16 = vld [vmem:[%s5742_s9 + $0x1c] sm:$0xf] }
  0xd6   : > { %5172 = vmatprep.mubr.msk.bf16.mxu0 %vm7395_vm3, %v4724_v63  ;;  %v4059_v17 = vsel %vm7405_vm7, %v4732_v11, 0  ;;  %v3864_v11 = vsel %vm6035_vm2, %v6796_v35, 0  ;;  %vm7409_vm6 = vmmov %vm7395_vm3  ;;  %v4736_v35 = vcombine.low %v7008_v49, %v7011_v18  ;;  %v4620_v63 = vcombine.low %v5529_v16, %v5530_v43 }
  0xd7   : > { %5043 = vmatmul.mubr.msk.bf16.vlgmr.msra.gmra.mrb[0].mxu1 %vm7401_vm11, %v2121_v15  ;;  %vm7410_vm1 = vmmov %vm7395_vm3  ;;  %v4727_v6 = vcombine.low %v3864_v11, %v3865_v38  ;;  %v4021_v0 = vsel %vm7413_vm12, %v4016_v56, %v4020_v51  ;;  %v4030_v15 = vshrl.u32 %v4735_v20, 16  ;;  %v4028_v22 = vrot.slane %v4026_v25, 1 }
  0xd8   : > { %5051 = vmatpush3.bf16.msra.mxu1 %v2258_v44  ;;  %5046 = vmatprep.mubr.msk.bf16.mxu1 %vm7403_vm4, %v2123_v24  ;;  %vm7411_vm3 = vmmov %vm7404_vm0  ;;  %v4034_v9 = vshll.u32 %v4736_v35, 16  ;;  %v3984_v44 = vld [vmem:[%s6362_s29 + $0x28] sm:$0x1]  ;;  %v4610_v24 = vcombine.low %v2219_v55, %v2220_v50  ;;  %v2391_v36 = vshll.u32 %v4620_v63, 16  ;;  %v4024_v42 = vor.u32 %v4022_v19, %v4020_v51 }
  0xd9   : > { %5424 = vmatprep.subr.msk.bf16.mxu1 %vm7404_vm0, %v5528_v52  ;;  %vm7412_vm11 = vmmov %vm7410_vm1  ;;  %v4737_v7 = vcombine.low %v3984_v44, %v3984_v44  ;;  %v4032_v27 = vor.u32 %v4030_v15, %v4028_v22  ;;  %v7418_v52 = vld [vmem:[#allocation2_spill] sm:$0xff]  ;;  %vm7420_vm0 = vcmp.ne.s16.totalorder %v5903_v13, 0  ;;  %vm7421_vm7 = vcmp.ne.s16.totalorder %v5907_v14, 0 }
  0xda   : > { %vm7414_vm14 = vmmov %vm7410_vm1  ;;  %v4036_v59 = vrot.slane %v4034_v9, 1  ;;  %v4136_v31 = vsel %vm7420_vm0, %v6957_v28, 0  ;;  %v4137_v47 = vsel %vm7421_vm7, %v6966_v62, 0  ;;  %vm7422_vm2 = vcmp.ne.s16.totalorder %v7373_v41, 0  ;;  %v5531_v14 = vld [vmem:[%s5742_s9 + $0x24] sm:$0x1] }
  0xdb   : > { %vm7416_vm8 = vmmov %vm7410_vm1  ;;  %v4138_v58 = vsel %vm7422_vm2, %v6969_v10, 0  ;;  %v2393_v26 = vrot.slane %v2391_v36, 1  ;;  %v4038_v61 = vshrl.u32 %v4736_v35, 16  ;;  %v4611_v28 = vcombine.low %v2221_v45, %v2222_v60 }
  0xdc   : > { %vm7417_vm15 = vmmov %vm7410_vm1  ;;  %v4621_v62 = vcombine.low %v5531_v14, %v5531_v14  ;;  %v2395_v35 = vshrl.u32 %v4620_v63, 16  ;;  %vm7436_vm0 = vcmask 1046528  }
  0xdd   : > { %5173 = vmatmul.mubr.msk.bf16.vlgmr.msra.gmra.mrb[0].mxu0 %vm7408_vm10, %v7407_v39  ;;  %vm7419_vm4 = vmmov %vm7410_vm1  ;;  %v4744_v39 = vcombine.low %v4137_v47, %v4138_v58  ;;  %v4040_v10 = vor.u32 %v4038_v61, %v4036_v59 }
  0xde   : > { %5181 = vmatpush3.bf16.msra.mxu0 %v4059_v17  ;;  %5176 = vmatprep.mubr.msk.bf16.mxu0 %vm7409_vm6, %v4726_v3  ;;  %v4135_v3 = vsel %vm7282_vm5, %v4134_v34, 0  ;;  %v2389_v17 = vor.u32 %v2387_v8, %v7423_v37  ;;  %vm7424_vm13 = vmmov %vm7413_vm12  ;;  %v2399_v51 = vshll.u32 %v4621_v62, 16  ;;  %v4753_v8 = vld [vmem:[%s7136_s5] ss:$0 sm:$0xff] }
  0xdf   : > { %5047 = vmatmul.mubr.msk.bf16.gmra.mrb[4].mxu1 %vm7410_vm1, %v2125_v29  ;;  %5437 = vmatprep.subr.msk.bf16.mxu0 %vm7411_vm3, %v4742_v4  ;;  %v4029_v54 = vsel %vm7424_vm13, %v4024_v42, %v4028_v22  ;;  %vm7425_vm9 = vmmov %vm7411_vm3  ;;  %v4042_v29 = vshll.u32 %v4737_v7, 16  ;;  %v4170_v38 = vrot.slane %v4744_v39, 1  ;;  %vm7439_vm13 = vcmp.ne.s16.totalorder %v6047_v21, 0 }
  0xe0   : > { %5052 = vmatprep.mubr.msk.bf16.mxu1 %vm7412_vm11, %v4608_v32  ;;  %v4191_v1 = vsel %vm7425_vm9, %v4742_v4, 0  ;;  %vm7426_vm5 = vmmov %vm7413_vm12  ;;  %v4743_v32 = vcombine.low %v4135_v3, %v4136_v31  ;;  %vm7430_vm11 = vcmp.ne.s16.totalorder %v5945_v48, 0  ;;  %vm7431_vm12 = vcmp.ne.s16.totalorder %v5959_v23, 0 }
  0xe1   : > { %v4037_v13 = vsel %vm7426_vm5, %v4032_v27, %v4036_v59  ;;  %vm7427_vm10 = vmmov %vm7410_vm1  ;;  %v4044_v11 = vrot.slane %v4042_v29, 1  ;;  %v4139_v20 = vsel %vm7430_vm11, %v6997_v30, 0  ;;  %v4140_v56 = vsel %vm7431_vm12, %v7000_v33, 0 }
  0xe2   : > { %vm7428_vm6 = vmmov %vm7426_vm5  ;;  %v4169_v4 = vrot.slane %v4743_v32, 1  ;;  %v4745_v48 = vcombine.low %v4139_v20, %v4140_v56  ;;  %v2401_v23 = vrot.slane %v2399_v51, 1  ;;  %v2397_v33 = vor.u32 %v2395_v35, %v2393_v26 }
  0xe3   : > { %v2394_v41 = vsel %vm7428_vm6, %v2389_v17, %v2393_v26  ;;  %vm7429_vm3 = vmmov %vm7410_vm1 }
  0xe4   : > { %v4171_v30 = vsel %vm7436_vm0, %v4169_v4, %v4170_v38  ;;  %vm7437_vm7 = vmmov %vm7410_vm1  ;;  %v4172_v55 = vrot.slane %v4745_v48, 1 }
  0xe5   : > { %5177 = vmatmul.mubr.msk.bf16.gmra.mrb[4].mxu0 %vm7414_vm14, %v4727_v6  ;;  %vm7432_vm14 = vmmov %vm7410_vm1 }
  0xe6   : > { %5182 = vmatprep.mubr.msk.bf16.mxu0 %vm7416_vm8, %v4021_v0  ;;  %vm7433_vm8 = vcmp.ne.s16.totalorder %v6027_v46, 0  ;;  %vm7438_vm2 = vmmov %vm7410_vm1  ;;  %v4143_v46 = vsel %vm7439_vm13, %v3984_v44, 0 }
  0xe7   : > { %5053 = vmatmul.mubr.msk.bf16.vlgmr.msra.gmra.mrb[0].mxu1 %vm7417_vm15, %v4609_v57  ;;  %v4141_v5 = vsel %vm7433_vm8, %v7008_v49, 0  ;;  %vm7434_vm15 = vcmp.ne.s16.totalorder %v6062_v12, 0  ;;  %vm7443_vm6 = vmmov %vm7436_vm0 }
  0xe8   : > { %5201 = vmatpush3.bf16.msra.mxu1 %v7418_v52  ;;  %5056 = vmatprep.mubr.msk.bf16.mxu1 %vm7419_vm4, %v4610_v24  ;;  %v4142_v2 = vsel %vm7434_vm15, %v7011_v18, 0  ;;  %vm7435_vm4 = vmmov %vm7426_vm5  ;;  %v4747_v18 = vcombine.low %v4143_v46, %v4143_v46  ;;  %v4752_v24 = vld [vmem:[%s7135_s4] ss:$0 sm:$0xff] }
  0xe9   : > { %v4045_v6 = vsel %vm7435_vm4, %v4040_v10, %v4044_v11  ;;  %v4746_v25 = vcombine.low %v4141_v5, %v4142_v2  ;;  %vm7440_vm9 = vmmov %vm7435_vm4 }
  0xea   : > { %v2402_v12 = vsel %vm7440_vm9, %v2397_v33, %v2401_v23  ;;  %vm7441_vm5 = vmmov %vm7436_vm0  ;;  %v4176_v43 = vrot.slane %v4747_v18, 1 }
  0xeb   : > { %v4174_v50 = vrot.slane %v4746_v25, 1  ;;  %v4173_v49 = vsel %vm7441_vm5, %v4170_v38, %v4172_v55  ;;  %vm7445_vm11 = vmmov %vm7436_vm0 }
  0xec   : > { %vm7446_vm12 = vmmov %vm7410_vm1 }
  0xed   : > { %5183 = vmatmul.mubr.msk.bf16.vlgmr.msra.gmra.mrb[0].mxu0 %vm7427_vm10, %v4029_v54  ;;  %vm7442_vm10 = vmmov %vm7410_vm1  ;;  %v4175_v16 = vsel %vm7443_vm6, %v4172_v55, %v4174_v50  ;;  %v4177_v63 = vsel %vm7445_vm11, %v4174_v50, %v4176_v43 }
  0xee   : > { %5191 = vmatpush3.bf16.msra.mxu0 %v4191_v1  ;;  %5186 = vmatprep.mubr.msk.bf16.mxu0 %vm7410_vm1, %v4037_v13 }
  0xef   : > { %5057 = vmatmul.mubr.msk.bf16.gmra.mrb[4].mxu1 %vm7429_vm3, %v4611_v28  ;;  %vm7444_vm3 = vmmov %vm7410_vm1 }
  0xf0   : > { %5066 = vmatprep.mubr.msk.bf16.mxu1 %vm7432_vm14, %v2394_v41 }
  0xf5   : > { %5187 = vmatmul.mubr.msk.bf16.gmra.mrb[4].mxu0 %vm7437_vm7, %v4045_v6 }
  0xf6   : > { %5192 = vmatprep.mubr.msk.bf16.mxu0 %vm7438_vm2, %v4171_v30 }
  0xfb   : > { %5067 = vmatmul.mubr.msk.bf16.vlgmr.msra.gmra.mrb[4].mxu1 %vm7442_vm10, %v2402_v12 }
  0xfd   : > { %5193 = vmatmul.mubr.msk.bf16.vlgmr.msra.gmra.mrb[0].mxu0 %vm7410_vm1, %v4173_v49 }
  0xfe   : > { %5196 = vmatprep.mubr.msk.bf16.mxu0 %vm7444_vm3, %v4175_v16 }
 0x105   : > { %5197 = vmatmul.mubr.msk.bf16.gmra.mrb[4].mxu0 %vm7446_vm12, %v4177_v63 }
 0x1ba   : > { %v5054_v21 = vpop.f32.mrb[0].mxu1 }
 0x1bb   : > { %v2294_v19 = vpop.f32.mrb[1].mxu1 }
 0x1bc   : > { %v5055_v57 = vpop.f32.mrb[2].mxu1 }
 0x1bd   : > { %v2297_v0 = vpop.f32.mrb[3].mxu1 }
 0x1ce   : > { %v5068_v15 = vpop.f32.mrb[4].mxu1 }
 0x1cf   : > { %v2468_v9 = vpop.f32.mrb[5].mxu1 }
 0x1d0   : > { %v5194_v44 = vpop.f32.mrb[0].mxu0  ;;  %v5069_v40 = vpop.f32.mrb[6].mxu1 }
 0x1d1   : > { %v5202_v22 = vadd.f32 %v5194_v44, %v5054_v21  ;;  %v4227_v34 = vpop.f32.mrb[1].mxu0  ;;  %v2471_v53 = vpop.f32.mrb[7].mxu1 }
 0x1d2   : > { %v5203_v36 = vadd.f32 %v4227_v34, %v2294_v19  ;;  %v5195_v42 = vpop.f32.mrb[2].mxu0 }
 0x1d3   : > { %v4275_v7 = vmul.f32 %v5202_v22, %v4752_v24  ;;  %v5204_v27 = vadd.f32 %v5195_v42, %v5055_v57  ;;  %v4230_v59 = vpop.f32.mrb[3].mxu0 }
 0x1d4   : > { %v4273_v45 = vmul.f32 %v5203_v36, %v4752_v24  ;;  %v5205_v60 = vadd.f32 %v4230_v59, %v2297_v0 }
 0x1d5   : > { %v4290_v52 = vadd.f32 %v4753_v8, %v4275_v7  ;;  %v4276_v3 = vmul.f32 %v5204_v27, %v4752_v24 }
 0x1d6   : > { %v4288_v31 = vadd.f32 %v4753_v8, %v4273_v45  ;;  %v4274_v47 = vmul.f32 %v5205_v60, %v4752_v24 }
 0x1d7   : > { %v4291_v58 = vadd.f32 %v4753_v8, %v4276_v3  ;;  %v4298_v26 = vmax.f32 %v4290_v52, 0.0 }
 0x1d8   : > { %v4289_v37 = vadd.f32 %v4753_v8, %v4274_v47  ;;  %v5198_v17 = vpop.f32.mrb[4].mxu0  ;;  %v4296_v29 = vmax.f32 %v4288_v31, 0.0 }
 0x1d9   : > { %v4299_v54 = vmax.f32 %v4291_v58, 0.0  ;;  %v5206_v1 = vadd.f32 %v5198_v17, %v5068_v15  ;;  %v4243_v61 = vpop.f32.mrb[5].mxu0 }
 0x1da   : > { %v4297_v13 = vmax.f32 %v4289_v37, 0.0  ;;  %v5207_v28 = vadd.f32 %v4243_v61, %v2468_v9  ;;  %v5199_v32 = vpop.f32.mrb[6].mxu0 }
 0x1db   : > { %v4780_v39 = vpack.c.bf16 %v4299_v54, %v4298_v26  ;;  %v4279_v14 = vmul.f32 %v5206_v1, %v4752_v24  ;;  %v5208_v62 = vadd.f32 %v5199_v32, %v5069_v40  ;;  %v4246_v41 = vpop.f32.mrb[7].mxu0 }
 0x1dc   : > { %v4775_v10 = vpack.c.bf16 %v4297_v13, %v4296_v29  ;;  %v4277_v11 = vmul.f32 %v5207_v28, %v4752_v24  ;;  %v5209_v4 = vadd.f32 %v4246_v41, %v2471_v53 }
 0x1dd   : > { %4792 = vst [vmem:[%s369_s13 + $0x8] sm:$0xff] %v4780_v39   ;;  %v4294_v38 = vadd.f32 %v4753_v8, %v4279_v14  ;;  %v4280_v20 = vmul.f32 %v5208_v62, %v4752_v24 }
 0x1de   : > { %4776 = vst [vmem:[%s369_s13] sm:$0xff] %v4775_v10   ;;  %v4292_v56 = vadd.f32 %v4753_v8, %v4277_v11  ;;  %v4278_v51 = vmul.f32 %v5209_v4, %v4752_v24 }
 0x1df   : > { %v4295_v35 = vadd.f32 %v4753_v8, %v4280_v20  ;;  %v4302_v2 = vmax.f32 %v4294_v38, 0.0 }
 0x1e0   : > { %v4293_v5 = vadd.f32 %v4753_v8, %v4278_v51  ;;  %v4300_v48 = vmax.f32 %v4292_v56, 0.0 }
 0x1e1   : > { %v4303_v6 = vmax.f32 %v4295_v35, 0.0 }
 0x1e2   : > { %v4301_v30 = vmax.f32 %v4293_v5, 0.0 }
 0x1e3   : > { %v4790_v25 = vpack.c.bf16 %v4303_v6, %v4302_v2 }
 0x1e4   : > { %v4785_v23 = vpack.c.bf16 %v4301_v30, %v4300_v48 }
 0x1e5   : > { %4794 = vst [vmem:[%s369_s13 + $0x18] sm:$0xff] %v4790_v25  }
 0x1e6   : > { %4793 = vst [vmem:[%s369_s13 + $0x10] sm:$0xff] %v4785_v23  }
 0x1e7 PF: > { %s16_s25 = sadd.s32 1, %s5570_s25   ;;  %s7447_s21 = smov %s5562_s23 }
 0x1e8   : > { %p13_p10 = scmp.ge.s32.totalorder %s16_s25, 18   ;;  %s7448_s22 = smov %s5566_s24 }
 0x1e9   : > { %s7449_s23 = smov %s7452_s26  ;;  %s7450_s24 = smov %s7456_s27 }
 0x1ea   :  { %15 = sbr.rel (!%p13_p10) target bundleno = 3 (0x3), region = 106 }

// kernel: da_basic_block.4
= control target key start
LH: loop header
LB: loop body
LE: loop exit
PB: predicated region body
PF: predicated region fallthrough
CT: control target
= control target key end

     0   :  { %s8308_s24 = smov 0   ;;  %s8310_s25 = smov 0   ;;  %s10173_s0 = inlined_call_operand.vmem [shape: bf16[2,10,82,128], index: 0, kind: input, shape index: {}, may-alias: {0,1,2}]   ;;  %s10174_s1 = inlined_call_operand.vmem [shape: bf16[2,10,82,128], index: 1, kind: input, shape index: {}, may-alias: {0,1,2}]   ;;  %s10175_s2 = inlined_call_operand.vmem [shape: bf16[2,10,82,128], index: 2, kind: input, shape index: {}, may-alias: {0,1,2}]   ;;  %s10176_s3 = inlined_call_operand.vmem [shape: bf16[27,128,128], index: 3, kind: input, shape index: {}]   ;;  %s10177_s4 = inlined_call_operand.vmem [shape: f32[1,128], index: 4, kind: input, shape index: {}]   ;;  %s10178_s5 = inlined_call_operand.vmem [shape: f32[1,128], index: 5, kind: input, shape index: {}]   ;;  %s10179_s6 = inlined_call_operand.vmem [shape: f32[2,8,64,128], index: 6, kind: output, shape index: {0}]   ;;  %s10180_s7 = inlined_call_operand.vmem [shape: f32[2,8,1,128], index: 7, kind: output, shape index: {1}]  }
   0x1   :  { %s8312_s26 = smov 0   ;;  %s8314_s27 = smov 0  }
   0x2   :  { %s8316_s28 = smov 0  }
   0x3 LB: > { %s27_s29 = sadd.s32 1, %s8257_s26  ;;  %s30_s30 = sadd.s32 1, %s8261_s27  ;;  %s8265_s28 = sphi %s8316_s28, %s18_s28   ;;  %s8261_s27 = sphi %s8314_s27, %s10319_s27   ;;  %s8257_s26 = sphi %s8312_s26, %s10318_s26   ;;  %s8253_s25 = sphi %s8310_s25, %s10317_s25   ;;  %s8249_s24 = sphi %s8308_s24, %s10316_s24  }
   0x4   : > { %p28_p0 = scmp.ge.s32.totalorder %s27_s29, 8  ;;  %p5950_p1 = scmp.ge.s32.totalorder %s8265_s28, 1 }
   0x5   : > { %p302_p2 = scmp.lt.s32.totalorder %s8265_s28, 17 }
   0x6   : > { %s10321_s29 = smov (%p28_p0, %s27_s29), 0  ;;  %s10323_s30 = smov (!%p28_p0, %s30_s30), %s8261_s27 }
   0x7   : > { %p303_p3 = pnand %p5950_p1, %p302_p2  ;;  %p32_p4 = scmp.ge.s32.totalorder %s10323_s30, 2 }
   0x8   : > { %v7961_v0 = vld [vmem:[%s10176_s3 + $0x40] sm:$0xff] (!%p303_p3)   ;;  %p369_p5 = scmp.lt.s32.totalorder (!%p303_p3), %s8253_s25, 1  ;;  %p371_p6 = scmp.lt.s32.totalorder (!%p303_p3), %s8249_s24, 9  ;;  %v7963_v2 = vld [vmem:[%s10176_s3 + $0x48] sm:$0xff] (!%p303_p3)   ;;  %v7965_v4 = vld [vmem:[%s10176_s3 + $0x50] sm:$0xff] (!%p303_p3)   ;;  %v419_v35 = vlaneseq (!%p303_p3)  ;;  %vm961_vm12 = vcmask (!%p303_p3), 1040384  }
   0x9   : > { %s10325_s30 = smov (%p32_p4, %s10323_s30), 0  ;;  %306 = sbr.rel (%p303_p3) target bundleno = 710 (0x2c6), region = 44 }
   0xa   : > { %v7962_v1 = vld [vmem:[%s10176_s3 + $0x340] sm:$0xff] (!%p303_p3)   ;;  %7044 = vmatprep.subr.bf16.mxu1 (!%p303_p3), %v7961_v0  ;;  %v7964_v3 = vld [vmem:[%s10176_s3 + $0x348] sm:$0xff] (!%p303_p3)   ;;  %v7966_v5 = vld [vmem:[%s10176_s3 + $0x350] sm:$0xff] (!%p303_p3)   ;;  %s378_s23 = sadd.s32 (!%p303_p3), 1, %s8249_s24  ;;  %vm10181_vm0 = vsmask.f32 (!%p303_p3), 7424 }
   0xb   : > { %7356 = vmatprep.subr.bf16.mxu0 (!%p303_p3), %v7962_v1  ;;  %7045 = vmatpush3.bf16.msra.mxu1 (!%p303_p3), %v7961_v0  ;;  %p381_p7 = scmp.lt.s32.totalorder (!%p303_p3), %s378_s23, 9  ;;  %v7967_v6 = vld [vmem:[%s10176_s3 + $0x58] sm:$0xff] (!%p303_p3)   ;;  %v7969_v8 = vld [vmem:[%s10176_s3 + $0x60] sm:$0xff] (!%p303_p3)   ;;  %v7971_v10 = vld [vmem:[%s10176_s3 + $0x68] sm:$0xff] (!%p303_p3)   ;;  %v8454_v50 = vshrl.u32 (!%p303_p3), %v419_v35, 7  ;;  %vm962_vm13 = vcmask (!%p303_p3), 1044484  }
   0xc   : > { %7357 = vmatpush3.bf16.msra.mxu0 (!%p303_p3), %v7962_v1  ;;  %7046 = vmatprep.subr.bf16.mxu1 (!%p303_p3), %v7963_v2  ;;  %v7968_v7 = vld [vmem:[%s10176_s3 + $0x358] sm:$0xff] (!%p303_p3)   ;;  %v7970_v9 = vld [vmem:[%s10176_s3 + $0x360] sm:$0xff] (!%p303_p3)   ;;  %v7972_v13 = vld [vmem:[%s10176_s3 + $0x368] sm:$0xff] (!%p303_p3)   ;;  %s389_s17 = sadd.s32 (!%p303_p3), 2, %s8249_s24  ;;  %p402_p9 = scmp.lt.s32.totalorder (!%p303_p3), %s8249_s24, 7 }
   0xd   : > { %7358 = vmatprep.subr.bf16.mxu0 (!%p303_p3), %v7964_v3  ;;  %v7973_v21 = vld [vmem:[%s10176_s3 + $0x70] sm:$0xff] (!%p303_p3)   ;;  %v7975_v29 = vld [vmem:[%s10176_s3 + $0x78] sm:$0xff] (!%p303_p3)   ;;  %v7979_v54 = vld [vmem:[%s10176_s3] sm:$0xff] (!%p303_p3)   ;;  %v8468_v62 = vadd.s32 (!%p303_p3), 16, %v8454_v50  ;;  %p9065_p8 = scmp.lt.s32.totalorder (!%p303_p3), %s389_s17, 9 }
   0xe   : > { %v7974_v25 = vld [vmem:[%s10176_s3 + $0x370] sm:$0xff] (!%p303_p3)   ;;  %v7976_v40 = vld [vmem:[%s10176_s3 + $0x378] sm:$0xff] (!%p303_p3)   ;;  %v7982_v58 = vld [vmem:[%s10176_s3 + $0x380] sm:$0xff] (!%p303_p3)  }
   0xf   : > { %7047 = vmatpush3.bf16.msra.mxu1 (!%p303_p3), %v7963_v2  ;;  %v7985_v61 = vld [vmem:[%s10176_s3 + $0x8] sm:$0xff] (!%p303_p3)   ;;  %v421_v2 = vadd.s32 (!%p303_p3), 8, %v8454_v50  ;;  %vm8581_vm15 = vmor (!%p303_p3), %vm961_vm12, %vm962_vm13 }
  0x10   : > { %s10327_s25 = smov (!%p369_p5, %s8253_s25), 1  ;;  %7359 = vmatpush3.bf16.msra.mxu0 %v7964_v3  ;;  %7048 = vmatprep.subr.bf16.mxu1 %v7965_v4  ;;  %s10329_s23 = smov (!%p381_p7, %s378_s23), 9  ;;  %v7986_v0 = vld [vmem:[%s10176_s3 + $0x388] sm:$0xff]   ;;  %v7987_v3 = vld [vmem:[%s10176_s3 + $0x10] sm:$0xff]  }
  0x11   : > { %s372_s16 = scalar_select %p371_p6, %s8249_s24, 9  ;;  %7360 = vmatprep.subr.bf16.mxu0 %v7966_v5 }
  0x12   : > { %s8360_s19 = smul.u32 110, %s10327_s25  ;;  %s10331_s17 = smov (!%p9065_p8, %s389_s17), 9 }
  0x13   : > { %s7916_s22 = smul.u32 11, %s372_s16  ;;  %7049 = vmatpush3.bf16.msra.mxu1 %v7965_v4  ;;  %s10333_s24 = smov (!%p402_p9, %s8249_s24), 7 }
  0x14   : > { %7361 = vmatpush3.bf16.msra.mxu0 %v7966_v5  ;;  %7050 = vmatprep.subr.bf16.mxu1 %v7967_v6  ;;  %s7918_s16 = smul.u32 11, %s10329_s23  ;;  %s5954_s12 = sshll.u32 %s10333_s24, 3 }
  0x15   : > { %s375_s8 = sadd.s32 %s8360_s19, %s7916_s22  ;;  %7362 = vmatprep.subr.bf16.mxu0 %v7968_v7  ;;  %s7919_s20 = smul.u32 11, %s10331_s17 }
  0x16   : > { %s5951_s13 = sshll.u32 %s375_s8, 2  ;;  %s385_s8 = sadd.s32 %s7918_s16, %s8360_s19 }
  0x17   : > { %s8382_s22 = scalar_lea.vmem %s10173_s0, %s5951_s13  ;;  %7051 = vmatpush3.bf16.msra.mxu1 %v7967_v6  ;;  %s5952_s9 = sshll.u32 %s385_s8, 2  ;;  %v432_v6 = vand.u32 7, %v8454_v50 }
  0x18   : > { %7363 = vmatpush3.bf16.msra.mxu0 %v7968_v7  ;;  %7052 = vmatprep.subr.bf16.mxu1 %v7969_v8  ;;  %s8391_s14 = scalar_lea.vmem %s10174_s1, %s5952_s9  ;;  %v8394_v11 = vld [vmem:[%s8382_s22] sm:$0xf]  ;;  %v8397_v12 = vld [vmem:[%s8382_s22 + $0x4] sm:$0xf]  ;;  %v8403_v14 = vld [vmem:[%s8382_s22 + $0x8] sm:$0xf]  ;;  %s396_s13 = sadd.s32 %s7919_s20, %s8360_s19 }
  0x19   : > { %7364 = vmatprep.subr.bf16.mxu0 %v7970_v9  ;;  %v8406_v15 = vld [vmem:[%s8382_s22 + $0xc] sm:$0xf]  ;;  %v5974_v16 = vcombine.low %v8394_v11, %v8397_v12  ;;  %v3053_v20 = vld [vmem:[%s8391_s14 + $0x4] sm:$0xf]  ;;  %v8417_v23 = vld [vmem:[%s8391_s14 + $0x8] sm:$0xf] }
  0x1a   : > { %v5975_v17 = vcombine.low %v8403_v14, %v8406_v15  ;;  %v8420_v24 = vld [vmem:[%s8391_s14 + $0xc] sm:$0xf]  ;;  %v8426_v27 = vld [vmem:[%s8391_s14 + $0x10] sm:$0xf]  ;;  %v6330_v28 = vcombine.low %v3053_v20, %v8417_v23  ;;  %v8438_v38 = vld [vmem:[%s8382_s22 + $0x14] sm:$0xf] }
  0x1b   : > { %7053 = vmatpush3.bf16.msra.mxu1 %v7969_v8  ;;  %v639_v18 = vshrl.u32 %v5974_v16, 16  ;;  %v641_v19 = vshll.u32 %v5974_v16, 16  ;;  %v6331_v31 = vcombine.low %v8420_v24, %v8426_v27  ;;  %v8435_v32 = vld [vmem:[%s8382_s22 + $0x10] sm:$0xf]  ;;  %v8441_v39 = vld [vmem:[%s8391_s14 + $0x14] sm:$0xf] }
  0x1c   : > { %7365 = vmatpush3.bf16.msra.mxu0 %v7970_v9  ;;  %7054 = vmatprep.subr.bf16.mxu1 %v7971_v10  ;;  %v646_v22 = vshll.u32 %v5975_v17, 16  ;;  %v650_v33 = vshrl.u32 %v5975_v17, 16  ;;  %v3103_v36 = vshrl.u32 %v6330_v28, 16  ;;  %v3105_v37 = vshll.u32 %v6330_v28, 16  ;;  %v8449_v43 = vld [vmem:[%s8391_s14 + $0x18] sm:$0xf] }
  0x1d   : > { %7366 = vmatprep.subr.bf16.mxu0 %v7972_v13  ;;  %v643_v26 = vrot.slane %v641_v19, 1  ;;  %v3110_v41 = vshll.u32 %v6331_v31, 16  ;;  %v5976_v42 = vcombine.low %v8435_v32, %v8438_v38  ;;  %v6332_v46 = vcombine.low %v8441_v39, %v8449_v43  ;;  %v8479_v4 = vld [vmem:[%s8382_s22 + $0x18] sm:$0xf]  ;;  %v8483_v7 = vld [vmem:[%s8382_s22 + $0x1c] sm:$0xf] }
  0x1e   : > { %v648_v30 = vrot.slane %v646_v22, 1  ;;  %v3107_v45 = vrot.slane %v3105_v37, 1  ;;  %v3114_v47 = vshrl.u32 %v6331_v31, 16  ;;  %v446_v8 = vand.u32 7, %v8468_v62  ;;  %v7988_v9 = vld [vmem:[%s10176_s3 + $0x390] sm:$0xff]   ;;  %v8010_v62 = vld [vmem:[%s10176_s3 + $0x3d8] sm:$0xff]  }
  0x1f   : > { %7055 = vmatpush3.bf16.msra.mxu1 %v7971_v10  ;;  %v644_v34 = vor.u32 %v643_v26, %v639_v18  ;;  %v3112_v48 = vrot.slane %v3110_v41, 1  ;;  %v654_v49 = vshll.u32 %v5976_v42, 16  ;;  %v3118_v53 = vshll.u32 %v6332_v46, 16  ;;  %v8495_v16 = vld [vmem:[%s8391_s14 + $0x20] sm:$0xf]  ;;  %s5953_s19 = sshll.u32 %s396_s13, 2 }
  0x20   : > { %7367 = vmatpush3.bf16.msra.mxu0 %v7972_v13  ;;  %7056 = vmatprep.subr.bf16.mxu1 %v7973_v21  ;;  %v3108_v51 = vor.u32 %v3107_v45, %v3103_v36  ;;  %v652_v52 = vor.u32 %v650_v33, %v648_v30  ;;  %v658_v1 = vshrl.u32 %v5976_v42, 16  ;;  %v3122_v5 = vshrl.u32 %v6332_v46, 16  ;;  %v8492_v13 = vld [vmem:[%s8391_s14 + $0x1c] sm:$0xf]  ;;  %v8507_v28 = vld [vmem:[%s8391_s14 + $0x24] sm:$0x1]  ;;  %s9177_s9 = scalar_lea.vmem %s10175_s2, %s5953_s19 }
  0x21   : > { %7368 = vmatprep.subr.bf16.mxu0 %v7974_v25  ;;  %v649_v44 = vsel %vm10181_vm0, %v644_v34, %v648_v30  ;;  %v656_v55 = vrot.slane %v654_v49, 1  ;;  %v3116_v56 = vor.u32 %v3114_v47, %v3112_v48  ;;  %v3120_v59 = vrot.slane %v3118_v53, 1  ;;  %v7989_v34 = vld [vmem:[%s10176_s3 + $0x18] sm:$0xff]   ;;  %v7991_v49 = vld [vmem:[%s10176_s3 + $0x20] sm:$0xff]   ;;  %v8140_v42 = vld [vmem:[%s10176_s3 + $0x590] sm:$0xff]   ;;  %s5955_s13 = sshll.u32 %s10327_s25, 6 }
  0x22   : > { %7060 = vmatprep.mubr.bf16.mxu1 %v649_v44  ;;  %v3113_v57 = vsel %vm10181_vm0, %v3108_v51, %v3112_v48  ;;  %v5977_v10 = vcombine.low %v8479_v4, %v8483_v7  ;;  %v6333_v17 = vcombine.low %v8492_v13, %v8495_v16  ;;  %v439_v18 = vand.u32 7, %v421_v2  ;;  %v7990_v36 = vld [vmem:[%s10176_s3 + $0x398] sm:$0xff]   ;;  %s406_s15 = sadd.s32 %s5955_s13, %s5954_s12  ;;  %s5957_s23 = sshll.u32 %s10327_s25, 3 }
  0x23   : > { %7057 = vmatpush3.bf16.msra.mxu1 %v7973_v21  ;;  %7372 = vmatprep.mubr.bf16.mxu0 %v3113_v57  ;;  %v657_v60 = vsel %vm10181_vm0, %v652_v52, %v656_v55  ;;  %v3121_v63 = vsel %vm10181_vm0, %v3116_v56, %v3120_v59  ;;  %vm8499_vm1 = vcmp.ge.s32.totalorder %v432_v6, 1  ;;  %v660_v20 = vor.u32 %v658_v1, %v656_v55  ;;  %v8001_v47 = vld [vmem:[%s10176_s3 + $0x38] sm:$0xff]  }
  0x24   : > { %7369 = vmatpush3.bf16.msra.mxu0 %v7974_v25  ;;  %7058 = vmatprep.subr.bf16.mxu1 %v7975_v29  ;;  %v662_v21 = vshll.u32 %v5977_v10, 16  ;;  %v3124_v22 = vor.u32 %v3122_v5, %v3120_v59  ;;  %v8504_v25 = vld [vmem:[%s8382_s22 + $0x20] sm:$0x1]  ;;  %v666_v26 = vshrl.u32 %v5977_v10, 16  ;;  %v6334_v31 = vcombine.low %v8507_v28, %v8507_v28  ;;  %vm8522_vm3 = vmpackc.low %vm8499_vm1, %vm8499_vm1  ;;  %v8141_v48 = vld [vmem:[%s10176_s3 + $0x258] sm:$0xff]  }
  0x25   : > { %7370 = vmatprep.subr.bf16.mxu0 %v7976_v40  ;;  %v5978_v30 = vcombine.low %v8504_v25, %v8504_v25  ;;  %v3130_v33 = vshrl.u32 %v6333_v17, 16  ;;  %vm525_vm2 = vcmp.ge.s32.totalorder %v439_v18, 1  ;;  %vm8527_vm4 = vcmp.le.s32.totalorder %v432_v6, 6 }
  0x26   : > { %v664_v35 = vrot.slane %v662_v21, 1  ;;  %v3134_v41 = vshll.u32 %v6334_v31, 16  ;;  %vm8531_vm5 = vcmp.le.s32.totalorder %v439_v18, 6  ;;  %vm8535_vm6 = vmpackc.low %vm525_vm2, %vm525_vm2  ;;  %v572_v55 = vsel %vm8522_vm3, %v8394_v11, 0 }
  0x27   : > { %7059 = vmatpush3.bf16.msra.mxu1 %v7975_v29  ;;  %v3126_v29 = vshll.u32 %v6333_v17, 16  ;;  %vm945_vm7 = vmpackc.low %vm8527_vm4, %vm8527_vm4  ;;  %v573_v56 = vsel %vm8535_vm6, %v8397_v12, 0  ;;  %v423_v57 = vadd.s32 24, %v8454_v50  ;;  %vm534_vm9 = vcmp.le.s32.totalorder %v446_v8, 6  ;;  %v7994_v17 = vld [vmem:[%s10176_s3 + $0x3a8] sm:$0xff]  }
  0x28   : > { %7371 = vmatpush3.bf16.msra.mxu0 %v7976_v40  ;;  %7068 = vmatprep.subr.bf16.mxu1 %v7979_v54  ;;  %v670_v40 = vshll.u32 %v5978_v30, 16  ;;  %v665_v44 = vsel %vm10181_vm0, %v660_v20, %v664_v35  ;;  %v668_v45 = vor.u32 %v666_v26, %v664_v35  ;;  %vm946_vm8 = vmpackc.low %vm8531_vm5, %vm8531_vm5  ;;  %vm8573_vm10 = vcmp.ge.s32.totalorder %v446_v8, 1  ;;  %v7996_v30 = vld [vmem:[%s10176_s3 + $0x30] sm:$0xff]  }
  0x29   : > { %7380 = vmatprep.subr.bf16.mxu0 %v7982_v58  ;;  %v3128_v37 = vrot.slane %v3126_v29, 1  ;;  %v453_v1 = vand.u32 7, %v423_v57  ;;  %vm947_vm11 = vmpackc.low %vm534_vm9, %vm534_vm9  ;;  %v424_v26 = vadd.s32 32, %v8454_v50  ;;  %v425_v29 = vadd.s32 40, %v8454_v50 }
  0x2a   : > { %7061 = vmatmul.mubr.bf16.vlgmr.msra.gmra.mrb[0].mxu1 %v657_v60  ;;  %v672_v52 = vrot.slane %v670_v40, 1  ;;  %v5987_v60 = vcombine.low %v572_v55, %v573_v56  ;;  %vm8611_vm4 = vmpackc.low %vm8573_vm10, %vm8573_vm10  ;;  %vm10184_vm9 = vcmask 1046528  }
  0x2b   : > { %7069 = vmatpush3.bf16.msra.mxu1 %v7979_v54  ;;  %7373 = vmatmul.mubr.bf16.vlgmr.msra.gmra.mrb[0].mxu0 %v3121_v63  ;;  %v3129_v51 = vsel %vm10181_vm0, %v3124_v22, %v3128_v37  ;;  %v3132_v53 = vor.u32 %v3130_v33, %v3128_v37  ;;  %v3136_v54 = vrot.slane %v3134_v41, 1  ;;  %vm535_vm14 = vcmp.le.s32.totalorder %v453_v1, 6  ;;  %v7998_v41 = vld [vmem:[%s10176_s3 + $0x3b0] sm:$0xff]  }
  0x2c   : > { %7381 = vmatpush3.bf16.msra.mxu0 %v7982_v58  ;;  %7070 = vmatprep.subr.bf16.mxu1 %v7985_v61  ;;  %v7992_v58 = vld [vmem:[%s10176_s3 + $0x3a0] sm:$0xff]   ;;  %v673_v59 = vsel %vm10181_vm0, %v668_v45, %v672_v52  ;;  %vm948_vm1 = vmpackc.low %vm535_vm14, %vm535_vm14  ;;  %v460_v40 = vand.u32 7, %v424_v26  ;;  %v8002_v52 = vld [vmem:[%s10176_s3 + $0x3b8] sm:$0xff]   ;;  %v574_v56 = vsel %vm8611_vm4, %v8403_v14, 0  ;;  %v426_v26 = vadd.s32 48, %v8454_v50 }
  0x2d   : > { %7382 = vmatprep.subr.bf16.mxu0 %v7986_v0  ;;  %7064 = vmatprep.mubr.bf16.mxu1 %v665_v44  ;;  %v3137_v11 = vsel %vm10181_vm0, %v3132_v53, %v3136_v54 }
  0x2e   : > { %7376 = vmatprep.mubr.bf16.mxu0 %v3129_v51  ;;  %v467_v51 = vand.u32 7, %v425_v29  ;;  %vm536_vm12 = vcmp.le.s32.totalorder %v460_v40, 6  ;;  %vm528_vm0 = vcmp.ge.s32.totalorder %v460_v40, 1  ;;  %v8005_v29 = vld [vmem:[%s10176_s3 + $0x88] sm:$0xff]   ;;  %v474_v37 = vand.u32 7, %v426_v26 }
  0x2f   : > { %7071 = vmatpush3.bf16.msra.mxu1 %v7985_v61  ;;  %v8267_v61 = vmov 0   ;;  %vm949_vm14 = vmpackc.low %vm536_vm12, %vm536_vm12 }
  0x30   : > { %7383 = vmatpush3.bf16.msra.mxu0 %v7986_v0  ;;  %7072 = vmatprep.subr.bf16.mxu1 %v7987_v3  ;;  %v954_v63 = vsel %vm946_vm8, 65537, %v8267_v61  ;;  %v953_v2 = vsel %vm945_vm7, 65537, %v8267_v61  ;;  %v955_v10 = vsel %vm947_vm11, 65537, %v8267_v61  ;;  %v956_v21 = vsel %vm948_vm1, 65537, %v8267_v61 }
  0x31   : > { %7384 = vmatprep.subr.bf16.mxu0 %v7988_v9  ;;  %v966_v0 = vrot.slane %v954_v63, 7  ;;  %v964_v6 = vrot.slane %v953_v2, 7  ;;  %v969_v19 = vrot.slane %v955_v10, 7  ;;  %v972_v35 = vrot.slane %v956_v21, 7 }
  0x32   : > { %7065 = vmatmul.mubr.bf16.gmra.mrb[4].mxu1 %v673_v59  ;;  %vm8617_vm8 = vcmp.ge.s32.totalorder %v453_v1, 1  ;;  %vm537_vm13 = vcmp.le.s32.totalorder %v467_v51, 6  ;;  %v957_v59 = vsel %vm949_vm14, 65537, %v8267_v61  ;;  %v8196_v1 = vld [vmem:[%s10176_s3 + $0x648] sm:$0xff]  }
  0x33   : > { %7073 = vmatpush3.bf16.msra.mxu1 %v7987_v3  ;;  %7377 = vmatmul.mubr.bf16.gmra.mrb[4].mxu0 %v3137_v11  ;;  %v3263_v3 = vld [vmem:[%s8391_s14 + $0x4] sm:$0xe]  ;;  %v968_v8 = vrot.slane %v966_v0, 4  ;;  %v965_v18 = vrot.slane %v964_v6, 4  ;;  %vm8588_vm2 = vcmp.ne.s16.totalorder %v964_v6, 0  ;;  %v974_v53 = vrot.slane %v972_v35, 4  ;;  %vm8647_vm11 = vmpackc.low %vm8617_vm8, %vm8617_vm8 }
  0x34   : > { %7385 = vmatpush3.bf16.msra.mxu0 %v7988_v9  ;;  %7074 = vmatprep.subr.bf16.mxu1 %v7989_v34  ;;  %v7993_v9 = vld [vmem:[%s10176_s3 + $0x28] sm:$0xff]   ;;  %v3264_v22 = vsel %vm8588_vm2, %v3263_v3, 0  ;;  %vm950_vm1 = vmpackc.low %vm537_vm13, %vm537_vm13  ;;  %v8003_v3 = vld [vmem:[%s10176_s3 + $0x80] sm:$0xff]  }
  0x35   : > { %7386 = vmatprep.subr.bf16.mxu0 %v7990_v36  ;;  %7084 = vmatprep.mubr.bf16.mxu1 %v5987_v60  ;;  %v8602_v31 = vsel %vm8581_vm15, %v965_v18, %v966_v0  ;;  %v8606_v33 = vsel %vm8581_vm15, %v968_v8, %v969_v19  ;;  %v575_v60 = vsel %vm8647_vm11, %v8406_v15, 0  ;;  %v958_v63 = vsel %vm950_vm1, 65537, %v8267_v61  ;;  %vm8659_vm8 = vmpackc.low %vm528_vm0, %vm528_vm0  ;;  %v8004_v6 = vld [vmem:[%s10176_s3 + $0x3c0] sm:$0xff]  }
  0x36   : > { %vm10185_vm5 = vcmp.ne.s16.totalorder %v8602_v31, 0  ;;  %vm10186_vm7 = vcmp.ne.s16.totalorder %v8606_v33, 0  ;;  %v975_v0 = vrot.slane %v957_v59, 7  ;;  %v978_v2 = vrot.slane %v958_v63, 7 }
  0x37   : > { %7075 = vmatpush3.bf16.msra.mxu1 %v7989_v34  ;;  %v971_v34 = vrot.slane %v969_v19, 4  ;;  %v3265_v45 = vsel %vm10185_vm5, %v8417_v23, 0  ;;  %v3266_v46 = vsel %vm10186_vm7, %v8420_v24, 0  ;;  %vm529_vm0 = vcmp.ge.s32.totalorder %v467_v51, 1 }
  0x38   : > { %7387 = vmatpush3.bf16.msra.mxu0 %v7990_v36  ;;  %7076 = vmatprep.subr.bf16.mxu1 %v7991_v49  ;;  %v977_v10 = vrot.slane %v975_v0, 4  ;;  %v5988_v8 = vcombine.low %v574_v56, %v575_v60  ;;  %vm8675_vm13 = vmpackc.low %vm529_vm0, %vm529_vm0  ;;  %v576_v18 = vsel %vm8659_vm8, %v8435_v32, 0  ;;  %vm8704_vm1 = vcmp.le.s32.totalorder %v474_v37, 6 }
  0x39   : > { %7388 = vmatprep.subr.bf16.mxu0 %v7992_v58  ;;  %v8626_v44 = vsel %vm8581_vm15, %v971_v34, %v972_v35  ;;  %v427_v34 = vadd.s32 56, %v8454_v50  ;;  %vm8708_vm0 = vcmp.ge.s32.totalorder %v474_v37, 1  ;;  %v997_v51 = vsel %vm10185_vm5, %v8397_v12, 0 }
  0x3a   : > { %vm10187_vm10 = vcmp.ne.s16.totalorder %v8626_v44, 0  ;;  %v8684_v19 = vsel %vm8581_vm15, %v977_v10, %v978_v2  ;;  %v3450_v10 = vsel %vm8611_vm4, %v8426_v27, 0 }
  0x3b   : > { %7077 = vmatpush3.bf16.msra.mxu1 %v7991_v49  ;;  %v6359_v49 = vcombine.low %v3264_v22, %v3265_v45  ;;  %v3267_v54 = vsel %vm10187_vm10, %v8426_v27, 0  ;;  %v577_v22 = vsel %vm8675_vm13, %v8438_v38, 0  ;;  %vm10182_vm14 = vcmp.ne.s16.totalorder %v8684_v19, 0  ;;  %v8009_v27 = vld [vmem:[%s10176_s3 + $0x98] sm:$0xff]  }
  0x3c   : > { %7389 = vmatpush3.bf16.msra.mxu0 %v7992_v58  ;;  %7078 = vmatprep.subr.bf16.mxu1 %v7993_v9  ;;  %v6360_v57 = vcombine.low %v3266_v46, %v3267_v54  ;;  %v3269_v35 = vsel %vm10182_vm14, %v8449_v43, 0  ;;  %v980_v45 = vrot.slane %v978_v2, 4  ;;  %v8006_v46 = vld [vmem:[%s10176_s3 + $0x3c8] sm:$0xff]   ;;  %v999_v59 = vsel %vm10187_vm10, %v8406_v15, 0  ;;  %v8008_v15 = vld [vmem:[%s10176_s3 + $0x3d0] sm:$0xff]  }
  0x3d   : > { %7390 = vmatprep.subr.bf16.mxu0 %v7994_v17  ;;  %v3313_v58 = vrot.slane %v6359_v49, 1  ;;  %v928_v49 = vld [vmem:[%s8382_s22] sm:$0xe]  ;;  %v3448_v54 = vsel %vm8522_vm3, %v8417_v23, 0  ;;  %vm10229_vm10 = vcmp.ne.s16.totalorder %v8684_v19, 0 }
  0x3e   : > { %v3314_v11 = vrot.slane %v6360_v57, 1  ;;  %v996_v56 = vsel %vm8588_vm2, %v928_v49, 0  ;;  %v8007_v57 = vld [vmem:[%s10176_s3 + $0x90] sm:$0xff]   ;;  %v8012_v49 = vld [vmem:[%s10176_s3 + $0x3e0] sm:$0xff]  }
  0x3f   : > { %7079 = vmatpush3.bf16.msra.mxu1 %v7993_v9  ;;  %v8672_v9 = vsel %vm8581_vm15, %v974_v53, %v975_v0  ;;  %v6015_v60 = vcombine.low %v996_v56, %v997_v51  ;;  %v8013_v56 = vld [vmem:[%s10176_s3 + $0xa8] sm:$0xff]  }
  0x40   : > { %7391 = vmatpush3.bf16.msra.mxu0 %v7994_v17  ;;  %7080 = vmatprep.subr.bf16.mxu1 %v7996_v30  ;;  %v3315_v5 = vsel %vm10184_vm9, %v3313_v58, %v3314_v11  ;;  %vm10183_vm12 = vcmp.ne.s16.totalorder %v8672_v9, 0  ;;  %v5149_v17 = vld [vmem:[%s9177_s9 + $0x24] sm:$0xf] }
  0x41   : > { %7392 = vmatprep.subr.bf16.mxu0 %v7998_v41  ;;  %7396 = vmatprep.mubr.bf16.mxu0 %v3315_v5  ;;  %v3268_v21 = vsel %vm10183_vm12, %v8441_v39, 0  ;;  %vm951_vm12 = vmpackc.low %vm8704_vm1, %vm8704_vm1  ;;  %vm10220_vm1 = vcmask 1046528  }
  0x42   : > { %v6361_v40 = vcombine.low %v3268_v21, %v3269_v35  ;;  %v959_v58 = vsel %vm951_vm12, 65537, %v8267_v61 }
  0x43   : > { %7081 = vmatpush3.bf16.msra.mxu1 %v7996_v30  ;;  %v5989_v30 = vcombine.low %v576_v18, %v577_v22  ;;  %v981_v2 = vrot.slane %v959_v58, 7  ;;  %v1046_v18 = vrot.slane %v6015_v60, 1  ;;  %v1001_v60 = vsel %vm10229_vm10, %v8438_v38, 0 }
  0x44   : > { %7393 = vmatpush3.bf16.msra.mxu0 %v7998_v41  ;;  %7082 = vmatprep.subr.bf16.mxu1 %v8001_v47  ;;  %v481_v41 = vand.u32 7, %v427_v34  ;;  %v8719_v53 = vrot.slane %v6361_v40, 1  ;;  %v3451_v40 = vsel %vm8647_vm11, %v8441_v39, 0 }
  0x45   : > { %7394 = vmatprep.subr.bf16.mxu0 %v8002_v52  ;;  %v8768_v21 = vsel %vm8581_vm15, %v980_v45, %v981_v2  ;;  %v983_v22 = vrot.slane %v981_v2, 4  ;;  %v8804_v50 = vcombine.low %v3450_v10, %v3451_v40  ;;  %v8016_v2 = vld [vmem:[%s10176_s3 + $0x3f0] sm:$0xff]  }
  0x46   : > { %vm539_vm14 = vcmp.le.s32.totalorder %v481_v41, 6  ;;  %vm8724_vm9 = vcmp.ge.s32.totalorder %v481_v41, 1  ;;  %v3317_v63 = vsel %vm10220_vm1, %v3314_v11, %v8719_v53  ;;  %v8011_v41 = vld [vmem:[%s10176_s3 + $0xa0] sm:$0xff]   ;;  %v8874_v40 = vld [vmem:[%s8391_s14 + $0x14] sm:$0xf] }
  0x47   : > { %7083 = vmatpush3.bf16.msra.mxu1 %v8001_v47  ;;  %vm952_vm5 = vmpackc.low %vm539_vm14, %vm539_vm14 }
  0x48   : > { %7395 = vmatpush3.bf16.msra.mxu0 %v8002_v52  ;;  %7092 = vmatprep.subr.bf16.mxu1 %v8003_v3  ;;  %v998_v52 = vsel %vm10186_vm7, %v8403_v14, 0  ;;  %v960_v0 = vsel %vm952_vm5, 65537, %v8267_v61  ;;  %vm8743_vm7 = vmpackc.low %vm8708_vm0, %vm8708_vm0 }
  0x49   : > { %7404 = vmatprep.subr.bf16.mxu0 %v8004_v6  ;;  %v6016_v5 = vcombine.low %v998_v52, %v999_v59  ;;  %v984_v11 = vrot.slane %v960_v0, 7  ;;  %vm8756_vm5 = vmpackc.low %vm8724_vm9, %vm8724_vm9  ;;  %vm993_vm9 = vcmp.ne.s16.totalorder %v8768_v21, 0 }
  0x4a   : > { %7085 = vmatmul.mubr.bf16.vlgmr.msra.gmra.mrb[0].mxu1 %v5988_v8  ;;  %v578_v8 = vsel %vm8743_vm7, %v8479_v4, 0  ;;  %v579_v26 = vsel %vm8756_vm5, %v8483_v7, 0  ;;  %v3270_v35 = vsel %vm993_vm9, %v8492_v13, 0  ;;  %vm10225_vm0 = vmmov %vm10220_vm1  ;;  %v1002_v38 = vsel %vm993_vm9, %v8479_v4, 0  ;;  %v3618_v4 = vld [vmem:[%s8391_s14 + $0x8] sm:$0xf] }
  0x4b   : > { %7093 = vmatpush3.bf16.msra.mxu1 %v8003_v3  ;;  %7088 = vmatprep.mubr.bf16.mxu1 %v5989_v30  ;;  %v8773_v30 = vrot.slane %v6016_v5, 1  ;;  %v8780_v34 = vsel %vm8581_vm15, %v983_v22, %v984_v11  ;;  %vm10226_vm15 = vmmov %vm10225_vm0  ;;  %v8017_v5 = vld [vmem:[%s10176_s3 + $0xb8] sm:$0xff]   ;;  %v8020_v22 = vld [vmem:[%s10176_s3 + $0x400] sm:$0xff]  }
  0x4c   : > { %7094 = vmatprep.subr.bf16.mxu1 %v8005_v29  ;;  %7397 = vmatmul.mubr.bf16.vlgmr.msra.gmra.mrb[0].mxu0 %v3317_v63  ;;  %vm994_vm12 = vcmp.ne.s16.totalorder %v8780_v34, 0  ;;  %vm10227_vm1 = vmmov %vm10225_vm0 }
  0x4d   : > { %7405 = vmatpush3.bf16.msra.mxu0 %v8004_v6  ;;  %v5990_v6 = vcombine.low %v578_v8, %v579_v26  ;;  %v1048_v37 = vsel %vm10225_vm0, %v1046_v18, %v8773_v30  ;;  %v3271_v45 = vsel %vm994_vm12, %v8495_v16, 0  ;;  %vm10228_vm0 = vcmp.ne.s16.totalorder %v8672_v9, 0  ;;  %v8019_v8 = vld [vmem:[%s10176_s3 + $0xc0] sm:$0xff]   ;;  %v8868_v26 = vld [vmem:[%s8391_s14 + $0x10] sm:$0xf]  ;;  %vm10230_vm10 = vmmov %vm10227_vm1 }
  0x4e   : > { %7406 = vmatprep.subr.bf16.mxu0 %v8006_v46  ;;  %v6362_v39 = vcombine.low %v3270_v35, %v3271_v45  ;;  %v1000_v23 = vsel %vm10228_vm0, %v8435_v32, 0  ;;  %v8014_v32 = vld [vmem:[%s10176_s3 + $0x3e8] sm:$0xff]   ;;  %v8883_v45 = vcombine.low %v8868_v26, %v8874_v40  ;;  %vm10232_vm0 = vsmask.f32 7424 }
  0x4f   : > { %7095 = vmatpush3.bf16.msra.mxu1 %v8005_v29  ;;  %v8776_v29 = vrot.slane %v984_v11, 4  ;;  %v6017_v0 = vcombine.low %v1000_v23, %v1001_v60  ;;  %v8018_v11 = vld [vmem:[%s10176_s3 + $0x3f8] sm:$0xff]   ;;  %v8027_v60 = vld [vmem:[%s10176_s3 + $0xe0] sm:$0xff]  }
  0x50   : > { %7096 = vmatprep.subr.bf16.mxu1 %v8007_v57  ;;  %v3318_v51 = vrot.slane %v6362_v39, 1 }
  0x51   : > { %vm995_vm14 = vcmp.ne.s16.totalorder %v8776_v29, 0  ;;  %7407 = vmatpush3.bf16.msra.mxu0 %v8006_v46 }
  0x52   : > { %7089 = vmatmul.mubr.bf16.gmra.mrb[4].mxu1 %v5990_v6  ;;  %v3272_v47 = vsel %vm995_vm14, %v8507_v28, 0  ;;  %7408 = vmatprep.subr.bf16.mxu0 %v8008_v15  ;;  %v3449_v28 = vsel %vm8535_vm6, %v8420_v24, 0  ;;  %v3452_v24 = vsel %vm8659_vm8, %v8449_v43, 0  ;;  %v8015_v43 = vld [vmem:[%s10176_s3 + $0xb0] sm:$0xff]   ;;  %v1004_v18 = vsel %vm995_vm14, %v8504_v25, 0  ;;  %v8021_v25 = vld [vmem:[%s10176_s3 + $0xc8] sm:$0xff]  }
  0x53   : > { %7097 = vmatpush3.bf16.msra.mxu1 %v8007_v57  ;;  %v6363_v46 = vcombine.low %v3272_v47, %v3272_v47  ;;  %7108 = vmatprep.mubr.bf16.mxu1 %v1048_v37  ;;  %v3319_v57 = vsel %vm10226_vm15, %v8719_v53, %v3318_v51  ;;  %v6388_v59 = vcombine.low %v3448_v54, %v3449_v28  ;;  %v3453_v53 = vsel %vm8675_vm13, %v8492_v13, 0  ;;  %vm10231_vm15 = vmmov %vm10227_vm1 }
  0x54   : > { %7098 = vmatprep.subr.bf16.mxu1 %v8009_v27  ;;  %7400 = vmatprep.mubr.bf16.mxu0 %v3319_v57  ;;  %v6390_v63 = vcombine.low %v3452_v24, %v3453_v53  ;;  %v1003_v13 = vsel %vm994_vm12, %v8483_v7, 0  ;;  %v8853_v7 = vld [vmem:[%s8391_s14 + $0xc] sm:$0xf]  ;;  %v6019_v37 = vcombine.low %v1004_v18, %v1004_v18  ;;  %v3675_v28 = vshll.u32 %v8883_v45, 16 }
  0x55   : > { %v3320_v52 = vrot.slane %v6363_v46, 1  ;;  %7409 = vmatpush3.bf16.msra.mxu0 %v8008_v15  ;;  %v6018_v10 = vcombine.low %v1002_v38, %v1003_v13  ;;  %v1049_v15 = vrot.slane %v6017_v0, 1  ;;  %v6416_v6 = vcombine.low %v3618_v4, %v8853_v7  ;;  %v8023_v46 = vld [vmem:[%s10176_s3 + $0xd0] sm:$0xff]   ;;  %v8934_v38 = vld [vmem:[%s8391_s14 + $0x18] sm:$0xf] }
  0x56   : > { %7410 = vmatprep.subr.bf16.mxu0 %v8010_v62  ;;  %v1053_v39 = vrot.slane %v6019_v37, 1  ;;  %v3454_v57 = vsel %vm8743_vm7, %v8495_v16, 0  ;;  %v8911_v24 = vrot.slane %v3675_v28, 1  ;;  %v8026_v16 = vld [vmem:[%s10176_s3 + $0x418] sm:$0xff]   ;;  %v8031_v0 = vld [vmem:[%s10176_s3 + $0xf0] sm:$0xff]  }
  0x57   : > { %7099 = vmatpush3.bf16.msra.mxu1 %v8009_v27  ;;  %v3321_v58 = vsel %vm10227_vm1, %v3318_v51, %v3320_v52  ;;  %v1051_v27 = vrot.slane %v6018_v10, 1  ;;  %v1050_v35 = vsel %vm10230_vm10, %v8773_v30, %v1049_v15  ;;  %v3670_v47 = vshll.u32 %v6416_v6, 16  ;;  %v8022_v30 = vld [vmem:[%s10176_s3 + $0x408] sm:$0xff]   ;;  %v8937_v13 = vld [vmem:[%s8391_s14 + $0x1c] sm:$0xf] }
  0x58   : > { %7100 = vmatprep.subr.bf16.mxu1 %v8011_v41  ;;  %7401 = vmatmul.mubr.bf16.gmra.mrb[4].mxu0 %v3321_v58  ;;  %v1182_v51 = vsel %vm8535_vm6, %v8403_v14, 0  ;;  %v3668_v52 = vshrl.u32 %v6416_v6, 16  ;;  %v8024_v14 = vld [vmem:[%s10176_s3 + $0x410] sm:$0xff]   ;;  %v1351_v10 = vld [vmem:[%s8382_s22 + $0x4] sm:$0xf]  ;;  %v6418_v4 = vcombine.low %v8934_v38, %v8937_v13  ;;  %v8034_v37 = vld [vmem:[%s10176_s3 + $0x438] sm:$0xff]  }
  0x59   : > { %7411 = vmatpush3.bf16.msra.mxu0 %v8010_v62  ;;  %7420 = vmatprep.mubr.bf16.mxu0 %v6388_v59  ;;  %v1052_v62 = vsel %vm10231_vm15, %v1049_v15, %v1051_v27  ;;  %v3672_v54 = vrot.slane %v3670_v47, 1  ;;  %v8032_v15 = vld [vmem:[%s10176_s3 + $0x430] sm:$0xff]   ;;  %v8222_v18 = vld [vmem:[%s8382_s22 + $0xc] sm:$0xf]  ;;  %vm10233_vm10 = vcmp.ne.s16.totalorder %v8606_v33, 0  ;;  %vm10234_vm15 = vcmp.ne.s16.totalorder %v8626_v44, 0 }
  0x5a   : > { %7412 = vmatprep.subr.bf16.mxu0 %v8012_v49 }
  0x5b   : > { %7101 = vmatpush3.bf16.msra.mxu1 %v8011_v41  ;;  %v3447_v41 = vld [vmem:[%s8391_s14 + $0x24] sm:$0xf]  ;;  %v3673_v23 = vor.u32 %v3672_v54, %v3668_v52  ;;  %v3687_v52 = vshrl.u32 %v6418_v4, 16  ;;  %v8225_v54 = vld [vmem:[%s8382_s22 + $0x18] sm:$0xf] }
  0x5c   : > { %7102 = vmatprep.subr.bf16.mxu1 %v8013_v56  ;;  %v1186_v28 = vsel %vm8675_vm13, %v8225_v54, 0  ;;  %v8044_v54 = vld [vmem:[%s10176_s3 + $0x118] sm:$0xff]  }
  0x5d   : > { %7413 = vmatpush3.bf16.msra.mxu0 %v8012_v49  ;;  %v1181_v49 = vsel %vm8522_vm3, %v8397_v12, 0  ;;  %v3455_v12 = vsel %vm8756_vm5, %v3447_v41, 0  ;;  %v3678_v53 = vsel %vm10232_vm0, %v3673_v23, %v8911_v24  ;;  %v3683_v41 = vshll.u32 %v6418_v4, 16  ;;  %v8038_v23 = vld [vmem:[%s10176_s3 + $0x440] sm:$0xff]  }
  0x5e   : > { %7414 = vmatprep.subr.bf16.mxu0 %v8014_v32  ;;  %v6044_v58 = vcombine.low %v1181_v49, %v1182_v51  ;;  %v6391_v59 = vcombine.low %v3454_v57, %v3455_v12  ;;  %v8224_v49 = vld [vmem:[%s8382_s22 + $0x14] sm:$0xf]  ;;  %v1180_v12 = vld [vmem:[%s8382_s22 + $0x20] sm:$0xf] }
  0x5f   : > { %7103 = vmatpush3.bf16.msra.mxu1 %v8013_v56  ;;  %v1054_v56 = vsel %vm10227_vm1, %v1051_v27, %v1053_v39  ;;  %v1183_v27 = vsel %vm8611_vm4, %v8222_v18, 0  ;;  %v8979_v39 = vld [vmem:[%s8382_s22 + $0xc] sm:$0xf]  ;;  %v1185_v51 = vsel %vm8659_vm8, %v8224_v49, 0  ;;  %v3685_v57 = vrot.slane %v3683_v41, 1  ;;  %vm10235_vm1 = vmmov %vm10232_vm0 }
  0x60   : > { %7104 = vmatprep.subr.bf16.mxu1 %v8015_v43  ;;  %vm10236_vm0 = vcmp.ne.s16.totalorder %v8602_v31, 0 }
  0x61   : > { %7415 = vmatpush3.bf16.msra.mxu0 %v8014_v32  ;;  %v8028_v32 = vld [vmem:[%s10176_s3 + $0x420] sm:$0xff]  }
  0x62   : > { %7416 = vmatprep.subr.bf16.mxu0 %v8016_v2 }
  0x63   : > { %7105 = vmatpush3.bf16.msra.mxu1 %v8015_v43  ;;  %v8029_v43 = vld [vmem:[%s10176_s3 + $0xe8] sm:$0xff]  }
  0x64   : > { %7106 = vmatprep.subr.bf16.mxu1 %v8017_v5 }
  0x65   : > { %7417 = vmatpush3.bf16.msra.mxu0 %v8016_v2  ;;  %v8940_v2 = vld [vmem:[%s8391_s14 + $0x20] sm:$0xf] }
  0x66   : > { %7418 = vmatprep.subr.bf16.mxu0 %v8018_v11 }
  0x67   : > { %7107 = vmatpush3.bf16.msra.mxu1 %v8017_v5  ;;  %v8943_v5 = vld [vmem:[%s8391_s14 + $0x24] sm:$0xf] }
  0x68   : > { %7116 = vmatprep.subr.bf16.mxu1 %v8019_v8 }
  0x69   : > { %7419 = vmatpush3.bf16.msra.mxu0 %v8018_v11  ;;  %v8952_v11 = vld [vmem:[%s8382_s22 + $0x8] sm:$0xf] }
  0x6a   : > { %7109 = vmatmul.mubr.bf16.vlgmr.msra.gmra.mrb[0].mxu1 %v1050_v35  ;;  %7428 = vmatprep.subr.bf16.mxu0 %v8020_v22  ;;  %v8965_v35 = vcombine.low %v8940_v2, %v8943_v5  ;;  %v6072_v47 = vcombine.low %v1351_v10, %v8952_v11  ;;  %v3831_v10 = vsel %vm10233_vm10, %v8868_v26, 0  ;;  %v3830_v26 = vsel %vm10236_vm0, %v8853_v7, 0  ;;  %vm10237_vm10 = vmmov %vm10235_vm1  ;;  %v8043_v7 = vld [vmem:[%s10176_s3 + $0x450] sm:$0xff]  }
  0x6b   : > { %7117 = vmatpush3.bf16.msra.mxu1 %v8019_v8  ;;  %7112 = vmatprep.mubr.bf16.mxu1 %v1052_v62  ;;  %v8033_v8 = vld [vmem:[%s10176_s3 + $0xf8] sm:$0xff]   ;;  %v3679_v62 = vshrl.u32 %v8883_v45, 16  ;;  %vm10239_vm0 = vcmask 1046528  }
  0x6c   : > { %7118 = vmatprep.subr.bf16.mxu1 %v8021_v25  ;;  %7421 = vmatmul.mubr.bf16.vlgmr.msra.gmra.mrb[0].mxu0 %v8804_v50  ;;  %v8025_v50 = vld [vmem:[%s10176_s3 + $0xd8] sm:$0xff]  }
  0x6d   : > { %7429 = vmatpush3.bf16.msra.mxu0 %v8020_v22  ;;  %7424 = vmatprep.mubr.bf16.mxu0 %v6390_v63  ;;  %v8030_v63 = vld [vmem:[%s10176_s3 + $0x428] sm:$0xff]   ;;  %v8223_v22 = vld [vmem:[%s8382_s22 + $0x10] sm:$0xf] }
  0x6e   : > { %7430 = vmatprep.subr.bf16.mxu0 %v8022_v30  ;;  %v1184_v6 = vsel %vm8647_vm11, %v8223_v22, 0 }
  0x6f   : > { %7119 = vmatpush3.bf16.msra.mxu1 %v8021_v25  ;;  %v8035_v25 = vld [vmem:[%s10176_s3 + $0x100] sm:$0xff]   ;;  %v6045_v45 = vcombine.low %v1183_v27, %v1184_v6  ;;  %v3695_v6 = vshrl.u32 %v8965_v35, 16 }
  0x70   : > { %7120 = vmatprep.subr.bf16.mxu1 %v8023_v46 }
  0x71   : > { %7431 = vmatpush3.bf16.msra.mxu0 %v8022_v30  ;;  %v8976_v30 = vld [vmem:[%s8391_s14 + $0x28] sm:$0x1] }
  0x72   : > { %7113 = vmatmul.mubr.bf16.gmra.mrb[4].mxu1 %v1054_v56  ;;  %7432 = vmatprep.subr.bf16.mxu0 %v8024_v14  ;;  %v3691_v56 = vshll.u32 %v8965_v35, 16 }
  0x73   : > { %7121 = vmatpush3.bf16.msra.mxu1 %v8023_v46  ;;  %7132 = vmatprep.mubr.bf16.mxu1 %v6044_v58  ;;  %v8982_v46 = vld [vmem:[%s8382_s22 + $0x10] sm:$0xf]  ;;  %v1403_v58 = vshll.u32 %v6072_v47, 16 }
  0x74   : > { %7122 = vmatprep.subr.bf16.mxu1 %v8025_v50  ;;  %7425 = vmatmul.mubr.bf16.gmra.mrb[4].mxu0 %v6391_v59  ;;  %v3681_v59 = vor.u32 %v3679_v62, %v8911_v24  ;;  %v1188_v24 = vsel %vm8756_vm5, %v1180_v12, 0 }
  0x75   : > { %7433 = vmatpush3.bf16.msra.mxu0 %v8024_v14  ;;  %7444 = vmatprep.mubr.bf16.mxu0 %v3678_v53  ;;  %v6420_v14 = vcombine.low %v8976_v30, %v8976_v30  ;;  %v3689_v53 = vor.u32 %v3687_v52, %v3685_v57  ;;  %v1405_v18 = vrot.slane %v1403_v58, 1 }
  0x76   : > { %7434 = vmatprep.subr.bf16.mxu0 %v8026_v16  ;;  %v3686_v22 = vsel %vm10235_vm1, %v3681_v59, %v3685_v57  ;;  %v9053_v59 = vld [vmem:[%s8382_s22 + $0x14] sm:$0xf] }
  0x77   : > { %7123 = vmatpush3.bf16.msra.mxu1 %v8025_v50  ;;  %v8996_v50 = vcombine.low %v8979_v39, %v8982_v46  ;;  %v3699_v4 = vshll.u32 %v6420_v14, 16 }
  0x78   : > { %7124 = vmatprep.subr.bf16.mxu1 %v8027_v60 }
  0x79   : > { %7435 = vmatpush3.bf16.msra.mxu0 %v8026_v16  ;;  %v8040_v16 = vld [vmem:[%s10176_s3 + $0x108] sm:$0xff]   ;;  %v1408_v27 = vshll.u32 %v8996_v50, 16 }
  0x7a   : > { %7436 = vmatprep.subr.bf16.mxu0 %v8028_v32 }
  0x7b   : > { %7125 = vmatpush3.bf16.msra.mxu1 %v8027_v60  ;;  %v6046_v60 = vcombine.low %v1185_v51, %v1186_v28  ;;  %v9035_v51 = vrot.slane %v1408_v27, 1  ;;  %v8045_v28 = vld [vmem:[%s10176_s3 + $0x458] sm:$0xff]  }
  0x7c   : > { %7126 = vmatprep.subr.bf16.mxu1 %v8029_v43 }
  0x7d   : > { %7437 = vmatpush3.bf16.msra.mxu0 %v8028_v32  ;;  %v8226_v32 = vld [vmem:[%s8382_s22 + $0x1c] sm:$0xf] }
  0x7e   : > { %7438 = vmatprep.subr.bf16.mxu0 %v8030_v63 }
  0x7f   : > { %7127 = vmatpush3.bf16.msra.mxu1 %v8029_v43  ;;  %v1187_v43 = vsel %vm8743_vm7, %v8226_v32, 0  ;;  %v8047_v32 = vld [vmem:[%s10176_s3 + $0x460] sm:$0xff]  }
  0x80   : > { %7128 = vmatprep.subr.bf16.mxu1 %v8031_v0 }
  0x81   : > { %7439 = vmatpush3.bf16.msra.mxu0 %v8030_v63  ;;  %v3828_v63 = vld [vmem:[%s8391_s14 + $0x8] sm:$0xe] }
  0x82   : > { %7440 = vmatprep.subr.bf16.mxu0 %v8032_v15  ;;  %v3829_v62 = vsel %vm8588_vm2, %v3828_v63, 0 }
  0x83   : > { %7129 = vmatpush3.bf16.msra.mxu1 %v8031_v0  ;;  %v3693_v0 = vrot.slane %v3691_v56, 1  ;;  %v6445_v52 = vcombine.low %v3829_v62, %v3830_v26  ;;  %v8046_v56 = vld [vmem:[%s10176_s3 + $0x120] sm:$0xff]   ;;  %v1412_v62 = vshrl.u32 %v8996_v50, 16  ;;  %v8052_v26 = vld [vmem:[%s10176_s3 + $0x470] sm:$0xff]  }
  0x84   : > { %7130 = vmatprep.subr.bf16.mxu1 %v8033_v8 }
  0x85   : > { %7441 = vmatpush3.bf16.msra.mxu0 %v8032_v15  ;;  %v3832_v15 = vsel %vm10234_vm15, %v8874_v40, 0  ;;  %v8041_v40 = vld [vmem:[%s10176_s3 + $0x448] sm:$0xff]   ;;  %v3694_v35 = vsel %vm10237_vm10, %v3689_v53, %v3693_v0  ;;  %vm10238_vm15 = vmmov %vm10235_vm1  ;;  %v3878_v12 = vrot.slane %v6445_v52, 1  ;;  %v1747_v53 = vsel %vm8535_vm6, %v8979_v39, 0  ;;  %v8058_v52 = vld [vmem:[%s10176_s3 + $0x140] sm:$0xff]  }
  0x86   : > { %7442 = vmatprep.subr.bf16.mxu0 %v8034_v37  ;;  %v6446_v41 = vcombine.low %v3831_v10, %v3832_v15  ;;  %vm10241_vm10 = vcmp.ne.s16.totalorder %v8672_v9, 0  ;;  %v9089_v15 = vld [vmem:[%s8382_s22 + $0x1c] sm:$0xf] }
  0x87   : > { %7131 = vmatpush3.bf16.msra.mxu1 %v8033_v8  ;;  %v1401_v8 = vshrl.u32 %v6072_v47, 16  ;;  %v3701_v47 = vrot.slane %v3699_v4, 1  ;;  %v9092_v4 = vld [vmem:[%s8382_s22 + $0x20] sm:$0xf] }
  0x88   : > { %7140 = vmatprep.subr.bf16.mxu1 %v8035_v25  ;;  %v9049_v14 = vrot.slane %v6446_v41, 1  ;;  %v6075_v27 = vcombine.low %v9089_v15, %v9092_v4 }
  0x89   : > { %7443 = vmatpush3.bf16.msra.mxu0 %v8034_v37  ;;  %v8042_v37 = vld [vmem:[%s10176_s3 + $0x110] sm:$0xff]   ;;  %v1406_v49 = vor.u32 %v1405_v18, %v1401_v8  ;;  %v8049_v8 = vld [vmem:[%s10176_s3 + $0x468] sm:$0xff]  }
  0x8a   : > { %7133 = vmatmul.mubr.bf16.vlgmr.msra.gmra.mrb[0].mxu1 %v6045_v45  ;;  %7452 = vmatprep.subr.bf16.mxu0 %v8038_v23  ;;  %v3697_v45 = vor.u32 %v3695_v6, %v3693_v0  ;;  %v1748_v6 = vsel %vm8611_vm4, %v8982_v46, 0  ;;  %v1424_v50 = vshll.u32 %v6075_v27, 16 }
  0x8b   : > { %7141 = vmatpush3.bf16.msra.mxu1 %v8035_v25  ;;  %7136 = vmatprep.mubr.bf16.mxu1 %v6046_v60  ;;  %v6047_v25 = vcombine.low %v1187_v43, %v1188_v24  ;;  %v1411_v57 = vsel %vm10238_vm15, %v1406_v49, %v9035_v51  ;;  %v3880_v60 = vsel %vm10239_vm0, %v3878_v12, %v9049_v14  ;;  %v8048_v43 = vld [vmem:[%s10176_s3 + $0x128] sm:$0xff]   ;;  %v3833_v24 = vsel %vm10241_vm10, %v8934_v38, 0  ;;  %v8050_v38 = vld [vmem:[%s10176_s3 + $0x130] sm:$0xff]   ;;  %v8055_v49 = vld [vmem:[%s10176_s3 + $0x478] sm:$0xff]  }
  0x8c   : > { %7142 = vmatprep.subr.bf16.mxu1 %v8040_v16  ;;  %7445 = vmatmul.mubr.bf16.vlgmr.msra.gmra.mrb[0].mxu0 %v3686_v22  ;;  %v3702_v58 = vsel %vm10235_vm1, %v3697_v45, %v3701_v47  ;;  %vm10242_vm15 = vcmp.ne.s16.totalorder %v8684_v19, 0  ;;  %v9109_v22 = vld [vmem:[%s8382_s22 + $0x24] sm:$0x1]  ;;  %v3835_v45 = vsel %vm993_vm9, %v8940_v2, 0  ;;  %vm10243_vm1 = vcmp.ne.s16.totalorder %v8602_v31, 0 }
  0x8d   : > { %7453 = vmatpush3.bf16.msra.mxu0 %v8038_v23  ;;  %7448 = vmatprep.mubr.bf16.mxu0 %v3694_v35  ;;  %v9056_v23 = vld [vmem:[%s8382_s22 + $0x18] sm:$0xf]  ;;  %v3834_v10 = vsel %vm10242_vm15, %v8937_v13, 0  ;;  %v1561_v12 = vld [vmem:[%s8382_s22 + $0x4] sm:$0xe]  ;;  %v1428_v2 = vshrl.u32 %v6075_v27, 16 }
  0x8e   : > { %7454 = vmatprep.subr.bf16.mxu0 %v8041_v40  ;;  %v6074_v63 = vcombine.low %v9053_v59, %v9056_v23  ;;  %v6447_v18 = vcombine.low %v3833_v24, %v3834_v10  ;;  %vm10244_vm0 = vcmp.ne.s16.totalorder %v8606_v33, 0  ;;  %vm10245_vm10 = vsmask.f32 7424 }
  0x8f   : > { %7143 = vmatpush3.bf16.msra.mxu1 %v8040_v16  ;;  %v1746_v16 = vsel %vm8522_vm3, %v8952_v11, 0  ;;  %vm10246_vm15 = vcmp.ne.s16.totalorder %v8626_v44, 0 }
  0x90   : > { %7144 = vmatprep.subr.bf16.mxu1 %v8042_v37  ;;  %v9080_v0 = vcombine.low %v1746_v16, %v1747_v53  ;;  %v1416_v13 = vshll.u32 %v6074_v63, 16  ;;  %v3881_v35 = vrot.slane %v6447_v18, 1  ;;  %v1420_v41 = vshrl.u32 %v6074_v63, 16  ;;  %v8061_v63 = vld [vmem:[%s10176_s3 + $0x148] sm:$0xff]  }
  0x91   : > { %7455 = vmatpush3.bf16.msra.mxu0 %v8041_v40  ;;  %v8054_v40 = vld [vmem:[%s10176_s3 + $0x138] sm:$0xff]   ;;  %v1750_v53 = vsel %vm8659_vm8, %v9056_v23, 0 }
  0x92   : > { %7137 = vmatmul.mubr.bf16.gmra.mrb[4].mxu1 %v6047_v25  ;;  %7456 = vmatprep.subr.bf16.mxu0 %v8043_v7  ;;  %v1749_v25 = vsel %vm8647_vm11, %v9053_v59, 0 }
  0x93   : > { %7145 = vmatpush3.bf16.msra.mxu1 %v8042_v37  ;;  %7156 = vmatprep.mubr.bf16.mxu1 %v1411_v57  ;;  %v1418_v37 = vrot.slane %v1416_v13, 1  ;;  %v9127_v47 = vcombine.low %v1748_v6, %v1749_v25  ;;  %v1414_v57 = vor.u32 %v1412_v62, %v9035_v51  ;;  %v1562_v51 = vsel %vm8588_vm2, %v1561_v12, 0  ;;  %v8062_v62 = vld [vmem:[%s10176_s3 + $0x488] sm:$0xff]  }
  0x94   : > { %7146 = vmatprep.subr.bf16.mxu1 %v8044_v54  ;;  %7449 = vmatmul.mubr.bf16.gmra.mrb[4].mxu0 %v3702_v58  ;;  %v1426_v58 = vrot.slane %v1424_v50, 1  ;;  %v4012_v50 = vld [vmem:[%s9177_s9] sm:$0xf] }
  0x95   : > { %7457 = vmatpush3.bf16.msra.mxu0 %v8043_v7  ;;  %7468 = vmatprep.mubr.bf16.mxu0 %v3880_v60  ;;  %v6076_v7 = vcombine.low %v9109_v22, %v9109_v22 }
  0x96   : > { %7458 = vmatprep.subr.bf16.mxu0 %v8045_v28  ;;  %v1430_v27 = vor.u32 %v1428_v2, %v1426_v58  ;;  %v8068_v2 = vld [vmem:[%s10176_s3 + $0x4a0] sm:$0xff]  }
  0x97   : > { %7147 = vmatpush3.bf16.msra.mxu1 %v8044_v54  ;;  %v3836_v54 = vsel %vm994_vm12, %v8943_v5, 0  ;;  %v1564_v5 = vsel %vm10244_vm0, %v8979_v39, 0  ;;  %v1432_v16 = vshll.u32 %v6076_v7, 16  ;;  %v1419_v39 = vsel %vm10245_vm10, %v1414_v57, %v1418_v37  ;;  %v8067_v57 = vld [vmem:[%s10176_s3 + $0x160] sm:$0xff]  }
  0x98   : > { %7148 = vmatprep.subr.bf16.mxu1 %v8046_v56  ;;  %v6448_v60 = vcombine.low %v3835_v45, %v3836_v54  ;;  %vm10248_vm0 = vcmask 1046528   ;;  %v4020_v45 = vsel %vm8522_vm3, %v4012_v50, 0 }
  0x99   : > { %7459 = vmatpush3.bf16.msra.mxu0 %v8045_v28  ;;  %v3837_v28 = vsel %vm995_vm14, %v8976_v30, 0  ;;  %v8059_v30 = vld [vmem:[%s10176_s3 + $0x480] sm:$0xff]   ;;  %v3882_v18 = vsel %vm10248_vm0, %v9049_v14, %v3881_v35  ;;  %v1434_v6 = vrot.slane %v1432_v16, 1  ;;  %v8072_v16 = vld [vmem:[%s10176_s3 + $0x170] sm:$0xff]  }
  0x9a   : > { %7460 = vmatprep.subr.bf16.mxu0 %v8047_v32  ;;  %v6449_v10 = vcombine.low %v3837_v28, %v3837_v28 }
  0x9b   : > { %7149 = vmatpush3.bf16.msra.mxu1 %v8046_v56  ;;  %v1563_v56 = vsel %vm10243_vm1, %v8952_v11, 0  ;;  %v1422_v11 = vor.u32 %v1420_v41, %v1418_v37  ;;  %vm10247_vm1 = vmmov %vm10245_vm10 }
  0x9c   : > { %7150 = vmatprep.subr.bf16.mxu1 %v8048_v43  ;;  %v6101_v13 = vcombine.low %v1562_v51, %v1563_v56  ;;  %vm10249_vm10 = vmmov %vm10248_vm0  ;;  %v3885_v37 = vrot.slane %v6449_v10, 1  ;;  %v8066_v56 = vld [vmem:[%s10176_s3 + $0x498] sm:$0xff]   ;;  %v4014_v51 = vld [vmem:[%s9177_s9 + $0x8] sm:$0xf] }
  0x9d   : > { %7461 = vmatpush3.bf16.msra.mxu0 %v8047_v32  ;;  %v1565_v32 = vsel %vm10246_vm15, %v8982_v46, 0  ;;  %vm10250_vm15 = vmmov %vm10247_vm1  ;;  %v4015_v10 = vld [vmem:[%s9177_s9 + $0xc] sm:$0xf] }
  0x9e   : > { %7462 = vmatprep.subr.bf16.mxu0 %v8049_v8  ;;  %v6102_v46 = vcombine.low %v1564_v5, %v1565_v32  ;;  %v1611_v25 = vrot.slane %v6101_v13, 1  ;;  %v1435_v7 = vsel %vm10250_vm15, %v1430_v27, %v1434_v6  ;;  %v8069_v5 = vld [vmem:[%s10176_s3 + $0x168] sm:$0xff]   ;;  %vm10253_vm15 = vcmp.ne.s16.totalorder %v8684_v19, 0  ;;  %v4017_v27 = vld [vmem:[%s9177_s9 + $0x14] sm:$0xf] }
  0x9f   : > { %7151 = vmatpush3.bf16.msra.mxu1 %v8048_v43  ;;  %v1751_v43 = vsel %vm8675_vm13, %v9089_v15, 0  ;;  %v1570_v32 = vsel %vm995_vm14, %v9109_v22, 0  ;;  %v4022_v22 = vsel %vm8611_vm4, %v4014_v51, 0  ;;  %v9262_v6 = vld [vmem:[%s9177_s9 + $0x8] sm:$0xf] }
  0xa0   : > { %7152 = vmatprep.subr.bf16.mxu1 %v8050_v38  ;;  %v9171_v24 = vcombine.low %v1750_v53, %v1751_v43  ;;  %v9191_v41 = vrot.slane %v6102_v46, 1  ;;  %v4190_v43 = vld [vmem:[%s9177_s9] sm:$0xf]  ;;  %v6105_v46 = vcombine.low %v1570_v32, %v1570_v32 }
  0xa1   : > { %7463 = vmatpush3.bf16.msra.mxu0 %v8049_v8  ;;  %v1427_v8 = vsel %vm10247_vm1, %v1422_v11, %v1426_v58  ;;  %vm10251_vm1 = vmmov %vm10248_vm0  ;;  %v8070_v58 = vld [vmem:[%s10176_s3 + $0x4a8] sm:$0xff]   ;;  %v1567_v11 = vsel %vm10253_vm15, %v9056_v23, 0  ;;  %v8075_v23 = vld [vmem:[%s10176_s3 + $0x178] sm:$0xff]   ;;  %vm10256_vm15 = vsmask.f32 7424 }
  0xa2   : > { %7464 = vmatprep.subr.bf16.mxu0 %v8052_v26 }
  0xa3   : > { %7153 = vmatpush3.bf16.msra.mxu1 %v8050_v38  ;;  %v3883_v38 = vrot.slane %v6448_v60, 1  ;;  %v8073_v60 = vld [vmem:[%s10176_s3 + $0x4b0] sm:$0xff]  }
  0xa4   : > { %7154 = vmatprep.subr.bf16.mxu1 %v8054_v40 }
  0xa5   : > { %7465 = vmatpush3.bf16.msra.mxu0 %v8052_v26  ;;  %v8063_v26 = vld [vmem:[%s10176_s3 + $0x150] sm:$0xff]   ;;  %v3884_v14 = vsel %vm10249_vm10, %v3881_v35, %v3883_v38  ;;  %v1613_v35 = vsel %vm10251_vm1, %v1611_v25, %v9191_v41  ;;  %v3886_v28 = vsel %vm10248_vm0, %v3883_v38, %v3885_v37  ;;  %vm10252_vm10 = vcmp.ne.s16.totalorder %v8672_v9, 0  ;;  %v9255_v38 = vld [vmem:[%s9177_s9 + $0x4] sm:$0xf]  ;;  %v9272_v37 = vld [vmem:[%s9177_s9 + $0xc] sm:$0xf] }
  0xa6   : > { %7466 = vmatprep.subr.bf16.mxu0 %v8055_v49  ;;  %v4585_v25 = vsel %vm8522_vm3, %v9255_v38, 0  ;;  %vm10254_vm1 = vmmov %vm10248_vm0 }
  0xa7   : > { %7155 = vmatpush3.bf16.msra.mxu1 %v8054_v40  ;;  %v8064_v40 = vld [vmem:[%s10176_s3 + $0x490] sm:$0xff]  }
  0xa8   : > { %7164 = vmatprep.subr.bf16.mxu1 %v8058_v52 }
  0xa9   : > { %7467 = vmatpush3.bf16.msra.mxu0 %v8055_v49  ;;  %v4013_v49 = vld [vmem:[%s9177_s9 + $0x4] sm:$0xf] }
  0xaa   : > { %7157 = vmatmul.mubr.bf16.vlgmr.msra.gmra.mrb[0].mxu1 %v1419_v39  ;;  %7476 = vmatprep.subr.bf16.mxu0 %v8059_v30  ;;  %v4021_v54 = vsel %vm8535_vm6, %v4013_v49, 0  ;;  %v1568_v39 = vsel %vm993_vm9, %v9089_v15, 0  ;;  %v8076_v15 = vld [vmem:[%s10176_s3 + $0x4b8] sm:$0xff]   ;;  %v1618_v49 = vrot.slane %v6105_v46, 1 }
  0xab   : > { %7165 = vmatpush3.bf16.msra.mxu1 %v8058_v52  ;;  %7160 = vmatprep.mubr.bf16.mxu1 %v1427_v8  ;;  %v8065_v52 = vld [vmem:[%s10176_s3 + $0x158] sm:$0xff]   ;;  %v6474_v12 = vcombine.low %v4020_v45, %v4021_v54  ;;  %v4586_v45 = vsel %vm8535_vm6, %v9262_v6, 0  ;;  %v4025_v54 = vsel %vm8675_vm13, %v4017_v27, 0 }
  0xac   : > { %7166 = vmatprep.subr.bf16.mxu1 %v8061_v63  ;;  %7469 = vmatmul.mubr.bf16.vlgmr.msra.gmra.mrb[0].mxu0 %v3882_v18  ;;  %v4016_v18 = vld [vmem:[%s9177_s9 + $0x10] sm:$0xf] }
  0xad   : > { %7477 = vmatpush3.bf16.msra.mxu0 %v8059_v30  ;;  %7472 = vmatprep.mubr.bf16.mxu0 %v3884_v14  ;;  %v1566_v30 = vsel %vm10252_vm10, %v9053_v59, 0  ;;  %v1569_v59 = vsel %vm994_vm12, %v9092_v4, 0  ;;  %vm10255_vm10 = vmmov %vm10248_vm0 }
  0xae   : > { %7478 = vmatprep.subr.bf16.mxu0 %v8062_v62  ;;  %v6103_v53 = vcombine.low %v1566_v30, %v1567_v11  ;;  %v6104_v8 = vcombine.low %v1568_v39, %v1569_v59  ;;  %v4587_v30 = vsel %vm8611_vm4, %v9272_v37, 0  ;;  %v9317_v39 = vld [vmem:[%s9177_s9 + $0x14] sm:$0xf] }
  0xaf   : > { %7167 = vmatpush3.bf16.msra.mxu1 %v8061_v63  ;;  %v8077_v63 = vld [vmem:[%s10176_s3 + $0x180] sm:$0xff]  }
  0xb0   : > { %7168 = vmatprep.subr.bf16.mxu1 %v8063_v26  ;;  %v1614_v13 = vrot.slane %v6103_v53, 1  ;;  %v1616_v14 = vrot.slane %v6104_v8, 1  ;;  %v4589_v8 = vsel %vm8659_vm8, %v9317_v39, 0 }
  0xb1   : > { %7479 = vmatpush3.bf16.msra.mxu0 %v8062_v62  ;;  %v6502_v62 = vcombine.low %v4190_v43, %v9255_v38  ;;  %v8082_v43 = vld [vmem:[%s10176_s3 + $0x4d0] sm:$0xff]  }
  0xb2   : > { %7161 = vmatmul.mubr.bf16.gmra.mrb[4].mxu1 %v1435_v7  ;;  %7480 = vmatprep.subr.bf16.mxu0 %v8064_v40  ;;  %v1615_v50 = vsel %vm10254_vm1, %v9191_v41, %v1614_v13  ;;  %v4023_v7 = vsel %vm8647_vm11, %v4015_v10, 0  ;;  %v9291_v41 = vcombine.low %v9262_v6, %v9272_v37  ;;  %vm10257_vm1 = vcmp.ne.s16.totalorder %v8602_v31, 0 }
  0xb3   : > { %7169 = vmatpush3.bf16.msra.mxu1 %v8063_v26  ;;  %7180 = vmatprep.mubr.bf16.mxu1 %v1613_v35  ;;  %v8078_v26 = vld [vmem:[%s10176_s3 + $0x4c0] sm:$0xff]   ;;  %v4024_v35 = vsel %vm8659_vm8, %v4016_v18, 0  ;;  %v4240_v53 = vshrl.u32 %v6502_v62, 16 }
  0xb4   : > { %7170 = vmatprep.subr.bf16.mxu1 %v8065_v52  ;;  %7473 = vmatmul.mubr.bf16.gmra.mrb[4].mxu0 %v3886_v28  ;;  %v4242_v28 = vshll.u32 %v6502_v62, 16  ;;  %v6476_v59 = vcombine.low %v4024_v35, %v4025_v54  ;;  %v4247_v32 = vshll.u32 %v9291_v41, 16  ;;  %v8090_v35 = vld [vmem:[%s10176_s3 + $0x4f0] sm:$0xff]   ;;  %v4251_v54 = vshrl.u32 %v9291_v41, 16  ;;  %v8093_v41 = vld [vmem:[%s10176_s3 + $0x1c0] sm:$0xff]  }
  0xb5   : > { %7481 = vmatpush3.bf16.msra.mxu0 %v8064_v40  ;;  %7492 = vmatprep.mubr.bf16.mxu0 %v6474_v12  ;;  %v8079_v40 = vld [vmem:[%s10176_s3 + $0x188] sm:$0xff]   ;;  %v6475_v12 = vcombine.low %v4022_v22, %v4023_v7 }
  0xb6   : > { %7482 = vmatprep.subr.bf16.mxu0 %v8066_v56  ;;  %v4249_v62 = vrot.slane %v4247_v32, 1  ;;  %v8088_v7 = vld [vmem:[%s10176_s3 + $0x4e8] sm:$0xff]   ;;  %v8096_v32 = vld [vmem:[%s10176_s3 + $0x500] sm:$0xff]  }
  0xb7   : > { %7171 = vmatpush3.bf16.msra.mxu1 %v8065_v52  ;;  %v4018_v52 = vld [vmem:[%s9177_s9 + $0x18] sm:$0xf] }
  0xb8   : > { %7172 = vmatprep.subr.bf16.mxu1 %v8067_v57  ;;  %v4026_v51 = vsel %vm8743_vm7, %v4018_v52, 0 }
  0xb9   : > { %7483 = vmatpush3.bf16.msra.mxu0 %v8066_v56  ;;  %v9294_v56 = vld [vmem:[%s9177_s9 + $0x10] sm:$0xf] }
  0xba   : > { %7484 = vmatprep.subr.bf16.mxu0 %v8068_v2  ;;  %v4588_v11 = vsel %vm8647_vm11, %v9294_v56, 0 }
  0xbb   : > { %7173 = vmatpush3.bf16.msra.mxu1 %v8067_v57  ;;  %v9296_v57 = vcombine.low %v4585_v25, %v4586_v45  ;;  %v8086_v25 = vld [vmem:[%s10176_s3 + $0x4e0] sm:$0xff]   ;;  %v8091_v45 = vld [vmem:[%s10176_s3 + $0x1b8] sm:$0xff]  }
  0xbc   : > { %7174 = vmatprep.subr.bf16.mxu1 %v8069_v5 }
  0xbd   : > { %7485 = vmatpush3.bf16.msra.mxu0 %v8068_v2  ;;  %v8080_v2 = vld [vmem:[%s10176_s3 + $0x4c8] sm:$0xff]  }
  0xbe   : > { %7486 = vmatprep.subr.bf16.mxu0 %v8070_v58 }
  0xbf   : > { %7175 = vmatpush3.bf16.msra.mxu1 %v8069_v5  ;;  %v8081_v5 = vld [vmem:[%s10176_s3 + $0x190] sm:$0xff]  }
  0xc0   : > { %7176 = vmatprep.subr.bf16.mxu1 %v8072_v16 }
  0xc1   : > { %7487 = vmatpush3.bf16.msra.mxu0 %v8070_v58  ;;  %v1617_v58 = vsel %vm10248_vm0, %v1614_v13, %v1616_v14  ;;  %v8083_v13 = vld [vmem:[%s10176_s3 + $0x198] sm:$0xff]   ;;  %vm10258_vm0 = vcmp.ne.s16.totalorder %v8606_v33, 0 }
  0xc2   : > { %7488 = vmatprep.subr.bf16.mxu0 %v8073_v60 }
  0xc3   : > { %7177 = vmatpush3.bf16.msra.mxu1 %v8072_v16  ;;  %v4019_v16 = vld [vmem:[%s9177_s9 + $0x1c] sm:$0xf] }
  0xc4   : > { %7178 = vmatprep.subr.bf16.mxu1 %v8075_v23  ;;  %v4027_v10 = vsel %vm8756_vm5, %v4019_v16, 0  ;;  %v9377_v16 = vld [vmem:[%s8382_s22 + $0x10] sm:$0xf] }
  0xc5   : > { %7489 = vmatpush3.bf16.msra.mxu0 %v8073_v60  ;;  %v9312_v60 = vcombine.low %v4587_v30, %v4588_v11  ;;  %v6477_v18 = vcombine.low %v4026_v51, %v4027_v10  ;;  %v8092_v30 = vld [vmem:[%s10176_s3 + $0x4f8] sm:$0xff]   ;;  %v9388_v51 = vld [vmem:[%s8382_s22 + $0x14] sm:$0xf] }
  0xc6   : > { %7490 = vmatprep.subr.bf16.mxu0 %v8076_v15 }
  0xc7   : > { %7179 = vmatpush3.bf16.msra.mxu1 %v8075_v23  ;;  %v4244_v23 = vrot.slane %v4242_v28, 1  ;;  %v9370_v28 = vld [vmem:[%s9177_s9 + $0x1c] sm:$0xf] }
  0xc8   : > { %7188 = vmatprep.subr.bf16.mxu1 %v8077_v63 }
  0xc9   : > { %7491 = vmatpush3.bf16.msra.mxu0 %v8076_v15  ;;  %v9324_v15 = vld [vmem:[%s9177_s9 + $0x18] sm:$0xf]  ;;  %v4245_v27 = vor.u32 %v4244_v23, %v4240_v53  ;;  %v1745_v23 = vld [vmem:[%s8382_s22 + $0x24] sm:$0xf] }
  0xca   : > { %7181 = vmatmul.mubr.bf16.vlgmr.msra.gmra.mrb[0].mxu1 %v1615_v50  ;;  %7500 = vmatprep.subr.bf16.mxu0 %v8078_v26  ;;  %v4590_v22 = vsel %vm8675_vm13, %v9324_v15, 0  ;;  %v8087_v50 = vld [vmem:[%s10176_s3 + $0x1a8] sm:$0xff]   ;;  %v6505_v11 = vcombine.low %v9324_v15, %v9370_v28 }
  0xcb   : > { %7189 = vmatpush3.bf16.msra.mxu1 %v8077_v63  ;;  %7184 = vmatprep.mubr.bf16.mxu1 %v1617_v58  ;;  %v1619_v63 = vsel %vm10255_vm10, %v1616_v14, %v1618_v49  ;;  %v9338_v46 = vcombine.low %v4589_v8, %v4590_v22  ;;  %v4250_v14 = vsel %vm10256_vm15, %v4245_v27, %v4249_v62  ;;  %v8089_v49 = vld [vmem:[%s10176_s3 + $0x1b0] sm:$0xff]   ;;  %v1752_v27 = vsel %vm8743_vm7, %v9092_v4, 0 }
  0xcc   : > { %7190 = vmatprep.subr.bf16.mxu1 %v8079_v40  ;;  %7493 = vmatmul.mubr.bf16.vlgmr.msra.gmra.mrb[0].mxu0 %v6475_v12  ;;  %v1916_v12 = vld [vmem:[%s8382_s22 + $0x8] sm:$0xf]  ;;  %v4253_v8 = vor.u32 %v4251_v54, %v4249_v62  ;;  %v1753_v62 = vsel %vm8756_vm5, %v1745_v23, 0  ;;  %vm10259_vm10 = vcmp.ne.s16.totalorder %v8626_v44, 0 }
  0xcd   : > { %7501 = vmatpush3.bf16.msra.mxu0 %v8078_v26  ;;  %7496 = vmatprep.mubr.bf16.mxu0 %v6476_v59  ;;  %v8084_v26 = vld [vmem:[%s10176_s3 + $0x4d8] sm:$0xff]   ;;  %v9392_v59 = vld [vmem:[%s9177_s9 + $0x20] sm:$0x1] }
  0xce   : > { %7502 = vmatprep.subr.bf16.mxu0 %v8080_v2  ;;  %v6506_v22 = vcombine.low %v9392_v59, %v9392_v59 }
  0xcf   : > { %7191 = vmatpush3.bf16.msra.mxu1 %v8079_v40  ;;  %v8085_v40 = vld [vmem:[%s10176_s3 + $0x1a0] sm:$0xff]  }
  0xd0   : > { %7192 = vmatprep.subr.bf16.mxu1 %v8081_v5 }
  0xd1   : > { %7503 = vmatpush3.bf16.msra.mxu0 %v8080_v2  ;;  %v9374_v2 = vld [vmem:[%s8382_s22 + $0xc] sm:$0xf] }
  0xd2   : > { %7185 = vmatmul.mubr.bf16.gmra.mrb[4].mxu1 %v1619_v63  ;;  %7504 = vmatprep.subr.bf16.mxu0 %v8082_v43  ;;  %v6158_v53 = vcombine.low %v1916_v12, %v9374_v2  ;;  %v9400_v63 = vcombine.low %v9377_v16, %v9388_v51 }
  0xd3   : > { %7193 = vmatpush3.bf16.msra.mxu1 %v8081_v5  ;;  %7204 = vmatprep.mubr.bf16.mxu1 %v9080_v0  ;;  %v6504_v0 = vcombine.low %v9294_v56, %v9317_v39 }
  0xd4   : > { %7194 = vmatprep.subr.bf16.mxu1 %v8083_v13  ;;  %7497 = vmatmul.mubr.bf16.gmra.mrb[4].mxu0 %v6477_v18  ;;  %v1968_v10 = vshll.u32 %v6158_v53, 16 }
  0xd5   : > { %7505 = vmatpush3.bf16.msra.mxu0 %v8082_v43  ;;  %7516 = vmatprep.mubr.bf16.mxu0 %v4250_v14  ;;  %v4255_v52 = vshll.u32 %v6504_v0, 16  ;;  %v4259_v58 = vshrl.u32 %v6504_v0, 16  ;;  %v4263_v43 = vshll.u32 %v6505_v11, 16  ;;  %v4267_v14 = vshrl.u32 %v6505_v11, 16  ;;  %v8101_v11 = vld [vmem:[%s10176_s3 + $0x510] sm:$0xff]  }
  0xd6   : > { %7506 = vmatprep.subr.bf16.mxu0 %v8084_v26  ;;  %v1966_v0 = vshrl.u32 %v6158_v53, 16 }
  0xd7   : > { %7195 = vmatpush3.bf16.msra.mxu1 %v8083_v13  ;;  %v4257_v5 = vrot.slane %v4255_v52, 1  ;;  %v8098_v13 = vld [vmem:[%s10176_s3 + $0x1c8] sm:$0xff]   ;;  %v4265_v4 = vrot.slane %v4263_v43, 1  ;;  %v4271_v52 = vshll.u32 %v6506_v22, 16 }
  0xd8   : > { %7196 = vmatprep.subr.bf16.mxu1 %v8085_v40  ;;  %v8106_v22 = vld [vmem:[%s10176_s3 + $0x1e8] sm:$0xff]  }
  0xd9   : > { %7507 = vmatpush3.bf16.msra.mxu0 %v8084_v26  ;;  %v4261_v18 = vor.u32 %v4259_v58, %v4257_v5  ;;  %v4400_v26 = vld [vmem:[%s9177_s9] sm:$0xe] }
  0xda   : > { %7508 = vmatprep.subr.bf16.mxu0 %v8086_v25 }
  0xdb   : > { %7197 = vmatpush3.bf16.msra.mxu1 %v8085_v40  ;;  %v4402_v40 = vsel %vm10257_vm1, %v9255_v38, 0  ;;  %v4258_v38 = vsel %vm10256_vm15, %v4253_v8, %v4257_v5  ;;  %vm10260_vm1 = vmmov %vm10256_vm15  ;;  %v8104_v8 = vld [vmem:[%s10176_s3 + $0x1e0] sm:$0xff]   ;;  %vm10263_vm15 = vcmask 1046528  }
  0xdc   : > { %7198 = vmatprep.subr.bf16.mxu1 %v8087_v50  ;;  %v4266_v54 = vsel %vm10260_vm1, %v4261_v18, %v4265_v4 }
  0xdd   : > { %7509 = vmatpush3.bf16.msra.mxu0 %v8086_v25  ;;  %v4403_v25 = vsel %vm10258_vm0, %v9262_v6, 0  ;;  %v8099_v6 = vld [vmem:[%s10176_s3 + $0x508] sm:$0xff]   ;;  %vm10261_vm0 = vmmov %vm10260_vm1  ;;  %vm10264_vm1 = vcmp.ne.s16.totalorder %v8672_v9, 0 }
  0xde   : > { %7510 = vmatprep.subr.bf16.mxu0 %v8088_v7 }
  0xdf   : > { %7199 = vmatpush3.bf16.msra.mxu1 %v8087_v50  ;;  %v4404_v50 = vsel %vm10259_vm10, %v9272_v37, 0  ;;  %v6133_v37 = vcombine.low %v1752_v27, %v1753_v62  ;;  %vm10262_vm10 = vmmov %vm10261_vm0  ;;  %v9463_v27 = vld [vmem:[%s8382_s22 + $0x18] sm:$0xf]  ;;  %v8107_v62 = vld [vmem:[%s10176_s3 + $0x528] sm:$0xff]  }
  0xe0   : > { %7200 = vmatprep.subr.bf16.mxu1 %v8089_v49 }
  0xe1   : > { %7511 = vmatpush3.bf16.msra.mxu0 %v8088_v7  ;;  %v1970_v7 = vrot.slane %v1968_v10, 1  ;;  %v8103_v10 = vld [vmem:[%s10176_s3 + $0x518] sm:$0xff]  }
  0xe2   : > { %7512 = vmatprep.subr.bf16.mxu0 %v8090_v35 }
  0xe3   : > { %7201 = vmatpush3.bf16.msra.mxu1 %v8089_v49  ;;  %v1973_v49 = vshll.u32 %v9400_v63, 16  ;;  %v1971_v12 = vor.u32 %v1970_v7, %v1966_v0  ;;  %v9489_v7 = vld [vmem:[%s8382_s22 + $0x28] sm:$0x1] }
  0xe4   : > { %7202 = vmatprep.subr.bf16.mxu1 %v8091_v45 }
  0xe5   : > { %7513 = vmatpush3.bf16.msra.mxu0 %v8090_v35  ;;  %v4401_v35 = vsel %vm8588_vm2, %v4400_v26, 0  ;;  %v9435_v5 = vrot.slane %v1973_v49, 1  ;;  %v9466_v26 = vld [vmem:[%s8382_s22 + $0x1c] sm:$0xf] }
  0xe6   : > { %7514 = vmatprep.subr.bf16.mxu0 %v8092_v30  ;;  %v6531_v58 = vcombine.low %v4401_v35, %v4402_v40  ;;  %v9469_v40 = vld [vmem:[%s8382_s22 + $0x20] sm:$0xf] }
  0xe7   : > { %7203 = vmatpush3.bf16.msra.mxu1 %v8091_v45  ;;  %v6532_v45 = vcombine.low %v4403_v25, %v4404_v50  ;;  %v1976_v53 = vsel %vm10261_vm0, %v1971_v12, %v9435_v5  ;;  %v6160_v25 = vcombine.low %v9463_v27, %v9466_v26  ;;  %v9480_v50 = vld [vmem:[%s8382_s22 + $0x24] sm:$0xf]  ;;  %vm10265_vm0 = vcmp.ne.s16.totalorder %v8684_v19, 0 }
  0xe8   : > { %7212 = vmatprep.subr.bf16.mxu1 %v8093_v41  ;;  %v4450_v23 = vrot.slane %v6531_v58, 1  ;;  %v4406_v0 = vsel %vm10265_vm0, %v9317_v39, 0  ;;  %v6161_v49 = vcombine.low %v9469_v40, %v9480_v50  ;;  %v6162_v39 = vcombine.low %v9489_v7, %v9489_v7 }
  0xe9   : > { %7515 = vmatpush3.bf16.msra.mxu0 %v8092_v30  ;;  %v4269_v30 = vor.u32 %v4267_v14, %v4265_v4  ;;  %v8108_v14 = vld [vmem:[%s10176_s3 + $0x1f0] sm:$0xff]   ;;  %v4405_v4 = vsel %vm10264_vm1, %v9294_v56, 0  ;;  %v1981_v35 = vshll.u32 %v6160_v25, 16  ;;  %v8112_v56 = vld [vmem:[%s10176_s3 + $0x1f8] sm:$0xff]   ;;  %vm10268_vm1 = vcmp.ne.s16.totalorder %v8626_v44, 0 }
  0xea   : > { %7205 = vmatmul.mubr.bf16.vlgmr.msra.gmra.mrb[0].mxu1 %v9127_v47  ;;  %7524 = vmatprep.subr.bf16.mxu0 %v8096_v32  ;;  %v8100_v47 = vld [vmem:[%s10176_s3 + $0x1d0] sm:$0xff]   ;;  %v1989_v12 = vshll.u32 %v6161_v49, 16  ;;  %vm10269_vm0 = vsmask.f32 7424 }
  0xeb   : > { %7213 = vmatpush3.bf16.msra.mxu1 %v8093_v41  ;;  %7208 = vmatprep.mubr.bf16.mxu1 %v9171_v24  ;;  %v4273_v41 = vrot.slane %v4271_v52, 1  ;;  %v8102_v24 = vld [vmem:[%s10176_s3 + $0x1d8] sm:$0xff]   ;;  %v1977_v52 = vshrl.u32 %v9400_v63, 16  ;;  %v4408_v63 = vsel %vm994_vm12, %v9370_v28, 0 }
  0xec   : > { %7214 = vmatprep.subr.bf16.mxu1 %v8098_v13  ;;  %7517 = vmatmul.mubr.bf16.vlgmr.msra.gmra.mrb[0].mxu0 %v4258_v38  ;;  %v8110_v38 = vld [vmem:[%s10176_s3 + $0x530] sm:$0xff]  }
  0xed   : > { %7525 = vmatpush3.bf16.msra.mxu0 %v8096_v32  ;;  %7520 = vmatprep.mubr.bf16.mxu0 %v4266_v54  ;;  %v9445_v32 = vrot.slane %v6532_v45, 1  ;;  %v4274_v43 = vsel %vm10262_vm10, %v4269_v30, %v4273_v41  ;;  %v8116_v45 = vld [vmem:[%s10176_s3 + $0x200] sm:$0xff]   ;;  %v1985_v54 = vshrl.u32 %v6160_v25, 16  ;;  %v1979_v58 = vor.u32 %v1977_v52, %v9435_v5  ;;  %v2126_v41 = vld [vmem:[%s8382_s22 + $0x8] sm:$0xe]  ;;  %s414_s22 = sadd.s32 %s5957_s23, %s10333_s24 }
  0xee   : > { %7526 = vmatprep.subr.bf16.mxu0 %v8099_v6  ;;  %v1983_v30 = vrot.slane %v1981_v35, 1  ;;  %vm10266_vm10 = vcmp.ne.s16.totalorder %v8602_v31, 0  ;;  %s415_s11 = scalar_lea.vmem %s10180_s7, %s414_s22 }
  0xef   : > { %7215 = vmatpush3.bf16.msra.mxu1 %v8098_v13  ;;  %v8105_v13 = vld [vmem:[%s10176_s3 + $0x520] sm:$0xff]   ;;  %v4452_v18 = vsel %vm10263_vm15, %v4450_v23, %v9445_v32  ;;  %vm10267_vm15 = vcmp.ne.s16.totalorder %v8606_v33, 0 }
  0xf0   : > { %7216 = vmatprep.subr.bf16.mxu1 %v8100_v47  ;;  %v2129_v23 = vsel %vm10267_vm15, %v9377_v16, 0  ;;  %v1987_v5 = vor.u32 %v1985_v54, %v1983_v30  ;;  %v1993_v16 = vshrl.u32 %v6161_v49, 16  ;;  %vm10271_vm15 = vmmov %vm10269_vm0 }
  0xf1   : > { %7527 = vmatpush3.bf16.msra.mxu0 %v8099_v6  ;;  %v6533_v6 = vcombine.low %v4405_v4, %v4406_v0  ;;  %v9538_v4 = vld [vmem:[%s9177_s9 + $0x8] sm:$0xf] }
  0xf2   : > { %7209 = vmatmul.mubr.bf16.gmra.mrb[4].mxu1 %v6133_v37  ;;  %7528 = vmatprep.subr.bf16.mxu0 %v8101_v11  ;;  %v8113_v37 = vld [vmem:[%s10176_s3 + $0x538] sm:$0xff]  }
  0xf3   : > { %7217 = vmatpush3.bf16.msra.mxu1 %v8100_v47  ;;  %7228 = vmatprep.mubr.bf16.mxu1 %v1976_v53  ;;  %v4407_v47 = vsel %vm993_vm9, %v9324_v15, 0  ;;  %v4453_v15 = vrot.slane %v6533_v6, 1  ;;  %v2128_v53 = vsel %vm10266_vm10, %v9374_v2, 0  ;;  %v8117_v2 = vld [vmem:[%s10176_s3 + $0x540] sm:$0xff]   ;;  %vm10270_vm10 = vcmask 1046528  }
  0xf4   : > { %7218 = vmatprep.subr.bf16.mxu1 %v8102_v24  ;;  %7521 = vmatmul.mubr.bf16.gmra.mrb[4].mxu0 %v4274_v43  ;;  %v2130_v43 = vsel %vm10268_vm1, %v9388_v51, 0  ;;  %v8119_v51 = vld [vmem:[%s10176_s3 + $0x208] sm:$0xff]   ;;  %v9547_v6 = vld [vmem:[%s9177_s9 + $0x10] sm:$0xf]  ;;  %vm10272_vm1 = vmmov %vm10270_vm10 }
  0xf5   : > { %7529 = vmatpush3.bf16.msra.mxu0 %v8101_v11  ;;  %7540 = vmatprep.mubr.bf16.mxu0 %v4452_v18  ;;  %v6534_v11 = vcombine.low %v4407_v47, %v4408_v63  ;;  %v6188_v25 = vcombine.low %v2129_v23, %v2130_v43  ;;  %v4454_v0 = vsel %vm10270_vm10, %v9445_v32, %v4453_v15  ;;  %v8121_v47 = vld [vmem:[%s10176_s3 + $0x210] sm:$0xff]   ;;  %vm10273_vm10 = vmmov %vm10272_vm1  ;;  %v8124_v23 = vld [vmem:[%s10176_s3 + $0x558] sm:$0xff]  }
  0xf6   : > { %7530 = vmatprep.subr.bf16.mxu0 %v8103_v10  ;;  %v8125_v43 = vld [vmem:[%s10176_s3 + $0x220] sm:$0xff]  }
  0xf7   : > { %7219 = vmatpush3.bf16.msra.mxu1 %v8102_v24  ;;  %v1997_v24 = vshll.u32 %v6162_v39, 16  ;;  %v8120_v39 = vld [vmem:[%s10176_s3 + $0x548] sm:$0xff]  }
  0xf8   : > { %7220 = vmatprep.subr.bf16.mxu1 %v8104_v8 }
  0xf9   : > { %7531 = vmatpush3.bf16.msra.mxu0 %v8103_v10  ;;  %v1991_v10 = vrot.slane %v1989_v12, 1  ;;  %v1999_v18 = vrot.slane %v1997_v24, 1  ;;  %v9572_v12 = vrot.slane %v6188_v25, 1 }
  0xfa   : > { %7532 = vmatprep.subr.bf16.mxu0 %v8105_v13 }
  0xfb   : > { %7221 = vmatpush3.bf16.msra.mxu1 %v8104_v8  ;;  %v2127_v8 = vsel %vm8588_vm2, %v2126_v41, 0  ;;  %v1992_v49 = vsel %vm10271_vm15, %v1987_v5, %v1991_v10  ;;  %v1995_v52 = vor.u32 %v1993_v16, %v1991_v10  ;;  %v8122_v41 = vld [vmem:[%s10176_s3 + $0x550] sm:$0xff]   ;;  %vm10274_vm15 = vmmov %vm10272_vm1  ;;  %v8126_v10 = vld [vmem:[%s10176_s3 + $0x560] sm:$0xff]  }
  0xfc   : > { %7222 = vmatprep.subr.bf16.mxu1 %v8106_v22 }
  0xfd   : > { %7533 = vmatpush3.bf16.msra.mxu0 %v8105_v13  ;;  %v1984_v13 = vsel %vm10269_vm0, %v1979_v58, %v1983_v30  ;;  %v2000_v24 = vsel %vm10269_vm0, %v1995_v52, %v1999_v18  ;;  %vm10276_vm0 = vcmp.ne.s16.totalorder %v8684_v19, 0  ;;  %v2134_v18 = vsel %vm994_vm12, %v9480_v50, 0  ;;  %v8135_v50 = vld [vmem:[%s10176_s3 + $0x240] sm:$0xff]  }
  0xfe   : > { %7534 = vmatprep.subr.bf16.mxu0 %v8107_v62 }
  0xff   : > { %7223 = vmatpush3.bf16.msra.mxu1 %v8106_v22  ;;  %v4455_v22 = vrot.slane %v6534_v11, 1  ;;  %v8123_v11 = vld [vmem:[%s10176_s3 + $0x218] sm:$0xff]  }
 0x100   : > { %7224 = vmatprep.subr.bf16.mxu1 %v8108_v14 }
 0x101   : > { %7535 = vmatpush3.bf16.msra.mxu0 %v8107_v62  ;;  %v4409_v62 = vsel %vm995_vm14, %v9392_v59, 0  ;;  %v5150_v59 = vsel %vm8522_vm3, %v9538_v4, 0  ;;  %v4456_v30 = vsel %vm10272_vm1, %v4453_v15, %v4455_v22  ;;  %vm10275_vm1 = vcmp.ne.s16.totalorder %v8672_v9, 0 }
 0x102   : > { %7536 = vmatprep.subr.bf16.mxu0 %v8110_v38  ;;  %v6535_v35 = vcombine.low %v4409_v62, %v4409_v62  ;;  %v2131_v16 = vsel %vm10275_vm1, %v9463_v27, 0  ;;  %v8131_v27 = vld [vmem:[%s10176_s3 + $0x570] sm:$0xff]   ;;  %vm10278_vm1 = vmmov %vm10273_vm10 }
 0x103   : > { %7225 = vmatpush3.bf16.msra.mxu1 %v8108_v14  ;;  %v6187_v14 = vcombine.low %v2127_v8, %v2128_v53  ;;  %v8127_v8 = vld [vmem:[%s10176_s3 + $0x228] sm:$0xff]  }
 0x104   : > { %7226 = vmatprep.subr.bf16.mxu1 %v8112_v56  ;;  %v4457_v53 = vrot.slane %v6535_v35, 1  ;;  %v8136_v35 = vld [vmem:[%s10176_s3 + $0x580] sm:$0xff]  }
 0x105   : > { %7537 = vmatpush3.bf16.msra.mxu0 %v8110_v38  ;;  %v9544_v38 = vld [vmem:[%s9177_s9 + $0xc] sm:$0xf]  ;;  %v2176_v54 = vrot.slane %v6187_v14, 1  ;;  %v4755_v14 = vld [vmem:[%s9177_s9 + $0x4] sm:$0xf] }
 0x106   : > { %7538 = vmatprep.subr.bf16.mxu0 %v8113_v37  ;;  %v5151_v32 = vsel %vm8535_vm6, %v9544_v38, 0  ;;  %v4458_v5 = vsel %vm10274_vm15, %v4455_v22, %v4457_v53  ;;  %v2133_v22 = vsel %vm993_vm9, %v9469_v40, 0  ;;  %v8134_v40 = vld [vmem:[%s10176_s3 + $0x578] sm:$0xff]   ;;  %vm10277_vm15 = vmmov %vm10273_vm10 }
 0x107   : > { %7227 = vmatpush3.bf16.msra.mxu1 %v8112_v56  ;;  %v9550_v56 = vld [vmem:[%s9177_s9 + $0x14] sm:$0xf]  ;;  %v9564_v63 = vcombine.low %v5150_v59, %v5151_v32  ;;  %v2178_v15 = vsel %vm10273_vm10, %v2176_v54, %v9572_v12  ;;  %v6190_v62 = vcombine.low %v2133_v22, %v2134_v18  ;;  %v9649_v54 = vld [vmem:[%s8391_s14 + $0x8] sm:$0xf] }
 0x108   : > { %7236 = vmatprep.subr.bf16.mxu1 %v8116_v45  ;;  %v2884_v53 = vsel %vm8535_vm6, %v9649_v54, 0 }
 0x109   : > { %7539 = vmatpush3.bf16.msra.mxu0 %v8113_v37  ;;  %v5152_v37 = vsel %vm8611_vm4, %v9547_v6, 0  ;;  %v2181_v52 = vrot.slane %v6190_v62, 1 }
 0x10a   : > { %7229 = vmatmul.mubr.bf16.vlgmr.msra.gmra.mrb[0].mxu1 %v1984_v13  ;;  %7548 = vmatprep.subr.bf16.mxu0 %v8117_v2  ;;  %v8130_v13 = vld [vmem:[%s10176_s3 + $0x230] sm:$0xff]  }
 0x10b   : > { %7237 = vmatpush3.bf16.msra.mxu1 %v8116_v45  ;;  %v5153_v45 = vsel %vm8647_vm11, %v9550_v56, 0  ;;  %7232 = vmatprep.mubr.bf16.mxu1 %v1992_v49  ;;  %v6588_v49 = vcombine.low %v4755_v14, %v9538_v4  ;;  %v9705_v14 = vld [vmem:[%s8391_s14 + $0x14] sm:$0xf] }
 0x10c   : > { %7238 = vmatprep.subr.bf16.mxu1 %v8119_v51  ;;  %v9574_v58 = vcombine.low %v5152_v37, %v5153_v45  ;;  %7541 = vmatmul.mubr.bf16.vlgmr.msra.gmra.mrb[0].mxu0 %v4454_v0  ;;  %v2135_v0 = vsel %vm995_vm14, %v9489_v7, 0  ;;  %v8137_v7 = vld [vmem:[%s10176_s3 + $0x248] sm:$0xff]   ;;  %v9646_v45 = vld [vmem:[%s8391_s14 + $0x4] sm:$0xf] }
 0x10d   : > { %7549 = vmatpush3.bf16.msra.mxu0 %v8117_v2  ;;  %7544 = vmatprep.mubr.bf16.mxu0 %v4456_v30  ;;  %v8128_v2 = vld [vmem:[%s10176_s3 + $0x568] sm:$0xff]   ;;  %v6191_v32 = vcombine.low %v2135_v0, %v2135_v0  ;;  %v4807_v37 = vshll.u32 %v6588_v49, 16  ;;  %v4805_v18 = vshrl.u32 %v6588_v49, 16  ;;  %v2887_v0 = vsel %vm8659_vm8, %v9705_v14, 0 }
 0x10e   : > { %7550 = vmatprep.subr.bf16.mxu0 %v8120_v39 }
 0x10f   : > { %7239 = vmatpush3.bf16.msra.mxu1 %v8119_v51  ;;  %v2132_v51 = vsel %vm10276_vm0, %v9466_v26, 0  ;;  %v8133_v26 = vld [vmem:[%s10176_s3 + $0x238] sm:$0xff]   ;;  %vm10283_vm0 = vcmp.ne.s16.totalorder %v8626_v44, 0 }
 0x110   : > { %7240 = vmatprep.subr.bf16.mxu1 %v8121_v47 }
 0x111   : > { %7551 = vmatpush3.bf16.msra.mxu0 %v8120_v39  ;;  %v4584_v39 = vld [vmem:[%s9177_s9 + $0x20] sm:$0xf] }
 0x112   : > { %7233 = vmatmul.mubr.bf16.gmra.mrb[4].mxu1 %v2000_v24  ;;  %7552 = vmatprep.subr.bf16.mxu0 %v8122_v41  ;;  %v2883_v24 = vsel %vm8522_vm3, %v9646_v45, 0 }
 0x113   : > { %7241 = vmatpush3.bf16.msra.mxu1 %v8121_v47  ;;  %7252 = vmatprep.mubr.bf16.mxu1 %v2178_v15  ;;  %v2310_v47 = vld [vmem:[%s8391_s14] sm:$0xf]  ;;  %v2183_v15 = vrot.slane %v6191_v32, 1 }
 0x114   : > { %7242 = vmatprep.subr.bf16.mxu1 %v8123_v11  ;;  %7545 = vmatmul.mubr.bf16.gmra.mrb[4].mxu0 %v4458_v5  ;;  %v8144_v32 = vld [vmem:[%s10176_s3 + $0x5a0] sm:$0xff]  }
 0x115   : > { %7553 = vmatpush3.bf16.msra.mxu0 %v8122_v41  ;;  %7564 = vmatprep.mubr.bf16.mxu0 %v9296_v57  ;;  %v6189_v57 = vcombine.low %v2131_v16, %v2132_v51  ;;  %v9657_v41 = vld [vmem:[%s8391_s14 + $0xc] sm:$0xf]  ;;  %v4591_v16 = vsel %vm8743_vm7, %v9370_v28, 0  ;;  %v4592_v51 = vsel %vm8756_vm5, %v4584_v39, 0  ;;  %v2184_v28 = vsel %vm10278_vm1, %v2181_v52, %v2183_v15  ;;  %v9732_v39 = vld [vmem:[%s9177_s9 + $0x18] sm:$0xf] }
 0x116   : > { %7554 = vmatprep.subr.bf16.mxu0 %v8124_v23  ;;  %v2885_v5 = vsel %vm8611_vm4, %v9657_v41, 0  ;;  %v8148_v15 = vld [vmem:[%s10176_s3 + $0x5b0] sm:$0xff]  }
 0x117   : > { %7243 = vmatpush3.bf16.msra.mxu1 %v8123_v11  ;;  %v2179_v25 = vrot.slane %v6189_v57, 1  ;;  %v9660_v11 = vld [vmem:[%s8391_s14 + $0x10] sm:$0xf]  ;;  %v2318_v57 = vsel %vm8522_vm3, %v2310_v47, 0  ;;  %vm10279_vm3 = vsmask.f32 7424 }
 0x118   : > { %7244 = vmatprep.subr.bf16.mxu1 %v8125_v43  ;;  %v8146_v47 = vld [vmem:[%s10176_s3 + $0x5a8] sm:$0xff]   ;;  %vm10286_vm1 = vmmov %vm10279_vm3 }
 0x119   : > { %7555 = vmatpush3.bf16.msra.mxu0 %v8124_v23  ;;  %v2180_v59 = vsel %vm10273_vm10, %v9572_v12, %v2179_v25  ;;  %v2182_v30 = vsel %vm10277_vm15, %v2179_v25, %v2181_v52  ;;  %v9654_v12 = vcombine.low %v9544_v38, %v9547_v6  ;;  %v2311_v23 = vld [vmem:[%s8391_s14 + $0x4] sm:$0xf]  ;;  %v9708_v25 = vld [vmem:[%s8391_s14 + $0x18] sm:$0xf]  ;;  %vm10284_vm10 = vmmov %vm10279_vm3 }
 0x11a   : > { %7556 = vmatprep.subr.bf16.mxu0 %v8126_v10  ;;  %v2319_v22 = vsel %vm8535_vm6, %v2311_v23, 0  ;;  %v2888_v49 = vsel %vm8675_vm13, %v9708_v25, 0  ;;  %v8142_v52 = vld [vmem:[%s10176_s3 + $0x598] sm:$0xff]   ;;  %vm10280_vm6 = vmmov %vm10279_vm3 }
 0x11b   : > { %7245 = vmatpush3.bf16.msra.mxu1 %v8125_v43  ;;  %v9669_v43 = vcombine.low %v2883_v24, %v2884_v53  ;;  %v6216_v62 = vcombine.low %v2318_v57, %v2319_v22  ;;  %v9743_v24 = vld [vmem:[%s9177_s9 + $0x1c] sm:$0xf]  ;;  %v9746_v53 = vld [vmem:[%s9177_s9 + $0x20] sm:$0xf]  ;;  %v2314_v57 = vld [vmem:[%s8391_s14 + $0x10] sm:$0xf] }
 0x11c   : > { %7246 = vmatprep.subr.bf16.mxu1 %v8127_v8  ;;  %v8149_v23 = vld [vmem:[%s10176_s3 + $0x278] sm:$0xff]   ;;  %v2322_v55 = vsel %vm8659_vm8, %v2314_v57, 0  ;;  %vm10285_vm15 = vmmov %vm10279_vm3 }
 0x11d   : > { %7557 = vmatpush3.bf16.msra.mxu0 %v8126_v10  ;;  %v2886_v10 = vsel %vm8647_vm11, %v9660_v11, 0 }
 0x11e   : > { %7558 = vmatprep.subr.bf16.mxu0 %v8128_v2 }
 0x11f   : > { %7247 = vmatpush3.bf16.msra.mxu1 %v8127_v8  ;;  %v8138_v8 = vld [vmem:[%s10176_s3 + $0x588] sm:$0xff]  }
 0x120   : > { %7248 = vmatprep.subr.bf16.mxu1 %v8130_v13 }
 0x121   : > { %7559 = vmatpush3.bf16.msra.mxu0 %v8128_v2  ;;  %v8139_v2 = vld [vmem:[%s10176_s3 + $0x250] sm:$0xff]  }
 0x122   : > { %7560 = vmatprep.subr.bf16.mxu0 %v8131_v27 }
 0x123   : > { %7249 = vmatpush3.bf16.msra.mxu1 %v8130_v13  ;;  %v9683_v13 = vcombine.low %v2885_v5, %v2886_v10  ;;  %v2488_v5 = vld [vmem:[%s8391_s14] sm:$0xf]  ;;  %v4816_v10 = vshrl.u32 %v9654_v12, 16 }
 0x124   : > { %7250 = vmatprep.subr.bf16.mxu1 %v8133_v26  ;;  %v6244_v22 = vcombine.low %v2488_v5, %v9646_v45 }
 0x125   : > { %7561 = vmatpush3.bf16.msra.mxu0 %v8131_v27  ;;  %v4809_v27 = vrot.slane %v4807_v37, 1  ;;  %v8147_v37 = vld [vmem:[%s10176_s3 + $0x270] sm:$0xff]  }
 0x126   : > { %7562 = vmatprep.subr.bf16.mxu0 %v8134_v40 }
 0x127   : > { %7251 = vmatpush3.bf16.msra.mxu1 %v8133_v26  ;;  %v4812_v26 = vshll.u32 %v9654_v12, 16 }
 0x128   : > { %7260 = vmatprep.subr.bf16.mxu1 %v8135_v50 }
 0x129   : > { %7563 = vmatpush3.bf16.msra.mxu0 %v8134_v40  ;;  %v4810_v40 = vor.u32 %v4809_v27, %v4805_v18  ;;  %v2315_v27 = vld [vmem:[%s8391_s14 + $0x14] sm:$0xf] }
 0x12a   : > { %7253 = vmatmul.mubr.bf16.vlgmr.msra.gmra.mrb[0].mxu1 %v2180_v59  ;;  %7572 = vmatprep.subr.bf16.mxu0 %v8136_v35 }
 0x12b   : > { %7261 = vmatpush3.bf16.msra.mxu1 %v8135_v50  ;;  %7256 = vmatprep.mubr.bf16.mxu1 %v2182_v30  ;;  %v4814_v50 = vrot.slane %v4812_v26, 1  ;;  %v6590_v30 = vcombine.low %v9550_v56, %v9732_v39  ;;  %v8150_v26 = vld [vmem:[%s10176_s3 + $0x5b8] sm:$0xff]  }
 0x12c   : > { %7262 = vmatprep.subr.bf16.mxu1 %v8137_v7  ;;  %7565 = vmatmul.mubr.bf16.vlgmr.msra.gmra.mrb[0].mxu0 %v9312_v60  ;;  %v6563_v60 = vcombine.low %v4591_v16, %v4592_v51  ;;  %v9760_v51 = vcombine.low %v9743_v24, %v9746_v53 }
 0x12d   : > { %7573 = vmatpush3.bf16.msra.mxu0 %v8136_v35  ;;  %7568 = vmatprep.mubr.bf16.mxu0 %v9338_v46  ;;  %v9716_v46 = vcombine.low %v2887_v0, %v2888_v49  ;;  %v8143_v35 = vld [vmem:[%s10176_s3 + $0x260] sm:$0xff]   ;;  %v4815_v59 = vsel %vm10279_vm3, %v4810_v40, %v4814_v50  ;;  %v4820_v16 = vshll.u32 %v6590_v30, 16  ;;  %v4824_v36 = vshrl.u32 %v6590_v30, 16  ;;  %v2316_v49 = vld [vmem:[%s8391_s14 + $0x18] sm:$0xf] }
 0x12e   : > { %7574 = vmatprep.subr.bf16.mxu0 %v8138_v8  ;;  %v2323_v0 = vsel %vm8675_vm13, %v2315_v27, 0  ;;  %v4965_v30 = vld [vmem:[%s9177_s9 + $0x4] sm:$0xe]  ;;  %vm10287_vm3 = vcmask 1046528  }
 0x12f   : > { %7263 = vmatpush3.bf16.msra.mxu1 %v8137_v7  ;;  %v8145_v7 = vld [vmem:[%s10176_s3 + $0x268] sm:$0xff]  }
 0x130   : > { %7264 = vmatprep.subr.bf16.mxu1 %v8139_v2 }
 0x131   : > { %7575 = vmatpush3.bf16.msra.mxu0 %v8138_v8  ;;  %v2312_v8 = vld [vmem:[%s8391_s14 + $0x8] sm:$0xf] }
 0x132   : > { %7257 = vmatmul.mubr.bf16.gmra.mrb[4].mxu1 %v2184_v28  ;;  %7576 = vmatprep.subr.bf16.mxu0 %v8140_v42  ;;  %v2320_v18 = vsel %vm8611_vm4, %v2312_v8, 0  ;;  %v8151_v28 = vld [vmem:[%s10176_s3 + $0x280] sm:$0xff]   ;;  %vm10281_vm4 = vcmp.ne.s16.totalorder %v8602_v31, 0 }
 0x133   : > { %7265 = vmatpush3.bf16.msra.mxu1 %v8139_v2  ;;  %7276 = vmatprep.mubr.bf16.mxu1 %v6216_v62  ;;  %v2313_v2 = vld [vmem:[%s8391_s14 + $0xc] sm:$0xf]  ;;  %v4828_v62 = vshll.u32 %v9760_v51, 16 }
 0x134   : > { %7266 = vmatprep.subr.bf16.mxu1 %v8141_v48  ;;  %7569 = vmatmul.mubr.bf16.gmra.mrb[4].mxu0 %v6563_v60  ;;  %v2321_v12 = vsel %vm8647_vm11, %v2313_v2, 0  ;;  %v9776_v60 = vld [vmem:[%s9177_s9 + $0x24] sm:$0x1]  ;;  %v4832_v2 = vshrl.u32 %v9760_v51, 16  ;;  %vm10282_vm11 = vcmp.ne.s16.totalorder %v8606_v33, 0  ;;  %v8157_v51 = vld [vmem:[%s10176_s3 + $0x5c8] sm:$0xff]  }
 0x135   : > { %7577 = vmatpush3.bf16.msra.mxu0 %v8140_v42  ;;  %7588 = vmatprep.mubr.bf16.mxu0 %v4815_v59  ;;  %v4818_v42 = vor.u32 %v4816_v10, %v4814_v50  ;;  %v6217_v40 = vcombine.low %v2320_v18, %v2321_v12  ;;  %v2540_v50 = vshll.u32 %v6244_v22, 16  ;;  %v6592_v59 = vcombine.low %v9776_v60, %v9776_v60 }
 0x136   : > { %7578 = vmatprep.subr.bf16.mxu0 %v8142_v52  ;;  %v4830_v5 = vrot.slane %v4828_v62, 1  ;;  %v2324_v10 = vsel %vm8743_vm7, %v2316_v49, 0  ;;  %v4968_v27 = vsel %vm10282_vm11, %v9544_v38, 0  ;;  %vm10290_vm11 = vmmov %vm10286_vm1 }
 0x137   : > { %7267 = vmatpush3.bf16.msra.mxu1 %v8141_v48  ;;  %v4822_v48 = vrot.slane %v4820_v16, 1  ;;  %v2538_v16 = vshrl.u32 %v6244_v22, 16  ;;  %v2542_v57 = vrot.slane %v2540_v50, 1  ;;  %v4836_v12 = vshll.u32 %v6592_v59, 16  ;;  %v8158_v22 = vld [vmem:[%s10176_s3 + $0x290] sm:$0xff]  }
 0x138   : > { %7268 = vmatprep.subr.bf16.mxu1 %v8143_v35 }
 0x139   : > { %7579 = vmatpush3.bf16.msra.mxu0 %v8142_v52  ;;  %v2317_v52 = vld [vmem:[%s8391_s14 + $0x1c] sm:$0xf]  ;;  %v2543_v38 = vor.u32 %v2542_v57, %v2538_v16  ;;  %v4838_v62 = vrot.slane %v4836_v12, 1  ;;  %v9868_v12 = vld [vmem:[%s8391_s14 + $0x20] sm:$0x1] }
 0x13a   : > { %7580 = vmatprep.subr.bf16.mxu0 %v8144_v32  ;;  %v2325_v8 = vsel %vm8756_vm5, %v2317_v52, 0 }
 0x13b   : > { %7269 = vmatpush3.bf16.msra.mxu1 %v8143_v35  ;;  %v9787_v35 = vcombine.low %v9649_v54, %v9657_v41 }
 0x13c   : > { %7270 = vmatprep.subr.bf16.mxu1 %v8145_v7 }
 0x13d   : > { %7581 = vmatpush3.bf16.msra.mxu0 %v8144_v32  ;;  %v8154_v32 = vld [vmem:[%s10176_s3 + $0x5c0] sm:$0xff]   ;;  %v2545_v18 = vshll.u32 %v9787_v35, 16 }
 0x13e   : > { %7582 = vmatprep.subr.bf16.mxu0 %v8146_v47 }
 0x13f   : > { %7271 = vmatpush3.bf16.msra.mxu1 %v8145_v7  ;;  %v4823_v7 = vsel %vm10280_vm6, %v4818_v42, %v4822_v48  ;;  %v4969_v42 = vsel %vm10283_vm0, %v9547_v6, 0  ;;  %v4834_v6 = vor.u32 %v4832_v2, %v4830_v5  ;;  %vm10288_vm6 = vcmp.ne.s16.totalorder %v8672_v9, 0 }
 0x140   : > { %7272 = vmatprep.subr.bf16.mxu1 %v8147_v37  ;;  %v4970_v16 = vsel %vm10288_vm6, %v9550_v56, 0  ;;  %v8170_v56 = vld [vmem:[%s10176_s3 + $0x2b8] sm:$0xff]   ;;  %vm10291_vm0 = vcmp.ne.s16.totalorder %v8602_v31, 0  ;;  %vm10294_vm6 = vmmov %vm10287_vm3 }
 0x141   : > { %7583 = vmatpush3.bf16.msra.mxu0 %v8146_v47  ;;  %v8156_v47 = vld [vmem:[%s10176_s3 + $0x288] sm:$0xff]   ;;  %v4839_v59 = vsel %vm10286_vm1, %v4834_v6, %v4838_v62 }
 0x142   : > { %7584 = vmatprep.subr.bf16.mxu0 %v8148_v15 }
 0x143   : > { %7273 = vmatpush3.bf16.msra.mxu1 %v8147_v37  ;;  %v4826_v37 = vor.u32 %v4824_v36, %v4822_v48  ;;  %v2547_v48 = vrot.slane %v2545_v18, 1 }
 0x144   : > { %7274 = vmatprep.subr.bf16.mxu1 %v8149_v23 }
 0x145   : > { %7585 = vmatpush3.bf16.msra.mxu0 %v8148_v15  ;;  %v4967_v15 = vsel %vm10281_vm4, %v9538_v4, 0  ;;  %v4966_v4 = vsel %vm8588_vm2, %v4965_v30, 0  ;;  %v2548_v49 = vsel %vm10285_vm15, %v2543_v38, %v2547_v48  ;;  %v8164_v30 = vld [vmem:[%s10176_s3 + $0x2a8] sm:$0xff]   ;;  %vm10289_vm4 = vcmp.ne.s16.totalorder %v8684_v19, 0 }
 0x146   : > { %7586 = vmatprep.subr.bf16.mxu0 %v8150_v26  ;;  %v6617_v36 = vcombine.low %v4966_v4, %v4967_v15  ;;  %v6246_v15 = vcombine.low %v9660_v11, %v9705_v14  ;;  %v4971_v57 = vsel %vm10289_vm4, %v9732_v39, 0  ;;  %v6248_v38 = vcombine.low %v9868_v12, %v9868_v12  ;;  %vm10295_vm4 = vmmov %vm10286_vm1 }
 0x147   : > { %7275 = vmatpush3.bf16.msra.mxu1 %v8149_v23  ;;  %v6218_v23 = vcombine.low %v2322_v55, %v2323_v0  ;;  %v6618_v55 = vcombine.low %v4968_v27, %v4969_v42  ;;  %v8160_v0 = vld [vmem:[%s10176_s3 + $0x298] sm:$0xff]   ;;  %v6619_v42 = vcombine.low %v4970_v16, %v4971_v57  ;;  %vm10293_vm15 = vcmp.ne.s16.totalorder %v8626_v44, 0 }
 0x148   : > { %7284 = vmatprep.subr.bf16.mxu1 %v8151_v28  ;;  %v5015_v52 = vrot.slane %v6617_v36, 1  ;;  %v2553_v2 = vshll.u32 %v6246_v15, 16  ;;  %v8174_v36 = vld [vmem:[%s10176_s3 + $0x2c0] sm:$0xff]  }
 0x149   : > { %7587 = vmatpush3.bf16.msra.mxu0 %v8150_v26  ;;  %v4831_v26 = vsel %vm10284_vm10, %v4826_v37, %v4830_v5  ;;  %v9830_v50 = vrot.slane %v6618_v55, 1  ;;  %v8163_v37 = vld [vmem:[%s10176_s3 + $0x5e0] sm:$0xff]   ;;  %v8165_v5 = vld [vmem:[%s10176_s3 + $0x5e8] sm:$0xff]   ;;  %v5018_v62 = vrot.slane %v6619_v42, 1  ;;  %vm10292_vm10 = vcmp.ne.s16.totalorder %v8606_v33, 0  ;;  %v8180_v42 = vld [vmem:[%s10176_s3 + $0x610] sm:$0xff]  }
 0x14a   : > { %7277 = vmatmul.mubr.bf16.vlgmr.msra.gmra.mrb[0].mxu1 %v6217_v40  ;;  %7596 = vmatprep.subr.bf16.mxu0 %v8154_v32  ;;  %v8159_v40 = vld [vmem:[%s10176_s3 + $0x5d0] sm:$0xff]   ;;  %v2555_v27 = vrot.slane %v2553_v2, 1  ;;  %v2698_v55 = vld [vmem:[%s8391_s14] sm:$0xe] }
 0x14b   : > { %7285 = vmatpush3.bf16.msra.mxu1 %v8151_v28  ;;  %7280 = vmatprep.mubr.bf16.mxu1 %v6218_v23  ;;  %v6219_v28 = vcombine.low %v2324_v10, %v2325_v8  ;;  %v9850_v23 = vld [vmem:[%s8391_s14 + $0x1c] sm:$0xf]  ;;  %v8166_v10 = vld [vmem:[%s10176_s3 + $0x2b0] sm:$0xff]   ;;  %v2549_v8 = vshrl.u32 %v9787_v35, 16 }
 0x14c   : > { %7286 = vmatprep.subr.bf16.mxu1 %v8156_v47  ;;  %7589 = vmatmul.mubr.bf16.vlgmr.msra.gmra.mrb[0].mxu0 %v4823_v7  ;;  %v8162_v7 = vld [vmem:[%s10176_s3 + $0x2a0] sm:$0xff]   ;;  %v6247_v18 = vcombine.low %v9708_v25, %v9850_v23  ;;  %v8168_v35 = vld [vmem:[%s10176_s3 + $0x5f0] sm:$0xff]   ;;  %v2889_v21 = vsel %vm8743_vm7, %v9850_v23, 0 }
 0x14d   : > { %7597 = vmatpush3.bf16.msra.mxu0 %v8154_v32  ;;  %7592 = vmatprep.mubr.bf16.mxu0 %v4831_v26  ;;  %v8161_v32 = vld [vmem:[%s10176_s3 + $0x5d8] sm:$0xff]   ;;  %v2551_v4 = vor.u32 %v2549_v8, %v2547_v48  ;;  %v4972_v26 = vsel %vm993_vm9, %v9743_v24, 0  ;;  %v5019_v8 = vsel %vm10287_vm3, %v9830_v50, %v5018_v62 }
 0x14e   : > { %7598 = vmatprep.subr.bf16.mxu0 %v8157_v51  ;;  %v8171_v48 = vld [vmem:[%s10176_s3 + $0x5f8] sm:$0xff]  }
 0x14f   : > { %7287 = vmatpush3.bf16.msra.mxu1 %v8156_v47  ;;  %v5017_v47 = vsel %vm10287_vm3, %v5015_v52, %v9830_v50  ;;  %v2556_v6 = vsel %vm10290_vm11, %v2551_v4, %v2555_v27  ;;  %v2565_v52 = vshrl.u32 %v6247_v18, 16  ;;  %vm10296_vm11 = vmmov %vm10287_vm3 }
 0x150   : > { %7288 = vmatprep.subr.bf16.mxu1 %v8158_v22 }
 0x151   : > { %7599 = vmatpush3.bf16.msra.mxu0 %v8157_v51  ;;  %v2557_v51 = vshrl.u32 %v6246_v15, 16  ;;  %v8177_v15 = vld [vmem:[%s10176_s3 + $0x2c8] sm:$0xff]  }
 0x152   : > { %7281 = vmatmul.mubr.bf16.gmra.mrb[4].mxu1 %v6219_v28  ;;  %7600 = vmatprep.subr.bf16.mxu0 %v8159_v40  ;;  %v4973_v28 = vsel %vm994_vm12, %v9746_v53, 0 }
 0x153   : > { %7289 = vmatpush3.bf16.msra.mxu1 %v8158_v22  ;;  %7300 = vmatprep.mubr.bf16.mxu1 %v2548_v49  ;;  %v2561_v22 = vshll.u32 %v6247_v18, 16  ;;  %v8179_v18 = vld [vmem:[%s10176_s3 + $0x2d0] sm:$0xff]  }
 0x154   : > { %7290 = vmatprep.subr.bf16.mxu1 %v8160_v0  ;;  %7593 = vmatmul.mubr.bf16.gmra.mrb[4].mxu0 %v4839_v59  ;;  %v2569_v59 = vshll.u32 %v6248_v38, 16  ;;  %v8183_v38 = vld [vmem:[%s10176_s3 + $0x2e0] sm:$0xff]  }
 0x155   : > { %7601 = vmatpush3.bf16.msra.mxu0 %v8159_v40  ;;  %7612 = vmatprep.mubr.bf16.mxu0 %v5017_v47  ;;  %v6620_v40 = vcombine.low %v4972_v26, %v4973_v28  ;;  %v2563_v49 = vrot.slane %v2561_v22, 1  ;;  %v2701_v47 = vsel %vm10292_vm10, %v9649_v54, 0  ;;  %v8182_v28 = vld [vmem:[%s10176_s3 + $0x618] sm:$0xff]   ;;  %vm10298_vm10 = vcmp.ne.s16.totalorder %v8672_v9, 0 }
 0x156   : > { %7602 = vmatprep.subr.bf16.mxu0 %v8161_v32  ;;  %v2571_v16 = vrot.slane %v2569_v59, 1  ;;  %v5320_v59 = vld [vmem:[%s9177_s9 + $0x8] sm:$0xf] }
 0x157   : > { %7291 = vmatpush3.bf16.msra.mxu1 %v8160_v0  ;;  %v2559_v0 = vor.u32 %v2557_v51, %v2555_v27  ;;  %v2567_v2 = vor.u32 %v2565_v52, %v2563_v49  ;;  %v8181_v51 = vld [vmem:[%s10176_s3 + $0x2d8] sm:$0xff]  }
 0x158   : > { %7292 = vmatprep.subr.bf16.mxu1 %v8162_v7 }
 0x159   : > { %7603 = vmatpush3.bf16.msra.mxu0 %v8161_v32  ;;  %v2699_v32 = vsel %vm8588_vm2, %v2698_v55, 0  ;;  %v2564_v54 = vsel %vm10286_vm1, %v2559_v0, %v2563_v49  ;;  %v2572_v50 = vsel %vm10295_vm4, %v2567_v2, %v2571_v16  ;;  %v8186_v55 = vld [vmem:[%s10176_s3 + $0x628] sm:$0xff]   ;;  %v2705_v0 = vsel %vm993_vm9, %v9708_v25, 0 }
 0x15a   : > { %7604 = vmatprep.subr.bf16.mxu0 %v8163_v37  ;;  %v2706_v49 = vsel %vm994_vm12, %v9850_v23, 0  ;;  %v5155_v16 = vsel %vm8675_vm13, %v9743_v24, 0  ;;  %vm10303_vm13 = vmmov %vm10295_vm4 }
 0x15b   : > { %7293 = vmatpush3.bf16.msra.mxu1 %v8162_v7  ;;  %v2700_v7 = vsel %vm10291_vm0, %v9646_v45, 0  ;;  %v4974_v45 = vsel %vm995_vm14, %v9776_v60, 0  ;;  %v8178_v60 = vld [vmem:[%s10176_s3 + $0x608] sm:$0xff]   ;;  %vm10297_vm0 = vmmov %vm10287_vm3  ;;  %v6276_v52 = vcombine.low %v2705_v0, %v2706_v49  ;;  %v5326_v0 = vld [vmem:[%s9177_s9 + $0x20] sm:$0xf] }
 0x15c   : > { %7294 = vmatprep.subr.bf16.mxu1 %v8164_v30  ;;  %v6621_v57 = vcombine.low %v4974_v45, %v4974_v45  ;;  %vm10300_vm1 = vmmov %vm10297_vm0  ;;  %v5327_v49 = vld [vmem:[%s9177_s9 + $0x24] sm:$0xf] }
 0x15d   : > { %7605 = vmatpush3.bf16.msra.mxu0 %v8163_v37  ;;  %v2702_v37 = vsel %vm10293_vm15, %v9657_v41, 0  ;;  %vm10299_vm15 = vcmp.ne.s16.totalorder %v8684_v19, 0  ;;  %vm10301_vm3 = vmmov %vm10297_vm0 }
 0x15e   : > { %7606 = vmatprep.subr.bf16.mxu0 %v8165_v5  ;;  %v6274_v41 = vcombine.low %v2701_v47, %v2702_v37  ;;  %v5022_v27 = vrot.slane %v6621_v57, 1  ;;  %v8193_v47 = vld [vmem:[%s10176_s3 + $0x300] sm:$0xff]   ;;  %v2707_v37 = vsel %vm995_vm14, %v9868_v12, 0  ;;  %v8195_v12 = vld [vmem:[%s10176_s3 + $0x308] sm:$0xff]   ;;  %vm10305_vm4 = vmmov %vm10299_vm15 }
 0x15f   : > { %7295 = vmatpush3.bf16.msra.mxu1 %v8164_v30  ;;  %v8175_v30 = vld [vmem:[%s10176_s3 + $0x600] sm:$0xff]  }
 0x160   : > { %7296 = vmatprep.subr.bf16.mxu1 %v8166_v10  ;;  %v2749_v4 = vrot.slane %v6274_v41, 1  ;;  %v8194_v41 = vld [vmem:[%s10176_s3 + $0x640] sm:$0xff]  }
 0x161   : > { %7607 = vmatpush3.bf16.msra.mxu0 %v8165_v5  ;;  %v5020_v5 = vrot.slane %v6620_v40, 1 }
 0x162   : > { %7608 = vmatprep.subr.bf16.mxu0 %v8168_v35 }
 0x163   : > { %7297 = vmatpush3.bf16.msra.mxu1 %v8166_v10  ;;  %v6273_v10 = vcombine.low %v2699_v32, %v2700_v7  ;;  %v5023_v26 = vsel %vm10297_vm0, %v5020_v5, %v5022_v27  ;;  %v9970_v32 = vld [vmem:[%s9177_s9 + $0xc] sm:$0xf]  ;;  %v8192_v7 = vld [vmem:[%s10176_s3 + $0x638] sm:$0xff]   ;;  %v5156_v27 = vsel %vm8743_vm7, %v9746_v53, 0  ;;  %vm10309_vm7 = vcmp.ne.s16.totalorder %v8626_v44, 0 }
 0x164   : > { %7298 = vmatprep.subr.bf16.mxu1 %v8170_v56  ;;  %v8200_v53 = vld [vmem:[%s10176_s3 + $0x658] sm:$0xff]  }
 0x165   : > { %7609 = vmatpush3.bf16.msra.mxu0 %v8168_v35  ;;  %v5021_v35 = vsel %vm10294_vm6, %v5018_v62, %v5020_v5  ;;  %v2703_v62 = vsel %vm10298_vm10, %v9660_v11, 0  ;;  %v8189_v11 = vld [vmem:[%s10176_s3 + $0x630] sm:$0xff]   ;;  %vm10304_vm6 = vmmov %vm10298_vm10 }
 0x166   : > { %7610 = vmatprep.subr.bf16.mxu0 %v8171_v48  ;;  %v9984_v5 = vld [vmem:[%s9177_s9 + $0x10] sm:$0xf]  ;;  %vm10313_vm10 = vmmov %vm10300_vm1 }
 0x167   : > { %7299 = vmatpush3.bf16.msra.mxu1 %v8170_v56  ;;  %v2748_v56 = vrot.slane %v6273_v10, 1  ;;  %v9987_v10 = vld [vmem:[%s9177_s9 + $0x14] sm:$0xf] }
 0x168   : > { %7308 = vmatprep.subr.bf16.mxu1 %v8174_v36  ;;  %v10004_v57 = vcombine.low %v9984_v5, %v9987_v10  ;;  %v5534_v3 = vsel %vm10309_vm7, %v9987_v10, 0 }
 0x169   : > { %7611 = vmatpush3.bf16.msra.mxu0 %v8171_v48  ;;  %v2750_v22 = vsel %vm10296_vm11, %v2748_v56, %v2749_v4  ;;  %v8184_v48 = vld [vmem:[%s10176_s3 + $0x620] sm:$0xff]   ;;  %vm10306_vm11 = vmmov %vm10303_vm13 }
 0x16a   : > { %7301 = vmatmul.mubr.bf16.vlgmr.msra.gmra.mrb[0].mxu1 %v2556_v6  ;;  %7620 = vmatprep.subr.bf16.mxu0 %v8175_v30  ;;  %v8188_v6 = vld [vmem:[%s10176_s3 + $0x2f0] sm:$0xff]  }
 0x16b   : > { %7309 = vmatpush3.bf16.msra.mxu1 %v8174_v36  ;;  %7304 = vmatprep.mubr.bf16.mxu1 %v2564_v54  ;;  %v8185_v36 = vld [vmem:[%s10176_s3 + $0x2e8] sm:$0xff]   ;;  %v6277_v54 = vcombine.low %v2707_v37, %v2707_v37 }
 0x16c   : > { %7310 = vmatprep.subr.bf16.mxu1 %v8177_v15  ;;  %7613 = vmatmul.mubr.bf16.vlgmr.msra.gmra.mrb[0].mxu0 %v5019_v8  ;;  %v5154_v8 = vsel %vm8659_vm8, %v9732_v39, 0  ;;  %v8197_v39 = vld [vmem:[%s10176_s3 + $0x310] sm:$0xff]   ;;  %vm10302_vm8 = vmmov %vm10297_vm0 }
 0x16d   : > { %7621 = vmatpush3.bf16.msra.mxu0 %v8175_v30  ;;  %7616 = vmatprep.mubr.bf16.mxu0 %v5021_v35  ;;  %v2753_v30 = vrot.slane %v6276_v52, 1  ;;  %v6648_v24 = vcombine.low %v5154_v8, %v5155_v16  ;;  %v5381_v52 = vshrl.u32 %v10004_v57, 16  ;;  %v5537_v16 = vsel %vm993_vm9, %v5326_v0, 0 }
 0x16e   : > { %7622 = vmatprep.subr.bf16.mxu0 %v8178_v60  ;;  %vm10307_vm9 = vcmp.ne.s16.totalorder %v8602_v31, 0  ;;  %v8216_v31 = vld [vmem:[%s10176_s3 + $0x690] sm:$0xff]  }
 0x16f   : > { %7311 = vmatpush3.bf16.msra.mxu1 %v8177_v15  ;;  %v6674_v15 = vcombine.low %v5320_v59, %v9970_v32  ;;  %v6677_v59 = vcombine.low %v5326_v0, %v5327_v49 }
 0x170   : > { %7312 = vmatprep.subr.bf16.mxu1 %v8179_v18 }
 0x171   : > { %7623 = vmatpush3.bf16.msra.mxu0 %v8178_v60  ;;  %v5372_v60 = vshll.u32 %v6674_v15, 16  ;;  %v5370_v35 = vshrl.u32 %v6674_v15, 16  ;;  %v8212_v15 = vld [vmem:[%s10176_s3 + $0x680] sm:$0xff]  }
 0x172   : > { %7305 = vmatmul.mubr.bf16.gmra.mrb[4].mxu1 %v2572_v50  ;;  %7624 = vmatprep.subr.bf16.mxu0 %v8180_v42 }
 0x173   : > { %7313 = vmatpush3.bf16.msra.mxu1 %v8179_v18  ;;  %7324 = vmatprep.mubr.bf16.mxu1 %v2750_v22  ;;  %v2755_v18 = vrot.slane %v6277_v54, 1  ;;  %v5374_v56 = vrot.slane %v5372_v60, 1  ;;  %v5393_v54 = vshll.u32 %v6677_v59, 16 }
 0x174   : > { %7314 = vmatprep.subr.bf16.mxu1 %v8181_v51  ;;  %7617 = vmatmul.mubr.bf16.gmra.mrb[4].mxu0 %v5023_v26 }
 0x175   : > { %7625 = vmatpush3.bf16.msra.mxu0 %v8180_v42  ;;  %7636 = vmatprep.mubr.bf16.mxu0 %v9564_v63  ;;  %v2704_v63 = vsel %vm10299_vm15, %v9705_v14, 0  ;;  %v8191_v14 = vld [vmem:[%s10176_s3 + $0x2f8] sm:$0xff]   ;;  %v2756_v50 = vsel %vm10302_vm8, %v2753_v30, %v2755_v18  ;;  %v5157_v42 = vsel %vm8756_vm5, %v5149_v17, 0  ;;  %v5375_v26 = vor.u32 %v5374_v56, %v5370_v35  ;;  %v8213_v18 = vld [vmem:[%s10176_s3 + $0x688] sm:$0xff]   ;;  %vm10315_vm15 = vmmov %vm10300_vm1 }
 0x176   : > { %7626 = vmatprep.subr.bf16.mxu0 %v8182_v28  ;;  %v6275_v40 = vcombine.low %v2703_v62, %v2704_v63  ;;  %v6649_v22 = vcombine.low %v5156_v27, %v5157_v42  ;;  %v8204_v62 = vld [vmem:[%s10176_s3 + $0x668] sm:$0xff]   ;;  %v8205_v63 = vld [vmem:[%s10176_s3 + $0x330] sm:$0xff]   ;;  %v5397_v17 = vshrl.u32 %v6677_v59, 16 }
 0x177   : > { %7315 = vmatpush3.bf16.msra.mxu1 %v8181_v51  ;;  %v8199_v51 = vld [vmem:[%s10176_s3 + $0x318] sm:$0xff]  }
 0x178   : > { %7316 = vmatprep.subr.bf16.mxu1 %v8183_v38  ;;  %v2751_v25 = vrot.slane %v6275_v40, 1 }
 0x179   : > { %7627 = vmatpush3.bf16.msra.mxu0 %v8182_v28 }
 0x17a   : > { %7628 = vmatprep.subr.bf16.mxu0 %v8184_v48  ;;  %v2752_v45 = vsel %vm10300_vm1, %v2749_v4, %v2751_v25  ;;  %v2754_v2 = vsel %vm10301_vm3, %v2751_v25, %v2753_v30  ;;  %v5377_v4 = vshll.u32 %v10004_v57, 16  ;;  %v5538_v57 = vsel %vm994_vm12, %v5327_v49, 0 }
 0x17b   : > { %7317 = vmatpush3.bf16.msra.mxu1 %v8183_v38  ;;  %v8201_v38 = vld [vmem:[%s10176_s3 + $0x320] sm:$0xff]   ;;  %v6706_v35 = vcombine.low %v5537_v16, %v5538_v57  ;;  %vm10308_vm12 = vcmp.ne.s16.totalorder %v8606_v33, 0 }
 0x17c   : > { %7318 = vmatprep.subr.bf16.mxu1 %v8185_v36  ;;  %v5379_v28 = vrot.slane %v5377_v4, 1  ;;  %v5532_v4 = vsel %vm10307_vm9, %v9970_v32, 0 }
 0x17d   : > { %7629 = vmatpush3.bf16.msra.mxu0 %v8184_v48 }
 0x17e   : > { %7630 = vmatprep.subr.bf16.mxu0 %v8186_v55  ;;  %v5380_v48 = vsel %vm10303_vm13, %v5375_v26, %v5379_v28  ;;  %v5383_v37 = vor.u32 %v5381_v52, %v5379_v28  ;;  %v8219_v26 = vld [vmem:[%s10176_s3 + $0x6a8] sm:$0xff]  }
 0x17f   : > { %7319 = vmatpush3.bf16.msra.mxu1 %v8185_v36  ;;  %v8202_v36 = vld [vmem:[%s10176_s3 + $0x660] sm:$0xff]  }
 0x180   : > { %7320 = vmatprep.subr.bf16.mxu1 %v8188_v6 }
 0x181   : > { %7631 = vmatpush3.bf16.msra.mxu0 %v8186_v55  ;;  %v8203_v55 = vld [vmem:[%s10176_s3 + $0x328] sm:$0xff]  }
 0x182   : > { %7632 = vmatprep.subr.bf16.mxu0 %v8189_v11 }
 0x183   : > { %7321 = vmatpush3.bf16.msra.mxu1 %v8188_v6  ;;  %v5324_v6 = vld [vmem:[%s9177_s9 + $0x18] sm:$0xf] }
 0x184   : > { %7322 = vmatprep.subr.bf16.mxu1 %v8191_v14  ;;  %v5535_v8 = vsel %vm10304_vm6, %v5324_v6, 0 }
 0x185   : > { %7633 = vmatpush3.bf16.msra.mxu0 %v8189_v11  ;;  %v8206_v11 = vld [vmem:[%s10176_s3 + $0x670] sm:$0xff]  }
 0x186   : > { %7634 = vmatprep.subr.bf16.mxu0 %v8192_v7 }
 0x187   : > { %7323 = vmatpush3.bf16.msra.mxu1 %v8191_v14  ;;  %v8207_v14 = vld [vmem:[%s10176_s3 + $0x338] sm:$0xff]  }
 0x188   : > { %7332 = vmatprep.subr.bf16.mxu1 %v8193_v47 }
 0x189   : > { %7635 = vmatpush3.bf16.msra.mxu0 %v8192_v7  ;;  %v10059_v7 = vld [vmem:[%s9177_s9 + $0x28] sm:$0x1] }
 0x18a   : > { %7325 = vmatmul.mubr.bf16.vlgmr.msra.gmra.mrb[0].mxu1 %v2752_v45  ;;  %7644 = vmatprep.subr.bf16.mxu0 %v8194_v41  ;;  %v5539_v28 = vsel %vm995_vm14, %v10059_v7, 0  ;;  %vm10314_vm14 = vmmov %vm10300_vm1 }
 0x18b   : > { %7333 = vmatpush3.bf16.msra.mxu1 %v8193_v47  ;;  %7328 = vmatprep.mubr.bf16.mxu1 %v2754_v2  ;;  %v8208_v47 = vld [vmem:[%s10176_s3 + $0x678] sm:$0xff]  }
 0x18c   : > { %7334 = vmatprep.subr.bf16.mxu1 %v8195_v12  ;;  %7637 = vmatmul.mubr.bf16.vlgmr.msra.gmra.mrb[0].mxu0 %v9574_v58  ;;  %v8198_v58 = vld [vmem:[%s10176_s3 + $0x650] sm:$0xff]  }
 0x18d   : > { %7645 = vmatpush3.bf16.msra.mxu0 %v8194_v41  ;;  %7640 = vmatprep.mubr.bf16.mxu0 %v6648_v24  ;;  %v6678_v41 = vcombine.low %v10059_v7, %v10059_v7 }
 0x18e   : > { %7646 = vmatprep.subr.bf16.mxu0 %v8196_v1 }
 0x18f   : > { %7335 = vmatpush3.bf16.msra.mxu1 %v8195_v12  ;;  %v2882_v12 = vld [vmem:[%s8391_s14 + $0x20] sm:$0xf]  ;;  %v5401_v19 = vshll.u32 %v6678_v41, 16 }
 0x190   : > { %7336 = vmatprep.subr.bf16.mxu1 %v8197_v39  ;;  %v2890_v34 = vsel %vm8756_vm5, %v2882_v12, 0  ;;  %vm10310_vm5 = vmmov %vm10306_vm11  ;;  %v6717_v12 = vld [vmem:[%s10178_s5] ss:$0 sm:$0xff] }
 0x191   : > { %7647 = vmatpush3.bf16.msra.mxu0 %v8196_v1  ;;  %v5530_v1 = vld [vmem:[%s9177_s9 + $0x8] sm:$0xe]  ;;  %v6305_v20 = vcombine.low %v2889_v21, %v2890_v34  ;;  %v5403_v10 = vrot.slane %v5401_v19, 1 }
 0x192   : > { %7329 = vmatmul.mubr.bf16.gmra.mrb[4].mxu1 %v2756_v50  ;;  %7648 = vmatprep.subr.bf16.mxu0 %v8198_v58  ;;  %v5531_v56 = vsel %vm8588_vm2, %v5530_v1, 0  ;;  %vm10311_vm2 = vmmov %vm10297_vm0 }
 0x193   : > { %7337 = vmatpush3.bf16.msra.mxu1 %v8197_v39  ;;  %7348 = vmatprep.mubr.bf16.mxu1 %v9669_v43  ;;  %v5325_v43 = vld [vmem:[%s9177_s9 + $0x1c] sm:$0xf]  ;;  %v5395_v39 = vrot.slane %v5393_v54, 1  ;;  %v6703_v23 = vcombine.low %v5531_v56, %v5532_v4  ;;  %vm10312_vm0 = vmmov %vm10310_vm5  ;;  %s5956_s9 = sshll.u32 %s406_s15, 3 }
 0x194   : > { %7338 = vmatprep.subr.bf16.mxu1 %v8199_v51  ;;  %7641 = vmatmul.mubr.bf16.gmra.mrb[4].mxu0 %v6649_v22  ;;  %v6676_v40 = vcombine.low %v5324_v6, %v5325_v43  ;;  %v5536_v2 = vsel %vm10305_vm4, %v5325_v43, 0  ;;  %s10143_s8 = scalar_lea.vmem %s10179_s6, %s5956_s9 }
 0x195   : > { %7649 = vmatpush3.bf16.msra.mxu0 %v8198_v58  ;;  %7660 = vmatprep.mubr.bf16.mxu0 %v5380_v48  ;;  %v6705_v24 = vcombine.low %v5535_v8, %v5536_v2  ;;  %v5399_v44 = vor.u32 %v5397_v17, %v5395_v39  ;;  %v5580_v50 = vrot.slane %v6703_v23, 1  ;;  %v8221_v48 = vld [vmem:[%s10176_s3 + $0x6b8] sm:$0xff]  }
 0x196   : > { %7650 = vmatprep.subr.bf16.mxu0 %v8200_v53  ;;  %v5385_v25 = vshll.u32 %v6676_v40, 16  ;;  %v5389_v45 = vshrl.u32 %v6676_v40, 16 }
 0x197   : > { %7339 = vmatpush3.bf16.msra.mxu1 %v8199_v51  ;;  %v5583_v33 = vrot.slane %v6705_v24, 1  ;;  %v5404_v58 = vsel %vm10312_vm0, %v5399_v44, %v5403_v10  ;;  %v8218_v51 = vld [vmem:[%s10176_s3 + $0x6a0] sm:$0xff]  }
 0x198   : > { %7340 = vmatprep.subr.bf16.mxu1 %v8201_v38  ;;  %v5387_v30 = vrot.slane %v5385_v25, 1 }
 0x199   : > { %7651 = vmatpush3.bf16.msra.mxu0 %v8200_v53  ;;  %v8220_v53 = vld [vmem:[%s10176_s3 + $0x6b0] sm:$0xff]  }
 0x19a   : > { %7652 = vmatprep.subr.bf16.mxu0 %v8202_v36  ;;  %v5388_v60 = vsel %vm10306_vm11, %v5383_v37, %v5387_v30  ;;  %v5391_v9 = vor.u32 %v5389_v45, %v5387_v30 }
 0x19b   : > { %7341 = vmatpush3.bf16.msra.mxu1 %v8201_v38  ;;  %v6707_v38 = vcombine.low %v5539_v28, %v5539_v28 }
 0x19c   : > { %7342 = vmatprep.subr.bf16.mxu1 %v8203_v55  ;;  %v5396_v61 = vsel %vm10310_vm5, %v5391_v9, %v5395_v39 }
 0x19d   : > { %7653 = vmatpush3.bf16.msra.mxu0 %v8202_v36  ;;  %v5587_v36 = vrot.slane %v6707_v38, 1 }
 0x19e   : > { %7654 = vmatprep.subr.bf16.mxu0 %v8204_v62 }
 0x19f   : > { %7343 = vmatpush3.bf16.msra.mxu1 %v8203_v55 }
 0x1a0   : > { %7344 = vmatprep.subr.bf16.mxu1 %v8205_v63 }
 0x1a1   : > { %7655 = vmatpush3.bf16.msra.mxu0 %v8204_v62 }
 0x1a2   : > { %7656 = vmatprep.subr.bf16.mxu0 %v8206_v11 }
 0x1a3   : > { %7345 = vmatpush3.bf16.msra.mxu1 %v8205_v63 }
 0x1a4   : > { %7346 = vmatprep.subr.bf16.mxu1 %v8207_v14 }
 0x1a5   : > { %7657 = vmatpush3.bf16.msra.mxu0 %v8206_v11 }
 0x1a6   : > { %7658 = vmatprep.subr.bf16.mxu0 %v8208_v47 }
 0x1a7   : > { %7347 = vmatpush3.bf16.msra.mxu1 %v8207_v14 }
 0x1a8   : > { %7692 = vmatprep.subr.bf16.mxu1 %v8212_v15 }
 0x1a9   : > { %7659 = vmatpush3.bf16.msra.mxu0 %v8208_v47 }
 0x1aa   : > { %7349 = vmatmul.mubr.bf16.vlgmr.msra.gmra.mrb[0].mxu1 %v9683_v13  ;;  %v5533_v13 = vsel %vm10308_vm12, %v9984_v5, 0  ;;  %7668 = vmatprep.subr.bf16.mxu0 %v8212_v15  ;;  %v5585_v5 = vrot.slane %v6706_v35, 1 }
 0x1ab   : > { %7700 = vmatpush3.bf16.msra.mxu1 %v8212_v15  ;;  %7352 = vmatprep.mubr.bf16.mxu1 %v9716_v46  ;;  %v6704_v32 = vcombine.low %v5533_v13, %v5534_v3  ;;  %v8217_v46 = vld [vmem:[%s10176_s3 + $0x698] sm:$0xff]  }
 0x1ac   : > { %7693 = vmatprep.subr.bf16.mxu1 %v8213_v18  ;;  %7661 = vmatmul.mubr.bf16.vlgmr.msra.gmra.mrb[0].mxu0 %v5388_v60  ;;  %v5586_v42 = vsel %vm10311_vm2, %v5583_v33, %v5585_v5  ;;  %v5588_v29 = vsel %vm10314_vm14, %v5585_v5, %v5587_v36 }
 0x1ad   : > { %7669 = vmatpush3.bf16.msra.mxu0 %v8212_v15  ;;  %7664 = vmatprep.mubr.bf16.mxu0 %v5396_v61  ;;  %v5581_v27 = vrot.slane %v6704_v32, 1  ;;  %v6716_v15 = vld [vmem:[%s10177_s4] ss:$0 sm:$0xff] }
 0x1ae   : > { %7670 = vmatprep.subr.bf16.mxu0 %v8213_v18 }
 0x1af   : > { %7701 = vmatpush3.bf16.msra.mxu1 %v8213_v18  ;;  %v5582_v22 = vsel %vm10313_vm10, %v5580_v50, %v5581_v27  ;;  %v5584_v55 = vsel %vm10315_vm15, %v5581_v27, %v5583_v33 }
 0x1b0   : > { %7694 = vmatprep.subr.bf16.mxu1 %v8216_v31 }
 0x1b1   : > { %7671 = vmatpush3.bf16.msra.mxu0 %v8213_v18 }
 0x1b2   : > { %7353 = vmatmul.mubr.bf16.gmra.mrb[4].mxu1 %v6305_v20  ;;  %7672 = vmatprep.subr.bf16.mxu0 %v8216_v31 }
 0x1b3   : > { %7702 = vmatpush3.bf16.msra.mxu1 %v8216_v31  ;;  %7688 = vmatprep.mubr.bf16.mxu1 %v5586_v42 }
 0x1b4   : > { %7695 = vmatprep.subr.bf16.mxu1 %v8217_v46  ;;  %7665 = vmatmul.mubr.bf16.gmra.mrb[4].mxu0 %v5404_v58 }
 0x1b5   : > { %7673 = vmatpush3.bf16.msra.mxu0 %v8216_v31  ;;  %7684 = vmatprep.mubr.bf16.mxu0 %v5582_v22 }
 0x1b6   : > { %7674 = vmatprep.subr.bf16.mxu0 %v8217_v46 }
 0x1b7   : > { %7703 = vmatpush3.bf16.msra.mxu1 %v8217_v46 }
 0x1b8   : > { %7696 = vmatprep.subr.bf16.mxu1 %v8218_v51 }
 0x1b9   : > { %7675 = vmatpush3.bf16.msra.mxu0 %v8217_v46 }
 0x1ba   : > { %7676 = vmatprep.subr.bf16.mxu0 %v8218_v51 }
 0x1bb   : > { %7704 = vmatpush3.bf16.msra.mxu1 %v8218_v51 }
 0x1bc   : > { %7697 = vmatprep.subr.bf16.mxu1 %v8219_v26 }
 0x1bd   : > { %7677 = vmatpush3.bf16.msra.mxu0 %v8218_v51 }
 0x1be   : > { %7678 = vmatprep.subr.bf16.mxu0 %v8219_v26 }
 0x1bf   : > { %7705 = vmatpush3.bf16.msra.mxu1 %v8219_v26 }
 0x1c0   : > { %7698 = vmatprep.subr.bf16.mxu1 %v8220_v53 }
 0x1c1   : > { %7679 = vmatpush3.bf16.msra.mxu0 %v8219_v26 }
 0x1c2   : > { %7680 = vmatprep.subr.bf16.mxu0 %v8220_v53 }
 0x1c3   : > { %7706 = vmatpush3.bf16.msra.mxu1 %v8220_v53 }
 0x1c4   : > { %7699 = vmatprep.subr.bf16.mxu1 %v8221_v48 }
 0x1c5   : > { %7681 = vmatpush3.bf16.msra.mxu0 %v8220_v53 }
 0x1c6   : > { %7682 = vmatprep.subr.bf16.mxu0 %v8221_v48 }
 0x1c7   : > { %7707 = vmatpush3.bf16.msra.mxu1 %v8221_v48 }
 0x1c9   : > { %7683 = vmatpush3.bf16.msra.mxu0 %v8221_v48 }
 0x1ca   : > { %7689 = vmatmul.mubr.bf16.vlgmr.msra.gmra.mrb[8].mxu1 %v5588_v29 }
 0x1cc   : > { %7685 = vmatmul.mubr.bf16.vlgmr.msra.gmra.mrb[0].mxu0 %v5584_v55 }
 0x27d   : > { %v7350_v6 = vpop.f32.mrb[0].mxu1 }
 0x27e   : > { %v3014_v43 = vpop.f32.mrb[1].mxu1 }
 0x27f   : > { %v7351_v62 = vpop.f32.mrb[2].mxu1 }
 0x280   : > { %v3017_v63 = vpop.f32.mrb[3].mxu1 }
 0x285   : > { %v7354_v40 = vpop.f32.mrb[4].mxu1 }
 0x286   : > { %v3030_v0 = vpop.f32.mrb[5].mxu1 }
 0x287   : > { %v7355_v49 = vpop.f32.mrb[6].mxu1  ;;  %v7666_v14 = vpop.f32.mrb[4].mxu0 }
 0x288   : > { %v3033_v11 = vpop.f32.mrb[7].mxu1  ;;  %v7712_v52 = vadd.f32 %v7666_v14, %v7354_v40  ;;  %v5507_v25 = vpop.f32.mrb[5].mxu0 }
 0x289   : > { %v7714_v59 = vadd.f32 %v5507_v25, %v3030_v0  ;;  %v7667_v7 = vpop.f32.mrb[6].mxu0 }
 0x28a   : > { %v7716_v47 = vadd.f32 %v7667_v7, %v7355_v49  ;;  %v5510_v37 = vpop.f32.mrb[7].mxu0 }
 0x28b   : > { %v7718_v30 = vadd.f32 %v5510_v37, %v3033_v11 }
 0x29d   : > { %v7690_v45 = vpop.f32.mrb[8].mxu1 }
 0x29e   : > { %v7713_v54 = vadd.f32 %v7712_v52, %v7690_v45  ;;  %v5691_v41 = vpop.f32.mrb[9].mxu1 }
 0x29f   : > { %v7715_v8 = vadd.f32 %v7714_v59, %v5691_v41  ;;  %v7691_v2 = vpop.f32.mrb[10].mxu1  ;;  %v7686_v18 = vpop.f32.mrb[0].mxu0 }
 0x2a0   : > { %v5727_v16 = vmul.f32 %v7713_v54, %v6716_v15  ;;  %v7717_v57 = vadd.f32 %v7716_v47, %v7691_v2  ;;  %v5694_v60 = vpop.f32.mrb[11].mxu1  ;;  %v7708_v39 = vadd.f32 %v7686_v18, %v7350_v6  ;;  %v5675_v19 = vpop.f32.mrb[1].mxu0 }
 0x2a1   : > { %v5725_v1 = vmul.f32 %v7715_v8, %v6716_v15  ;;  %v7719_v9 = vadd.f32 %v7718_v30, %v5694_v60  ;;  %v7709_v34 = vadd.f32 %v5675_v19, %v3014_v43  ;;  %v7687_v35 = vpop.f32.mrb[2].mxu0 }
 0x2a2   : > { %v5742_v17 = vadd.f32 %v6717_v12, %v5727_v16  ;;  %v5728_v21 = vmul.f32 %v7717_v57, %v6716_v15  ;;  %v5723_v4 = vmul.f32 %v7708_v39, %v6716_v15  ;;  %v7710_v13 = vadd.f32 %v7687_v35, %v7351_v62  ;;  %v5678_v61 = vpop.f32.mrb[3].mxu0 }
 0x2a3   : > { %v5740_v24 = vadd.f32 %v6717_v12, %v5725_v1  ;;  %v5726_v56 = vmul.f32 %v7719_v9, %v6716_v15  ;;  %v5721_v20 = vmul.f32 %v7709_v34, %v6716_v15  ;;  %v7711_v31 = vadd.f32 %v5678_v61, %v3017_v63 }
 0x2a4   : > { %5750 = vst [vmem:[%s10143_s8 + $0x30] sm:$0xff] %v5742_v17  ;;  %v5743_v3 = vadd.f32 %v6717_v12, %v5728_v21  ;;  %v5738_v32 = vadd.f32 %v6717_v12, %v5723_v4  ;;  %v5724_v33 = vmul.f32 %v7710_v13, %v6716_v15 }
 0x2a5   : > { %5748 = vst [vmem:[%s10143_s8 + $0x20] sm:$0xff] %v5740_v24  ;;  %v5741_v23 = vadd.f32 %v6717_v12, %v5726_v56  ;;  %v5736_v5 = vadd.f32 %v6717_v12, %v5721_v20  ;;  %v5722_v44 = vmul.f32 %v7711_v31, %v6716_v15 }
 0x2a6   : > { %5751 = vst [vmem:[%s10143_s8 + $0x38] sm:$0xff] %v5743_v3  ;;  %5746 = vst [vmem:[%s10143_s8 + $0x10] sm:$0xff] %v5738_v32  ;;  %v5739_v10 = vadd.f32 %v6717_v12, %v5724_v33 }
 0x2a7   : > { %5749 = vst [vmem:[%s10143_s8 + $0x28] sm:$0xff] %v5741_v23  ;;  %5744 = vst [vmem:[%s10143_s8] sm:$0xff] %v5736_v5  ;;  %v5737_v46 = vadd.f32 %v6717_v12, %v5722_v44 }
 0x2a8   : > { %5747 = vst [vmem:[%s10143_s8 + $0x18] sm:$0xff] %v5739_v10 }
 0x2a9   : > { %5745 = vst [vmem:[%s10143_s8 + $0x8] sm:$0xff] %v5737_v46  ;;  %v5752_v50 = vadd.f32 %v5737_v46, %v5736_v5 }
 0x2ab   : > { %v5753_v27 = vadd.f32 %v5752_v50, %v5738_v32 }
 0x2ad   : > { %v5754_v42 = vadd.f32 %v5753_v27, %v5739_v10 }
 0x2af   : > { %v5755_v58 = vadd.f32 %v5754_v42, %v5740_v24 }
 0x2b1   : > { %v5756_v51 = vadd.f32 %v5755_v58, %v5741_v23 }
 0x2b3   : > { %v5757_v22 = vadd.f32 %v5756_v51, %v5742_v17 }
 0x2b5   : > { %v5758_v26 = vadd.f32 %v5757_v22, %v5743_v3 }
 0x2b7   : > { %v5759_v28 = vrot.slane %v5758_v26, 4 }
 0x2b9   : > { %v5760_v53 = vadd.f32 %v5759_v28, %v5758_v26 }
 0x2bb   : > { %v5761_v38 = vrot.slane %v5760_v53, 2 }
 0x2bd   : > { %v5762_v48 = vadd.f32 %v5761_v38, %v5760_v53 }
 0x2bf   : > { %v5763_v36 = vrot.slane %v5762_v48, 1 }
 0x2c1   : > { %v5764_v29 = vadd.f32 %v5763_v36, %v5762_v48 }
 0x2c3   : > { %v5766_v55 = vmul.f32 0.015625, %v5764_v29 }
 0x2c5   : > { %5767 = vst [vmem:[%s415_s11] sm:$0x1] %v5766_v55 }
 0x2c6 PF: > { %s18_s28 = sadd.s32 1, %s8265_s28   ;;  %s10316_s24 = smov %s8257_s26 }
 0x2c7   : > { %p15_p10 = scmp.ge.s32.totalorder %s18_s28, 18   ;;  %s10317_s25 = smov %s8261_s27 }
 0x2c8   : > { %s10318_s26 = smov %s10321_s29  ;;  %s10319_s27 = smov %s10325_s30 }
 0x2c9   :  { %17 = sbr.rel (!%p15_p10) target bundleno = 3 (0x3), region = 118 }

</bundles_post_ra>
